<compile_context>
chip_gen: v6e
topology: v6e:2x2x1
jax: 0.10.0
libtpu: 0.0.40
codegen_flags: <defaults>
</compile_context>

<pallas_src>
import jax
import jax.numpy as jnp
import numpy as np
from jax.experimental import pallas as pl
from jax.experimental.pallas import tpu as pltpu

EPS = 1e-5  # torch.nn.BatchNorm2d default eps


# ----------------------------------------------------------------------------
# helpers
# ----------------------------------------------------------------------------
def _divisors(n):
    return [d for d in range(1, n + 1) if n % d == 0]


def _pick_conv_band(h_src, w_out, upscale, target_m=128):
    """Source rows per band (divisor of h_src) keeping the f32 accumulator at
    ~<=128 MXU rows so it stays in vregs (feedback: acc <= 64 KiB)."""
    fitting = [d for d in _divisors(h_src) if d * upscale * w_out <= target_m]
    return max(fitting) if fitting else 1


def _pick_epilogue_rows(h, wc, max_bytes=1 << 20):
    """Row band for the elementwise epilogue; second-minor block dim must be a
    multiple of 8 (or the full extent)."""
    cands = [d for d in _divisors(h) if d % 8 == 0 or d == h]
    fitting = [d for d in cands if d * wc * 4 <= max_bytes]
    return max(fitting) if fitting else min(cands)


def _padded_bytes(shape, dtype):
    """VMEM footprint estimate with (8, 128) layout padding of the last dims."""
    s = list(shape)
    if len(s) >= 1:
        s[-1] = -(-s[-1] // 128) * 128
    if len(s) >= 2:
        s[-2] = -(-s[-2] // 8) * 8
    return int(np.prod(s)) * jnp.dtype(dtype).itemsize


def _vmem_limit(block_bytes, scratch_bytes=0):
    total = 2 * int(sum(block_bytes)) + int(scratch_bytes)   # double-buffered
    return int(min(64 << 20, max(32 << 20, 4 * total)))


def _upsample_nn(x, s):
    """Nearest-neighbour upsample of (H, W, C) by integer factor s."""
    if s == 1:
        return x
    H, W, C = x.shape
    x = jnp.broadcast_to(x[:, None, :, :], (H, s, W, C)).reshape(H * s, W, C)
    x = jnp.broadcast_to(x[:, :, None, :], (H * s, W, s, C)).reshape(H * s, W * s, C)
    return x


def _upsample_w(x, s):
    """Width-only nearest upsample of a (1, W, C) halo row."""
    if s == 1:
        return x
    H, W, C = x.shape
    return jnp.broadcast_to(x[:, :, None, :], (H, W, s, C)).reshape(H, W * s, C)


# ----------------------------------------------------------------------------
# fused conv kernel (one row band per grid step):
#   [optional BN-affine+ReLU prologue] -> [optional nearest upsample]
#   -> zero-pad band (+halo rows) in VMEM -> 3x3 conv (bf16 MXU, f32 acc)
#   + bias; outputs: bf16 conv band + per-band per-channel (sum, sumsq)
# ----------------------------------------------------------------------------
def _make_conv_kernel(TH_src, Ws, Cin, Cout, upscale, has_prologue):
    TH_out = TH_src * upscale
    Wout = Ws * upscale
    Wp = Wout + 2
    M = TH_out * Wout

    def kernel(*refs):
        if has_prologue:
            (x_ref, top_ref, bot_ref, w_ref, b_ref, s_ref, t_ref,
             o_ref, st_ref, xp_ref) = refs
        else:
            x_ref, top_ref, bot_ref, w_ref, b_ref, o_ref, st_ref, xp_ref = refs
            s_ref = t_ref = None

        band_idx = pl.program_id(1)
        n_bands = pl.num_programs(1)

        def prep(v):                                  # producer relu(bn(.)) fused
            v = v.astype(jnp.float32)
            if has_prologue:
                v = jnp.maximum(v * s_ref[0, :] + t_ref[0, :], 0.0)
            return v

        body = prep(x_ref[0])                         # (TH_src, Ws, Cin)
        top = prep(top_ref[0])                        # (1, Ws, Cin) halo above
        bot = prep(bot_ref[0])                        # (1, Ws, Cin) halo below
        # image-boundary halo rows are the conv's zero padding
        top = top * (band_idx > 0).astype(jnp.float32)
        bot = bot * (band_idx < n_bands - 1).astype(jnp.float32)

        # ---- nearest upsample + zero-pad into the band-sized VMEM scratch ----
        zc = jnp.zeros((TH_out + 2, 1, Cin), jnp.float32)
        xp_ref[:, 0:1, :] = zc
        xp_ref[:, Wp - 1:Wp, :] = zc
        xp_ref[0:1, 1:1 + Wout, :] = _upsample_w(top, upscale)
        xp_ref[1:1 + TH_out, 1:1 + Wout, :] = _upsample_nn(body, upscale)
        xp_ref[1 + TH_out:2 + TH_out, 1:1 + Wout, :] = _upsample_w(bot, upscale)

        # ---- 3x3 conv: 9 shifted-window MXU matmuls, bounded f32 accumulator
        # TODO(synk): single im2col matmul (contraction 9*Cin) when Cin makes
        # the MXU/result-FIFO the binding unit; at Cin=8 it is not.
        acc = jnp.zeros((M, Cout), jnp.float32)
        for dy in range(3):
            for dx in range(3):
                patch = xp_ref[dy:dy + TH_out, dx:dx + Wout, :]
                patch = patch.reshape(M, Cin).astype(jnp.bfloat16)
                acc = acc + jnp.dot(patch, w_ref[dy, dx],
                                    preferred_element_type=jnp.float32)
        acc = acc + b_ref[0, :]

        # per-band partial BN statistics (reduced in f32 by the wrapper)
        st_ref[0, 0, 0:1, :] = jnp.sum(acc, axis=0).reshape(1, Cout)
        st_ref[0, 0, 1:2, :] = jnp.sum(acc * acc, axis=0).reshape(1, Cout)

        o_ref[0, :, :, :] = acc.reshape(TH_out, Wout, Cout).astype(o_ref.dtype)

    return kernel


def conv3x3_fused(x, w, b=None, prologue=None, upscale=1,
                  out_dtype=jnp.bfloat16):
    """3x3 conv (stride 1, pad 1) on NHWC, row-band grid with 1-row halos,
    fused padding / optional affine+ReLU prologue / optional nearest upsample,
    bf16 MXU operands / f32 accumulation, per-band (sum, sumsq) 2nd output."""
    N, Hs, Ws, Cin = x.shape
    Cout = w.shape[-1]
    Hout, Wout = Hs * upscale, Ws * upscale
    TH_src = _pick_conv_band(Hs, Wout, upscale)
    TH_out = TH_src * upscale
    n_bands = Hs // TH_src
    has_prologue = prologue is not None
    if b is None:
        b = jnp.zeros((Cout,), jnp.float32)

    args = [x, x, x,
            w.astype(jnp.bfloat16),
            b.reshape(1, Cout).astype(jnp.float32)]
    in_specs = [
        pl.BlockSpec((1, TH_src, Ws, Cin), lambda n, bb: (n, bb, 0, 0)),
        pl.BlockSpec((1, 1, Ws, Cin),
                     lambda n, bb: (n, jnp.maximum(bb * TH_src - 1, 0), 0, 0)),
        pl.BlockSpec((1, 1, Ws, Cin),
                     lambda n, bb: (n, jnp.minimum((bb + 1) * TH_src, Hs - 1), 0, 0)),
        pl.BlockSpec((3, 3, Cin, Cout), lambda n, bb: (0, 0, 0, 0)),
        pl.BlockSpec((1, Cout), lambda n, bb: (0, 0)),
    ]
    blk = [((1, TH_src, Ws, Cin), x.dtype),
           ((1, 1, Ws, Cin), x.dtype),
           ((1, 1, Ws, Cin), x.dtype),
           ((3, 3, Cin, Cout), jnp.bfloat16),
           ((1, Cout), jnp.float32),
           ((1, TH_out, Wout, Cout), out_dtype),
           ((1, 1, 2, Cout), jnp.float32)]
    if has_prologue:
        scale, shift = prologue
        args += [scale.reshape(1, Cin).astype(jnp.float32),
                 shift.reshape(1, Cin).astype(jnp.float32)]
        in_specs += [pl.BlockSpec((1, Cin), lambda n, bb: (0, 0)),
                     pl.BlockSpec((1, Cin), lambda n, bb: (0, 0))]
        blk += [((1, Cin), jnp.float32)] * 2

    scratch_shape = (TH_out + 2, Wout + 2, Cin)
    blk_bytes = [_padded_bytes(s, d) for s, d in blk]
    scratch_bytes = _padded_bytes(scratch_shape, jnp.float32)

    kernel = _make_conv_kernel(TH_src, Ws, Cin, Cout, upscale, has_prologue)
    out, stats = pl.pallas_call(
        kernel,
        out_shape=(jax.ShapeDtypeStruct((N, Hout, Wout, Cout), out_dtype),
                   jax.ShapeDtypeStruct((N, n_bands, 2, Cout), jnp.float32)),
        grid=(N, n_bands),
        in_specs=in_specs,
        out_specs=(pl.BlockSpec((1, TH_out, Wout, Cout),
                                lambda n, bb: (n, bb, 0, 0)),
                   pl.BlockSpec((1, 1, 2, Cout), lambda n, bb: (n, bb, 0, 0))),
        scratch_shapes=[pltpu.VMEM(scratch_shape, jnp.float32)],
        compiler_params=pltpu.CompilerParams(
            dimension_semantics=("parallel", "parallel"),
            vmem_limit_bytes=_vmem_limit(blk_bytes, scratch_bytes)),
    )(*args)
    return out, stats


def _bn_scale_shift(stats, count, gamma, beta):
    """Training-mode BatchNorm (biased batch var) scale/shift from per-band
    (sum, sumsq) partials emitted by the conv kernels (tiny (C,)-sized math)."""
    ssum = jnp.sum(stats[:, :, 0, :], axis=(0, 1))
    sssq = jnp.sum(stats[:, :, 1, :], axis=(0, 1))
    mean = ssum / count
    var = jnp.maximum(sssq / count - mean * mean, 0.0)
    scale = gamma * jax.lax.rsqrt(var + EPS)
    shift = beta - mean * scale
    return scale, shift


# ----------------------------------------------------------------------------
# fused epilogue:  relu(a*sa + ta + r*sr + tr)   -- lane-dense (H, W*C) slabs
# ----------------------------------------------------------------------------
def _epilogue_kernel(a_ref, sa_ref, ta_ref, r_ref, sr_ref, tr_ref, o_ref):
    a = a_ref[0].astype(jnp.float32)
    r = r_ref[0].astype(jnp.float32)
    y = a * sa_ref[0, :] + ta_ref[0, :] + (r * sr_ref[0, :] + tr_ref[0, :])
    o_ref[0, :, :] = jnp.maximum(y, 0.0)


def bn_add_relu(a, sa, ta, r, sr, tr):
    """relu(a*sa + ta + r*sr + tr) with per-channel vectors; inputs may be
    bf16 (conv outputs), math in f32, lane-dense W*C layout."""
    N, H, W, C = a.shape
    WC = W * C
    a2 = a.reshape(N, H, WC)
    r2 = r.reshape(N, H, WC)
    TH = _pick_epilogue_rows(H, WC)
    nb = H // TH

    img = lambda: pl.BlockSpec((1, TH, WC), lambda n, rb: (n, rb, 0))
    vec = lambda: pl.BlockSpec((1, WC), lambda n, rb: (0, 0))
    tile = lambda v: jnp.tile(v.astype(jnp.float32), W).reshape(1, WC)

    blk_bytes = [_padded_bytes((1, TH, WC), a2.dtype),
                 _padded_bytes((1, TH, WC), r2.dtype),
                 _padded_bytes((1, TH, WC), jnp.float32)]
    blk_bytes += [_padded_bytes((1, WC), jnp.float32)] * 4

    out = pl.pallas_call(
        _epilogue_kernel,
        out_shape=jax.ShapeDtypeStruct((N, H, WC), jnp.float32),
        grid=(N, nb),
        in_specs=[img(), vec(), vec(), img(), vec(), vec()],
        out_specs=img(),
        compiler_params=pltpu.CompilerParams(
            dimension_semantics=("parallel", "parallel"),
            vmem_limit_bytes=_vmem_limit(blk_bytes)),
    )(a2, tile(sa), tile(ta), r2, tile(sr), tile(tr))
    return out.reshape(N, H, W, C)


# ----------------------------------------------------------------------------
# BasicBlockDec forward (public API: NCHW in / NCHW out, like PyTorch)
# ----------------------------------------------------------------------------
def basic_block_dec(x_nchw, params, stride):
    x = jnp.transpose(x_nchw, (0, 2, 3, 1)).astype(jnp.float32)  # -> NHWC
    N, H, W, Cin = x.shape
    planes = params["conv1_w"].shape[-1]

    # out = relu(bn2(conv2(x)))  -- conv2 emits stats; bn2+relu fused downstream
    c2, st2 = conv3x3_fused(x, params["conv2_w"])
    s2, t2 = _bn_scale_shift(st2, N * H * W,
                             params["bn2_gamma"], params["bn2_beta"])

    if stride == 1:
        c1, st1 = conv3x3_fused(c2, params["conv1_w"], prologue=(s2, t2))
        s1, t1 = _bn_scale_shift(st1, N * H * W,
                                 params["bn1_gamma"], params["bn1_beta"])
        res = x                                           # identity shortcut
        sr = jnp.ones((planes,), jnp.float32)
        tr = jnp.zeros((planes,), jnp.float32)
    else:
        Ho, Wo = H * stride, W * stride
        # conv1 = ResizeConv2d: fused [bn2+relu prologue] + upsample + conv+bias
        c1, st1 = conv3x3_fused(c2, params["conv1_w"], b=params["conv1_b"],
                                prologue=(s2, t2), upscale=stride)
        s1, t1 = _bn_scale_shift(st1, N * Ho * Wo,
                                 params["bn1_gamma"], params["bn1_beta"])
        # shortcut = ResizeConv2d + BatchNorm2d (affine fused into epilogue)
        cs, sts = conv3x3_fused(x, params["sc_conv_w"], b=params["sc_conv_b"],
                                upscale=stride)
        sr, tr = _bn_scale_shift(sts, N * Ho * Wo,
                                 params["sc_bn_gamma"], params["sc_bn_beta"])
        res = cs

    # out = relu(bn1(conv1(.)) + shortcut(x))  -- one fused lane-dense pass
    out = bn_add_relu(c1, s1, t1, res, sr, tr)
    return jnp.transpose(out, (0, 3, 1, 2))               # -> NCHW


def init_params(key, in_planes, stride):
    planes = in_planes // stride
    ks = jax.random.split(key, 10)

    def w(k, cin, cout):
        return 0.05 * jax.random.normal(k, (3, 3, cin, cout), jnp.float32)

    p = {
        "conv2_w": w(ks[0], in_planes, in_planes),
        "bn2_gamma": 1.0 + 0.1 * jax.random.normal(ks[1], (in_planes,), jnp.float32),
        "bn2_beta": 0.1 * jax.random.normal(ks[2], (in_planes,), jnp.float32),
        "conv1_w": w(ks[3], in_planes, planes),
        "bn1_gamma": 1.0 + 0.1 * jax.random.normal(ks[4], (planes,), jnp.float32),
        "bn1_beta": 0.1 * jax.random.normal(ks[5], (planes,), jnp.float32),
    }
    if stride != 1:
        p["conv1_b"] = 0.05 * jax.random.normal(ks[6], (planes,), jnp.float32)
        p["sc_conv_w"] = w(ks[7], in_planes, planes)
        p["sc_conv_b"] = 0.05 * jax.random.normal(ks[8], (planes,), jnp.float32)
        p["sc_bn_gamma"] = 1.0 + 0.1 * jax.random.normal(ks[9], (planes,), jnp.float32)
        p["sc_bn_beta"] = jnp.zeros((planes,), jnp.float32)
    return p


# ----------------------------------------------------------------------------
# Pure-JAX reference (bf16 MXU operands, f32 accumulation / BN, like the kernel)
# ----------------------------------------------------------------------------
def _conv_ref(x, w, b=None):
    y = jax.lax.conv_general_dilated(
        x.astype(jnp.bfloat16), w.astype(jnp.bfloat16),
        window_strides=(1, 1), padding=((1, 1), (1, 1)),
        dimension_numbers=("NHWC", "HWIO", "NHWC"),
        preferred_element_type=jnp.float32)
    if b is not None:
        y = y + b
    return y


def _bn_ref(x, gamma, beta):
    m = jnp.mean(x, axis=(0, 1, 2))
    v = jnp.var(x, axis=(0, 1, 2))            # biased, matches torch train-mode BN
    return (x - m) / jnp.sqrt(v + EPS) * gamma + beta


def upsample_nearest_ref(x, s):               # NHWC
    return jnp.repeat(jnp.repeat(x, s, axis=1), s, axis=2)


def basic_block_dec_ref(x_nchw, params, stride):
    x = jnp.transpose(x_nchw, (0, 2, 3, 1)).astype(jnp.float32)
    out = jax.nn.relu(_bn_ref(_conv_ref(x, params["conv2_w"]),
                              params["bn2_gamma"], params["bn2_beta"]))
    if stride == 1:
        c1 = _conv_ref(out, params["conv1_w"])
        res = x
    else:
        c1 = _conv_ref(upsample_nearest_ref(out, stride),
                       params["conv1_w"], params["conv1_b"])
        cs = _conv_ref(upsample_nearest_ref(x, stride),
                       params["sc_conv_w"], params["sc_conv_b"])
        res = _bn_ref(cs, params["sc_bn_gamma"], params["sc_bn_beta"])
    out = jax.nn.relu(_bn_ref(c1, params["bn1_gamma"], params["bn1_beta"]) + res)
    return jnp.transpose(out, (0, 3, 1, 2))


# ----------------------------------------------------------------------------
if __name__ == "__main__":
    key = jax.random.PRNGKey(0)
    kx, kp1, kp2 = jax.random.split(key, 3)

    N, C, H, W = 2, 8, 16, 16
    x = jax.random.normal(kx, (N, C, H, W), jnp.float32)

    fwd = jax.jit(basic_block_dec, static_argnums=2)

    # stride=2 path: ResizeConv2d conv1 + (ResizeConv2d, BatchNorm2d) shortcut
    p2 = init_params(kp2, C, 2)
    y2 = jax.block_until_ready(fwd(x, p2, 2))
    assert y2.shape == (N, C // 2, 2 * H, 2 * W), y2.shape
    ref2 = basic_block_dec_ref(x, p2, 2)
    np.testing.assert_allclose(np.asarray(y2), np.asarray(ref2),
                               rtol=2e-2, atol=2e-2)

    # stride=1 path: plain conv1 + identity shortcut (multi-band halo exercised)
    p1 = init_params(kp1, C, 1)
    y1 = jax.block_until_ready(fwd(x, p1, 1))
    assert y1.shape == (N, C, H, W), y1.shape
    ref1 = basic_block_dec_ref(x, p1, 1)
    np.testing.assert_allclose(np.asarray(y1), np.asarray(ref1),
                               rtol=2e-2, atol=2e-2)

    print("KERNEL_OK")
</pallas_src>

<mosaic_0001>
module attributes {stable_mosaic.version = 11 : i64} {
  func.func @kernel(%arg0: i32, %arg1: i32, %arg2: memref<1x8x16x8xf32, #tpu.memory_space<vmem>>, %arg3: memref<1x1x16x8xf32, #tpu.memory_space<vmem>>, %arg4: memref<1x1x16x8xf32, #tpu.memory_space<vmem>>, %arg5: memref<3x3x8x8xbf16, #tpu.memory_space<vmem>>, %arg6: memref<1x8xf32, #tpu.memory_space<vmem>>, %arg7: memref<1x8x16x8xbf16, #tpu.memory_space<vmem>>, %arg8: memref<1x1x2x8xf32, #tpu.memory_space<vmem>>, %arg9: memref<10x18x8xf32, #tpu.memory_space<vmem>>) attributes {dimension_semantics = [#tpu.dimension_semantics<parallel>, #tpu.dimension_semantics<parallel>], iteration_bounds = array<i64: 2, 2>, scalar_prefetch = 0 : i64, scratch_operands = 1 : i64, tpu.core_type = #tpu.core_type<tc>, window_params = [{transform_indices = @transform_0, window_bounds = array<i64: 1, 8, 16, 8>}, {transform_indices = @transform_1, window_bounds = array<i64: 1, 1, 16, 8>}, {transform_indices = @transform_2, window_bounds = array<i64: 1, 1, 16, 8>}, {pipeline_mode = #tpu.pipeline_mode<synchronous>, transform_indices = @transform_3, window_bounds = array<i64: 3, 3, 8, 8>}, {pipeline_mode = #tpu.pipeline_mode<synchronous>, transform_indices = @transform_4, window_bounds = array<i64: 1, 8>}, {transform_indices = @transform_5, window_bounds = array<i64: 1, 8, 16, 8>}, {transform_indices = @transform_6, window_bounds = array<i64: 1, 1, 2, 8>}]} {
    %c0 = arith.constant 0 : index
    %c0_0 = arith.constant 0 : index
    %c0_1 = arith.constant 0 : index
    %c0_2 = arith.constant 0 : index
    %0 = vector.load %arg2[%c0, %c0_0, %c0_1, %c0_2] : memref<1x8x16x8xf32, #tpu.memory_space<vmem>>, vector<1x8x16x8xf32>
    %1 = vector.shape_cast %0 : vector<1x8x16x8xf32> to vector<8x16x8xf32>
    %c0_3 = arith.constant 0 : index
    %c0_4 = arith.constant 0 : index
    %c0_5 = arith.constant 0 : index
    %c0_6 = arith.constant 0 : index
    %2 = vector.load %arg3[%c0_3, %c0_4, %c0_5, %c0_6] : memref<1x1x16x8xf32, #tpu.memory_space<vmem>>, vector<1x1x16x8xf32>
    %3 = vector.shape_cast %2 : vector<1x1x16x8xf32> to vector<1x16x8xf32>
    %c0_7 = arith.constant 0 : index
    %c0_8 = arith.constant 0 : index
    %c0_9 = arith.constant 0 : index
    %c0_10 = arith.constant 0 : index
    %4 = vector.load %arg4[%c0_7, %c0_8, %c0_9, %c0_10] : memref<1x1x16x8xf32, #tpu.memory_space<vmem>>, vector<1x1x16x8xf32>
    %5 = vector.shape_cast %4 : vector<1x1x16x8xf32> to vector<1x16x8xf32>
    %c0_i32 = arith.constant 0 : i32
    %6 = arith.cmpi sgt, %arg1, %c0_i32 : i32
    %7 = arith.extui %6 : i1 to i32
    %8 = arith.sitofp %7 : i32 to f32
    %9 = vector.broadcast %8 : f32 to vector<1x16x8xf32>
    %10 = arith.mulf %3, %9 : vector<1x16x8xf32>
    %c1_i32 = arith.constant 1 : i32
    %11 = arith.cmpi slt, %arg1, %c1_i32 : i32
    %12 = arith.extui %11 : i1 to i32
    %13 = arith.sitofp %12 : i32 to f32
    %14 = vector.broadcast %13 : f32 to vector<1x16x8xf32>
    %15 = arith.mulf %5, %14 : vector<1x16x8xf32>
    %cst = arith.constant 0.000000e+00 : f32
    %16 = vector.broadcast %cst : f32 to vector<10x1x8xf32>
    %c0_11 = arith.constant 0 : index
    %c0_12 = arith.constant 0 : index
    %c0_13 = arith.constant 0 : index
    %17 = vector.load %arg9[%c0_11, %c0_12, %c0_13] : memref<10x18x8xf32, #tpu.memory_space<vmem>>, vector<10x1x8xf32>
    tpu.vector_store %arg9[%c0_11, %c0_12, %c0_13], %16 {strides = array<i32>} : memref<10x18x8xf32, #tpu.memory_space<vmem>>, vector<10x1x8xf32>,
    %c0_14 = arith.constant 0 : index
    %c17 = arith.constant 17 : index
    %c0_15 = arith.constant 0 : index
    %18 = vector.load %arg9[%c0_14, %c17, %c0_15] : memref<10x18x8xf32, #tpu.memory_space<vmem>>, vector<10x1x8xf32>
    tpu.vector_store %arg9[%c0_14, %c17, %c0_15], %16 {strides = array<i32>} : memref<10x18x8xf32, #tpu.memory_space<vmem>>, vector<10x1x8xf32>,
    %c0_16 = arith.constant 0 : index
    %c1 = arith.constant 1 : index
    %c0_17 = arith.constant 0 : index
    %19 = vector.load %arg9[%c0_16, %c1, %c0_17] : memref<10x18x8xf32, #tpu.memory_space<vmem>>, vector<1x16x8xf32>
    tpu.vector_store %arg9[%c0_16, %c1, %c0_17], %10 {strides = array<i32>} : memref<10x18x8xf32, #tpu.memory_space<vmem>>, vector<1x16x8xf32>,
    %c1_18 = arith.constant 1 : index
    %c1_19 = arith.constant 1 : index
    %c0_20 = arith.constant 0 : index
    %20 = vector.load %arg9[%c1_18, %c1_19, %c0_20] : memref<10x18x8xf32, #tpu.memory_space<vmem>>, vector<8x16x8xf32>
    tpu.vector_store %arg9[%c1_18, %c1_19, %c0_20], %1 {strides = array<i32>} : memref<10x18x8xf32, #tpu.memory_space<vmem>>, vector<8x16x8xf32>,
    %c9 = arith.constant 9 : index
    %c1_21 = arith.constant 1 : index
    %c0_22 = arith.constant 0 : index
    %21 = vector.load %arg9[%c9, %c1_21, %c0_22] : memref<10x18x8xf32, #tpu.memory_space<vmem>>, vector<1x16x8xf32>
    tpu.vector_store %arg9[%c9, %c1_21, %c0_22], %15 {strides = array<i32>} : memref<10x18x8xf32, #tpu.memory_space<vmem>>, vector<1x16x8xf32>,
    %cst_23 = arith.constant 0.000000e+00 : f32
    %22 = vector.broadcast %cst_23 : f32 to vector<128x8xf32>
    %c0_24 = arith.constant 0 : index
    %c0_25 = arith.constant 0 : index
    %c0_26 = arith.constant 0 : index
    %23 = vector.load %arg9[%c0_24, %c0_25, %c0_26] : memref<10x18x8xf32, #tpu.memory_space<vmem>>, vector<8x16x8xf32>
    %24 = vector.shape_cast %23 : vector<8x16x8xf32> to vector<128x8xf32>
    %25 = arith.truncf %24 : vector<128x8xf32> to vector<128x8xbf16>
    %c0_27 = arith.constant 0 : index
    %c0_28 = arith.constant 0 : index
    %c0_29 = arith.constant 0 : index
    %c0_30 = arith.constant 0 : index
    %26 = vector.load %arg5[%c0_27, %c0_28, %c0_29, %c0_30] : memref<3x3x8x8xbf16, #tpu.memory_space<vmem>>, vector<1x1x8x8xbf16>
    %27 = vector.shape_cast %26 : vector<1x1x8x8xbf16> to vector<8x8xbf16>
    %cst_31 = arith.constant dense<0.000000e+00> : vector<128x8xf32>
    %28 = tpu.matmul %25, %27, %cst_31 {dimension_numbers = #tpu.dot_dimension_numbers<[1], [0], [0], [1], [0, 0, 1, 1], [], []>} : vector<128x8xbf16>, vector<8x8xbf16>, vector<128x8xf32> -> vector<128x8xf32>
    %29 = arith.addf %22, %28 : vector<128x8xf32>
    %c0_32 = arith.constant 0 : index
    %c1_33 = arith.constant 1 : index
    %c0_34 = arith.constant 0 : index
    %30 = vector.load %arg9[%c0_32, %c1_33, %c0_34] : memref<10x18x8xf32, #tpu.memory_space<vmem>>, vector<8x16x8xf32>
    %31 = vector.shape_cast %30 : vector<8x16x8xf32> to vector<128x8xf32>
    %32 = arith.truncf %31 : vector<128x8xf32> to vector<128x8xbf16>
    %c0_35 = arith.constant 0 : index
    %c1_36 = arith.constant 1 : index
    %c0_37 = arith.constant 0 : index
    %c0_38 = arith.constant 0 : index
    %33 = vector.load %arg5[%c0_35, %c1_36, %c0_37, %c0_38] : memref<3x3x8x8xbf16, #tpu.memory_space<vmem>>, vector<1x1x8x8xbf16>
    %34 = vector.shape_cast %33 : vector<1x1x8x8xbf16> to vector<8x8xbf16>
    %cst_39 = arith.constant dense<0.000000e+00> : vector<128x8xf32>
    %35 = tpu.matmul %32, %34, %cst_39 {dimension_numbers = #tpu.dot_dimension_numbers<[1], [0], [0], [1], [0, 0, 1, 1], [], []>} : vector<128x8xbf16>, vector<8x8xbf16>, vector<128x8xf32> -> vector<128x8xf32>
    %36 = arith.addf %29, %35 : vector<128x8xf32>
    %c0_40 = arith.constant 0 : index
    %c2 = arith.constant 2 : index
    %c0_41 = arith.constant 0 : index
    %37 = vector.load %arg9[%c0_40, %c2, %c0_41] : memref<10x18x8xf32, #tpu.memory_space<vmem>>, vector<8x16x8xf32>
    %38 = vector.shape_cast %37 : vector<8x16x8xf32> to vector<128x8xf32>
    %39 = arith.truncf %38 : vector<128x8xf32> to vector<128x8xbf16>
    %c0_42 = arith.constant 0 : index
    %c2_43 = arith.constant 2 : index
    %c0_44 = arith.constant 0 : index
    %c0_45 = arith.constant 0 : index
    %40 = vector.load %arg5[%c0_42, %c2_43, %c0_44, %c0_45] : memref<3x3x8x8xbf16, #tpu.memory_space<vmem>>, vector<1x1x8x8xbf16>
    %41 = vector.shape_cast %40 : vector<1x1x8x8xbf16> to vector<8x8xbf16>
    %cst_46 = arith.constant dense<0.000000e+00> : vector<128x8xf32>
    %42 = tpu.matmul %39, %41, %cst_46 {dimension_numbers = #tpu.dot_dimension_numbers<[1], [0], [0], [1], [0, 0, 1, 1], [], []>} : vector<128x8xbf16>, vector<8x8xbf16>, vector<128x8xf32> -> vector<128x8xf32>
    %43 = arith.addf %36, %42 : vector<128x8xf32>
    %c1_47 = arith.constant 1 : index
    %c0_48 = arith.constant 0 : index
    %c0_49 = arith.constant 0 : index
    %44 = vector.load %arg9[%c1_47, %c0_48, %c0_49] : memref<10x18x8xf32, #tpu.memory_space<vmem>>, vector<8x16x8xf32>
    %45 = vector.shape_cast %44 : vector<8x16x8xf32> to vector<128x8xf32>
    %46 = arith.truncf %45 : vector<128x8xf32> to vector<128x8xbf16>
    %c1_50 = arith.constant 1 : index
    %c0_51 = arith.constant 0 : index
    %c0_52 = arith.constant 0 : index
    %c0_53 = arith.constant 0 : index
    %47 = vector.load %arg5[%c1_50, %c0_51, %c0_52, %c0_53] : memref<3x3x8x8xbf16, #tpu.memory_space<vmem>>, vector<1x1x8x8xbf16>
    %48 = vector.shape_cast %47 : vector<1x1x8x8xbf16> to vector<8x8xbf16>
    %cst_54 = arith.constant dense<0.000000e+00> : vector<128x8xf32>
    %49 = tpu.matmul %46, %48, %cst_54 {dimension_numbers = #tpu.dot_dimension_numbers<[1], [0], [0], [1], [0, 0, 1, 1], [], []>} : vector<128x8xbf16>, vector<8x8xbf16>, vector<128x8xf32> -> vector<128x8xf32>
    %50 = arith.addf %43, %49 : vector<128x8xf32>
    %c1_55 = arith.constant 1 : index
    %c1_56 = arith.constant 1 : index
    %c0_57 = arith.constant 0 : index
    %51 = vector.load %arg9[%c1_55, %c1_56, %c0_57] : memref<10x18x8xf32, #tpu.memory_space<vmem>>, vector<8x16x8xf32>
    %52 = vector.shape_cast %51 : vector<8x16x8xf32> to vector<128x8xf32>
    %53 = arith.truncf %52 : vector<128x8xf32> to vector<128x8xbf16>
    %c1_58 = arith.constant 1 : index
    %c1_59 = arith.constant 1 : index
    %c0_60 = arith.constant 0 : index
    %c0_61 = arith.constant 0 : index
    %54 = vector.load %arg5[%c1_58, %c1_59, %c0_60, %c0_61] : memref<3x3x8x8xbf16, #tpu.memory_space<vmem>>, vector<1x1x8x8xbf16>
    %55 = vector.shape_cast %54 : vector<1x1x8x8xbf16> to vector<8x8xbf16>
    %cst_62 = arith.constant dense<0.000000e+00> : vector<128x8xf32>
    %56 = tpu.matmul %53, %55, %cst_62 {dimension_numbers = #tpu.dot_dimension_numbers<[1], [0], [0], [1], [0, 0, 1, 1], [], []>} : vector<128x8xbf16>, vector<8x8xbf16>, vector<128x8xf32> -> vector<128x8xf32>
    %57 = arith.addf %50, %56 : vector<128x8xf32>
    %c1_63 = arith.constant 1 : index
    %c2_64 = arith.constant 2 : index
    %c0_65 = arith.constant 0 : index
    %58 = vector.load %arg9[%c1_63, %c2_64, %c0_65] : memref<10x18x8xf32, #tpu.memory_space<vmem>>, vector<8x16x8xf32>
    %59 = vector.shape_cast %58 : vector<8x16x8xf32> to vector<128x8xf32>
    %60 = arith.truncf %59 : vector<128x8xf32> to vector<128x8xbf16>
    %c1_66 = arith.constant 1 : index
    %c2_67 = arith.constant 2 : index
    %c0_68 = arith.constant 0 : index
    %c0_69 = arith.constant 0 : index
    %61 = vector.load %arg5[%c1_66, %c2_67, %c0_68, %c0_69] : memref<3x3x8x8xbf16, #tpu.memory_space<vmem>>, vector<1x1x8x8xbf16>
    %62 = vector.shape_cast %61 : vector<1x1x8x8xbf16> to vector<8x8xbf16>
    %cst_70 = arith.constant dense<0.000000e+00> : vector<128x8xf32>
    %63 = tpu.matmul %60, %62, %cst_70 {dimension_numbers = #tpu.dot_dimension_numbers<[1], [0], [0], [1], [0, 0, 1, 1], [], []>} : vector<128x8xbf16>, vector<8x8xbf16>, vector<128x8xf32> -> vector<128x8xf32>
    %64 = arith.addf %57, %63 : vector<128x8xf32>
    %c2_71 = arith.constant 2 : index
    %c0_72 = arith.constant 0 : index
    %c0_73 = arith.constant 0 : index
    %65 = vector.load %arg9[%c2_71, %c0_72, %c0_73] : memref<10x18x8xf32, #tpu.memory_space<vmem>>, vector<8x16x8xf32>
    %66 = vector.shape_cast %65 : vector<8x16x8xf32> to vector<128x8xf32>
    %67 = arith.truncf %66 : vector<128x8xf32> to vector<128x8xbf16>
    %c2_74 = arith.constant 2 : index
    %c0_75 = arith.constant 0 : index
    %c0_76 = arith.constant 0 : index
    %c0_77 = arith.constant 0 : index
    %68 = vector.load %arg5[%c2_74, %c0_75, %c0_76, %c0_77] : memref<3x3x8x8xbf16, #tpu.memory_space<vmem>>, vector<1x1x8x8xbf16>
    %69 = vector.shape_cast %68 : vector<1x1x8x8xbf16> to vector<8x8xbf16>
    %cst_78 = arith.constant dense<0.000000e+00> : vector<128x8xf32>
    %70 = tpu.matmul %67, %69, %cst_78 {dimension_numbers = #tpu.dot_dimension_numbers<[1], [0], [0], [1], [0, 0, 1, 1], [], []>} : vector<128x8xbf16>, vector<8x8xbf16>, vector<128x8xf32> -> vector<128x8xf32>
    %71 = arith.addf %64, %70 : vector<128x8xf32>
    %c2_79 = arith.constant 2 : index
    %c1_80 = arith.constant 1 : index
    %c0_81 = arith.constant 0 : index
    %72 = vector.load %arg9[%c2_79, %c1_80, %c0_81] : memref<10x18x8xf32, #tpu.memory_space<vmem>>, vector<8x16x8xf32>
    %73 = vector.shape_cast %72 : vector<8x16x8xf32> to vector<128x8xf32>
    %74 = arith.truncf %73 : vector<128x8xf32> to vector<128x8xbf16>
    %c2_82 = arith.constant 2 : index
    %c1_83 = arith.constant 1 : index
    %c0_84 = arith.constant 0 : index
    %c0_85 = arith.constant 0 : index
    %75 = vector.load %arg5[%c2_82, %c1_83, %c0_84, %c0_85] : memref<3x3x8x8xbf16, #tpu.memory_space<vmem>>, vector<1x1x8x8xbf16>
    %76 = vector.shape_cast %75 : vector<1x1x8x8xbf16> to vector<8x8xbf16>
    %cst_86 = arith.constant dense<0.000000e+00> : vector<128x8xf32>
    %77 = tpu.matmul %74, %76, %cst_86 {dimension_numbers = #tpu.dot_dimension_numbers<[1], [0], [0], [1], [0, 0, 1, 1], [], []>} : vector<128x8xbf16>, vector<8x8xbf16>, vector<128x8xf32> -> vector<128x8xf32>
    %78 = arith.addf %71, %77 : vector<128x8xf32>
    %c2_87 = arith.constant 2 : index
    %c2_88 = arith.constant 2 : index
    %c0_89 = arith.constant 0 : index
    %79 = vector.load %arg9[%c2_87, %c2_88, %c0_89] : memref<10x18x8xf32, #tpu.memory_space<vmem>>, vector<8x16x8xf32>
    %80 = vector.shape_cast %79 : vector<8x16x8xf32> to vector<128x8xf32>
    %81 = arith.truncf %80 : vector<128x8xf32> to vector<128x8xbf16>
    %c2_90 = arith.constant 2 : index
    %c2_91 = arith.constant 2 : index
    %c0_92 = arith.constant 0 : index
    %c0_93 = arith.constant 0 : index
    %82 = vector.load %arg5[%c2_90, %c2_91, %c0_92, %c0_93] : memref<3x3x8x8xbf16, #tpu.memory_space<vmem>>, vector<1x1x8x8xbf16>
    %83 = vector.shape_cast %82 : vector<1x1x8x8xbf16> to vector<8x8xbf16>
    %cst_94 = arith.constant dense<0.000000e+00> : vector<128x8xf32>
    %84 = tpu.matmul %81, %83, %cst_94 {dimension_numbers = #tpu.dot_dimension_numbers<[1], [0], [0], [1], [0, 0, 1, 1], [], []>} : vector<128x8xbf16>, vector<8x8xbf16>, vector<128x8xf32> -> vector<128x8xf32>
    %85 = arith.addf %78, %84 : vector<128x8xf32>
    %c0_95 = arith.constant 0 : index
    %c0_96 = arith.constant 0 : index
    %86 = vector.load %arg6[%c0_95, %c0_96] : memref<1x8xf32, #tpu.memory_space<vmem>>, vector<1x8xf32>
    %87 = vector.shape_cast %86 : vector<1x8xf32> to vector<8xf32>
    %88 = vector.shape_cast %87 : vector<8xf32> to vector<1x8xf32>
    %89 = vector.broadcast %88 : vector<1x8xf32> to vector<128x8xf32>
    %90 = arith.addf %85, %89 : vector<128x8xf32>
    %cst_97 = arith.constant dense<0.000000e+00> : vector<8xf32>
    %91 = vector.multi_reduction <add>, %90, %cst_97 [0] : vector<128x8xf32> to vector<8xf32>
    %92 = vector.shape_cast %91 : vector<8xf32> to vector<1x8xf32>
    %c0_98 = arith.constant 0 : index
    %c0_99 = arith.constant 0 : index
    %c0_100 = arith.constant 0 : index
    %c0_101 = arith.constant 0 : index
    %93 = vector.load %arg8[%c0_98, %c0_99, %c0_100, %c0_101] : memref<1x1x2x8xf32, #tpu.memory_space<vmem>>, vector<1x1x1x8xf32>
    %94 = vector.shape_cast %93 : vector<1x1x1x8xf32> to vector<1x8xf32>
    %95 = vector.shape_cast %92 : vector<1x8xf32> to vector<1x1x1x8xf32>
    tpu.vector_store %arg8[%c0_98, %c0_99, %c0_100, %c0_101], %95 {strides = array<i32>} : memref<1x1x2x8xf32, #tpu.memory_space<vmem>>, vector<1x1x1x8xf32>,
    %96 = arith.mulf %90, %90 : vector<128x8xf32>
    %cst_102 = arith.constant dense<0.000000e+00> : vector<8xf32>
    %97 = vector.multi_reduction <add>, %96, %cst_102 [0] : vector<128x8xf32> to vector<8xf32>
    %98 = vector.shape_cast %97 : vector<8xf32> to vector<1x8xf32>
    %c0_103 = arith.constant 0 : index
    %c0_104 = arith.constant 0 : index
    %c1_105 = arith.constant 1 : index
    %c0_106 = arith.constant 0 : index
    %99 = vector.load %arg8[%c0_103, %c0_104, %c1_105, %c0_106] : memref<1x1x2x8xf32, #tpu.memory_space<vmem>>, vector<1x1x1x8xf32>
    %100 = vector.shape_cast %99 : vector<1x1x1x8xf32> to vector<1x8xf32>
    %101 = vector.shape_cast %98 : vector<1x8xf32> to vector<1x1x1x8xf32>
    tpu.vector_store %arg8[%c0_103, %c0_104, %c1_105, %c0_106], %101 {strides = array<i32>} : memref<1x1x2x8xf32, #tpu.memory_space<vmem>>, vector<1x1x1x8xf32>,
    %102 = vector.shape_cast %90 : vector<128x8xf32> to vector<8x16x8xf32>
    %103 = arith.truncf %102 : vector<8x16x8xf32> to vector<8x16x8xbf16>
    %c0_107 = arith.constant 0 : index
    %c0_108 = arith.constant 0 : index
    %c0_109 = arith.constant 0 : index
    %c0_110 = arith.constant 0 : index
    %104 = vector.load %arg7[%c0_107, %c0_108, %c0_109, %c0_110] : memref<1x8x16x8xbf16, #tpu.memory_space<vmem>>, vector<1x8x16x8xbf16>
    %105 = vector.shape_cast %104 : vector<1x8x16x8xbf16> to vector<8x16x8xbf16>
    %106 = vector.shape_cast %103 : vector<8x16x8xbf16> to vector<1x8x16x8xbf16>
    tpu.vector_store %arg7[%c0_107, %c0_108, %c0_109, %c0_110], %106 {strides = array<i32>} : memref<1x8x16x8xbf16, #tpu.memory_space<vmem>>, vector<1x8x16x8xbf16>,
    return
  }
  func.func @transform_0(%arg0: i32, %arg1: i32) -> (i32, i32, i32, i32) {
    %c0_i32 = arith.constant 0 : i32
    %c0_i32_0 = arith.constant 0 : i32
    %c0_i32_1 = arith.constant 0 : i32
    return %arg0, %arg1, %c0_i32, %c0_i32_0 : i32, i32, i32, i32
  }
  func.func @transform_1(%arg0: i32, %arg1: i32) -> (i32, i32, i32, i32) {
    %c8_i32 = arith.constant 8 : i32
    %0 = arith.muli %arg1, %c8_i32 : i32
    %c1_i32 = arith.constant 1 : i32
    %1 = arith.subi %0, %c1_i32 : i32
    %c0_i32 = arith.constant 0 : i32
    %2 = arith.maxsi %1, %c0_i32 : i32
    %c0_i32_0 = arith.constant 0 : i32
    %c0_i32_1 = arith.constant 0 : i32
    %c0_i32_2 = arith.constant 0 : i32
    return %arg0, %2, %c0_i32_0, %c0_i32_1 : i32, i32, i32, i32
  }
  func.func @transform_2(%arg0: i32, %arg1: i32) -> (i32, i32, i32, i32) {
    %c1_i32 = arith.constant 1 : i32
    %0 = arith.addi %arg1, %c1_i32 : i32
    %c8_i32 = arith.constant 8 : i32
    %1 = arith.muli %0, %c8_i32 : i32
    %c15_i32 = arith.constant 15 : i32
    %2 = arith.minsi %1, %c15_i32 : i32
    %c0_i32 = arith.constant 0 : i32
    %c0_i32_0 = arith.constant 0 : i32
    %c0_i32_1 = arith.constant 0 : i32
    return %arg0, %2, %c0_i32, %c0_i32_0 : i32, i32, i32, i32
  }
  func.func @transform_3(%arg0: i32, %arg1: i32) -> (i32, i32, i32, i32) {
    %c0_i32 = arith.constant 0 : i32
    %c0_i32_0 = arith.constant 0 : i32
    %c0_i32_1 = arith.constant 0 : i32
    %c0_i32_2 = arith.constant 0 : i32
    %c0_i32_3 = arith.constant 0 : i32
    return %c0_i32, %c0_i32_0, %c0_i32_1, %c0_i32_2 : i32, i32, i32, i32
  }
  func.func @transform_4(%arg0: i32, %arg1: i32) -> (i32, i32) {
    %c0_i32 = arith.constant 0 : i32
    %c0_i32_0 = arith.constant 0 : i32
    %c0_i32_1 = arith.constant 0 : i32
    return %c0_i32, %c0_i32_0 : i32, i32
  }
  func.func @transform_5(%arg0: i32, %arg1: i32) -> (i32, i32, i32, i32) {
    %c0_i32 = arith.constant 0 : i32
    %c0_i32_0 = arith.constant 0 : i32
    %c0_i32_1 = arith.constant 0 : i32
    return %arg0, %arg1, %c0_i32, %c0_i32_0 : i32, i32, i32, i32
  }
  func.func @transform_6(%arg0: i32, %arg1: i32) -> (i32, i32, i32, i32) {
    %c0_i32 = arith.constant 0 : i32
    %c0_i32_0 = arith.constant 0 : i32
    %c0_i32_1 = arith.constant 0 : i32
    return %arg0, %arg1, %c0_i32, %c0_i32_0 : i32, i32, i32, i32
  }
}

module attributes {stable_mosaic.version = 11 : i64} {
  func.func @kernel(%arg0: i32, %arg1: i32, %arg2: memref<1x2x16x8xbf16, #tpu.memory_space<vmem>>, %arg3: memref<1x1x16x8xbf16, #tpu.memory_space<vmem>>, %arg4: memref<1x1x16x8xbf16, #tpu.memory_space<vmem>>, %arg5: memref<3x3x8x4xbf16, #tpu.memory_space<vmem>>, %arg6: memref<1x4xf32, #tpu.memory_space<vmem>>, %arg7: memref<1x8xf32, #tpu.memory_space<vmem>>, %arg8: memref<1x8xf32, #tpu.memory_space<vmem>>, %arg9: memref<1x4x32x4xbf16, #tpu.memory_space<vmem>>, %arg10: memref<1x1x2x4xf32, #tpu.memory_space<vmem>>, %arg11: memref<6x34x8xf32, #tpu.memory_space<vmem>>) attributes {dimension_semantics = [#tpu.dimension_semantics<parallel>, #tpu.dimension_semantics<parallel>], iteration_bounds = array<i64: 2, 8>, scalar_prefetch = 0 : i64, scratch_operands = 1 : i64, tpu.core_type = #tpu.core_type<tc>, window_params = [{transform_indices = @transform_0, window_bounds = array<i64: 1, 2, 16, 8>}, {transform_indices = @transform_1, window_bounds = array<i64: 1, 1, 16, 8>}, {transform_indices = @transform_2, window_bounds = array<i64: 1, 1, 16, 8>}, {pipeline_mode = #tpu.pipeline_mode<synchronous>, transform_indices = @transform_3, window_bounds = array<i64: 3, 3, 8, 4>}, {pipeline_mode = #tpu.pipeline_mode<synchronous>, transform_indices = @transform_4, window_bounds = array<i64: 1, 4>}, {pipeline_mode = #tpu.pipeline_mode<synchronous>, transform_indices = @transform_5, window_bounds = array<i64: 1, 8>}, {pipeline_mode = #tpu.pipeline_mode<synchronous>, transform_indices = @transform_6, window_bounds = array<i64: 1, 8>}, {transform_indices = @transform_7, window_bounds = array<i64: 1, 4, 32, 4>}, {transform_indices = @transform_8, window_bounds = array<i64: 1, 1, 2, 4>}]} {
    %c0 = arith.constant 0 : index
    %c0_0 = arith.constant 0 : index
    %c0_1 = arith.constant 0 : index
    %c0_2 = arith.constant 0 : index
    %0 = vector.load %arg2[%c0, %c0_0, %c0_1, %c0_2] : memref<1x2x16x8xbf16, #tpu.memory_space<vmem>>, vector<1x2x16x8xbf16>
    %1 = vector.shape_cast %0 : vector<1x2x16x8xbf16> to vector<2x16x8xbf16>
    %2 = arith.extf %1 : vector<2x16x8xbf16> to vector<2x16x8xf32>
    %c0_3 = arith.constant 0 : index
    %c0_4 = arith.constant 0 : index
    %3 = vector.load %arg7[%c0_3, %c0_4] : memref<1x8xf32, #tpu.memory_space<vmem>>, vector<1x8xf32>
    %4 = vector.shape_cast %3 : vector<1x8xf32> to vector<8xf32>
    %5 = vector.shape_cast %4 : vector<8xf32> to vector<1x1x8xf32>
    %6 = vector.broadcast %5 : vector<1x1x8xf32> to vector<2x16x8xf32>
    %7 = arith.mulf %2, %6 : vector<2x16x8xf32>
    %c0_5 = arith.constant 0 : index
    %c0_6 = arith.constant 0 : index
    %8 = vector.load %arg8[%c0_5, %c0_6] : memref<1x8xf32, #tpu.memory_space<vmem>>, vector<1x8xf32>
    %9 = vector.shape_cast %8 : vector<1x8xf32> to vector<8xf32>
    %10 = vector.shape_cast %9 : vector<8xf32> to vector<1x1x8xf32>
    %11 = vector.broadcast %10 : vector<1x1x8xf32> to vector<2x16x8xf32>
    %12 = arith.addf %7, %11 : vector<2x16x8xf32>
    %cst = arith.constant 0.000000e+00 : f32
    %13 = vector.broadcast %cst : f32 to vector<2x16x8xf32>
    %14 = arith.maximumf %12, %13 : vector<2x16x8xf32>
    %c0_7 = arith.constant 0 : index
    %c0_8 = arith.constant 0 : index
    %c0_9 = arith.constant 0 : index
    %c0_10 = arith.constant 0 : index
    %15 = vector.load %arg3[%c0_7, %c0_8, %c0_9, %c0_10] : memref<1x1x16x8xbf16, #tpu.memory_space<vmem>>, vector<1x1x16x8xbf16>
    %16 = vector.shape_cast %15 : vector<1x1x16x8xbf16> to vector<1x16x8xbf16>
    %17 = arith.extf %16 : vector<1x16x8xbf16> to vector<1x16x8xf32>
    %c0_11 = arith.constant 0 : index
    %c0_12 = arith.constant 0 : index
    %18 = vector.load %arg7[%c0_11, %c0_12] : memref<1x8xf32, #tpu.memory_space<vmem>>, vector<1x8xf32>
    %19 = vector.shape_cast %18 : vector<1x8xf32> to vector<8xf32>
    %20 = vector.shape_cast %19 : vector<8xf32> to vector<1x1x8xf32>
    %21 = vector.broadcast %20 : vector<1x1x8xf32> to vector<1x16x8xf32>
    %22 = arith.mulf %17, %21 : vector<1x16x8xf32>
    %c0_13 = arith.constant 0 : index
    %c0_14 = arith.constant 0 : index
    %23 = vector.load %arg8[%c0_13, %c0_14] : memref<1x8xf32, #tpu.memory_space<vmem>>, vector<1x8xf32>
    %24 = vector.shape_cast %23 : vector<1x8xf32> to vector<8xf32>
    %25 = vector.shape_cast %24 : vector<8xf32> to vector<1x1x8xf32>
    %26 = vector.broadcast %25 : vector<1x1x8xf32> to vector<1x16x8xf32>
    %27 = arith.addf %22, %26 : vector<1x16x8xf32>
    %cst_15 = arith.constant 0.000000e+00 : f32
    %28 = vector.broadcast %cst_15 : f32 to vector<1x16x8xf32>
    %29 = arith.maximumf %27, %28 : vector<1x16x8xf32>
    %c0_16 = arith.constant 0 : index
    %c0_17 = arith.constant 0 : index
    %c0_18 = arith.constant 0 : index
    %c0_19 = arith.constant 0 : index
    %30 = vector.load %arg4[%c0_16, %c0_17, %c0_18, %c0_19] : memref<1x1x16x8xbf16, #tpu.memory_space<vmem>>, vector<1x1x16x8xbf16>
    %31 = vector.shape_cast %30 : vector<1x1x16x8xbf16> to vector<1x16x8xbf16>
    %32 = arith.extf %31 : vector<1x16x8xbf16> to vector<1x16x8xf32>
    %c0_20 = arith.constant 0 : index
    %c0_21 = arith.constant 0 : index
    %33 = vector.load %arg7[%c0_20, %c0_21] : memref<1x8xf32, #tpu.memory_space<vmem>>, vector<1x8xf32>
    %34 = vector.shape_cast %33 : vector<1x8xf32> to vector<8xf32>
    %35 = vector.shape_cast %34 : vector<8xf32> to vector<1x1x8xf32>
    %36 = vector.broadcast %35 : vector<1x1x8xf32> to vector<1x16x8xf32>
    %37 = arith.mulf %32, %36 : vector<1x16x8xf32>
    %c0_22 = arith.constant 0 : index
    %c0_23 = arith.constant 0 : index
    %38 = vector.load %arg8[%c0_22, %c0_23] : memref<1x8xf32, #tpu.memory_space<vmem>>, vector<1x8xf32>
    %39 = vector.shape_cast %38 : vector<1x8xf32> to vector<8xf32>
    %40 = vector.shape_cast %39 : vector<8xf32> to vector<1x1x8xf32>
    %41 = vector.broadcast %40 : vector<1x1x8xf32> to vector<1x16x8xf32>
    %42 = arith.addf %37, %41 : vector<1x16x8xf32>
    %cst_24 = arith.constant 0.000000e+00 : f32
    %43 = vector.broadcast %cst_24 : f32 to vector<1x16x8xf32>
    %44 = arith.maximumf %42, %43 : vector<1x16x8xf32>
    %c0_i32 = arith.constant 0 : i32
    %45 = arith.cmpi sgt, %arg1, %c0_i32 : i32
    %46 = arith.extui %45 : i1 to i32
    %47 = arith.sitofp %46 : i32 to f32
    %48 = vector.broadcast %47 : f32 to vector<1x16x8xf32>
    %49 = arith.mulf %29, %48 : vector<1x16x8xf32>
    %c7_i32 = arith.constant 7 : i32
    %50 = arith.cmpi slt, %arg1, %c7_i32 : i32
    %51 = arith.extui %50 : i1 to i32
    %52 = arith.sitofp %51 : i32 to f32
    %53 = vector.broadcast %52 : f32 to vector<1x16x8xf32>
    %54 = arith.mulf %44, %53 : vector<1x16x8xf32>
    %cst_25 = arith.constant 0.000000e+00 : f32
    %55 = vector.broadcast %cst_25 : f32 to vector<6x1x8xf32>
    %c0_26 = arith.constant 0 : index
    %c0_27 = arith.constant 0 : index
    %c0_28 = arith.constant 0 : index
    %56 = vector.load %arg11[%c0_26, %c0_27, %c0_28] : memref<6x34x8xf32, #tpu.memory_space<vmem>>, vector<6x1x8xf32>
    tpu.vector_store %arg11[%c0_26, %c0_27, %c0_28], %55 {strides = array<i32>} : memref<6x34x8xf32, #tpu.memory_space<vmem>>, vector<6x1x8xf32>,
    %c0_29 = arith.constant 0 : index
    %c33 = arith.constant 33 : index
    %c0_30 = arith.constant 0 : index
    %57 = vector.load %arg11[%c0_29, %c33, %c0_30] : memref<6x34x8xf32, #tpu.memory_space<vmem>>, vector<6x1x8xf32>
    tpu.vector_store %arg11[%c0_29, %c33, %c0_30], %55 {strides = array<i32>} : memref<6x34x8xf32, #tpu.memory_space<vmem>>, vector<6x1x8xf32>,
    %58 = vector.shape_cast %49 : vector<1x16x8xf32> to vector<1x16x1x8xf32>
    %59 = vector.shape_cast %58 : vector<1x16x1x8xf32> to vector<1x16x1x8xf32>
    %60 = vector.broadcast %59 : vector<1x16x1x8xf32> to vector<1x16x2x8xf32>
    %61 = vector.shape_cast %60 : vector<1x16x2x8xf32> to vector<1x32x8xf32>
    %c0_31 = arith.constant 0 : index
    %c1 = arith.constant 1 : index
    %c0_32 = arith.constant 0 : index
    %62 = vector.load %arg11[%c0_31, %c1, %c0_32] : memref<6x34x8xf32, #tpu.memory_space<vmem>>, vector<1x32x8xf32>
    tpu.vector_store %arg11[%c0_31, %c1, %c0_32], %61 {strides = array<i32>} : memref<6x34x8xf32, #tpu.memory_space<vmem>>, vector<1x32x8xf32>,
    %63 = vector.shape_cast %14 : vector<2x16x8xf32> to vector<2x1x16x8xf32>
    %64 = vector.shape_cast %63 : vector<2x1x16x8xf32> to vector<2x1x16x8xf32>
    %65 = vector.broadcast %64 : vector<2x1x16x8xf32> to vector<2x2x16x8xf32>
    %66 = vector.shape_cast %65 : vector<2x2x16x8xf32> to vector<4x16x8xf32>
    %67 = vector.shape_cast %66 : vector<4x16x8xf32> to vector<4x16x1x8xf32>
    %68 = vector.shape_cast %67 : vector<4x16x1x8xf32> to vector<4x16x1x8xf32>
    %69 = vector.broadcast %68 : vector<4x16x1x8xf32> to vector<4x16x2x8xf32>
    %70 = vector.shape_cast %69 : vector<4x16x2x8xf32> to vector<4x32x8xf32>
    %c1_33 = arith.constant 1 : index
    %c1_34 = arith.constant 1 : index
    %c0_35 = arith.constant 0 : index
    %71 = vector.load %arg11[%c1_33, %c1_34, %c0_35] : memref<6x34x8xf32, #tpu.memory_space<vmem>>, vector<4x32x8xf32>
    tpu.vector_store %arg11[%c1_33, %c1_34, %c0_35], %70 {strides = array<i32>} : memref<6x34x8xf32, #tpu.memory_space<vmem>>, vector<4x32x8xf32>,
    %72 = vector.shape_cast %54 : vector<1x16x8xf32> to vector<1x16x1x8xf32>
    %73 = vector.shape_cast %72 : vector<1x16x1x8xf32> to vector<1x16x1x8xf32>
    %74 = vector.broadcast %73 : vector<1x16x1x8xf32> to vector<1x16x2x8xf32>
    %75 = vector.shape_cast %74 : vector<1x16x2x8xf32> to vector<1x32x8xf32>
    %c5 = arith.constant 5 : index
    %c1_36 = arith.constant 1 : index
    %c0_37 = arith.constant 0 : index
    %76 = vector.load %arg11[%c5, %c1_36, %c0_37] : memref<6x34x8xf32, #tpu.memory_space<vmem>>, vector<1x32x8xf32>
    tpu.vector_store %arg11[%c5, %c1_36, %c0_37], %75 {strides = array<i32>} : memref<6x34x8xf32, #tpu.memory_space<vmem>>, vector<1x32x8xf32>,
    %cst_38 = arith.constant 0.000000e+00 : f32
    %77 = vector.broadcast %cst_38 : f32 to vector<128x4xf32>
    %c0_39 = arith.constant 0 : index
    %c0_40 = arith.constant 0 : index
    %c0_41 = arith.constant 0 : index
    %78 = vector.load %arg11[%c0_39, %c0_40, %c0_41] : memref<6x34x8xf32, #tpu.memory_space<vmem>>, vector<4x32x8xf32>
    %79 = vector.shape_cast %78 : vector<4x32x8xf32> to vector<128x8xf32>
    %80 = arith.truncf %79 : vector<128x8xf32> to vector<128x8xbf16>
    %c0_42 = arith.constant 0 : index
    %c0_43 = arith.constant 0 : index
    %c0_44 = arith.constant 0 : index
    %c0_45 = arith.constant 0 : index
    %81 = vector.load %arg5[%c0_42, %c0_43, %c0_44, %c0_45] : memref<3x3x8x4xbf16, #tpu.memory_space<vmem>>, vector<1x1x8x4xbf16>
    %82 = vector.shape_cast %81 : vector<1x1x8x4xbf16> to vector<8x4xbf16>
    %cst_46 = arith.constant dense<0.000000e+00> : vector<128x4xf32>
    %83 = tpu.matmul %80, %82, %cst_46 {dimension_numbers = #tpu.dot_dimension_numbers<[1], [0], [0], [1], [0, 0, 1, 1], [], []>} : vector<128x8xbf16>, vector<8x4xbf16>, vector<128x4xf32> -> vector<128x4xf32>
    %84 = arith.addf %77, %83 : vector<128x4xf32>
    %c0_47 = arith.constant 0 : index
    %c1_48 = arith.constant 1 : index
    %c0_49 = arith.constant 0 : index
    %85 = vector.load %arg11[%c0_47, %c1_48, %c0_49] : memref<6x34x8xf32, #tpu.memory_space<vmem>>, vector<4x32x8xf32>
    %86 = vector.shape_cast %85 : vector<4x32x8xf32> to vector<128x8xf32>
    %87 = arith.truncf %86 : vector<128x8xf32> to vector<128x8xbf16>
    %c0_50 = arith.constant 0 : index
    %c1_51 = arith.constant 1 : index
    %c0_52 = arith.constant 0 : index
    %c0_53 = arith.constant 0 : index
    %88 = vector.load %arg5[%c0_50, %c1_51, %c0_52, %c0_53] : memref<3x3x8x4xbf16, #tpu.memory_space<vmem>>, vector<1x1x8x4xbf16>
    %89 = vector.shape_cast %88 : vector<1x1x8x4xbf16> to vector<8x4xbf16>
    %cst_54 = arith.constant dense<0.000000e+00> : vector<128x4xf32>
    %90 = tpu.matmul %87, %89, %cst_54 {dimension_numbers = #tpu.dot_dimension_numbers<[1], [0], [0], [1], [0, 0, 1, 1], [], []>} : vector<128x8xbf16>, vector<8x4xbf16>, vector<128x4xf32> -> vector<128x4xf32>
    %91 = arith.addf %84, %90 : vector<128x4xf32>
    %c0_55 = arith.constant 0 : index
    %c2 = arith.constant 2 : index
    %c0_56 = arith.constant 0 : index
    %92 = vector.load %arg11[%c0_55, %c2, %c0_56] : memref<6x34x8xf32, #tpu.memory_space<vmem>>, vector<4x32x8xf32>
    %93 = vector.shape_cast %92 : vector<4x32x8xf32> to vector<128x8xf32>
    %94 = arith.truncf %93 : vector<128x8xf32> to vector<128x8xbf16>
    %c0_57 = arith.constant 0 : index
    %c2_58 = arith.constant 2 : index
    %c0_59 = arith.constant 0 : index
    %c0_60 = arith.constant 0 : index
    %95 = vector.load %arg5[%c0_57, %c2_58, %c0_59, %c0_60] : memref<3x3x8x4xbf16, #tpu.memory_space<vmem>>, vector<1x1x8x4xbf16>
    %96 = vector.shape_cast %95 : vector<1x1x8x4xbf16> to vector<8x4xbf16>
    %cst_61 = arith.constant dense<0.000000e+00> : vector<128x4xf32>
    %97 = tpu.matmul %94, %96, %cst_61 {dimension_numbers = #tpu.dot_dimension_numbers<[1], [0], [0], [1], [0, 0, 1, 1], [], []>} : vector<128x8xbf16>, vector<8x4xbf16>, vector<128x4xf32> -> vector<128x4xf32>
    %98 = arith.addf %91, %97 : vector<128x4xf32>
    %c1_62 = arith.constant 1 : index
    %c0_63 = arith.constant 0 : index
    %c0_64 = arith.constant 0 : index
    %99 = vector.load %arg11[%c1_62, %c0_63, %c0_64] : memref<6x34x8xf32, #tpu.memory_space<vmem>>, vector<4x32x8xf32>
    %100 = vector.shape_cast %99 : vector<4x32x8xf32> to vector<128x8xf32>
    %101 = arith.truncf %100 : vector<128x8xf32> to vector<128x8xbf16>
    %c1_65 = arith.constant 1 : index
    %c0_66 = arith.constant 0 : index
    %c0_67 = arith.constant 0 : index
    %c0_68 = arith.constant 0 : index
    %102 = vector.load %arg5[%c1_65, %c0_66, %c0_67, %c0_68] : memref<3x3x8x4xbf16, #tpu.memory_space<vmem>>, vector<1x1x8x4xbf16>
    %103 = vector.shape_cast %102 : vector<1x1x8x4xbf16> to vector<8x4xbf16>
    %cst_69 = arith.constant dense<0.000000e+00> : vector<128x4xf32>
    %104 = tpu.matmul %101, %103, %cst_69 {dimension_numbers = #tpu.dot_dimension_numbers<[1], [0], [0], [1], [0, 0, 1, 1], [], []>} : vector<128x8xbf16>, vector<8x4xbf16>, vector<128x4xf32> -> vector<128x4xf32>
    %105 = arith.addf %98, %104 : vector<128x4xf32>
    %c1_70 = arith.constant 1 : index
    %c1_71 = arith.constant 1 : index
    %c0_72 = arith.constant 0 : index
    %106 = vector.load %arg11[%c1_70, %c1_71, %c0_72] : memref<6x34x8xf32, #tpu.memory_space<vmem>>, vector<4x32x8xf32>
    %107 = vector.shape_cast %106 : vector<4x32x8xf32> to vector<128x8xf32>
    %108 = arith.truncf %107 : vector<128x8xf32> to vector<128x8xbf16>
    %c1_73 = arith.constant 1 : index
    %c1_74 = arith.constant 1 : index
    %c0_75 = arith.constant 0 : index
    %c0_76 = arith.constant 0 : index
    %109 = vector.load %arg5[%c1_73, %c1_74, %c0_75, %c0_76] : memref<3x3x8x4xbf16, #tpu.memory_space<vmem>>, vector<1x1x8x4xbf16>
    %110 = vector.shape_cast %109 : vector<1x1x8x4xbf16> to vector<8x4xbf16>
    %cst_77 = arith.constant dense<0.000000e+00> : vector<128x4xf32>
    %111 = tpu.matmul %108, %110, %cst_77 {dimension_numbers = #tpu.dot_dimension_numbers<[1], [0], [0], [1], [0, 0, 1, 1], [], []>} : vector<128x8xbf16>, vector<8x4xbf16>, vector<128x4xf32> -> vector<128x4xf32>
    %112 = arith.addf %105, %111 : vector<128x4xf32>
    %c1_78 = arith.constant 1 : index
    %c2_79 = arith.constant 2 : index
    %c0_80 = arith.constant 0 : index
    %113 = vector.load %arg11[%c1_78, %c2_79, %c0_80] : memref<6x34x8xf32, #tpu.memory_space<vmem>>, vector<4x32x8xf32>
    %114 = vector.shape_cast %113 : vector<4x32x8xf32> to vector<128x8xf32>
    %115 = arith.truncf %114 : vector<128x8xf32> to vector<128x8xbf16>
    %c1_81 = arith.constant 1 : index
    %c2_82 = arith.constant 2 : index
    %c0_83 = arith.constant 0 : index
    %c0_84 = arith.constant 0 : index
    %116 = vector.load %arg5[%c1_81, %c2_82, %c0_83, %c0_84] : memref<3x3x8x4xbf16, #tpu.memory_space<vmem>>, vector<1x1x8x4xbf16>
    %117 = vector.shape_cast %116 : vector<1x1x8x4xbf16> to vector<8x4xbf16>
    %cst_85 = arith.constant dense<0.000000e+00> : vector<128x4xf32>
    %118 = tpu.matmul %115, %117, %cst_85 {dimension_numbers = #tpu.dot_dimension_numbers<[1], [0], [0], [1], [0, 0, 1, 1], [], []>} : vector<128x8xbf16>, vector<8x4xbf16>, vector<128x4xf32> -> vector<128x4xf32>
    %119 = arith.addf %112, %118 : vector<128x4xf32>
    %c2_86 = arith.constant 2 : index
    %c0_87 = arith.constant 0 : index
    %c0_88 = arith.constant 0 : index
    %120 = vector.load %arg11[%c2_86, %c0_87, %c0_88] : memref<6x34x8xf32, #tpu.memory_space<vmem>>, vector<4x32x8xf32>
    %121 = vector.shape_cast %120 : vector<4x32x8xf32> to vector<128x8xf32>
    %122 = arith.truncf %121 : vector<128x8xf32> to vector<128x8xbf16>
    %c2_89 = arith.constant 2 : index
    %c0_90 = arith.constant 0 : index
    %c0_91 = arith.constant 0 : index
    %c0_92 = arith.constant 0 : index
    %123 = vector.load %arg5[%c2_89, %c0_90, %c0_91, %c0_92] : memref<3x3x8x4xbf16, #tpu.memory_space<vmem>>, vector<1x1x8x4xbf16>
    %124 = vector.shape_cast %123 : vector<1x1x8x4xbf16> to vector<8x4xbf16>
    %cst_93 = arith.constant dense<0.000000e+00> : vector<128x4xf32>
    %125 = tpu.matmul %122, %124, %cst_93 {dimension_numbers = #tpu.dot_dimension_numbers<[1], [0], [0], [1], [0, 0, 1, 1], [], []>} : vector<128x8xbf16>, vector<8x4xbf16>, vector<128x4xf32> -> vector<128x4xf32>
    %126 = arith.addf %119, %125 : vector<128x4xf32>
    %c2_94 = arith.constant 2 : index
    %c1_95 = arith.constant 1 : index
    %c0_96 = arith.constant 0 : index
    %127 = vector.load %arg11[%c2_94, %c1_95, %c0_96] : memref<6x34x8xf32, #tpu.memory_space<vmem>>, vector<4x32x8xf32>
    %128 = vector.shape_cast %127 : vector<4x32x8xf32> to vector<128x8xf32>
    %129 = arith.truncf %128 : vector<128x8xf32> to vector<128x8xbf16>
    %c2_97 = arith.constant 2 : index
    %c1_98 = arith.constant 1 : index
    %c0_99 = arith.constant 0 : index
    %c0_100 = arith.constant 0 : index
    %130 = vector.load %arg5[%c2_97, %c1_98, %c0_99, %c0_100] : memref<3x3x8x4xbf16, #tpu.memory_space<vmem>>, vector<1x1x8x4xbf16>
    %131 = vector.shape_cast %130 : vector<1x1x8x4xbf16> to vector<8x4xbf16>
    %cst_101 = arith.constant dense<0.000000e+00> : vector<128x4xf32>
    %132 = tpu.matmul %129, %131, %cst_101 {dimension_numbers = #tpu.dot_dimension_numbers<[1], [0], [0], [1], [0, 0, 1, 1], [], []>} : vector<128x8xbf16>, vector<8x4xbf16>, vector<128x4xf32> -> vector<128x4xf32>
    %133 = arith.addf %126, %132 : vector<128x4xf32>
    %c2_102 = arith.constant 2 : index
    %c2_103 = arith.constant 2 : index
    %c0_104 = arith.constant 0 : index
    %134 = vector.load %arg11[%c2_102, %c2_103, %c0_104] : memref<6x34x8xf32, #tpu.memory_space<vmem>>, vector<4x32x8xf32>
    %135 = vector.shape_cast %134 : vector<4x32x8xf32> to vector<128x8xf32>
    %136 = arith.truncf %135 : vector<128x8xf32> to vector<128x8xbf16>
    %c2_105 = arith.constant 2 : index
    %c2_106 = arith.constant 2 : index
    %c0_107 = arith.constant 0 : index
    %c0_108 = arith.constant 0 : index
    %137 = vector.load %arg5[%c2_105, %c2_106, %c0_107, %c0_108] : memref<3x3x8x4xbf16, #tpu.memory_space<vmem>>, vector<1x1x8x4xbf16>
    %138 = vector.shape_cast %137 : vector<1x1x8x4xbf16> to vector<8x4xbf16>
    %cst_109 = arith.constant dense<0.000000e+00> : vector<128x4xf32>
    %139 = tpu.matmul %136, %138, %cst_109 {dimension_numbers = #tpu.dot_dimension_numbers<[1], [0], [0], [1], [0, 0, 1, 1], [], []>} : vector<128x8xbf16>, vector<8x4xbf16>, vector<128x4xf32> -> vector<128x4xf32>
    %140 = arith.addf %133, %139 : vector<128x4xf32>
    %c0_110 = arith.constant 0 : index
    %c0_111 = arith.constant 0 : index
    %141 = vector.load %arg6[%c0_110, %c0_111] : memref<1x4xf32, #tpu.memory_space<vmem>>, vector<1x4xf32>
    %142 = vector.shape_cast %141 : vector<1x4xf32> to vector<4xf32>
    %143 = vector.shape_cast %142 : vector<4xf32> to vector<1x4xf32>
    %144 = vector.broadcast %143 : vector<1x4xf32> to vector<128x4xf32>
    %145 = arith.addf %140, %144 : vector<128x4xf32>
    %cst_112 = arith.constant dense<0.000000e+00> : vector<4xf32>
    %146 = vector.multi_reduction <add>, %145, %cst_112 [0] : vector<128x4xf32> to vector<4xf32>
    %147 = vector.shape_cast %146 : vector<4xf32> to vector<1x4xf32>
    %c0_113 = arith.constant 0 : index
    %c0_114 = arith.constant 0 : index
    %c0_115 = arith.constant 0 : index
    %c0_116 = arith.constant 0 : index
    %148 = vector.load %arg10[%c0_113, %c0_114, %c0_115, %c0_116] : memref<1x1x2x4xf32, #tpu.memory_space<vmem>>, vector<1x1x1x4xf32>
    %149 = vector.shape_cast %148 : vector<1x1x1x4xf32> to vector<1x4xf32>
    %150 = vector.shape_cast %147 : vector<1x4xf32> to vector<1x1x1x4xf32>
    tpu.vector_store %arg10[%c0_113, %c0_114, %c0_115, %c0_116], %150 {strides = array<i32>} : memref<1x1x2x4xf32, #tpu.memory_space<vmem>>, vector<1x1x1x4xf32>,
    %151 = arith.mulf %145, %145 : vector<128x4xf32>
    %cst_117 = arith.constant dense<0.000000e+00> : vector<4xf32>
    %152 = vector.multi_reduction <add>, %151, %cst_117 [0] : vector<128x4xf32> to vector<4xf32>
    %153 = vector.shape_cast %152 : vector<4xf32> to vector<1x4xf32>
    %c0_118 = arith.constant 0 : index
    %c0_119 = arith.constant 0 : index
    %c1_120 = arith.constant 1 : index
    %c0_121 = arith.constant 0 : index
    %154 = vector.load %arg10[%c0_118, %c0_119, %c1_120, %c0_121] : memref<1x1x2x4xf32, #tpu.memory_space<vmem>>, vector<1x1x1x4xf32>
    %155 = vector.shape_cast %154 : vector<1x1x1x4xf32> to vector<1x4xf32>
    %156 = vector.shape_cast %153 : vector<1x4xf32> to vector<1x1x1x4xf32>
    tpu.vector_store %arg10[%c0_118, %c0_119, %c1_120, %c0_121], %156 {strides = array<i32>} : memref<1x1x2x4xf32, #tpu.memory_space<vmem>>, vector<1x1x1x4xf32>,
    %157 = vector.shape_cast %145 : vector<128x4xf32> to vector<4x32x4xf32>
    %158 = arith.truncf %157 : vector<4x32x4xf32> to vector<4x32x4xbf16>
    %c0_122 = arith.constant 0 : index
    %c0_123 = arith.constant 0 : index
    %c0_124 = arith.constant 0 : index
    %c0_125 = arith.constant 0 : index
    %159 = vector.load %arg9[%c0_122, %c0_123, %c0_124, %c0_125] : memref<1x4x32x4xbf16, #tpu.memory_space<vmem>>, vector<1x4x32x4xbf16>
    %160 = vector.shape_cast %159 : vector<1x4x32x4xbf16> to vector<4x32x4xbf16>
    %161 = vector.shape_cast %158 : vector<4x32x4xbf16> to vector<1x4x32x4xbf16>
    tpu.vector_store %arg9[%c0_122, %c0_123, %c0_124, %c0_125], %161 {strides = array<i32>} : memref<1x4x32x4xbf16, #tpu.memory_space<vmem>>, vector<1x4x32x4xbf16>,
    return
  }
  func.func @transform_0(%arg0: i32, %arg1: i32) -> (i32, i32, i32, i32) {
    %c0_i32 = arith.constant 0 : i32
    %c0_i32_0 = arith.constant 0 : i32
    %c0_i32_1 = arith.constant 0 : i32
    return %arg0, %arg1, %c0_i32, %c0_i32_0 : i32, i32, i32, i32
  }
  func.func @transform_1(%arg0: i32, %arg1: i32) -> (i32, i32, i32, i32) {
    %c2_i32 = arith.constant 2 : i32
    %0 = arith.muli %arg1, %c2_i32 : i32
    %c1_i32 = arith.constant 1 : i32
    %1 = arith.subi %0, %c1_i32 : i32
    %c0_i32 = arith.constant 0 : i32
    %2 = arith.maxsi %1, %c0_i32 : i32
    %c0_i32_0 = arith.constant 0 : i32
    %c0_i32_1 = arith.constant 0 : i32
    %c0_i32_2 = arith.constant 0 : i32
    return %arg0, %2, %c0_i32_0, %c0_i32_1 : i32, i32, i32, i32
  }
  func.func @transform_2(%arg0: i32, %arg1: i32) -> (i32, i32, i32, i32) {
    %c1_i32 = arith.constant 1 : i32
    %0 = arith.addi %arg1, %c1_i32 : i32
    %c2_i32 = arith.constant 2 : i32
    %1 = arith.muli %0, %c2_i32 : i32
    %c15_i32 = arith.constant 15 : i32
    %2 = arith.minsi %1, %c15_i32 : i32
    %c0_i32 = arith.constant 0 : i32
    %c0_i32_0 = arith.constant 0 : i32
    %c0_i32_1 = arith.constant 0 : i32
    return %arg0, %2, %c0_i32, %c0_i32_0 : i32, i32, i32, i32
  }
  func.func @transform_3(%arg0: i32, %arg1: i32) -> (i32, i32, i32, i32) {
    %c0_i32 = arith.constant 0 : i32
    %c0_i32_0 = arith.constant 0 : i32
    %c0_i32_1 = arith.constant 0 : i32
    %c0_i32_2 = arith.constant 0 : i32
    %c0_i32_3 = arith.constant 0 : i32
    return %c0_i32, %c0_i32_0, %c0_i32_1, %c0_i32_2 : i32, i32, i32, i32
  }
  func.func @transform_4(%arg0: i32, %arg1: i32) -> (i32, i32) {
    %c0_i32 = arith.constant 0 : i32
    %c0_i32_0 = arith.constant 0 : i32
    %c0_i32_1 = arith.constant 0 : i32
    return %c0_i32, %c0_i32_0 : i32, i32
  }
  func.func @transform_5(%arg0: i32, %arg1: i32) -> (i32, i32) {
    %c0_i32 = arith.constant 0 : i32
    %c0_i32_0 = arith.constant 0 : i32
    %c0_i32_1 = arith.constant 0 : i32
    return %c0_i32, %c0_i32_0 : i32, i32
  }
  func.func @transform_6(%arg0: i32, %arg1: i32) -> (i32, i32) {
    %c0_i32 = arith.constant 0 : i32
    %c0_i32_0 = arith.constant 0 : i32
    %c0_i32_1 = arith.constant 0 : i32
    return %c0_i32, %c0_i32_0 : i32, i32
  }
  func.func @transform_7(%arg0: i32, %arg1: i32) -> (i32, i32, i32, i32) {
    %c0_i32 = arith.constant 0 : i32
    %c0_i32_0 = arith.constant 0 : i32
    %c0_i32_1 = arith.constant 0 : i32
    return %arg0, %arg1, %c0_i32, %c0_i32_0 : i32, i32, i32, i32
  }
  func.func @transform_8(%arg0: i32, %arg1: i32) -> (i32, i32, i32, i32) {
    %c0_i32 = arith.constant 0 : i32
    %c0_i32_0 = arith.constant 0 : i32
    %c0_i32_1 = arith.constant 0 : i32
    return %arg0, %arg1, %c0_i32, %c0_i32_0 : i32, i32, i32, i32
  }
}

module attributes {stable_mosaic.version = 11 : i64} {
  func.func @kernel(%arg0: i32, %arg1: i32, %arg2: memref<1x2x16x8xf32, #tpu.memory_space<vmem>>, %arg3: memref<1x1x16x8xf32, #tpu.memory_space<vmem>>, %arg4: memref<1x1x16x8xf32, #tpu.memory_space<vmem>>, %arg5: memref<3x3x8x4xbf16, #tpu.memory_space<vmem>>, %arg6: memref<1x4xf32, #tpu.memory_space<vmem>>, %arg7: memref<1x4x32x4xbf16, #tpu.memory_space<vmem>>, %arg8: memref<1x1x2x4xf32, #tpu.memory_space<vmem>>, %arg9: memref<6x34x8xf32, #tpu.memory_space<vmem>>) attributes {dimension_semantics = [#tpu.dimension_semantics<parallel>, #tpu.dimension_semantics<parallel>], iteration_bounds = array<i64: 2, 8>, scalar_prefetch = 0 : i64, scratch_operands = 1 : i64, tpu.core_type = #tpu.core_type<tc>, window_params = [{transform_indices = @transform_0, window_bounds = array<i64: 1, 2, 16, 8>}, {transform_indices = @transform_1, window_bounds = array<i64: 1, 1, 16, 8>}, {transform_indices = @transform_2, window_bounds = array<i64: 1, 1, 16, 8>}, {pipeline_mode = #tpu.pipeline_mode<synchronous>, transform_indices = @transform_3, window_bounds = array<i64: 3, 3, 8, 4>}, {pipeline_mode = #tpu.pipeline_mode<synchronous>, transform_indices = @transform_4, window_bounds = array<i64: 1, 4>}, {transform_indices = @transform_5, window_bounds = array<i64: 1, 4, 32, 4>}, {transform_indices = @transform_6, window_bounds = array<i64: 1, 1, 2, 4>}]} {
    %c0 = arith.constant 0 : index
    %c0_0 = arith.constant 0 : index
    %c0_1 = arith.constant 0 : index
    %c0_2 = arith.constant 0 : index
    %0 = vector.load %arg2[%c0, %c0_0, %c0_1, %c0_2] : memref<1x2x16x8xf32, #tpu.memory_space<vmem>>, vector<1x2x16x8xf32>
    %1 = vector.shape_cast %0 : vector<1x2x16x8xf32> to vector<2x16x8xf32>
    %c0_3 = arith.constant 0 : index
    %c0_4 = arith.constant 0 : index
    %c0_5 = arith.constant 0 : index
    %c0_6 = arith.constant 0 : index
    %2 = vector.load %arg3[%c0_3, %c0_4, %c0_5, %c0_6] : memref<1x1x16x8xf32, #tpu.memory_space<vmem>>, vector<1x1x16x8xf32>
    %3 = vector.shape_cast %2 : vector<1x1x16x8xf32> to vector<1x16x8xf32>
    %c0_7 = arith.constant 0 : index
    %c0_8 = arith.constant 0 : index
    %c0_9 = arith.constant 0 : index
    %c0_10 = arith.constant 0 : index
    %4 = vector.load %arg4[%c0_7, %c0_8, %c0_9, %c0_10] : memref<1x1x16x8xf32, #tpu.memory_space<vmem>>, vector<1x1x16x8xf32>
    %5 = vector.shape_cast %4 : vector<1x1x16x8xf32> to vector<1x16x8xf32>
    %c0_i32 = arith.constant 0 : i32
    %6 = arith.cmpi sgt, %arg1, %c0_i32 : i32
    %7 = arith.extui %6 : i1 to i32
    %8 = arith.sitofp %7 : i32 to f32
    %9 = vector.broadcast %8 : f32 to vector<1x16x8xf32>
    %10 = arith.mulf %3, %9 : vector<1x16x8xf32>
    %c7_i32 = arith.constant 7 : i32
    %11 = arith.cmpi slt, %arg1, %c7_i32 : i32
    %12 = arith.extui %11 : i1 to i32
    %13 = arith.sitofp %12 : i32 to f32
    %14 = vector.broadcast %13 : f32 to vector<1x16x8xf32>
    %15 = arith.mulf %5, %14 : vector<1x16x8xf32>
    %cst = arith.constant 0.000000e+00 : f32
    %16 = vector.broadcast %cst : f32 to vector<6x1x8xf32>
    %c0_11 = arith.constant 0 : index
    %c0_12 = arith.constant 0 : index
    %c0_13 = arith.constant 0 : index
    %17 = vector.load %arg9[%c0_11, %c0_12, %c0_13] : memref<6x34x8xf32, #tpu.memory_space<vmem>>, vector<6x1x8xf32>
    tpu.vector_store %arg9[%c0_11, %c0_12, %c0_13], %16 {strides = array<i32>} : memref<6x34x8xf32, #tpu.memory_space<vmem>>, vector<6x1x8xf32>,
    %c0_14 = arith.constant 0 : index
    %c33 = arith.constant 33 : index
    %c0_15 = arith.constant 0 : index
    %18 = vector.load %arg9[%c0_14, %c33, %c0_15] : memref<6x34x8xf32, #tpu.memory_space<vmem>>, vector<6x1x8xf32>
    tpu.vector_store %arg9[%c0_14, %c33, %c0_15], %16 {strides = array<i32>} : memref<6x34x8xf32, #tpu.memory_space<vmem>>, vector<6x1x8xf32>,
    %19 = vector.shape_cast %10 : vector<1x16x8xf32> to vector<1x16x1x8xf32>
    %20 = vector.shape_cast %19 : vector<1x16x1x8xf32> to vector<1x16x1x8xf32>
    %21 = vector.broadcast %20 : vector<1x16x1x8xf32> to vector<1x16x2x8xf32>
    %22 = vector.shape_cast %21 : vector<1x16x2x8xf32> to vector<1x32x8xf32>
    %c0_16 = arith.constant 0 : index
    %c1 = arith.constant 1 : index
    %c0_17 = arith.constant 0 : index
    %23 = vector.load %arg9[%c0_16, %c1, %c0_17] : memref<6x34x8xf32, #tpu.memory_space<vmem>>, vector<1x32x8xf32>
    tpu.vector_store %arg9[%c0_16, %c1, %c0_17], %22 {strides = array<i32>} : memref<6x34x8xf32, #tpu.memory_space<vmem>>, vector<1x32x8xf32>,
    %24 = vector.shape_cast %1 : vector<2x16x8xf32> to vector<2x1x16x8xf32>
    %25 = vector.shape_cast %24 : vector<2x1x16x8xf32> to vector<2x1x16x8xf32>
    %26 = vector.broadcast %25 : vector<2x1x16x8xf32> to vector<2x2x16x8xf32>
    %27 = vector.shape_cast %26 : vector<2x2x16x8xf32> to vector<4x16x8xf32>
    %28 = vector.shape_cast %27 : vector<4x16x8xf32> to vector<4x16x1x8xf32>
    %29 = vector.shape_cast %28 : vector<4x16x1x8xf32> to vector<4x16x1x8xf32>
    %30 = vector.broadcast %29 : vector<4x16x1x8xf32> to vector<4x16x2x8xf32>
    %31 = vector.shape_cast %30 : vector<4x16x2x8xf32> to vector<4x32x8xf32>
    %c1_18 = arith.constant 1 : index
    %c1_19 = arith.constant 1 : index
    %c0_20 = arith.constant 0 : index
    %32 = vector.load %arg9[%c1_18, %c1_19, %c0_20] : memref<6x34x8xf32, #tpu.memory_space<vmem>>, vector<4x32x8xf32>
    tpu.vector_store %arg9[%c1_18, %c1_19, %c0_20], %31 {strides = array<i32>} : memref<6x34x8xf32, #tpu.memory_space<vmem>>, vector<4x32x8xf32>,
    %33 = vector.shape_cast %15 : vector<1x16x8xf32> to vector<1x16x1x8xf32>
    %34 = vector.shape_cast %33 : vector<1x16x1x8xf32> to vector<1x16x1x8xf32>
    %35 = vector.broadcast %34 : vector<1x16x1x8xf32> to vector<1x16x2x8xf32>
    %36 = vector.shape_cast %35 : vector<1x16x2x8xf32> to vector<1x32x8xf32>
    %c5 = arith.constant 5 : index
    %c1_21 = arith.constant 1 : index
    %c0_22 = arith.constant 0 : index
    %37 = vector.load %arg9[%c5, %c1_21, %c0_22] : memref<6x34x8xf32, #tpu.memory_space<vmem>>, vector<1x32x8xf32>
    tpu.vector_store %arg9[%c5, %c1_21, %c0_22], %36 {strides = array<i32>} : memref<6x34x8xf32, #tpu.memory_space<vmem>>, vector<1x32x8xf32>,
    %cst_23 = arith.constant 0.000000e+00 : f32
    %38 = vector.broadcast %cst_23 : f32 to vector<128x4xf32>
    %c0_24 = arith.constant 0 : index
    %c0_25 = arith.constant 0 : index
    %c0_26 = arith.constant 0 : index
    %39 = vector.load %arg9[%c0_24, %c0_25, %c0_26] : memref<6x34x8xf32, #tpu.memory_space<vmem>>, vector<4x32x8xf32>
    %40 = vector.shape_cast %39 : vector<4x32x8xf32> to vector<128x8xf32>
    %41 = arith.truncf %40 : vector<128x8xf32> to vector<128x8xbf16>
    %c0_27 = arith.constant 0 : index
    %c0_28 = arith.constant 0 : index
    %c0_29 = arith.constant 0 : index
    %c0_30 = arith.constant 0 : index
    %42 = vector.load %arg5[%c0_27, %c0_28, %c0_29, %c0_30] : memref<3x3x8x4xbf16, #tpu.memory_space<vmem>>, vector<1x1x8x4xbf16>
    %43 = vector.shape_cast %42 : vector<1x1x8x4xbf16> to vector<8x4xbf16>
    %cst_31 = arith.constant dense<0.000000e+00> : vector<128x4xf32>
    %44 = tpu.matmul %41, %43, %cst_31 {dimension_numbers = #tpu.dot_dimension_numbers<[1], [0], [0], [1], [0, 0, 1, 1], [], []>} : vector<128x8xbf16>, vector<8x4xbf16>, vector<128x4xf32> -> vector<128x4xf32>
    %45 = arith.addf %38, %44 : vector<128x4xf32>
    %c0_32 = arith.constant 0 : index
    %c1_33 = arith.constant 1 : index
    %c0_34 = arith.constant 0 : index
    %46 = vector.load %arg9[%c0_32, %c1_33, %c0_34] : memref<6x34x8xf32, #tpu.memory_space<vmem>>, vector<4x32x8xf32>
    %47 = vector.shape_cast %46 : vector<4x32x8xf32> to vector<128x8xf32>
    %48 = arith.truncf %47 : vector<128x8xf32> to vector<128x8xbf16>
    %c0_35 = arith.constant 0 : index
    %c1_36 = arith.constant 1 : index
    %c0_37 = arith.constant 0 : index
    %c0_38 = arith.constant 0 : index
    %49 = vector.load %arg5[%c0_35, %c1_36, %c0_37, %c0_38] : memref<3x3x8x4xbf16, #tpu.memory_space<vmem>>, vector<1x1x8x4xbf16>
    %50 = vector.shape_cast %49 : vector<1x1x8x4xbf16> to vector<8x4xbf16>
    %cst_39 = arith.constant dense<0.000000e+00> : vector<128x4xf32>
    %51 = tpu.matmul %48, %50, %cst_39 {dimension_numbers = #tpu.dot_dimension_numbers<[1], [0], [0], [1], [0, 0, 1, 1], [], []>} : vector<128x8xbf16>, vector<8x4xbf16>, vector<128x4xf32> -> vector<128x4xf32>
    %52 = arith.addf %45, %51 : vector<128x4xf32>
    %c0_40 = arith.constant 0 : index
    %c2 = arith.constant 2 : index
    %c0_41 = arith.constant 0 : index
    %53 = vector.load %arg9[%c0_40, %c2, %c0_41] : memref<6x34x8xf32, #tpu.memory_space<vmem>>, vector<4x32x8xf32>
    %54 = vector.shape_cast %53 : vector<4x32x8xf32> to vector<128x8xf32>
    %55 = arith.truncf %54 : vector<128x8xf32> to vector<128x8xbf16>
    %c0_42 = arith.constant 0 : index
    %c2_43 = arith.constant 2 : index
    %c0_44 = arith.constant 0 : index
    %c0_45 = arith.constant 0 : index
    %56 = vector.load %arg5[%c0_42, %c2_43, %c0_44, %c0_45] : memref<3x3x8x4xbf16, #tpu.memory_space<vmem>>, vector<1x1x8x4xbf16>
    %57 = vector.shape_cast %56 : vector<1x1x8x4xbf16> to vector<8x4xbf16>
    %cst_46 = arith.constant dense<0.000000e+00> : vector<128x4xf32>
    %58 = tpu.matmul %55, %57, %cst_46 {dimension_numbers = #tpu.dot_dimension_numbers<[1], [0], [0], [1], [0, 0, 1, 1], [], []>} : vector<128x8xbf16>, vector<8x4xbf16>, vector<128x4xf32> -> vector<128x4xf32>
    %59 = arith.addf %52, %58 : vector<128x4xf32>
    %c1_47 = arith.constant 1 : index
    %c0_48 = arith.constant 0 : index
    %c0_49 = arith.constant 0 : index
    %60 = vector.load %arg9[%c1_47, %c0_48, %c0_49] : memref<6x34x8xf32, #tpu.memory_space<vmem>>, vector<4x32x8xf32>
    %61 = vector.shape_cast %60 : vector<4x32x8xf32> to vector<128x8xf32>
    %62 = arith.truncf %61 : vector<128x8xf32> to vector<128x8xbf16>
    %c1_50 = arith.constant 1 : index
    %c0_51 = arith.constant 0 : index
    %c0_52 = arith.constant 0 : index
    %c0_53 = arith.constant 0 : index
    %63 = vector.load %arg5[%c1_50, %c0_51, %c0_52, %c0_53] : memref<3x3x8x4xbf16, #tpu.memory_space<vmem>>, vector<1x1x8x4xbf16>
    %64 = vector.shape_cast %63 : vector<1x1x8x4xbf16> to vector<8x4xbf16>
    %cst_54 = arith.constant dense<0.000000e+00> : vector<128x4xf32>
    %65 = tpu.matmul %62, %64, %cst_54 {dimension_numbers = #tpu.dot_dimension_numbers<[1], [0], [0], [1], [0, 0, 1, 1], [], []>} : vector<128x8xbf16>, vector<8x4xbf16>, vector<128x4xf32> -> vector<128x4xf32>
    %66 = arith.addf %59, %65 : vector<128x4xf32>
    %c1_55 = arith.constant 1 : index
    %c1_56 = arith.constant 1 : index
    %c0_57 = arith.constant 0 : index
    %67 = vector.load %arg9[%c1_55, %c1_56, %c0_57] : memref<6x34x8xf32, #tpu.memory_space<vmem>>, vector<4x32x8xf32>
    %68 = vector.shape_cast %67 : vector<4x32x8xf32> to vector<128x8xf32>
    %69 = arith.truncf %68 : vector<128x8xf32> to vector<128x8xbf16>
    %c1_58 = arith.constant 1 : index
    %c1_59 = arith.constant 1 : index
    %c0_60 = arith.constant 0 : index
    %c0_61 = arith.constant 0 : index
    %70 = vector.load %arg5[%c1_58, %c1_59, %c0_60, %c0_61] : memref<3x3x8x4xbf16, #tpu.memory_space<vmem>>, vector<1x1x8x4xbf16>
    %71 = vector.shape_cast %70 : vector<1x1x8x4xbf16> to vector<8x4xbf16>
    %cst_62 = arith.constant dense<0.000000e+00> : vector<128x4xf32>
    %72 = tpu.matmul %69, %71, %cst_62 {dimension_numbers = #tpu.dot_dimension_numbers<[1], [0], [0], [1], [0, 0, 1, 1], [], []>} : vector<128x8xbf16>, vector<8x4xbf16>, vector<128x4xf32> -> vector<128x4xf32>
    %73 = arith.addf %66, %72 : vector<128x4xf32>
    %c1_63 = arith.constant 1 : index
    %c2_64 = arith.constant 2 : index
    %c0_65 = arith.constant 0 : index
    %74 = vector.load %arg9[%c1_63, %c2_64, %c0_65] : memref<6x34x8xf32, #tpu.memory_space<vmem>>, vector<4x32x8xf32>
    %75 = vector.shape_cast %74 : vector<4x32x8xf32> to vector<128x8xf32>
    %76 = arith.truncf %75 : vector<128x8xf32> to vector<128x8xbf16>
    %c1_66 = arith.constant 1 : index
    %c2_67 = arith.constant 2 : index
    %c0_68 = arith.constant 0 : index
    %c0_69 = arith.constant 0 : index
    %77 = vector.load %arg5[%c1_66, %c2_67, %c0_68, %c0_69] : memref<3x3x8x4xbf16, #tpu.memory_space<vmem>>, vector<1x1x8x4xbf16>
    %78 = vector.shape_cast %77 : vector<1x1x8x4xbf16> to vector<8x4xbf16>
    %cst_70 = arith.constant dense<0.000000e+00> : vector<128x4xf32>
    %79 = tpu.matmul %76, %78, %cst_70 {dimension_numbers = #tpu.dot_dimension_numbers<[1], [0], [0], [1], [0, 0, 1, 1], [], []>} : vector<128x8xbf16>, vector<8x4xbf16>, vector<128x4xf32> -> vector<128x4xf32>
    %80 = arith.addf %73, %79 : vector<128x4xf32>
    %c2_71 = arith.constant 2 : index
    %c0_72 = arith.constant 0 : index
    %c0_73 = arith.constant 0 : index
    %81 = vector.load %arg9[%c2_71, %c0_72, %c0_73] : memref<6x34x8xf32, #tpu.memory_space<vmem>>, vector<4x32x8xf32>
    %82 = vector.shape_cast %81 : vector<4x32x8xf32> to vector<128x8xf32>
    %83 = arith.truncf %82 : vector<128x8xf32> to vector<128x8xbf16>
    %c2_74 = arith.constant 2 : index
    %c0_75 = arith.constant 0 : index
    %c0_76 = arith.constant 0 : index
    %c0_77 = arith.constant 0 : index
    %84 = vector.load %arg5[%c2_74, %c0_75, %c0_76, %c0_77] : memref<3x3x8x4xbf16, #tpu.memory_space<vmem>>, vector<1x1x8x4xbf16>
    %85 = vector.shape_cast %84 : vector<1x1x8x4xbf16> to vector<8x4xbf16>
    %cst_78 = arith.constant dense<0.000000e+00> : vector<128x4xf32>
    %86 = tpu.matmul %83, %85, %cst_78 {dimension_numbers = #tpu.dot_dimension_numbers<[1], [0], [0], [1], [0, 0, 1, 1], [], []>} : vector<128x8xbf16>, vector<8x4xbf16>, vector<128x4xf32> -> vector<128x4xf32>
    %87 = arith.addf %80, %86 : vector<128x4xf32>
    %c2_79 = arith.constant 2 : index
    %c1_80 = arith.constant 1 : index
    %c0_81 = arith.constant 0 : index
    %88 = vector.load %arg9[%c2_79, %c1_80, %c0_81] : memref<6x34x8xf32, #tpu.memory_space<vmem>>, vector<4x32x8xf32>
    %89 = vector.shape_cast %88 : vector<4x32x8xf32> to vector<128x8xf32>
    %90 = arith.truncf %89 : vector<128x8xf32> to vector<128x8xbf16>
    %c2_82 = arith.constant 2 : index
    %c1_83 = arith.constant 1 : index
    %c0_84 = arith.constant 0 : index
    %c0_85 = arith.constant 0 : index
    %91 = vector.load %arg5[%c2_82, %c1_83, %c0_84, %c0_85] : memref<3x3x8x4xbf16, #tpu.memory_space<vmem>>, vector<1x1x8x4xbf16>
    %92 = vector.shape_cast %91 : vector<1x1x8x4xbf16> to vector<8x4xbf16>
    %cst_86 = arith.constant dense<0.000000e+00> : vector<128x4xf32>
    %93 = tpu.matmul %90, %92, %cst_86 {dimension_numbers = #tpu.dot_dimension_numbers<[1], [0], [0], [1], [0, 0, 1, 1], [], []>} : vector<128x8xbf16>, vector<8x4xbf16>, vector<128x4xf32> -> vector<128x4xf32>
    %94 = arith.addf %87, %93 : vector<128x4xf32>
    %c2_87 = arith.constant 2 : index
    %c2_88 = arith.constant 2 : index
    %c0_89 = arith.constant 0 : index
    %95 = vector.load %arg9[%c2_87, %c2_88, %c0_89] : memref<6x34x8xf32, #tpu.memory_space<vmem>>, vector<4x32x8xf32>
    %96 = vector.shape_cast %95 : vector<4x32x8xf32> to vector<128x8xf32>
    %97 = arith.truncf %96 : vector<128x8xf32> to vector<128x8xbf16>
    %c2_90 = arith.constant 2 : index
    %c2_91 = arith.constant 2 : index
    %c0_92 = arith.constant 0 : index
    %c0_93 = arith.constant 0 : index
    %98 = vector.load %arg5[%c2_90, %c2_91, %c0_92, %c0_93] : memref<3x3x8x4xbf16, #tpu.memory_space<vmem>>, vector<1x1x8x4xbf16>
    %99 = vector.shape_cast %98 : vector<1x1x8x4xbf16> to vector<8x4xbf16>
    %cst_94 = arith.constant dense<0.000000e+00> : vector<128x4xf32>
    %100 = tpu.matmul %97, %99, %cst_94 {dimension_numbers = #tpu.dot_dimension_numbers<[1], [0], [0], [1], [0, 0, 1, 1], [], []>} : vector<128x8xbf16>, vector<8x4xbf16>, vector<128x4xf32> -> vector<128x4xf32>
    %101 = arith.addf %94, %100 : vector<128x4xf32>
    %c0_95 = arith.constant 0 : index
    %c0_96 = arith.constant 0 : index
    %102 = vector.load %arg6[%c0_95, %c0_96] : memref<1x4xf32, #tpu.memory_space<vmem>>, vector<1x4xf32>
    %103 = vector.shape_cast %102 : vector<1x4xf32> to vector<4xf32>
    %104 = vector.shape_cast %103 : vector<4xf32> to vector<1x4xf32>
    %105 = vector.broadcast %104 : vector<1x4xf32> to vector<128x4xf32>
    %106 = arith.addf %101, %105 : vector<128x4xf32>
    %cst_97 = arith.constant dense<0.000000e+00> : vector<4xf32>
    %107 = vector.multi_reduction <add>, %106, %cst_97 [0] : vector<128x4xf32> to vector<4xf32>
    %108 = vector.shape_cast %107 : vector<4xf32> to vector<1x4xf32>
    %c0_98 = arith.constant 0 : index
    %c0_99 = arith.constant 0 : index
    %c0_100 = arith.constant 0 : index
    %c0_101 = arith.constant 0 : index
    %109 = vector.load %arg8[%c0_98, %c0_99, %c0_100, %c0_101] : memref<1x1x2x4xf32, #tpu.memory_space<vmem>>, vector<1x1x1x4xf32>
    %110 = vector.shape_cast %109 : vector<1x1x1x4xf32> to vector<1x4xf32>
    %111 = vector.shape_cast %108 : vector<1x4xf32> to vector<1x1x1x4xf32>
    tpu.vector_store %arg8[%c0_98, %c0_99, %c0_100, %c0_101], %111 {strides = array<i32>} : memref<1x1x2x4xf32, #tpu.memory_space<vmem>>, vector<1x1x1x4xf32>,
    %112 = arith.mulf %106, %106 : vector<128x4xf32>
    %cst_102 = arith.constant dense<0.000000e+00> : vector<4xf32>
    %113 = vector.multi_reduction <add>, %112, %cst_102 [0] : vector<128x4xf32> to vector<4xf32>
    %114 = vector.shape_cast %113 : vector<4xf32> to vector<1x4xf32>
    %c0_103 = arith.constant 0 : index
    %c0_104 = arith.constant 0 : index
    %c1_105 = arith.constant 1 : index
    %c0_106 = arith.constant 0 : index
    %115 = vector.load %arg8[%c0_103, %c0_104, %c1_105, %c0_106] : memref<1x1x2x4xf32, #tpu.memory_space<vmem>>, vector<1x1x1x4xf32>
    %116 = vector.shape_cast %115 : vector<1x1x1x4xf32> to vector<1x4xf32>
    %117 = vector.shape_cast %114 : vector<1x4xf32> to vector<1x1x1x4xf32>
    tpu.vector_store %arg8[%c0_103, %c0_104, %c1_105, %c0_106], %117 {strides = array<i32>} : memref<1x1x2x4xf32, #tpu.memory_space<vmem>>, vector<1x1x1x4xf32>,
    %118 = vector.shape_cast %106 : vector<128x4xf32> to vector<4x32x4xf32>
    %119 = arith.truncf %118 : vector<4x32x4xf32> to vector<4x32x4xbf16>
    %c0_107 = arith.constant 0 : index
    %c0_108 = arith.constant 0 : index
    %c0_109 = arith.constant 0 : index
    %c0_110 = arith.constant 0 : index
    %120 = vector.load %arg7[%c0_107, %c0_108, %c0_109, %c0_110] : memref<1x4x32x4xbf16, #tpu.memory_space<vmem>>, vector<1x4x32x4xbf16>
    %121 = vector.shape_cast %120 : vector<1x4x32x4xbf16> to vector<4x32x4xbf16>
    %122 = vector.shape_cast %119 : vector<4x32x4xbf16> to vector<1x4x32x4xbf16>
    tpu.vector_store %arg7[%c0_107, %c0_108, %c0_109, %c0_110], %122 {strides = array<i32>} : memref<1x4x32x4xbf16, #tpu.memory_space<vmem>>, vector<1x4x32x4xbf16>,
    return
  }
  func.func @transform_0(%arg0: i32, %arg1: i32) -> (i32, i32, i32, i32) {
    %c0_i32 = arith.constant 0 : i32
    %c0_i32_0 = arith.constant 0 : i32
    %c0_i32_1 = arith.constant 0 : i32
    return %arg0, %arg1, %c0_i32, %c0_i32_0 : i32, i32, i32, i32
  }
  func.func @transform_1(%arg0: i32, %arg1: i32) -> (i32, i32, i32, i32) {
    %c2_i32 = arith.constant 2 : i32
    %0 = arith.muli %arg1, %c2_i32 : i32
    %c1_i32 = arith.constant 1 : i32
    %1 = arith.subi %0, %c1_i32 : i32
    %c0_i32 = arith.constant 0 : i32
    %2 = arith.maxsi %1, %c0_i32 : i32
    %c0_i32_0 = arith.constant 0 : i32
    %c0_i32_1 = arith.constant 0 : i32
    %c0_i32_2 = arith.constant 0 : i32
    return %arg0, %2, %c0_i32_0, %c0_i32_1 : i32, i32, i32, i32
  }
  func.func @transform_2(%arg0: i32, %arg1: i32) -> (i32, i32, i32, i32) {
    %c1_i32 = arith.constant 1 : i32
    %0 = arith.addi %arg1, %c1_i32 : i32
    %c2_i32 = arith.constant 2 : i32
    %1 = arith.muli %0, %c2_i32 : i32
    %c15_i32 = arith.constant 15 : i32
    %2 = arith.minsi %1, %c15_i32 : i32
    %c0_i32 = arith.constant 0 : i32
    %c0_i32_0 = arith.constant 0 : i32
    %c0_i32_1 = arith.constant 0 : i32
    return %arg0, %2, %c0_i32, %c0_i32_0 : i32, i32, i32, i32
  }
  func.func @transform_3(%arg0: i32, %arg1: i32) -> (i32, i32, i32, i32) {
    %c0_i32 = arith.constant 0 : i32
    %c0_i32_0 = arith.constant 0 : i32
    %c0_i32_1 = arith.constant 0 : i32
    %c0_i32_2 = arith.constant 0 : i32
    %c0_i32_3 = arith.constant 0 : i32
    return %c0_i32, %c0_i32_0, %c0_i32_1, %c0_i32_2 : i32, i32, i32, i32
  }
  func.func @transform_4(%arg0: i32, %arg1: i32) -> (i32, i32) {
    %c0_i32 = arith.constant 0 : i32
    %c0_i32_0 = arith.constant 0 : i32
    %c0_i32_1 = arith.constant 0 : i32
    return %c0_i32, %c0_i32_0 : i32, i32
  }
  func.func @transform_5(%arg0: i32, %arg1: i32) -> (i32, i32, i32, i32) {
    %c0_i32 = arith.constant 0 : i32
    %c0_i32_0 = arith.constant 0 : i32
    %c0_i32_1 = arith.constant 0 : i32
    return %arg0, %arg1, %c0_i32, %c0_i32_0 : i32, i32, i32, i32
  }
  func.func @transform_6(%arg0: i32, %arg1: i32) -> (i32, i32, i32, i32) {
    %c0_i32 = arith.constant 0 : i32
    %c0_i32_0 = arith.constant 0 : i32
    %c0_i32_1 = arith.constant 0 : i32
    return %arg0, %arg1, %c0_i32, %c0_i32_0 : i32, i32, i32, i32
  }
}

module attributes {stable_mosaic.version = 11 : i64} {
  func.func @_epilogue_kernel(%arg0: i32, %arg1: i32, %arg2: memref<1x32x128xbf16, #tpu.memory_space<vmem>>, %arg3: memref<1x128xf32, #tpu.memory_space<vmem>>, %arg4: memref<1x128xf32, #tpu.memory_space<vmem>>, %arg5: memref<1x32x128xbf16, #tpu.memory_space<vmem>>, %arg6: memref<1x128xf32, #tpu.memory_space<vmem>>, %arg7: memref<1x128xf32, #tpu.memory_space<vmem>>, %arg8: memref<1x32x128xf32, #tpu.memory_space<vmem>>) attributes {dimension_semantics = [#tpu.dimension_semantics<parallel>, #tpu.dimension_semantics<parallel>], iteration_bounds = array<i64: 2, 1>, scalar_prefetch = 0 : i64, scratch_operands = 0 : i64, tpu.core_type = #tpu.core_type<tc>, window_params = [{transform_indices = @transform_0, window_bounds = array<i64: 1, 32, 128>}, {pipeline_mode = #tpu.pipeline_mode<synchronous>, transform_indices = @transform_1, window_bounds = array<i64: 1, 128>}, {pipeline_mode = #tpu.pipeline_mode<synchronous>, transform_indices = @transform_2, window_bounds = array<i64: 1, 128>}, {transform_indices = @transform_3, window_bounds = array<i64: 1, 32, 128>}, {pipeline_mode = #tpu.pipeline_mode<synchronous>, transform_indices = @transform_4, window_bounds = array<i64: 1, 128>}, {pipeline_mode = #tpu.pipeline_mode<synchronous>, transform_indices = @transform_5, window_bounds = array<i64: 1, 128>}, {transform_indices = @transform_6, window_bounds = array<i64: 1, 32, 128>}]} {
    %c0 = arith.constant 0 : index
    %c0_0 = arith.constant 0 : index
    %c0_1 = arith.constant 0 : index
    %0 = vector.load %arg2[%c0, %c0_0, %c0_1] : memref<1x32x128xbf16, #tpu.memory_space<vmem>>, vector<1x32x128xbf16>
    %1 = vector.shape_cast %0 : vector<1x32x128xbf16> to vector<32x128xbf16>
    %2 = arith.extf %1 : vector<32x128xbf16> to vector<32x128xf32>
    %c0_2 = arith.constant 0 : index
    %c0_3 = arith.constant 0 : index
    %c0_4 = arith.constant 0 : index
    %3 = vector.load %arg5[%c0_2, %c0_3, %c0_4] : memref<1x32x128xbf16, #tpu.memory_space<vmem>>, vector<1x32x128xbf16>
    %4 = vector.shape_cast %3 : vector<1x32x128xbf16> to vector<32x128xbf16>
    %5 = arith.extf %4 : vector<32x128xbf16> to vector<32x128xf32>
    %c0_5 = arith.constant 0 : index
    %c0_6 = arith.constant 0 : index
    %6 = vector.load %arg3[%c0_5, %c0_6] : memref<1x128xf32, #tpu.memory_space<vmem>>, vector<1x128xf32>
    %7 = vector.shape_cast %6 : vector<1x128xf32> to vector<128xf32>
    %8 = vector.shape_cast %7 : vector<128xf32> to vector<1x128xf32>
    %9 = vector.broadcast %8 : vector<1x128xf32> to vector<32x128xf32>
    %10 = arith.mulf %2, %9 : vector<32x128xf32>
    %c0_7 = arith.constant 0 : index
    %c0_8 = arith.constant 0 : index
    %11 = vector.load %arg4[%c0_7, %c0_8] : memref<1x128xf32, #tpu.memory_space<vmem>>, vector<1x128xf32>
    %12 = vector.shape_cast %11 : vector<1x128xf32> to vector<128xf32>
    %13 = vector.shape_cast %12 : vector<128xf32> to vector<1x128xf32>
    %14 = vector.broadcast %13 : vector<1x128xf32> to vector<32x128xf32>
    %15 = arith.addf %10, %14 : vector<32x128xf32>
    %c0_9 = arith.constant 0 : index
    %c0_10 = arith.constant 0 : index
    %16 = vector.load %arg6[%c0_9, %c0_10] : memref<1x128xf32, #tpu.memory_space<vmem>>, vector<1x128xf32>
    %17 = vector.shape_cast %16 : vector<1x128xf32> to vector<128xf32>
    %18 = vector.shape_cast %17 : vector<128xf32> to vector<1x128xf32>
    %19 = vector.broadcast %18 : vector<1x128xf32> to vector<32x128xf32>
    %20 = arith.mulf %5, %19 : vector<32x128xf32>
    %c0_11 = arith.constant 0 : index
    %c0_12 = arith.constant 0 : index
    %21 = vector.load %arg7[%c0_11, %c0_12] : memref<1x128xf32, #tpu.memory_space<vmem>>, vector<1x128xf32>
    %22 = vector.shape_cast %21 : vector<1x128xf32> to vector<128xf32>
    %23 = vector.shape_cast %22 : vector<128xf32> to vector<1x128xf32>
    %24 = vector.broadcast %23 : vector<1x128xf32> to vector<32x128xf32>
    %25 = arith.addf %20, %24 : vector<32x128xf32>
    %26 = arith.addf %15, %25 : vector<32x128xf32>
    %cst = arith.constant 0.000000e+00 : f32
    %27 = vector.broadcast %cst : f32 to vector<32x128xf32>
    %28 = arith.maximumf %26, %27 : vector<32x128xf32>
    %c0_13 = arith.constant 0 : index
    %c0_14 = arith.constant 0 : index
    %c0_15 = arith.constant 0 : index
    %29 = vector.load %arg8[%c0_13, %c0_14, %c0_15] : memref<1x32x128xf32, #tpu.memory_space<vmem>>, vector<1x32x128xf32>
    %30 = vector.shape_cast %29 : vector<1x32x128xf32> to vector<32x128xf32>
    %31 = vector.shape_cast %28 : vector<32x128xf32> to vector<1x32x128xf32>
    tpu.vector_store %arg8[%c0_13, %c0_14, %c0_15], %31 {strides = array<i32>} : memref<1x32x128xf32, #tpu.memory_space<vmem>>, vector<1x32x128xf32>,
    return
  }
  func.func @transform_0(%arg0: i32, %arg1: i32) -> (i32, i32, i32) {
    %c0_i32 = arith.constant 0 : i32
    %c0_i32_0 = arith.constant 0 : i32
    return %arg0, %arg1, %c0_i32 : i32, i32, i32
  }
  func.func @transform_1(%arg0: i32, %arg1: i32) -> (i32, i32) {
    %c0_i32 = arith.constant 0 : i32
    %c0_i32_0 = arith.constant 0 : i32
    %c0_i32_1 = arith.constant 0 : i32
    return %c0_i32, %c0_i32_0 : i32, i32
  }
  func.func @transform_2(%arg0: i32, %arg1: i32) -> (i32, i32) {
    %c0_i32 = arith.constant 0 : i32
    %c0_i32_0 = arith.constant 0 : i32
    %c0_i32_1 = arith.constant 0 : i32
    return %c0_i32, %c0_i32_0 : i32, i32
  }
  func.func @transform_3(%arg0: i32, %arg1: i32) -> (i32, i32, i32) {
    %c0_i32 = arith.constant 0 : i32
    %c0_i32_0 = arith.constant 0 : i32
    return %arg0, %arg1, %c0_i32 : i32, i32, i32
  }
  func.func @transform_4(%arg0: i32, %arg1: i32) -> (i32, i32) {
    %c0_i32 = arith.constant 0 : i32
    %c0_i32_0 = arith.constant 0 : i32
    %c0_i32_1 = arith.constant 0 : i32
    return %c0_i32, %c0_i32_0 : i32, i32
  }
  func.func @transform_5(%arg0: i32, %arg1: i32) -> (i32, i32) {
    %c0_i32 = arith.constant 0 : i32
    %c0_i32_0 = arith.constant 0 : i32
    %c0_i32_1 = arith.constant 0 : i32
    return %c0_i32, %c0_i32_0 : i32, i32
  }
  func.func @transform_6(%arg0: i32, %arg1: i32) -> (i32, i32, i32) {
    %c0_i32 = arith.constant 0 : i32
    %c0_i32_0 = arith.constant 0 : i32
    return %arg0, %arg1, %c0_i32 : i32, i32, i32
  }
}

</mosaic_0001>

<bundles_post_ra>
// kernel: tile.23
= control target key start
LH: loop header
LB: loop body
LE: loop exit
PB: predicated region body
PF: predicated region fallthrough
CT: control target
= control target key end

     0   :  { %s40_s0 = inlined_call_operand.vmem [shape: f32[4], index: 0, kind: input, shape index: {}]   ;;  %s41_s1 = inlined_call_operand.vmem [shape: f32[32,4], index: 1, kind: output, shape index: {}]  }
   0x1   :  { %v4_v0 = vld [vmem:[%s40_s0] ss:$0 sm:$0xff] }
   0x2   :  { %5 = vst [vmem:[%s41_s1] sm:$0xff] %v4_v0  ;;  %12 = vst [vmem:[%s41_s1 + $0x8] sm:$0xff] %v4_v0 }
   0x3   :  { %13 = vst [vmem:[%s41_s1 + $0x10] sm:$0xff] %v4_v0  ;;  %14 = vst [vmem:[%s41_s1 + $0x18] sm:$0xff] %v4_v0 }

// kernel: tile.24
= control target key start
LH: loop header
LB: loop body
LE: loop exit
PB: predicated region body
PF: predicated region fallthrough
CT: control target
= control target key end

     0   :  { %s261_s10 = smov 124   ;;  %s262_s11 = smov 116   ;;  %vm3_vm0 = vcmask 31744   ;;  %vm9_vm1 = vcmask 1048544   ;;  %vm15_vm2 = vcmask 1015744   ;;  %vm21_vm3 = vcmask 982944   ;;  %s401_s0 = inlined_call_operand.vmem [shape: f32[32,4], index: 0, kind: input, shape index: {}]   ;;  %s402_s1 = inlined_call_operand.vmem [shape: f32[1,128], index: 1, kind: output, shape index: {}]  }
   0x1   :  { %v199_v0 = vld [vmem:[%s401_s0 + $0x1f] sm:$0x1]   ;;  %v201_v1 = vld [vmem:[%s401_s0 + $0x1d] sm:$0x1]   ;;  %v200_v2 = vld [vmem:[%s401_s0 + $0x1e] sm:$0x1]  }
   0x2   :  { %7 = vrot.lane.b32.xlu0 %v199_v0, %s261_s10  ;;  %19 = vrot.lane.b32.xlu1 %v201_v1, %s262_s11  ;;  %v202_v3 = vld [vmem:[%s401_s0 + $0x1c] sm:$0x1]   ;;  %s263_s16 = smov 120   ;;  %s264_s17 = smov 112   ;;  %v203_v4 = vld [vmem:[%s401_s0 + $0x1b] sm:$0x1]  }
   0x3   :  { %v204_v5 = vld [vmem:[%s401_s0 + $0x1a] sm:$0x1]   ;;  %s265_s22 = smov 108   ;;  %s266_s23 = smov 104   ;;  %v205_v6 = vld [vmem:[%s401_s0 + $0x19] sm:$0x1]  }
   0x4   :  { %v206_v7 = vld [vmem:[%s401_s0 + $0x18] sm:$0x1]   ;;  %s267_s28 = smov 100   ;;  %s268_s29 = smov 96   ;;  %v207_v8 = vld [vmem:[%s401_s0 + $0x17] sm:$0x1]  }
   0x5   :  { %v208_v9 = vld [vmem:[%s401_s0 + $0x16] sm:$0x1]   ;;  %v2_v10 = vld [vmem:[%s401_s0] sm:$0x1]   ;;  %s269_s7 = smov 92   ;;  %s270_s8 = smov 88  }
   0x6   :  { %13 = vrot.lane.b32.xlu0 %v200_v2, %s263_s16  ;;  %25 = vrot.lane.b32.xlu1 %v202_v3, %s264_s17  ;;  %4 = vst.msk [vmem:[#allocation0] sm:$0x1] %vm3_vm0, %v2_v10   ;;  %v209_v11 = vld [vmem:[%s401_s0 + $0x15] sm:$0x1]   ;;  %v210_v12 = vld [vmem:[%s401_s0 + $0x14] sm:$0x1]  }
   0x7   :  { %s271_s13 = smov 84   ;;  %s272_s14 = smov 80   ;;  %v211_v13 = vld [vmem:[%s401_s0 + $0x13] sm:$0x1]   ;;  %v212_v14 = vld [vmem:[%s401_s0 + $0x12] sm:$0x1]  }
   0x8   :  { %s273_s19 = smov 76   ;;  %s274_s20 = smov 72   ;;  %v213_v15 = vld [vmem:[%s401_s0 + $0x11] sm:$0x1]   ;;  %v214_v16 = vld [vmem:[%s401_s0 + $0x10] sm:$0x1]  }
   0x9   :  { %s275_s25 = smov 68   ;;  %s276_s26 = smov 64   ;;  %v215_v17 = vld [vmem:[%s401_s0 + $0xf] sm:$0x1]   ;;  %v216_v18 = vld [vmem:[%s401_s0 + $0xe] sm:$0x1]  }
   0xa   :  { %31 = vrot.lane.b32.xlu0 %v203_v4, %s265_s22  ;;  %37 = vrot.lane.b32.xlu1 %v204_v5, %s266_s23  ;;  %s277_s2 = smov 60   ;;  %s278_s3 = smov 56   ;;  %v217_v19 = vld [vmem:[%s401_s0 + $0xd] sm:$0x1]   ;;  %v218_v20 = vld [vmem:[%s401_s0 + $0xc] sm:$0x1]  }
   0xb   :  { %s280_s9 = smov 48   ;;  %v219_v21 = vld [vmem:[%s401_s0 + $0xb] sm:$0x1]   ;;  %v220_v22 = vld [vmem:[%s401_s0 + $0xa] sm:$0x1]   ;;  %s282_s15 = smov 40  }
   0xc   :  { %v221_v23 = vld [vmem:[%s401_s0 + $0x9] sm:$0x1]   ;;  %v222_v24 = vld [vmem:[%s401_s0 + $0x8] sm:$0x1]   ;;  %s284_s21 = smov 32   ;;  %s286_s27 = smov 24  }
   0xd   :  { %v223_v25 = vld [vmem:[%s401_s0 + $0x7] sm:$0x1]   ;;  %v224_v26 = vld [vmem:[%s401_s0 + $0x6] sm:$0x1]   ;;  %v225_v27 = vld [vmem:[%s401_s0 + $0x5] sm:$0x1]  }
   0xe   :  { %43 = vrot.lane.b32.xlu0 %v205_v6, %s267_s28  ;;  %49 = vrot.lane.b32.xlu1 %v206_v7, %s268_s29  ;;  %v226_v28 = vld [vmem:[%s401_s0 + $0x4] sm:$0x1]   ;;  %s288_s4 = smov 16   ;;  %v227_v29 = vld [vmem:[%s401_s0 + $0x3] sm:$0x1]   ;;  %s290_s10 = smov 8  }
   0xf   :  { %v228_v30 = vld [vmem:[%s401_s0 + $0x2] sm:$0x1]   ;;  %v229_v31 = vld [vmem:[%s401_s0 + $0x1] sm:$0x1]   ;;  %s291_s0 = smov 4   ;;  %vm27_vm4 = vcmask 950144  }
  0x10   :  { %vm33_vm5 = vcmask 917344   ;;  %vm39_vm6 = vcmask 884544   ;;  %vm45_vm7 = vcmask 851744   ;;  %vm51_vm8 = vcmask 818944  }
  0x11   :  { %vm57_vm9 = vcmask 786144   ;;  %vm63_vm10 = vcmask 753344   ;;  %vm69_vm11 = vcmask 720544   ;;  %vm75_vm12 = vcmask 687744  }
  0x12   :  { %55 = vrot.lane.b32.xlu0 %v207_v8, %s269_s7  ;;  %61 = vrot.lane.b32.xlu1 %v208_v9, %s270_s8  ;;  %s279_s8 = smov 52   ;;  %vm81_vm13 = vcmask 654944   ;;  %vm87_vm14 = vcmask 622144   ;;  %vm93_vm15 = vcmask 589344   ;;  %vm99_vm0 = vcmask 556544  }
  0x16   :  { %67 = vrot.lane.b32.xlu0 %v209_v11, %s271_s13  ;;  %73 = vrot.lane.b32.xlu1 %v210_v12, %s272_s14  ;;  %s281_s14 = smov 44  }
  0x1a   :  { %79 = vrot.lane.b32.xlu0 %v211_v13, %s273_s19  ;;  %85 = vrot.lane.b32.xlu1 %v212_v14, %s274_s20  ;;  %s283_s20 = smov 36  }
  0x1e   :  { %91 = vrot.lane.b32.xlu0 %v213_v15, %s275_s25  ;;  %97 = vrot.lane.b32.xlu1 %v214_v16, %s276_s26  ;;  %s285_s26 = smov 28  }
  0x22   :  { %103 = vrot.lane.b32.xlu0 %v215_v17, %s277_s2  ;;  %109 = vrot.lane.b32.xlu1 %v216_v18, %s278_s3  ;;  %s287_s3 = smov 20  }
  0x26   :  { %115 = vrot.lane.b32.xlu0 %v217_v19, %s279_s8  ;;  %121 = vrot.lane.b32.xlu1 %v218_v20, %s280_s9  ;;  %s289_s9 = smov 12  }
  0x2a   :  { %127 = vrot.lane.b32.xlu0 %v219_v21, %s281_s14  ;;  %133 = vrot.lane.b32.xlu1 %v220_v22, %s282_s15 }
  0x2e   :  { %139 = vrot.lane.b32.xlu0 %v221_v23, %s283_s20  ;;  %145 = vrot.lane.b32.xlu1 %v222_v24, %s284_s21 }
  0x32   :  { %151 = vrot.lane.b32.xlu0 %v223_v25, %s285_s26  ;;  %157 = vrot.lane.b32.xlu1 %v224_v26, %s286_s27 }
  0x36   :  { %163 = vrot.lane.b32.xlu0 %v225_v27, %s287_s3  ;;  %169 = vrot.lane.b32.xlu1 %v226_v28, %s288_s4 }
  0x3a   :  { %175 = vrot.lane.b32.xlu0 %v227_v29, %s289_s9  ;;  %181 = vrot.lane.b32.xlu1 %v228_v30, %s290_s10 }
  0x3e   :  { %187 = vrot.lane.b32.xlu0 %v229_v31, %s291_s0 }
  0x74   :  { %v8_v32 = vpop.permute.xlu0 %7   ;;  %v20_v33 = vpop.permute.xlu1 %19  }
  0x75   :  { %10 = vst.msk [vmem:[#allocation0] sm:$0x1] %vm9_vm1, %v8_v32   ;;  %vm105_vm1 = vcmask 523744  }
  0x78   :  { %v14_v34 = vpop.permute.xlu0 %13   ;;  %v26_v35 = vpop.permute.xlu1 %25  }
  0x79   :  { %16 = vst.msk [vmem:[#allocation0] sm:$0x1] %vm15_vm2, %v14_v34   ;;  %vm111_vm2 = vcmask 490944  }
  0x7a   :  { %22 = vst.msk [vmem:[#allocation0] sm:$0x1] %vm21_vm3, %v20_v33   ;;  %vm117_vm3 = vcmask 458144  }
  0x7b   :  { %28 = vst.msk [vmem:[#allocation0] sm:$0x1] %vm27_vm4, %v26_v35   ;;  %vm123_vm4 = vcmask 425344  }
  0x7c   :  { %v32_v36 = vpop.permute.xlu0 %31   ;;  %v38_v37 = vpop.permute.xlu1 %37  }
  0x7d   :  { %34 = vst.msk [vmem:[#allocation0] sm:$0x1] %vm33_vm5, %v32_v36   ;;  %vm129_vm5 = vcmask 392544  }
  0x7e   :  { %40 = vst.msk [vmem:[#allocation0] sm:$0x1] %vm39_vm6, %v38_v37   ;;  %vm135_vm6 = vcmask 359744  }
  0x80   :  { %v44_v38 = vpop.permute.xlu0 %43   ;;  %v50_v39 = vpop.permute.xlu1 %49  }
  0x81   :  { %46 = vst.msk [vmem:[#allocation0] sm:$0x1] %vm45_vm7, %v44_v38   ;;  %vm141_vm7 = vcmask 326944  }
  0x82   :  { %52 = vst.msk [vmem:[#allocation0] sm:$0x1] %vm51_vm8, %v50_v39   ;;  %vm147_vm8 = vcmask 294144  }
  0x84   :  { %v56_v40 = vpop.permute.xlu0 %55   ;;  %v62_v41 = vpop.permute.xlu1 %61  }
  0x85   :  { %58 = vst.msk [vmem:[#allocation0] sm:$0x1] %vm57_vm9, %v56_v40   ;;  %vm153_vm9 = vcmask 261344  }
  0x86   :  { %64 = vst.msk [vmem:[#allocation0] sm:$0x1] %vm63_vm10, %v62_v41   ;;  %vm159_vm10 = vcmask 228544  }
  0x88   :  { %v68_v42 = vpop.permute.xlu0 %67   ;;  %v74_v43 = vpop.permute.xlu1 %73  }
  0x89   :  { %70 = vst.msk [vmem:[#allocation0] sm:$0x1] %vm69_vm11, %v68_v42   ;;  %vm165_vm11 = vcmask 195744  }
  0x8a   :  { %76 = vst.msk [vmem:[#allocation0] sm:$0x1] %vm75_vm12, %v74_v43   ;;  %vm171_vm12 = vcmask 162944  }
  0x8c   :  { %v80_v44 = vpop.permute.xlu0 %79   ;;  %v86_v45 = vpop.permute.xlu1 %85  }
  0x8d   :  { %82 = vst.msk [vmem:[#allocation0] sm:$0x1] %vm81_vm13, %v80_v44   ;;  %vm177_vm13 = vcmask 130144  }
  0x8e   :  { %88 = vst.msk [vmem:[#allocation0] sm:$0x1] %vm87_vm14, %v86_v45   ;;  %vm183_vm14 = vcmask 97344  }
  0x90   :  { %v92_v46 = vpop.permute.xlu0 %91   ;;  %v98_v47 = vpop.permute.xlu1 %97  }
  0x91   :  { %94 = vst.msk [vmem:[#allocation0] sm:$0x1] %vm93_vm15, %v92_v46   ;;  %vm189_vm15 = vcmask 64544  }
  0x92   :  { %100 = vst.msk [vmem:[#allocation0] sm:$0x1] %vm99_vm0, %v98_v47  }
  0x94   :  { %v104_v48 = vpop.permute.xlu0 %103   ;;  %v110_v49 = vpop.permute.xlu1 %109  }
  0x95   :  { %106 = vst.msk [vmem:[#allocation0] sm:$0x1] %vm105_vm1, %v104_v48  }
  0x96   :  { %112 = vst.msk [vmem:[#allocation0] sm:$0x1] %vm111_vm2, %v110_v49  }
  0x98   :  { %v116_v50 = vpop.permute.xlu0 %115   ;;  %v122_v51 = vpop.permute.xlu1 %121  }
  0x99   :  { %118 = vst.msk [vmem:[#allocation0] sm:$0x1] %vm117_vm3, %v116_v50  }
  0x9a   :  { %124 = vst.msk [vmem:[#allocation0] sm:$0x1] %vm123_vm4, %v122_v51  }
  0x9c   :  { %v128_v52 = vpop.permute.xlu0 %127   ;;  %v134_v53 = vpop.permute.xlu1 %133  }
  0x9d   :  { %130 = vst.msk [vmem:[#allocation0] sm:$0x1] %vm129_vm5, %v128_v52  }
  0x9e   :  { %136 = vst.msk [vmem:[#allocation0] sm:$0x1] %vm135_vm6, %v134_v53  }
  0xa0   :  { %v140_v54 = vpop.permute.xlu0 %139   ;;  %v146_v55 = vpop.permute.xlu1 %145  }
  0xa1   :  { %142 = vst.msk [vmem:[#allocation0] sm:$0x1] %vm141_vm7, %v140_v54  }
  0xa2   :  { %148 = vst.msk [vmem:[#allocation0] sm:$0x1] %vm147_vm8, %v146_v55  }
  0xa4   :  { %v152_v56 = vpop.permute.xlu0 %151   ;;  %v158_v57 = vpop.permute.xlu1 %157  }
  0xa5   :  { %154 = vst.msk [vmem:[#allocation0] sm:$0x1] %vm153_vm9, %v152_v56  }
  0xa6   :  { %160 = vst.msk [vmem:[#allocation0] sm:$0x1] %vm159_vm10, %v158_v57  }
  0xa8   :  { %v164_v58 = vpop.permute.xlu0 %163   ;;  %v170_v59 = vpop.permute.xlu1 %169  }
  0xa9   :  { %166 = vst.msk [vmem:[#allocation0] sm:$0x1] %vm165_vm11, %v164_v58  }
  0xaa   :  { %172 = vst.msk [vmem:[#allocation0] sm:$0x1] %vm171_vm12, %v170_v59  }
  0xac   :  { %v176_v60 = vpop.permute.xlu0 %175   ;;  %v182_v61 = vpop.permute.xlu1 %181  }
  0xad   :  { %178 = vst.msk [vmem:[#allocation0] sm:$0x1] %vm177_vm13, %v176_v60  }
  0xae   :  { %184 = vst.msk [vmem:[#allocation0] sm:$0x1] %vm183_vm14, %v182_v61  }
  0xb0   :  { %v188_v62 = vpop.permute.xlu0 %187  }
  0xb1   :  { %190 = vst.msk [vmem:[#allocation0] sm:$0x1] %vm189_vm15, %v188_v62  }
  0xb8   :  { %v195_v63 = vld [vmem:[#allocation0] sm:$0x1] }
  0xb9   :  { %198 = vst [vmem:[%s402_s1] sm:$0x1] %v195_v63 }

// kernel: basic_block_dec.4
= control target key start
LH: loop header
LB: loop body
LE: loop exit
PB: predicated region body
PF: predicated region fallthrough
CT: control target
= control target key end

     0   :  { %s2898_s21 = smov 0   ;;  %s2900_s22 = smov 0   ;;  %s3612_s0 = inlined_call_operand.vmem [shape: f32[2,16,16,8], index: 0, kind: input, shape index: {}, may-alias: {0,1,2}]   ;;  %s3613_s1 = inlined_call_operand.vmem [shape: f32[2,16,16,8], index: 1, kind: input, shape index: {}, may-alias: {0,1,2}]   ;;  %s3614_s2 = inlined_call_operand.vmem [shape: f32[2,16,16,8], index: 2, kind: input, shape index: {}, may-alias: {0,1,2}]   ;;  %s3615_s3 = inlined_call_operand.vmem [shape: bf16[3,3,8,8], index: 3, kind: input, shape index: {}]   ;;  %s3616_s4 = inlined_call_operand.vmem [shape: f32[1,8], index: 4, kind: input, shape index: {}]   ;;  %s3617_s5 = inlined_call_operand.vmem [shape: bf16[2,16,16,8], index: 5, kind: output, shape index: {0}]   ;;  %s3618_s6 = inlined_call_operand.vmem [shape: f32[2,2,2,8], index: 6, kind: output, shape index: {1}]  }
   0x1   :  { %s2902_s23 = smov 0   ;;  %s2904_s24 = smov 0  }
   0x2   :  { %s2906_s25 = smov 0  }
   0x3 LB: > { %s26_s26 = sadd.s32 1, %s2852_s23  ;;  %s29_s27 = sadd.s32 1, %s2856_s24  ;;  %s2860_s25 = sphi %s2906_s25, %s17_s25   ;;  %s2856_s24 = sphi %s2904_s24, %s3663_s24   ;;  %s2852_s23 = sphi %s2902_s23, %s3662_s23   ;;  %s2848_s22 = sphi %s2900_s22, %s3661_s22   ;;  %s2844_s21 = sphi %s2898_s21, %s3660_s21  }
   0x4   : > { %p27_p0 = scmp.ge.s32.totalorder %s26_s26, 2  ;;  %p2375_p1 = scmp.ge.s32.totalorder %s2860_s25, 1 }
   0x5   : > { %p303_p2 = scmp.lt.s32.totalorder %s2860_s25, 5 }
   0x6   : > { %s3665_s26 = smov (%p27_p0, %s26_s26), 0  ;;  %s3667_s27 = smov (!%p27_p0, %s29_s27), %s2856_s24 }
   0x7   : > { %p304_p3 = pnand %p2375_p1, %p303_p2  ;;  %p31_p4 = scmp.ge.s32.totalorder %s3667_s27, 2 }
   0x9   : > { %s3669_s27 = smov (%p31_p4, %s3667_s27), 0  ;;  %307 = sbr.rel (%p304_p3) target bundleno = 408 (0x198), region = 40 }
   0xe   : > { %v2403_v0 = vld [vmem:[%s3615_s3 + $0x4] sm:$0xf]  ;;  %vm593_vm0 = vcmask 1043456   ;;  %s2934_s30 = sshll.u32 %s2844_s21, 3  ;;  %p378_p5 = scmp.lt.s32.totalorder %s2848_s22, 1  ;;  %vm474_vm1 = vcmask 57344  }
   0xf   : > { %2772 = vmatprep.subr.msk.bf16.mxu1 %vm593_vm0, %v2403_v0  ;;  %v595_v1 = vsel %vm593_vm0, %v2403_v0, 0  ;;  %p380_p6 = scmp.lt.s32.totalorder %s2934_s30, 15  ;;  %2771 = vmatprep.subr.msk.bf16.mxu0 %vm593_vm0, %v2403_v0  ;;  %v2943_v2 = vld [vmem:[%s3615_s3] sm:$0xf]  ;;  %s2946_s9 = sadd.s32 4294967295, %s2934_s30  ;;  %v2862_v4 = vmov 0.0  }
  0x10   : > { %2770 = vmatpush3.bf16.msra.mxu1 %v595_v1  ;;  %s3671_s22 = smov (!%p378_p5, %s2848_s22), 1  ;;  %2608 = vmatpush3.bf16.msra.mxu0 %v595_v1  ;;  %v2953_v3 = vld [vmem:[%s3615_s3 + $0x8] sm:$0xf]  ;;  %475 = vst.msk [vmem:[#allocation2] sm:$0x1] %vm474_vm1, %v2862_v4  ;;  %p390_p7 = scmp.gt.s32.totalorder %s2946_s9, 0 }
  0x11   : > { %s381_s12 = scalar_select %p380_p6, %s2934_s30, 15  ;;  %2773 = vmatprep.subr.msk.bf16.mxu1 %vm593_vm0, %v2943_v2  ;;  %2774 = vmatprep.subr.msk.bf16.mxu0 %vm593_vm0, %v2953_v3  ;;  %476 = vst.msk [vmem:[#allocation2 + $0x18] sm:$0x1] %vm474_vm1, %v2862_v4  ;;  %477 = vst.msk [vmem:[#allocation2 + $0x30] sm:$0x1] %vm474_vm1, %v2862_v4  ;;  %vm495_vm2 = vcmask 64512  }
  0x12   : > { %478 = vst.msk [vmem:[#allocation2 + $0x48] sm:$0x1] %vm474_vm1, %v2862_v4  ;;  %479 = vst.msk [vmem:[#allocation2 + $0x60] sm:$0x1] %vm474_vm1, %v2862_v4  ;;  %s2981_s13 = sshll.u32 %s3671_s22, 5  ;;  %p462_p8 = scmp.gt.s32.totalorder %s2844_s21, 0 }
  0x13   : > { %480 = vst.msk [vmem:[#allocation2 + $0x78] sm:$0x1] %vm474_vm1, %v2862_v4  ;;  %481 = vst.msk [vmem:[#allocation2 + $0x90] sm:$0x1] %vm474_vm1, %v2862_v4  ;;  %s2377_s14 = sshll.u32 %s381_s12, 1  ;;  %p2382_p9 = scmp.lt.s32.totalorder %s2946_s9, 15 }
  0x14   : > { %482 = vst.msk [vmem:[#allocation2 + $0xa8] sm:$0x1] %vm474_vm1, %v2862_v4  ;;  %483 = vst.msk [vmem:[#allocation2 + $0xc0] sm:$0x1] %vm474_vm1, %v2862_v4  ;;  %s2985_s15 = sadd.s32 %s2981_s13, %s2377_s14  ;;  %s2509_s20 = sadd.s32 8, %s2934_s30  ;;  %v719_v30 = vsel %vm593_vm0, %v2943_v2, 0 }
  0x15   : > { %484 = vst.msk [vmem:[#allocation2 + $0xd8] sm:$0x1] %vm474_vm1, %v2862_v4  ;;  %485 = vst.msk [vmem:[#allocation2 + $0x11] sm:$0x1] %vm474_vm1, %v2862_v4  ;;  %s2379_s16 = sshll.u32 %s2985_s15, 3  ;;  %p3033_p10 = scmp.lt.s32.totalorder %s2509_s20, 15 }
  0x16   : > { %486 = vst.msk [vmem:[#allocation2 + $0x29] sm:$0x1] %vm474_vm1, %v2862_v4  ;;  %487 = vst.msk [vmem:[#allocation2 + $0x41] sm:$0x1] %vm474_vm1, %v2862_v4  ;;  %s2993_s19 = scalar_lea.vmem %s3612_s0, %s2379_s16  ;;  %v2429_v35 = vld [vmem:[%s3615_s3 + $0xc] sm:$0xf] }
  0x17   : > { %488 = vst.msk [vmem:[#allocation2 + $0x59] sm:$0x1] %vm474_vm1, %v2862_v4  ;;  %489 = vst.msk [vmem:[#allocation2 + $0x71] sm:$0x1] %vm474_vm1, %v2862_v4  ;;  %v448_v5 = vld [vmem:[%s2993_s19 + $0x30] sm:$0xff]  ;;  %v449_v6 = vld [vmem:[%s2993_s19 + $0x38] sm:$0xff] }
  0x18   : > { %490 = vst.msk [vmem:[#allocation2 + $0x89] sm:$0x1] %vm474_vm1, %v2862_v4  ;;  %491 = vst.msk [vmem:[#allocation2 + $0xa1] sm:$0x1] %vm474_vm1, %v2862_v4  ;;  %v450_v7 = vld [vmem:[%s2993_s19 + $0x40] sm:$0xff]  ;;  %s391_s28 = scalar_select %p390_p7, %s2946_s9, 0 }
  0x19   : > { %492 = vst.msk [vmem:[#allocation2 + $0xb9] sm:$0x1] %vm474_vm1, %v2862_v4  ;;  %493 = vst.msk [vmem:[#allocation2 + $0xd1] sm:$0x1] %vm474_vm1, %v2862_v4  ;;  %v451_v8 = vld [vmem:[%s2993_s19 + $0x48] sm:$0xff]  ;;  %v442_v9 = vld [vmem:[%s2993_s19] sm:$0xff] }
  0x1a   : > { %494 = vst.msk [vmem:[#allocation2 + $0xe9] sm:$0x1] %vm474_vm1, %v2862_v4  ;;  %s3006_s29 = scalar_select %p462_p8, 1, 0  ;;  %v443_v10 = vld [vmem:[%s2993_s19 + $0x8] sm:$0xff]  ;;  %v452_v11 = vld [vmem:[%s2993_s19 + $0x50] sm:$0xff] }
  0x1b   : > { %505 = vst.msk [vmem:[#allocation2 + $0x61] sm:$0xff] %vm495_vm2, %v448_v5  ;;  %506 = vst.msk [vmem:[#allocation2 + $0x69] sm:$0xff] %vm495_vm2, %v449_v6  ;;  %s3673_s28 = smov (!%p2382_p9, %s391_s28), 15  ;;  %v453_v12 = vld [vmem:[%s2993_s19 + $0x58] sm:$0xff]  ;;  %v454_v13 = vld [vmem:[%s2993_s19 + $0x60] sm:$0xff]  ;;  %s3675_s20 = smov (!%p3033_p10, %s2509_s20), 15 }
  0x1c   : > { %507 = vst.msk [vmem:[#allocation2 + $0x79] sm:$0xff] %vm495_vm2, %v450_v7  ;;  %508 = vst.msk [vmem:[#allocation2 + $0x81] sm:$0xff] %vm495_vm2, %v451_v8  ;;  %s464_s7 = scvt.s32.f32 %s3006_s29  ;;  %v455_v14 = vld [vmem:[%s2993_s19 + $0x68] sm:$0xff]  ;;  %v444_v15 = vld [vmem:[%s2993_s19 + $0x10] sm:$0xff]  ;;  %s2387_s8 = sshll.u32 %s3673_s28, 1  ;;  %v869_v51 = vsel %vm593_vm0, %v2953_v3, 0 }
  0x1d   : > { %499 = vst.msk [vmem:[#allocation2 + $0x19] sm:$0xff] %vm495_vm2, %v442_v9  ;;  %500 = vst.msk [vmem:[#allocation2 + $0x21] sm:$0xff] %vm495_vm2, %v443_v10  ;;  %v445_v16 = vld [vmem:[%s2993_s19 + $0x18] sm:$0xff]  ;;  %v446_v17 = vld [vmem:[%s2993_s19 + $0x20] sm:$0xff]  ;;  %s398_s10 = sadd.s32 %s2387_s8, %s2981_s13  ;;  %s3677_s20 = smov (!%p3033_p10, %s3675_s20), 15  ;;  %v1035_v1 = vsel %vm593_vm0, %v2429_v35, 0 }
  0x1e   : > { %509 = vst.msk [vmem:[#allocation2 + $0x91] sm:$0xff] %vm495_vm2, %v452_v11  ;;  %510 = vst.msk [vmem:[#allocation2 + $0x99] sm:$0xff] %vm495_vm2, %v453_v12  ;;  %v447_v18 = vld [vmem:[%s2993_s19 + $0x28] sm:$0xff]  ;;  %v456_v19 = vld [vmem:[%s2993_s19 + $0x70] sm:$0xff]  ;;  %s2389_s11 = sshll.u32 %s398_s10, 3  ;;  %v465_v21 = vstv %s464_s7  ;;  %p435_p11 = scmp.lt.s32.totalorder %s2844_s21, 1 }
  0x1f   : > { %511 = vst.msk [vmem:[#allocation2 + $0xa9] sm:$0xff] %vm495_vm2, %v454_v13  ;;  %512 = vst.msk [vmem:[#allocation2 + $0xb1] sm:$0xff] %vm495_vm2, %v455_v14  ;;  %v457_v20 = vld [vmem:[%s2993_s19 + $0x78] sm:$0xff]  ;;  %s400_s16 = scalar_lea.vmem %s3613_s1, %s2389_s11  ;;  %s2394_s18 = sshll.u32 %s3677_s20, 1  ;;  %v2438_v55 = vld [vmem:[%s3615_s3 + $0x10] sm:$0xf] }
  0x20   : > { %501 = vst.msk [vmem:[#allocation2 + $0x31] sm:$0xff] %vm495_vm2, %v444_v15  ;;  %502 = vst.msk [vmem:[#allocation2 + $0x39] sm:$0xff] %vm495_vm2, %v445_v16  ;;  %v458_v27 = vld [vmem:[%s400_s16] sm:$0xff]  ;;  %v459_v28 = vld [vmem:[%s400_s16 + $0x8] sm:$0xff]  ;;  %s3077_s19 = scalar_select %p435_p11, 1, 0 }
  0x21   : > { %503 = vst.msk [vmem:[#allocation2 + $0x49] sm:$0xff] %vm495_vm2, %v446_v17  ;;  %504 = vst.msk [vmem:[#allocation2 + $0x51] sm:$0xff] %vm495_vm2, %v447_v18  ;;  %v466_v31 = vmul.f32 %v465_v21, %v458_v27  ;;  %v467_v32 = vmul.f32 %v465_v21, %v459_v28  ;;  %s415_s28 = sadd.s32 %s2394_s18, %s2981_s13  ;;  %v3112_v4 = vld [vmem:[%s3615_s3 + $0x14] sm:$0xf]  ;;  %v1201_v21 = vsel %vm593_vm0, %v2438_v55, 0  ;;  %vm2160_vm3 = vcmask 60416  }
  0x22   : > { %513 = vst.msk [vmem:[#allocation2 + $0xc1] sm:$0xff] %vm495_vm2, %v456_v19  ;;  %514 = vst.msk [vmem:[#allocation2 + $0xc9] sm:$0xff] %vm495_vm2, %v457_v20  ;;  %v551_v22 = vld [vmem:[#allocation2 + $0x61] sm:$0xff]  ;;  %v552_v23 = vld [vmem:[#allocation2 + $0x69] sm:$0xff]  ;;  %s2396_s20 = sshll.u32 %s415_s28, 3  ;;  %s470_s29 = scvt.s32.f32 %s3077_s19 }
  0x23   : > { %v553_v24 = vld [vmem:[#allocation2 + $0x79] sm:$0xff]  ;;  %v3050_v25 = vpack.c.bf16 %v552_v23, %v551_v22  ;;  %v554_v26 = vld [vmem:[#allocation2 + $0x81] sm:$0xff]  ;;  %496 = vst.msk [vmem:[#allocation2 + $0x1] sm:$0xff] %vm495_vm2, %v466_v31  ;;  %497 = vst.msk [vmem:[#allocation2 + $0x9] sm:$0xff] %vm495_vm2, %v467_v32  ;;  %s417_s10 = scalar_lea.vmem %s3614_s2, %s2396_s20  ;;  %s3679_s21 = smov (!%p435_p11, %s2844_s21), 1 }
  0x24   : > { %v3052_v29 = vpack.c.bf16 %v554_v26, %v553_v24  ;;  %v545_v39 = vld [vmem:[#allocation2 + $0x19] sm:$0xff]  ;;  %v546_v40 = vld [vmem:[#allocation2 + $0x21] sm:$0xff]  ;;  %v471_v61 = vstv %s470_s29  ;;  %s2400_s29 = sshll.u32 %s2985_s15, 2  ;;  %s2401_s8 = sshll.u32 %s3671_s22, 1 }
  0x25   : > { %v555_v33 = vld [vmem:[#allocation2 + $0x91] sm:$0xff]  ;;  %2617 = vmatprep.mubr.msk.bf16.mxu1 %vm495_vm2, %v3050_v25  ;;  %v556_v34 = vld [vmem:[#allocation2 + $0x99] sm:$0xff]  ;;  %v3080_v46 = vpack.c.bf16 %v546_v40, %v545_v39  ;;  %v461_v5 = vld [vmem:[%s417_s10 + $0x8] sm:$0xff]  ;;  %s3487_s7 = scalar_lea.vmem %s3617_s5, %s2400_s29  ;;  %s438_s9 = sadd.s32 %s2401_s8, %s3679_s21 }
  0x26   : > { %2618 = vmatmul.mubr.msk.bf16.vlgmr.msra.gmra.mxu1 %vm495_vm2, %v3052_v29  ;;  %v3067_v36 = vpack.c.bf16 %v556_v34, %v555_v33  ;;  %v557_v37 = vld [vmem:[#allocation2 + $0xa9] sm:$0xff]  ;;  %v558_v38 = vld [vmem:[#allocation2 + $0xb1] sm:$0xff]  ;;  %v521_v54 = vld [vmem:[#allocation2 + $0x20] sm:$0xff]  ;;  %v473_v8 = vmul.f32 %v471_v61, %v461_v5 }
  0x27   : > { %2626 = vmatpush3.bf16.msra.mxu1 %v719_v30  ;;  %v3073_v41 = vpack.c.bf16 %v558_v38, %v557_v37  ;;  %v547_v42 = vld [vmem:[#allocation2 + $0x31] sm:$0xff]  ;;  %v548_v43 = vld [vmem:[#allocation2 + $0x39] sm:$0xff]  ;;  %v527_v12 = vld [vmem:[#allocation2 + $0x68] sm:$0xff] }
  0x28   : > { %2621 = vmatprep.mubr.msk.bf16.mxu1 %vm495_vm2, %v3067_v36  ;;  %2775 = vmatprep.subr.msk.bf16.mxu1 %vm593_vm0, %v2429_v35  ;;  %v3084_v49 = vpack.c.bf16 %v548_v43, %v547_v42  ;;  %v520_v53 = vld [vmem:[#allocation2 + $0x18] sm:$0xff]  ;;  %v522_v56 = vld [vmem:[#allocation2 + $0x30] sm:$0xff]  ;;  %v460_v2 = vld [vmem:[%s417_s10] sm:$0xff]  ;;  %517 = vst.msk [vmem:[#allocation2 + $0xe1] sm:$0xff] %vm495_vm2, %v473_v8  ;;  %s2402_s10 = sshll.u32 %s438_s9, 1 }
  0x29   : > { %v523_v57 = vld [vmem:[#allocation2 + $0x38] sm:$0xff]  ;;  %v549_v58 = vld [vmem:[#allocation2 + $0x49] sm:$0xff]  ;;  %v3101_v60 = vpack.c.bf16 %v521_v54, %v520_v53  ;;  %v472_v6 = vmul.f32 %v471_v61, %v460_v2  ;;  %v526_v11 = vld [vmem:[#allocation2 + $0x60] sm:$0xff]  ;;  %s440_s14 = scalar_lea.vmem %s3618_s6, %s2402_s10 }
  0x2a   : > { %v543_v44 = vld [vmem:[#allocation2 + $0x1] sm:$0xff]  ;;  %v544_v45 = vld [vmem:[#allocation2 + $0x9] sm:$0xff]  ;;  %v550_v59 = vld [vmem:[#allocation2 + $0x51] sm:$0xff]  ;;  %v3104_v0 = vpack.c.bf16 %v523_v57, %v522_v56  ;;  %v3127_v18 = vpack.c.bf16 %v527_v12, %v526_v11 }
  0x2b   : > { %v518_v47 = vld [vmem:[#allocation2] sm:$0xff]  ;;  %v559_v48 = vpack.c.bf16 %v544_v45, %v543_v44  ;;  %v519_v50 = vld [vmem:[#allocation2 + $0x8] sm:$0xff]  ;;  %v3107_v3 = vpack.c.bf16 %v550_v59, %v549_v58  ;;  %v525_v10 = vld [vmem:[#allocation2 + $0x50] sm:$0xff]  ;;  %516 = vst.msk [vmem:[#allocation2 + $0xd9] sm:$0xff] %vm495_vm2, %v472_v6 }
  0x2c   : > { %v534_v52 = vpack.c.bf16 %v519_v50, %v518_v47  ;;  %v818_v62 = vld [vmem:[#allocation2 + $0x2] sm:$0xff]  ;;  %v819_v63 = vld [vmem:[#allocation2 + $0xa] sm:$0xff]  ;;  %v820_v13 = vld [vmem:[#allocation2 + $0x1a] sm:$0xff] }
  0x2d   : > { %2609 = vmatprep.mubr.msk.bf16.mxu0 %vm495_vm2, %v559_v48  ;;  %v834_v7 = vpack.c.bf16 %v819_v63, %v818_v62  ;;  %v524_v9 = vld [vmem:[#allocation2 + $0x48] sm:$0xff]  ;;  %v822_v16 = vld [vmem:[#allocation2 + $0x32] sm:$0xff]  ;;  %v823_v17 = vld [vmem:[#allocation2 + $0x3a] sm:$0xff] }
  0x2e   : > { %2622 = vmatmul.mubr.msk.bf16.gmra.mxu1 %vm495_vm2, %v3073_v41  ;;  %2610 = vmatmul.mubr.msk.bf16.vlgmr.msra.gmra.mxu0 %vm495_vm2, %v3080_v46  ;;  %v821_v14 = vld [vmem:[#allocation2 + $0x22] sm:$0xff]  ;;  %v3125_v15 = vpack.c.bf16 %v525_v10, %v524_v9  ;;  %v3133_v20 = vpack.c.bf16 %v823_v17, %v822_v16  ;;  %v528_v22 = vld [vmem:[#allocation2 + $0x78] sm:$0xff]  ;;  %v530_v24 = vld [vmem:[#allocation2 + $0x90] sm:$0xff] }
  0x2f   : > { %2627 = vmatprep.mubr.msk.bf16.mxu1 %vm495_vm2, %v534_v52  ;;  %2644 = vmatpush3.bf16.msra.mxu0 %v869_v51  ;;  %v3129_v19 = vpack.c.bf16 %v821_v14, %v820_v13  ;;  %v529_v23 = vld [vmem:[#allocation2 + $0x80] sm:$0xff]  ;;  %v531_v26 = vld [vmem:[#allocation2 + $0x98] sm:$0xff]  ;;  %v824_v28 = vld [vmem:[#allocation2 + $0x4a] sm:$0xff]  ;;  %v1367_v52 = vsel %vm593_vm0, %v3112_v4, 0 }
  0x30   : > { %2613 = vmatprep.mubr.msk.bf16.mxu0 %vm495_vm2, %v3084_v49  ;;  %2776 = vmatprep.subr.msk.bf16.mxu0 %vm593_vm0, %v2438_v55  ;;  %v2456_v27 = vld [vmem:[%s3615_s3 + $0x18] sm:$0xf]  ;;  %v3145_v31 = vpack.c.bf16 %v529_v23, %v528_v22  ;;  %v826_v32 = vld [vmem:[#allocation2 + $0x62] sm:$0xff]  ;;  %v827_v33 = vld [vmem:[#allocation2 + $0x6a] sm:$0xff]  ;;  %v3147_v34 = vpack.c.bf16 %v531_v26, %v530_v24 }
  0x31   : > { %v825_v30 = vld [vmem:[#allocation2 + $0x52] sm:$0xff]  ;;  %v3154_v37 = vpack.c.bf16 %v827_v33, %v826_v32  ;;  %v532_v38 = vld [vmem:[#allocation2 + $0xa8] sm:$0xff]  ;;  %v828_v40 = vld [vmem:[#allocation2 + $0x7a] sm:$0xff]  ;;  %v1534_v55 = vsel %vm593_vm0, %v2456_v27, 0 }
  0x32   : > { %v3150_v35 = vpack.c.bf16 %v825_v30, %v824_v28  ;;  %v533_v39 = vld [vmem:[#allocation2 + $0xb0] sm:$0xff]  ;;  %v829_v42 = vld [vmem:[#allocation2 + $0x82] sm:$0xff]  ;;  %v831_v45 = vld [vmem:[#allocation2 + $0x9a] sm:$0xff] }
  0x33   : > { %v3162_v43 = vpack.c.bf16 %v533_v39, %v532_v38  ;;  %v830_v44 = vld [vmem:[#allocation2 + $0x92] sm:$0xff]  ;;  %v3164_v47 = vpack.c.bf16 %v829_v42, %v828_v40  ;;  %v832_v50 = vld [vmem:[#allocation2 + $0xaa] sm:$0xff]  ;;  %v2465_v54 = vld [vmem:[%s3615_s3 + $0x1c] sm:$0xf] }
  0x34   : > { %v3168_v48 = vpack.c.bf16 %v831_v45, %v830_v44  ;;  %v833_v51 = vld [vmem:[#allocation2 + $0xb2] sm:$0xff]  ;;  %v2474_v56 = vld [vmem:[%s3615_s3 + $0x20] sm:$0xf]  ;;  %v999_v57 = vld [vmem:[#allocation2 + $0xc8] sm:$0xff]  ;;  %v1700_v61 = vsel %vm593_vm0, %v2465_v54, 0 }
  0x35   : > { %v3178_v53 = vpack.c.bf16 %v833_v51, %v832_v50  ;;  %v1164_v59 = vld [vmem:[#allocation2 + $0xc1] sm:$0xff]  ;;  %v1866_v63 = vsel %vm593_vm0, %v2474_v56, 0 }
  0x36   : > { %2628 = vmatmul.mubr.msk.bf16.vlgmr.msra.gmra.mxu1 %vm495_vm2, %v3101_v60  ;;  %2614 = vmatmul.mubr.msk.bf16.gmra.mxu0 %vm495_vm2, %v3107_v3  ;;  %v1498_v5 = vld [vmem:[#allocation2 + $0xe0] sm:$0xff] }
  0x37   : > { %2662 = vmatpush3.bf16.msra.mxu1 %v1035_v1  ;;  %2631 = vmatprep.mubr.msk.bf16.mxu1 %vm495_vm2, %v3104_v0  ;;  %v1331_v1 = vld [vmem:[#allocation2 + $0xca] sm:$0xff] }
  0x38   : > { %2777 = vmatprep.subr.msk.bf16.mxu1 %vm593_vm0, %v3112_v4  ;;  %2645 = vmatprep.mubr.msk.bf16.mxu0 %vm495_vm2, %v834_v7  ;;  %v1497_v4 = vld [vmem:[#allocation2 + $0xd8] sm:$0xff] }
  0x39   : > { %v1506_v6 = vpack.c.bf16 %v1498_v5, %v1497_v4 }
  0x3e   : > { %2632 = vmatmul.mubr.msk.bf16.gmra.mxu1 %vm495_vm2, %v3125_v15  ;;  %2646 = vmatmul.mubr.msk.bf16.vlgmr.msra.gmra.mxu0 %vm495_vm2, %v3129_v19 }
  0x3f   : > { %2635 = vmatprep.mubr.msk.bf16.mxu1 %vm495_vm2, %v3127_v18  ;;  %2680 = vmatpush3.bf16.msra.mxu0 %v1201_v21 }
  0x40   : > { %2649 = vmatprep.mubr.msk.bf16.mxu0 %vm495_vm2, %v3133_v20  ;;  %2778 = vmatprep.subr.msk.bf16.mxu0 %vm593_vm0, %v2456_v27 }
  0x46   : > { %2636 = vmatmul.mubr.msk.bf16.gmra.mxu1 %vm495_vm2, %v3145_v31  ;;  %2650 = vmatmul.mubr.msk.bf16.gmra.mxu0 %vm495_vm2, %v3150_v35 }
  0x47   : > { %2639 = vmatprep.mubr.msk.bf16.mxu1 %vm495_vm2, %v3147_v34  ;;  %2653 = vmatprep.mubr.msk.bf16.mxu0 %vm495_vm2, %v3154_v37 }
  0x4e   : > { %2640 = vmatmul.mubr.msk.bf16.gmra.mxu1 %vm495_vm2, %v3162_v43  ;;  %2654 = vmatmul.mubr.msk.bf16.gmra.mxu0 %vm495_vm2, %v3164_v47 }
  0x4f   : > { %2663 = vmatprep.mubr.msk.bf16.mxu1 %vm495_vm2, %v3101_v60  ;;  %2657 = vmatprep.mubr.msk.bf16.mxu0 %vm495_vm2, %v3168_v48  ;;  %v1165_v60 = vld [vmem:[#allocation2 + $0xc9] sm:$0xff] }
  0x50   : > { %v1173_v62 = vpack.c.bf16 %v1165_v60, %v1164_v59 }
  0x56   : > { %2664 = vmatmul.mubr.msk.bf16.vlgmr.msra.gmra.mxu1 %vm495_vm2, %v3104_v0  ;;  %2658 = vmatmul.mubr.msk.bf16.gmra.mxu0 %vm495_vm2, %v3178_v53 }
  0x57   : > { %2698 = vmatpush3.bf16.msra.mxu1 %v1367_v52  ;;  %2667 = vmatprep.mubr.msk.bf16.mxu1 %vm495_vm2, %v3125_v15 }
  0x58   : > { %2779 = vmatprep.subr.msk.bf16.mxu1 %vm593_vm0, %v2465_v54  ;;  %2681 = vmatprep.mubr.msk.bf16.mxu0 %vm495_vm2, %v3080_v46  ;;  %v998_v46 = vld [vmem:[#allocation2 + $0xc0] sm:$0xff] }
  0x59   : > { %v1007_v58 = vpack.c.bf16 %v999_v57, %v998_v46 }
  0x5e   : > { %2668 = vmatmul.mubr.msk.bf16.gmra.mxu1 %vm495_vm2, %v3127_v18  ;;  %2682 = vmatmul.mubr.msk.bf16.vlgmr.msra.gmra.mxu0 %vm495_vm2, %v3084_v49 }
  0x5f   : > { %2671 = vmatprep.mubr.msk.bf16.mxu1 %vm495_vm2, %v3145_v31  ;;  %2716 = vmatpush3.bf16.msra.mxu0 %v1534_v55 }
  0x60   : > { %2685 = vmatprep.mubr.msk.bf16.mxu0 %vm495_vm2, %v3107_v3  ;;  %2780 = vmatprep.subr.msk.bf16.mxu0 %vm593_vm0, %v2474_v56 }
  0x66   : > { %2672 = vmatmul.mubr.msk.bf16.gmra.mxu1 %vm495_vm2, %v3147_v34  ;;  %2686 = vmatmul.mubr.msk.bf16.gmra.mxu0 %vm495_vm2, %v3050_v25 }
  0x67   : > { %2675 = vmatprep.mubr.msk.bf16.mxu1 %vm495_vm2, %v3162_v43  ;;  %2689 = vmatprep.mubr.msk.bf16.mxu0 %vm495_vm2, %v3052_v29 }
  0x6e   : > { %2676 = vmatmul.mubr.msk.bf16.gmra.mxu1 %vm495_vm2, %v1007_v58  ;;  %2690 = vmatmul.mubr.msk.bf16.gmra.mxu0 %vm495_vm2, %v3067_v36 }
  0x6f   : > { %2699 = vmatprep.mubr.msk.bf16.mxu1 %vm495_vm2, %v3129_v19  ;;  %2693 = vmatprep.mubr.msk.bf16.mxu0 %vm495_vm2, %v3073_v41 }
  0x76   : > { %2700 = vmatmul.mubr.msk.bf16.vlgmr.msra.gmra.mxu1 %vm495_vm2, %v3133_v20  ;;  %2694 = vmatmul.mubr.msk.bf16.gmra.mxu0 %vm495_vm2, %v1173_v62 }
  0x77   : > { %2734 = vmatpush3.bf16.msra.mxu1 %v1700_v61  ;;  %2703 = vmatprep.mubr.msk.bf16.mxu1 %vm495_vm2, %v3150_v35 }
  0x78   : > { %2717 = vmatprep.mubr.msk.bf16.mxu0 %vm495_vm2, %v3104_v0  ;;  %v1330_v0 = vld [vmem:[#allocation2 + $0xc2] sm:$0xff] }
  0x79   : > { %v1339_v2 = vpack.c.bf16 %v1331_v1, %v1330_v0 }
  0x7e   : > { %2704 = vmatmul.mubr.msk.bf16.gmra.mxu1 %vm495_vm2, %v3154_v37  ;;  %2718 = vmatmul.mubr.msk.bf16.vlgmr.msra.gmra.mxu0 %vm495_vm2, %v3125_v15 }
  0x7f   : > { %2707 = vmatprep.mubr.msk.bf16.mxu1 %vm495_vm2, %v3164_v47  ;;  %2752 = vmatpush3.bf16.msra.mxu0 %v1866_v63 }
  0x80   : > { %2721 = vmatprep.mubr.msk.bf16.mxu0 %vm495_vm2, %v3127_v18 }
  0x86   : > { %2708 = vmatmul.mubr.msk.bf16.gmra.mxu1 %vm495_vm2, %v3168_v48  ;;  %2722 = vmatmul.mubr.msk.bf16.gmra.mxu0 %vm495_vm2, %v3145_v31 }
  0x87   : > { %2711 = vmatprep.mubr.msk.bf16.mxu1 %vm495_vm2, %v3178_v53  ;;  %2725 = vmatprep.mubr.msk.bf16.mxu0 %vm495_vm2, %v3147_v34 }
  0x8e   : > { %2712 = vmatmul.mubr.msk.bf16.gmra.mxu1 %vm495_vm2, %v1339_v2  ;;  %2726 = vmatmul.mubr.msk.bf16.gmra.mxu0 %vm495_vm2, %v3162_v43 }
  0x8f   : > { %2735 = vmatprep.mubr.msk.bf16.mxu1 %vm495_vm2, %v3084_v49  ;;  %2729 = vmatprep.mubr.msk.bf16.mxu0 %vm495_vm2, %v1007_v58  ;;  %v1664_v49 = vld [vmem:[#allocation2 + $0xe1] sm:$0xff] }
  0x96   : > { %2736 = vmatmul.mubr.msk.bf16.vlgmr.msra.gmra.mxu1 %vm495_vm2, %v3107_v3  ;;  %2730 = vmatmul.mubr.msk.bf16.gmra.mxu0 %vm495_vm2, %v1506_v6 }
  0x97   : > { %2739 = vmatprep.mubr.msk.bf16.mxu1 %vm495_vm2, %v3050_v25  ;;  %2753 = vmatprep.mubr.msk.bf16.mxu0 %vm495_vm2, %v3133_v20  ;;  %v1663_v25 = vld [vmem:[#allocation2 + $0xd9] sm:$0xff] }
  0x9e   : > { %2740 = vmatmul.mubr.msk.bf16.gmra.mxu1 %vm495_vm2, %v3052_v29  ;;  %2754 = vmatmul.mubr.msk.bf16.vlgmr.msra.gmra.mxu0 %vm495_vm2, %v3150_v35  ;;  %v1672_v29 = vpack.c.bf16 %v1664_v49, %v1663_v25 }
  0x9f   : > { %2743 = vmatprep.mubr.msk.bf16.mxu1 %vm495_vm2, %v3067_v36  ;;  %2757 = vmatprep.mubr.msk.bf16.mxu0 %vm495_vm2, %v3154_v37  ;;  %v1829_v36 = vld [vmem:[#allocation2 + $0xda] sm:$0xff] }
  0xa6   : > { %2744 = vmatmul.mubr.msk.bf16.gmra.mxu1 %vm495_vm2, %v3073_v41  ;;  %2758 = vmatmul.mubr.msk.bf16.gmra.mxu0 %vm495_vm2, %v3164_v47  ;;  %v1830_v41 = vld [vmem:[#allocation2 + $0xe2] sm:$0xff] }
  0xa7   : > { %2747 = vmatprep.mubr.msk.bf16.mxu1 %vm495_vm2, %v1173_v62  ;;  %2761 = vmatprep.mubr.msk.bf16.mxu0 %vm495_vm2, %v3168_v48  ;;  %v1838_v3 = vpack.c.bf16 %v1830_v41, %v1829_v36 }
  0xae   : > { %2748 = vmatmul.mubr.msk.bf16.gmra.mxu1 %vm495_vm2, %v1672_v29  ;;  %2762 = vmatmul.mubr.msk.bf16.gmra.mxu0 %vm495_vm2, %v3178_v53 }
  0xaf   : > { %2765 = vmatprep.mubr.msk.bf16.mxu0 %vm495_vm2, %v1339_v2 }
  0xb6   : > { %2766 = vmatmul.mubr.msk.bf16.gmra.mxu0 %vm495_vm2, %v1838_v3 }
  0xe6   : > { %v2619_v7 = vpop.f32.mrf.mxu1 }
  0xe8   : > { %v663_v8 = vpop.f32.mrf.mxu1 }
  0xea   : > { %v2620_v9 = vpop.f32.mrf.mxu1 }
  0xec   : > { %v666_v10 = vpop.f32.mrf.mxu1 }
  0xee   : > { %v2623_v11 = vpop.f32.mrf.mxu1  ;;  %v2611_v13 = vpop.f32.mrf.mxu0 }
  0xf0   : > { %v679_v12 = vpop.f32.mrf.mxu1  ;;  %v631_v15 = vpop.f32.mrf.mxu0 }
  0xf2   : > { %v2624_v14 = vpop.f32.mrf.mxu1  ;;  %v2612_v17 = vpop.f32.mrf.mxu0 }
  0xf4   : > { %v682_v16 = vpop.f32.mrf.mxu1  ;;  %v634_v19 = vpop.f32.mrf.mxu0 }
  0xf6   : > { %v2629_v18 = vpop.f32.mrf.mxu1  ;;  %v2615_v22 = vpop.f32.mrf.mxu0 }
  0xf7   : > { %v764_v20 = vadd.f32 %v2629_v18, %v2611_v13 }
  0xf8   : > { %v755_v21 = vpop.f32.mrf.mxu1  ;;  %v647_v26 = vpop.f32.mrf.mxu0 }
  0xf9   : > { %v756_v23 = vadd.f32 %v755_v21, %v631_v15 }
  0xfa   : > { %v2630_v24 = vpop.f32.mrf.mxu1  ;;  %v2616_v30 = vpop.f32.mrf.mxu0 }
  0xfb   : > { %v767_v27 = vadd.f32 %v2630_v24, %v2612_v17 }
  0xfc   : > { %v758_v28 = vpop.f32.mrf.mxu1  ;;  %v650_v33 = vpop.f32.mrf.mxu0 }
  0xfd   : > { %v759_v31 = vadd.f32 %v758_v28, %v634_v19 }
  0xfe   : > { %v2633_v32 = vpop.f32.mrf.mxu1  ;;  %v2647_v37 = vpop.f32.mrf.mxu0 }
  0xff   : > { %v780_v34 = vadd.f32 %v2633_v32, %v2615_v22  ;;  %v3278_v39 = vadd.f32 %v2647_v37, %v764_v20 }
 0x100   : > { %v771_v35 = vpop.f32.mrf.mxu1  ;;  %v905_v42 = vpop.f32.mrf.mxu0 }
 0x101   : > { %v772_v38 = vadd.f32 %v771_v35, %v647_v26  ;;  %v3280_v44 = vadd.f32 %v905_v42, %v756_v23 }
 0x102   : > { %v2634_v40 = vpop.f32.mrf.mxu1  ;;  %v2648_v47 = vpop.f32.mrf.mxu0 }
 0x103   : > { %v783_v43 = vadd.f32 %v2634_v40, %v2616_v30  ;;  %v3282_v50 = vadd.f32 %v2648_v47, %v767_v27 }
 0x104   : > { %v774_v45 = vpop.f32.mrf.mxu1  ;;  %v908_v52 = vpop.f32.mrf.mxu0 }
 0x105   : > { %v775_v48 = vadd.f32 %v774_v45, %v650_v33  ;;  %v3284_v54 = vadd.f32 %v908_v52, %v759_v31 }
 0x106   : > { %v2637_v51 = vpop.f32.mrf.mxu1  ;;  %v2651_v56 = vpop.f32.mrf.mxu0 }
 0x107   : > { %v796_v53 = vadd.f32 %v2637_v51, %v2619_v7  ;;  %v3286_v57 = vadd.f32 %v2651_v56, %v780_v34 }
 0x108   : > { %v787_v55 = vpop.f32.mrf.mxu1  ;;  %v921_v59 = vpop.f32.mrf.mxu0 }
 0x109   : > { %v788_v46 = vadd.f32 %v787_v55, %v663_v8  ;;  %v3288_v61 = vadd.f32 %v921_v59, %v772_v38 }
 0x10a   : > { %v2638_v58 = vpop.f32.mrf.mxu1  ;;  %v2652_v63 = vpop.f32.mrf.mxu0 }
 0x10b   : > { %v799_v60 = vadd.f32 %v2638_v58, %v2620_v9  ;;  %v3290_v1 = vadd.f32 %v2652_v63, %v783_v43 }
 0x10c   : > { %v790_v62 = vpop.f32.mrf.mxu1  ;;  %v924_v4 = vpop.f32.mrf.mxu0 }
 0x10d   : > { %v791_v0 = vadd.f32 %v790_v62, %v666_v10  ;;  %v3292_v6 = vadd.f32 %v924_v4, %v775_v48 }
 0x10e   : > { %v2641_v2 = vpop.f32.mrf.mxu1  ;;  %v2655_v49 = vpop.f32.mrf.mxu0 }
 0x10f   : > { %v812_v5 = vadd.f32 %v2641_v2, %v2623_v11  ;;  %v3294_v36 = vadd.f32 %v2655_v49, %v796_v53 }
 0x110   : > { %v803_v25 = vpop.f32.mrf.mxu1  ;;  %v937_v3 = vpop.f32.mrf.mxu0 }
 0x111   : > { %v804_v29 = vadd.f32 %v803_v25, %v679_v12  ;;  %v3296_v8 = vadd.f32 %v937_v3, %v788_v46 }
 0x112   : > { %v2642_v41 = vpop.f32.mrf.mxu1  ;;  %v2656_v13 = vpop.f32.mrf.mxu0 }
 0x113   : > { %v815_v7 = vadd.f32 %v2642_v41, %v2624_v14  ;;  %v3298_v15 = vadd.f32 %v2656_v13, %v799_v60 }
 0x114   : > { %v806_v9 = vpop.f32.mrf.mxu1  ;;  %v940_v11 = vpop.f32.mrf.mxu0 }
 0x115   : > { %v807_v10 = vadd.f32 %v806_v9, %v682_v16  ;;  %v3302_v18 = vadd.f32 %v940_v11, %v791_v0 }
 0x116   : > { %v3300_v17 = vpop.f32.mrf.mxu1  ;;  %v2659_v12 = vpop.f32.mrf.mxu0 }
 0x117   : > { %v3306_v20 = vadd.f32 %v2659_v12, %v812_v5 }
 0x118   : > { %v3304_v19 = vpop.f32.mrf.mxu1  ;;  %v953_v14 = vpop.f32.mrf.mxu0 }
 0x119   : > { %v3310_v22 = vadd.f32 %v953_v14, %v804_v29 }
 0x11a   : > { %v3308_v21 = vpop.f32.mrf.mxu1  ;;  %v2660_v16 = vpop.f32.mrf.mxu0 }
 0x11b   : > { %v3314_v24 = vadd.f32 %v2660_v16, %v815_v7 }
 0x11c   : > { %v3312_v23 = vpop.f32.mrf.mxu1  ;;  %v956_v27 = vpop.f32.mrf.mxu0 }
 0x11d   : > { %v3318_v28 = vadd.f32 %v956_v27, %v807_v10 }
 0x11e   : > { %v3316_v26 = vpop.f32.mrf.mxu1  ;;  %v2683_v31 = vpop.f32.mrf.mxu0 }
 0x120   : > { %v1087_v30 = vpop.f32.mrf.mxu1  ;;  %v1237_v33 = vpop.f32.mrf.mxu0 }
 0x122   : > { %v3320_v32 = vpop.f32.mrf.mxu1  ;;  %v2684_v35 = vpop.f32.mrf.mxu0 }
 0x124   : > { %v1090_v34 = vpop.f32.mrf.mxu1  ;;  %v1240_v38 = vpop.f32.mrf.mxu0 }
 0x126   : > { %v3322_v37 = vpop.f32.mrf.mxu1  ;;  %v2687_v42 = vpop.f32.mrf.mxu0 }
 0x128   : > { %v3324_v40 = vpop.f32.mrf.mxu1  ;;  %v1253_v45 = vpop.f32.mrf.mxu0 }
 0x12a   : > { %v3326_v43 = vpop.f32.mrf.mxu1  ;;  %v2688_v48 = vpop.f32.mrf.mxu0 }
 0x12c   : > { %v3328_v47 = vpop.f32.mrf.mxu1  ;;  %v3332_v52 = vpop.f32.mrf.mxu0 }
 0x12e   : > { %v3330_v51 = vpop.f32.mrf.mxu1  ;;  %v2691_v55 = vpop.f32.mrf.mxu0 }
 0x130   : > { %v3334_v53 = vpop.f32.mrf.mxu1  ;;  %v3338_v46 = vpop.f32.mrf.mxu0 }
 0x132   : > { %v3336_v56 = vpop.f32.mrf.mxu1  ;;  %v3342_v59 = vpop.f32.mrf.mxu0 }
 0x134   : > { %v3340_v58 = vpop.f32.mrf.mxu1  ;;  %v3346_v62 = vpop.f32.mrf.mxu0 }
 0x136   : > { %v3344_v60 = vpop.f32.mrf.mxu1  ;;  %v3350_v0 = vpop.f32.mrf.mxu0 }
 0x138   : > { %v3348_v63 = vpop.f32.mrf.mxu1  ;;  %v3354_v4 = vpop.f32.mrf.mxu0 }
 0x13a   : > { %v3352_v2 = vpop.f32.mrf.mxu1  ;;  %v3358_v25 = vpop.f32.mrf.mxu0 }
 0x13c   : > { %v3356_v5 = vpop.f32.mrf.mxu1  ;;  %v3362_v29 = vpop.f32.mrf.mxu0 }
 0x13e   : > { %v3360_v49 = vpop.f32.mrf.mxu1  ;;  %v3366_v3 = vpop.f32.mrf.mxu0 }
 0x13f   : > { %3620 = vst [vmem:[#allocation3_spill] sm:$0xff] %v3360_v49 }
 0x140   : > { %v3364_v41 = vpop.f32.mrf.mxu1  ;;  %v3370_v9 = vpop.f32.mrf.mxu0 }
 0x141   : > { %3621 = vst [vmem:[#allocation4_spill] sm:$0xff] %v3364_v41  ;;  %3623 = vst [vmem:[#allocation6_spill] sm:$0xff] %v3370_v9 }
 0x142   : > { %v3368_v7 = vpop.f32.mrf.mxu1  ;;  %v3374_v10 = vpop.f32.mrf.mxu0 }
 0x143   : > { %3622 = vst [vmem:[#allocation5_spill] sm:$0xff] %v3368_v7  ;;  %3625 = vst [vmem:[#allocation8_spill] sm:$0xff] %v3374_v10 }
 0x144   : > { %v3372_v13 = vpop.f32.mrf.mxu1  ;;  %v3378_v12 = vpop.f32.mrf.mxu0 }
 0x145   : > { %3624 = vst [vmem:[#allocation7_spill] sm:$0xff] %v3372_v13  ;;  %3627 = vst [vmem:[#allocation10_spill] sm:$0xff] %v3378_v12 }
 0x146   : > { %v3376_v11 = vpop.f32.mrf.mxu1  ;;  %v3382_v16 = vpop.f32.mrf.mxu0 }
 0x147   : > { %3626 = vst [vmem:[#allocation9_spill] sm:$0xff] %v3376_v11  ;;  %3629 = vst [vmem:[#allocation12_spill] sm:$0xff] %v3382_v16 }
 0x148   : > { %v3380_v14 = vpop.f32.mrf.mxu1  ;;  %v3386_v41 = vpop.f32.mrf.mxu0 }
 0x149   : > { %3628 = vst [vmem:[#allocation11_spill] sm:$0xff] %v3380_v14  ;;  %3630 = vst [vmem:[#allocation13_spill] sm:$0xff] %v3386_v41  ;;  %v1136_v41 = vadd.f32 %v3300_v17, %v3278_v39 }
 0x14a   : > { %v3384_v27 = vpop.f32.mrf.mxu1  ;;  %v3390_v7 = vpop.f32.mrf.mxu0 }
 0x14b   : > { %3632 = vst [vmem:[#allocation15_spill] sm:$0xff] %v3390_v7  ;;  %v1302_v7 = vadd.f32 %v2683_v31, %v1136_v41 }
 0x14c   : > { %v3388_v49 = vpop.f32.mrf.mxu1  ;;  %v3394_v13 = vpop.f32.mrf.mxu0 }
 0x14d   : > { %3631 = vst [vmem:[#allocation14_spill] sm:$0xff] %v3388_v49  ;;  %3634 = vst [vmem:[#allocation17_spill] sm:$0xff] %v3394_v13  ;;  %v1137_v13 = vadd.f32 %v3308_v21, %v3282_v50 }
 0x14e   : > { %v3392_v9 = vpop.f32.mrf.mxu1  ;;  %v3398_v11 = vpop.f32.mrf.mxu0 }
 0x14f   : > { %3633 = vst [vmem:[#allocation16_spill] sm:$0xff] %v3392_v9  ;;  %3636 = vst [vmem:[#allocation19_spill] sm:$0xff] %v3398_v11  ;;  %v1134_v9 = vadd.f32 %v3304_v19, %v3280_v44  ;;  %v1303_v17 = vadd.f32 %v2684_v35, %v1137_v13  ;;  %v1141_v44 = vadd.f32 %v3320_v32, %v3290_v1 }
 0x150   : > { %v3396_v10 = vpop.f32.mrf.mxu1  ;;  %v3402_v14 = vpop.f32.mrf.mxu0  ;;  %v1139_v19 = vadd.f32 %v1090_v34, %v3292_v6  ;;  %v1143_v1 = vadd.f32 %v3328_v47, %v3302_v18  ;;  %v1147_v18 = vadd.f32 %v3340_v58, %v3318_v28  ;;  %v3648_v13 = vld [vmem:[#allocation11_spill] sm:$0xff] }
 0x151   : > { %3635 = vst [vmem:[#allocation18_spill] sm:$0xff] %v3396_v10  ;;  %3638 = vst [vmem:[#allocation21_spill] sm:$0xff] %v3402_v14  ;;  %v1140_v14 = vadd.f32 %v3316_v26, %v3286_v57  ;;  %v1300_v39 = vadd.f32 %v1237_v33, %v1134_v9  ;;  %v1142_v57 = vadd.f32 %v3324_v40, %v3296_v8  ;;  %v3647_v9 = vld [vmem:[#allocation9_spill] sm:$0xff] }
 0x152   : > { %v3400_v12 = vpop.f32.mrf.mxu1  ;;  %v3408_v49 = vpop.f32.mrf.mxu0  ;;  %v1307_v26 = vadd.f32 %v2688_v48, %v1141_v44  ;;  %v1305_v32 = vadd.f32 %v3332_v52, %v1139_v19  ;;  %v1146_v8 = vadd.f32 %v3334_v53, %v3310_v22  ;;  %v1313_v52 = vadd.f32 %v3362_v29, %v1147_v18  ;;  %v3640_v53 = vld [vmem:[#allocation3_spill] sm:$0xff] }
 0x153   : > { %3637 = vst [vmem:[#allocation20_spill] sm:$0xff] %v3400_v12  ;;  %v1135_v12 = vadd.f32 %v3312_v23, %v3284_v54  ;;  %v1306_v31 = vadd.f32 %v2687_v42, %v1140_v14  ;;  %v1144_v54 = vadd.f32 %v3322_v37, %v3294_v36  ;;  %v1148_v36 = vadd.f32 %v3330_v51, %v3306_v20 }
 0x154   : > { %v3404_v16 = vpop.f32.mrf.mxu1  ;;  %v3419_v11 = vpop.f32.mrf.mxu0  ;;  %v1308_v35 = vadd.f32 %v3338_v46, %v1142_v57  ;;  %v1468_v37 = vadd.f32 %v3344_v60, %v1302_v7  ;;  %v1309_v20 = vadd.f32 %v3346_v62, %v1143_v1  ;;  %v1466_v22 = vadd.f32 %v3348_v63, %v1300_v39  ;;  %v3643_v62 = vld [vmem:[#allocation5_spill] sm:$0xff]  ;;  %v3646_v7 = vld [vmem:[#allocation10_spill] sm:$0xff]  ;;  %v3649_v39 = vld [vmem:[#allocation12_spill] sm:$0xff] }
 0x155   : > { %3639 = vst [vmem:[#allocation22_spill] sm:$0xff] %v3404_v16  ;;  %v1138_v16 = vadd.f32 %v1087_v30, %v3288_v61  ;;  %v1301_v21 = vadd.f32 %v1240_v38, %v1135_v12  ;;  %v1145_v30 = vadd.f32 %v3326_v43, %v3298_v15  ;;  %v1310_v33 = vadd.f32 %v2691_v55, %v1144_v54  ;;  %v3651_v57 = vld [vmem:[#allocation15_spill] sm:$0xff] }
 0x156   : > { %v2737_v10 = vpop.f32.mrf.mxu1  ;;  %v3428_v23 = vpop.f32.mrf.mxu0  ;;  %v1149_v15 = vadd.f32 %v3336_v56, %v3314_v24  ;;  %v1314_v42 = vadd.f32 %v3350_v0, %v1148_v36  ;;  %v1469_v24 = vadd.f32 %v3352_v2, %v1303_v17  ;;  %v1635_v47 = vadd.f32 %v3366_v3, %v1468_v37  ;;  %v3641_v56 = vld [vmem:[#allocation4_spill] sm:$0xff]  ;;  %v3644_v0 = vld [vmem:[#allocation7_spill] sm:$0xff]  ;;  %v3654_v36 = vld [vmem:[#allocation17_spill] sm:$0xff] }
 0x157   : > { %v1304_v61 = vadd.f32 %v1253_v45, %v1138_v16  ;;  %v1311_v40 = vadd.f32 %v3342_v59, %v1145_v30  ;;  %v1312_v45 = vadd.f32 %v3354_v4, %v1146_v8  ;;  %v1467_v28 = vadd.f32 %v3356_v5, %v1301_v21  ;;  %v3642_v59 = vld [vmem:[#allocation6_spill] sm:$0xff]  ;;  %v3645_v5 = vld [vmem:[#allocation8_spill] sm:$0xff]  ;;  %v3469_v16 = vld [vmem:[%s3616_s4] ss:$0 sm:$0xff] }
 0x158   : > { %v1736_v50 = vpop.f32.mrf.mxu1  ;;  %v3439_v34 = vpop.f32.mrf.mxu0  ;;  %v1315_v51 = vadd.f32 %v3358_v25, %v1149_v15  ;;  %v1472_v55 = vadd.f32 %v3640_v53, %v1306_v31  ;;  %v1633_v60 = vadd.f32 %v3642_v59, %v1466_v22  ;;  %v1473_v63 = vadd.f32 %v3643_v62, %v1307_v26  ;;  %v3650_v31 = vld [vmem:[#allocation13_spill] sm:$0xff]  ;;  %v3652_v26 = vld [vmem:[#allocation14_spill] sm:$0xff]  ;;  %v3653_v1 = vld [vmem:[#allocation16_spill] sm:$0xff] }
 0x159   : > { %v1470_v46 = vadd.f32 %v3641_v56, %v1304_v61  ;;  %v1471_v2 = vadd.f32 %v3644_v0, %v1305_v32  ;;  %v1801_v4 = vadd.f32 %v2737_v10, %v1635_v47  ;;  %v1636_v3 = vadd.f32 %v3645_v5, %v1469_v24  ;;  %v3656_v37 = vld [vmem:[#allocation19_spill] sm:$0xff]  ;;  %v3657_v22 = vld [vmem:[#allocation21_spill] sm:$0xff] }
 0x15a   : > { %v2738_v6 = vpop.f32.mrf.mxu1  ;;  %v2732_v43 = vpop.f32.mrf.mxu0  ;;  %v1634_v25 = vadd.f32 %v3646_v7, %v1467_v28  ;;  %v1476_v29 = vadd.f32 %v3647_v9, %v1310_v33  ;;  %v1474_v12 = vadd.f32 %v3648_v13, %v1308_v35  ;;  %v1639_v17 = vadd.f32 %v3649_v39, %v1472_v55  ;;  %v3655_v35 = vld [vmem:[#allocation18_spill] sm:$0xff]  ;;  %v3658_v47 = vld [vmem:[#allocation20_spill] sm:$0xff] }
 0x15b   : > { %v1477_v44 = vadd.f32 %v3384_v27, %v1311_v40  ;;  %v1799_v10 = vadd.f32 %v1736_v50, %v1633_v60  ;;  %v1637_v54 = vadd.f32 %v3650_v31, %v1470_v46  ;;  %v1640_v61 = vadd.f32 %v3651_v57, %v1473_v63 }
 0x15c   : > { %v1739_v38 = vpop.f32.mrf.mxu1  ;;  %v1621_v58 = vpop.f32.mrf.mxu0  ;;  %v1475_v30 = vadd.f32 %v3652_v26, %v1309_v20  ;;  %v1480_v32 = vadd.f32 %v3653_v1, %v1314_v42  ;;  %v1638_v8 = vadd.f32 %v3654_v36, %v1471_v2  ;;  %v1478_v15 = vadd.f32 %v3655_v35, %v1312_v45  ;;  %v3659_v45 = vld [vmem:[#allocation22_spill] sm:$0xff] }
 0x15d   : > { %v1643_v40 = vadd.f32 %v3656_v37, %v1476_v29  ;;  %v1641_v24 = vadd.f32 %v3657_v22, %v1474_v12  ;;  %v1481_v28 = vadd.f32 %v3658_v47, %v1315_v51  ;;  %v1802_v53 = vadd.f32 %v2738_v6, %v1636_v3 }
 0x15e   : > { %v2741_v48 = vpop.f32.mrf.mxu1  ;;  %v2755_v14 = vpop.f32.mrf.mxu0  ;;  %v1644_v42 = vadd.f32 %v3408_v49, %v1477_v44  ;;  %v1479_v55 = vadd.f32 %v3659_v45, %v1313_v52  ;;  %v3493_v60 = vadd.f32 %v3419_v11, %v1475_v30  ;;  %v3496_v6 = vadd.f32 %v3428_v23, %v1480_v32 }
 0x15f   : > { %v1967_v19 = vadd.f32 %v2755_v14, %v1801_v4  ;;  %v1800_v51 = vadd.f32 %v1739_v38, %v1634_v25  ;;  %v3499_v0 = vadd.f32 %v3439_v34, %v1478_v15  ;;  %v1805_v2 = vadd.f32 %v2741_v48, %v1639_v17 }
 0x160   : > { %v1752_v41 = vpop.f32.mrf.mxu1  ;;  %v1902_v33 = vpop.f32.mrf.mxu0  ;;  %v3503_v5 = vadd.f32 %v2732_v43, %v1481_v28  ;;  %v3505_v11 = vadd.f32 %v1621_v58, %v1479_v55 }
 0x161   : > { %v1990_v18 = vadd.f32 %v3469_v16, %v1967_v19  ;;  %v1965_v27 = vadd.f32 %v1902_v33, %v1799_v10  ;;  %v1803_v34 = vadd.f32 %v1752_v41, %v1637_v54 }
 0x162   : > { %v2742_v21 = vpop.f32.mrf.mxu1  ;;  %v2756_v20 = vpop.f32.mrf.mxu0 }
 0x163   : > { %v2512_v56 = vpack.c.bf16 %v1990_v18, %v1990_v18  ;;  %v1988_v46 = vadd.f32 %v3469_v16, %v1965_v27  ;;  %v1968_v62 = vadd.f32 %v2756_v20, %v1802_v53  ;;  %v2044_v49 = vmul.f32 %v1990_v18, %v1990_v18 }
 0x164   : > { %v1755_v50 = vpop.f32.mrf.mxu1  ;;  %v1905_v63 = vpop.f32.mrf.mxu0  ;;  %v1806_v25 = vadd.f32 %v2742_v21, %v1640_v61  ;;  %v2007_v13 = vsel %vm495_vm2, %v1990_v18, 0.0 }
 0x165   : > { %2163 = vst.msk [vmem:[%s3487_s7 + $0x8] sm:$0xf] %vm2160_vm3, %v2512_v56  ;;  %v2510_v52 = vpack.c.bf16 %v1988_v46, %v1988_v46  ;;  %v1991_v23 = vadd.f32 %v3469_v16, %v1968_v62  ;;  %v1966_v3 = vadd.f32 %v1905_v63, %v1800_v51  ;;  %v2042_v38 = vmul.f32 %v1988_v46, %v1988_v46 }
 0x166   : > { %v2745_v59 = vpop.f32.mrf.mxu1  ;;  %v2759_v7 = vpop.f32.mrf.mxu0  ;;  %v1804_v12 = vadd.f32 %v1755_v50, %v1638_v8  ;;  %v2061_v14 = vsel %vm495_vm2, %v2044_v49, 0.0  ;;  %v2004_v41 = vsel %vm495_vm2, %v1988_v46, 0.0 }
 0x167   : > { %2161 = vst.msk [vmem:[%s3487_s7] sm:$0xf] %vm2160_vm3, %v2510_v52  ;;  %v1971_v9 = vadd.f32 %v2759_v7, %v1805_v2  ;;  %v2513_v48 = vpack.c.bf16 %v1991_v23, %v1991_v23  ;;  %v1989_v43 = vadd.f32 %v3469_v16, %v1966_v3  ;;  %v1809_v44 = vadd.f32 %v2745_v59, %v1643_v40 }
 0x168   : > { %v1768_v4 = vpop.f32.mrf.mxu1  ;;  %v1918_v58 = vpop.f32.mrf.mxu0  ;;  %v2058_v57 = vsel %vm495_vm2, %v2042_v38, 0.0  ;;  %v2045_v1 = vmul.f32 %v1991_v23, %v1991_v23  ;;  %v2009_v35 = vsel %vm495_vm2, %v1991_v23, 0.0 }
 0x169   : > { %v1994_v39 = vadd.f32 %v3469_v16, %v1971_v9  ;;  %v1969_v17 = vadd.f32 %v1918_v58, %v1803_v34  ;;  %2164 = vst.msk [vmem:[%s3487_s7 + $0xc] sm:$0xf] %vm2160_vm3, %v2513_v48  ;;  %v2005_v19 = vsel %vm495_vm2, %v1989_v43, 0.0  ;;  %v2043_v21 = vmul.f32 %v1989_v43, %v1989_v43 }
 0x16a   : > { %v2746_v29 = vpop.f32.mrf.mxu1  ;;  %v2511_v31 = vpack.c.bf16 %v1989_v43, %v1989_v43  ;;  %v2760_v54 = vpop.f32.mrf.mxu0  ;;  %v2006_v61 = vadd.f32 %v2005_v19, %v2004_v41  ;;  %v1807_v30 = vadd.f32 %v1768_v4, %v1641_v24  ;;  %v2063_v55 = vsel %vm495_vm2, %v2045_v1, 0.0 }
 0x16b   : > { %v2516_v26 = vpack.c.bf16 %v1994_v39, %v1994_v39  ;;  %v2059_v32 = vsel %vm495_vm2, %v2043_v21, 0.0  ;;  %v1992_v33 = vadd.f32 %v3469_v16, %v1969_v17  ;;  %v1972_v36 = vadd.f32 %v2760_v54, %v1806_v25 }
 0x16c   : > { %v1771_v10 = vpop.f32.mrf.mxu1  ;;  %2162 = vst.msk [vmem:[%s3487_s7 + $0x4] sm:$0xf] %vm2160_vm3, %v2511_v31  ;;  %v1921_v8 = vpop.f32.mrf.mxu0  ;;  %v2008_v15 = vadd.f32 %v2007_v13, %v2006_v61  ;;  %v2060_v18 = vadd.f32 %v2059_v32, %v2058_v57  ;;  %v1810_v24 = vadd.f32 %v2746_v29, %v1644_v42  ;;  %v2048_v56 = vmul.f32 %v1994_v39, %v1994_v39 }
 0x16d   : > { %2167 = vst.msk [vmem:[%s3487_s7 + $0x18] sm:$0xf] %vm2160_vm3, %v2516_v26  ;;  %v1970_v27 = vadd.f32 %v1921_v8, %v1804_v12  ;;  %v2046_v37 = vmul.f32 %v1992_v33, %v1992_v33  ;;  %v2514_v40 = vpack.c.bf16 %v1992_v33, %v1992_v33  ;;  %v1995_v22 = vadd.f32 %v3469_v16, %v1972_v36 }
 0x16e   : > { %v2749_v50 = vpop.f32.mrf.mxu1  ;;  %v2763_v47 = vpop.f32.mrf.mxu0  ;;  %v2062_v28 = vadd.f32 %v2061_v14, %v2060_v18  ;;  %v2010_v53 = vadd.f32 %v2009_v35, %v2008_v15  ;;  %v2011_v46 = vsel %vm495_vm2, %v1992_v33, 0.0  ;;  %v2015_v38 = vsel %vm495_vm2, %v1994_v39, 0.0 }
 0x16f   : > { %v1993_v20 = vadd.f32 %v3469_v16, %v1970_v27  ;;  %v1975_v45 = vadd.f32 %v2763_v47, %v1809_v44  ;;  %2165 = vst.msk [vmem:[%s3487_s7 + $0x10] sm:$0xf] %vm2160_vm3, %v2514_v40  ;;  %v2517_v59 = vpack.c.bf16 %v1995_v22, %v1995_v22  ;;  %v2065_v2 = vsel %vm495_vm2, %v2046_v37, 0.0 }
 0x170   : > { %v1934_v51 = vpop.f32.mrf.mxu0  ;;  %v2012_v62 = vadd.f32 %v2011_v46, %v2010_v53  ;;  %v2064_v63 = vadd.f32 %v2063_v55, %v2062_v28  ;;  %v1784_v52 = vpop.f32.mrf.mxu1  ;;  %v2049_v29 = vmul.f32 %v1995_v22, %v1995_v22  ;;  %v1808_v48 = vadd.f32 %v1771_v10, %v3493_v60 }
 0x171   : > { %v2013_v42 = vsel %vm495_vm2, %v1993_v20, 0.0  ;;  %v2047_v49 = vmul.f32 %v1993_v20, %v1993_v20  ;;  %2168 = vst.msk [vmem:[%s3487_s7 + $0x1c] sm:$0xf] %vm2160_vm3, %v2517_v59  ;;  %v2515_v4 = vpack.c.bf16 %v1993_v20, %v1993_v20  ;;  %v1998_v23 = vadd.f32 %v3469_v16, %v1975_v45 }
 0x172   : > { %v1973_v3 = vadd.f32 %v1934_v51, %v1807_v30  ;;  %v2764_v7 = vpop.f32.mrf.mxu0  ;;  %v2066_v34 = vadd.f32 %v2065_v2, %v2064_v63  ;;  %v2014_v25 = vadd.f32 %v2013_v42, %v2012_v62  ;;  %v2069_v58 = vsel %vm495_vm2, %v2048_v56, 0.0  ;;  %v2750_v44 = vpop.f32.mrf.mxu1 }
 0x173   : > { %v2067_v9 = vsel %vm495_vm2, %v2047_v49, 0.0  ;;  %2166 = vst.msk [vmem:[%s3487_s7 + $0x14] sm:$0xf] %vm2160_vm3, %v2515_v4  ;;  %v2520_v13 = vpack.c.bf16 %v1998_v23, %v1998_v23  ;;  %v1976_v39 = vadd.f32 %v2764_v7, %v1810_v24  ;;  %v2017_v41 = vsel %vm495_vm2, %v1995_v22, 0.0 }
 0x174   : > { %v1996_v43 = vadd.f32 %v3469_v16, %v1973_v3  ;;  %v1937_v12 = vpop.f32.mrf.mxu0  ;;  %v2016_v14 = vadd.f32 %v2015_v38, %v2014_v25  ;;  %v2068_v17 = vadd.f32 %v2067_v9, %v2066_v34  ;;  %v1813_v31 = vadd.f32 %v2749_v50, %v3496_v6  ;;  %v1787_v15 = vpop.f32.mrf.mxu1 }
 0x175   : > { %2171 = vst.msk [vmem:[%s3487_s7 + $0x28] sm:$0xf] %vm2160_vm3, %v2520_v13  ;;  %v1999_v57 = vadd.f32 %v3469_v16, %v1976_v39  ;;  %v1974_v61 = vadd.f32 %v1937_v12, %v1808_v48  ;;  %v2071_v26 = vsel %vm495_vm2, %v2049_v29, 0.0  ;;  %v1811_v1 = vadd.f32 %v1784_v52, %v3499_v0 }
 0x176   : > { %v2050_v19 = vmul.f32 %v1996_v43, %v1996_v43  ;;  %v2518_v21 = vpack.c.bf16 %v1996_v43, %v1996_v43  ;;  %v2767_v54 = vpop.f32.mrf.mxu0  ;;  %v2070_v60 = vadd.f32 %v2069_v58, %v2068_v17  ;;  %v2018_v10 = vadd.f32 %v2017_v41, %v2016_v14 }
 0x177   : > { %v2019_v30 = vsel %vm495_vm2, %v1996_v43, 0.0  ;;  %v1979_v32 = vadd.f32 %v2767_v54, %v1813_v31  ;;  %v1814_v35 = vadd.f32 %v2750_v44, %v3503_v5  ;;  %v2521_v18 = vpack.c.bf16 %v1999_v57, %v1999_v57 }
 0x178   : > { %2169 = vst.msk [vmem:[%s3487_s7 + $0x20] sm:$0xf] %vm2160_vm3, %v2518_v21  ;;  %v1950_v33 = vpop.f32.mrf.mxu0  ;;  %v2020_v36 = vadd.f32 %v2019_v30, %v2018_v10  ;;  %v2072_v8 = vadd.f32 %v2071_v26, %v2070_v60  ;;  %v2073_v6 = vsel %vm495_vm2, %v2050_v19, 0.0  ;;  %v1997_v27 = vadd.f32 %v3469_v16, %v1974_v61 }
 0x179   : > { %v2002_v50 = vadd.f32 %v3469_v16, %v1979_v32  ;;  %v1977_v37 = vadd.f32 %v1950_v33, %v1811_v1  ;;  %v2052_v22 = vmul.f32 %v1998_v23, %v1998_v23  ;;  %2172 = vst.msk [vmem:[%s3487_s7 + $0x2c] sm:$0xf] %vm2160_vm3, %v2521_v18  ;;  %v1812_v5 = vadd.f32 %v1787_v15, %v3505_v11 }
 0x17a   : > { %v2768_v40 = vpop.f32.mrf.mxu0  ;;  %v2074_v0 = vadd.f32 %v2073_v6, %v2072_v8  ;;  %v2021_v47 = vsel %vm495_vm2, %v1997_v27, 0.0  ;;  %v2051_v28 = vmul.f32 %v1997_v27, %v1997_v27  ;;  %v2519_v53 = vpack.c.bf16 %v1997_v27, %v1997_v27 }
 0x17b   : > { %v1980_v24 = vadd.f32 %v2768_v40, %v1814_v35  ;;  %v2023_v45 = vsel %vm495_vm2, %v1998_v23, 0.0  ;;  %v2022_v55 = vadd.f32 %v2021_v47, %v2020_v36  ;;  %v2524_v56 = vpack.c.bf16 %v2002_v50, %v2002_v50 }
 0x17c   : > { %v1953_v20 = vpop.f32.mrf.mxu0  ;;  %v2000_v46 = vadd.f32 %v3469_v16, %v1977_v37  ;;  %v2053_v59 = vmul.f32 %v1999_v57, %v1999_v57  ;;  %v2075_v51 = vsel %vm495_vm2, %v2051_v28, 0.0  ;;  %2170 = vst.msk [vmem:[%s3487_s7 + $0x24] sm:$0xf] %vm2160_vm3, %v2519_v53  ;;  %v2077_v11 = vsel %vm495_vm2, %v2052_v22, 0.0 }
 0x17d   : > { %v2003_v62 = vadd.f32 %v3469_v16, %v1980_v24  ;;  %v1978_v63 = vadd.f32 %v1953_v20, %v1812_v5  ;;  %v2024_v42 = vadd.f32 %v2023_v45, %v2022_v55  ;;  %v2076_v49 = vadd.f32 %v2075_v51, %v2074_v0  ;;  %2175 = vst.msk [vmem:[%s3487_s7 + $0x38] sm:$0xf] %vm2160_vm3, %v2524_v56 }
 0x17e   : > { %v2025_v52 = vsel %vm495_vm2, %v1999_v57, 0.0  ;;  %v2054_v2 = vmul.f32 %v2000_v46, %v2000_v46  ;;  %v2522_v4 = vpack.c.bf16 %v2000_v46, %v2000_v46  ;;  %v2079_v34 = vsel %vm495_vm2, %v2053_v59, 0.0 }
 0x17f   : > { %v2078_v23 = vadd.f32 %v2077_v11, %v2076_v49  ;;  %v2026_v3 = vadd.f32 %v2025_v52, %v2024_v42  ;;  %v2525_v7 = vpack.c.bf16 %v2003_v62, %v2003_v62  ;;  %v2001_v38 = vadd.f32 %v3469_v16, %v1978_v63 }
 0x180   : > { %v2027_v25 = vsel %vm495_vm2, %v2000_v46, 0.0  ;;  %2173 = vst.msk [vmem:[%s3487_s7 + $0x30] sm:$0xf] %vm2160_vm3, %v2522_v4  ;;  %v2056_v43 = vmul.f32 %v2002_v50, %v2002_v50  ;;  %v2081_v12 = vsel %vm495_vm2, %v2054_v2, 0.0  ;;  %v2031_v39 = vsel %vm495_vm2, %v2002_v50, 0.0 }
 0x181   : > { %v2028_v9 = vadd.f32 %v2027_v25, %v2026_v3  ;;  %v2080_v29 = vadd.f32 %v2079_v34, %v2078_v23  ;;  %2176 = vst.msk [vmem:[%s3487_s7 + $0x3c] sm:$0xf] %vm2160_vm3, %v2525_v7  ;;  %v2029_v13 = vsel %vm495_vm2, %v2001_v38, 0.0  ;;  %v2055_v48 = vmul.f32 %v2001_v38, %v2001_v38 }
 0x182   : > { %v2523_v16 = vpack.c.bf16 %v2001_v38, %v2001_v38  ;;  %v2057_v44 = vmul.f32 %v2003_v62, %v2003_v62  ;;  %v2085_v21 = vsel %vm495_vm2, %v2056_v43, 0.0  ;;  %v2033_v31 = vsel %vm495_vm2, %v2003_v62, 0.0 }
 0x183   : > { %v2082_v58 = vadd.f32 %v2081_v12, %v2080_v29  ;;  %v2030_v14 = vadd.f32 %v2029_v13, %v2028_v9  ;;  %v2083_v17 = vsel %vm495_vm2, %v2055_v48, 0.0 }
 0x184   : > { %2174 = vst.msk [vmem:[%s3487_s7 + $0x34] sm:$0xf] %vm2160_vm3, %v2523_v16  ;;  %v2087_v10 = vsel %vm495_vm2, %v2057_v44, 0.0 }
 0x185   : > { %v2032_v41 = vadd.f32 %v2031_v39, %v2030_v14  ;;  %v2084_v19 = vadd.f32 %v2083_v17, %v2082_v58 }
 0x187   : > { %v2034_v54 = vadd.f32 %v2033_v31, %v2032_v41  ;;  %v2086_v60 = vadd.f32 %v2085_v21, %v2084_v19 }
 0x189   : > { %v2035_v57 = vrot.slane %v2034_v54, 4  ;;  %v2088_v61 = vadd.f32 %v2087_v10, %v2086_v60 }
 0x18b   : > { %v2036_v26 = vadd.f32 %v2035_v57, %v2034_v54  ;;  %v2089_v30 = vrot.slane %v2088_v61, 4 }
 0x18d   : > { %v2037_v1 = vrot.slane %v2036_v26, 2  ;;  %v2090_v32 = vadd.f32 %v2089_v30, %v2088_v61 }
 0x18f   : > { %v2038_v33 = vadd.f32 %v2037_v1, %v2036_v26  ;;  %v2091_v36 = vrot.slane %v2090_v32, 2 }
 0x191   : > { %v2039_v8 = vrot.slane %v2038_v33, 1  ;;  %v2092_v6 = vadd.f32 %v2091_v36, %v2090_v32 }
 0x193   : > { %v2040_v35 = vadd.f32 %v2039_v8, %v2038_v33  ;;  %v2093_v15 = vrot.slane %v2092_v6, 1 }
 0x195   : > { %2041 = vst.msk [vmem:[%s440_s14] sm:$0x1] %vm474_vm1, %v2040_v35  ;;  %v2094_v18 = vadd.f32 %v2093_v15, %v2092_v6 }
 0x197   : > { %2095 = vst.msk [vmem:[%s440_s14 + $0x1] sm:$0x1] %vm474_vm1, %v2094_v18 }
 0x198 PF: > { %s17_s25 = sadd.s32 1, %s2860_s25   ;;  %s3660_s21 = smov %s2852_s23 }
 0x199   : > { %p14_p12 = scmp.ge.s32.totalorder %s17_s25, 6   ;;  %s3661_s22 = smov %s2856_s24 }
 0x19a   : > { %s3662_s23 = smov %s3665_s26  ;;  %s3663_s24 = smov %s3669_s27 }
 0x19b   :  { %16 = sbr.rel (!%p14_p12) target bundleno = 3 (0x3), region = 99 }

// kernel: basic_block_dec.5
= control target key start
LH: loop header
LB: loop body
LE: loop exit
PB: predicated region body
PF: predicated region fallthrough
CT: control target
= control target key end

     0   :  { %s3961_s27 = smov 0   ;;  %s3963_s28 = smov 0   ;;  %s4868_s0 = inlined_call_operand.vmem [shape: bf16[2,16,16,8], index: 0, kind: input, shape index: {}, may-alias: {0,1,2}]   ;;  %s4869_s1 = inlined_call_operand.vmem [shape: bf16[2,16,16,8], index: 1, kind: input, shape index: {}, may-alias: {0,1,2}]   ;;  %s4870_s2 = inlined_call_operand.vmem [shape: bf16[2,16,16,8], index: 2, kind: input, shape index: {}, may-alias: {0,1,2}]   ;;  %s4871_s3 = inlined_call_operand.vmem [shape: bf16[3,3,8,4], index: 3, kind: input, shape index: {}]   ;;  %s4872_s4 = inlined_call_operand.vmem [shape: f32[1,4], index: 4, kind: input, shape index: {}]   ;;  %s4873_s5 = inlined_call_operand.vmem [shape: f32[1,8], index: 5, kind: input, shape index: {}]   ;;  %s4874_s6 = inlined_call_operand.vmem [shape: f32[1,8], index: 6, kind: input, shape index: {}]   ;;  %s4875_s7 = inlined_call_operand.vmem [shape: bf16[2,32,32,4], index: 7, kind: output, shape index: {0}]   ;;  %s4876_s8 = inlined_call_operand.vmem [shape: f32[2,8,2,4], index: 8, kind: output, shape index: {1}]  }
   0x1   :  { %s3965_s29 = smov 0   ;;  %s3967_s30 = smov 0  }
   0x2   :  { %s3969_s9 = smov 0  }
   0x3 LB: > { %s28_s10 = sadd.s32 1, %s3903_s29  ;;  %s31_s11 = sadd.s32 1, %s3907_s30  ;;  %s3911_s9 = sphi %s3969_s9, %s19_s9   ;;  %s3907_s30 = sphi %s3967_s30, %s4919_s30   ;;  %s3903_s29 = sphi %s3965_s29, %s4918_s29   ;;  %s3899_s28 = sphi %s3963_s28, %s4917_s28   ;;  %s3895_s27 = sphi %s3961_s27, %s4916_s27  }
   0x4   : > { %p29_p0 = scmp.ge.s32.totalorder %s28_s10, 8  ;;  %p3405_p1 = scmp.ge.s32.totalorder %s3911_s9, 1 }
   0x5   : > { %p353_p2 = scmp.lt.s32.totalorder %s3911_s9, 17 }
   0x6   : > { %s4921_s10 = smov (%p29_p0, %s28_s10), 0  ;;  %s4923_s11 = smov (!%p29_p0, %s31_s11), %s3907_s30 }
   0x7   : > { %p354_p3 = pnand %p3405_p1, %p353_p2  ;;  %p33_p4 = scmp.ge.s32.totalorder %s4923_s11, 2 }
   0x9   : > { %s4925_s11 = smov (%p33_p4, %s4923_s11), 0  ;;  %357 = sbr.rel (%p354_p3) target bundleno = 456 (0x1c8), region = 48 }
   0xe   : > { %v3435_v0 = vld [vmem:[%s4871_s3 + $0x4] sm:$0xf]  ;;  %vm1621_vm0 = vcmask 1043456   ;;  %s3997_s14 = sshll.u32 %s3895_s27, 1  ;;  %p432_p5 = scmp.lt.s32.totalorder %s3899_s28, 1  ;;  %vm562_vm1 = vcmask 57344   ;;  %v581_v7 = vlaneseq }
   0xf   : > { %3821 = vmatprep.subr.msk.bf16.mxu1 %vm1621_vm0, %v3435_v0  ;;  %v1623_v1 = vsel %vm1621_vm0, %v3435_v0, 0  ;;  %p434_p6 = scmp.lt.s32.totalorder %s3997_s14, 15  ;;  %3820 = vmatprep.subr.msk.bf16.mxu0 %vm1621_vm0, %v3435_v0  ;;  %v1570_v2 = vld [vmem:[%s4871_s3] sm:$0xf]  ;;  %v4016_v3 = vld [vmem:[%s4871_s3 + $0x8] sm:$0xf] }
  0x10   : > { %3819 = vmatpush3.bf16.msra.mxu1 %v1623_v1  ;;  %s4927_s28 = smov (!%p432_p5, %s3899_s28), 1  ;;  %3657 = vmatpush3.bf16.msra.mxu0 %v1623_v1  ;;  %v3913_v4 = vmov 0.0   ;;  %v3914_v5 = vmov 1966171168   ;;  %v4039_v10 = vld [vmem:[%s4873_s5] ss:$0 sm:$0xff] }
  0x11   : > { %s435_s15 = scalar_select %p434_p6, %s3997_s14, 15  ;;  %3822 = vmatprep.subr.msk.bf16.mxu1 %vm1621_vm0, %v1570_v2  ;;  %563 = vst.msk [vmem:[#allocation2] sm:$0x1] %vm562_vm1, %v3913_v4  ;;  %564 = vst.msk [vmem:[#allocation2 + $0x28] sm:$0x1] %vm562_vm1, %v3913_v4  ;;  %v579_v6 = vunpack.c.l.s4 %v3914_v5  ;;  %3823 = vmatprep.subr.msk.bf16.mxu0 %vm1621_vm0, %v4016_v3  ;;  %v582_v12 = vshrl.u32 %v581_v7, 7 }
  0x12   : > { %s4010_s18 = sshll.u32 %s4927_s28, 5  ;;  %565 = vst.msk [vmem:[#allocation2 + $0x50] sm:$0x1] %vm562_vm1, %v3913_v4  ;;  %566 = vst.msk [vmem:[#allocation2 + $0x78] sm:$0x1] %vm562_vm1, %v3913_v4  ;;  %v4064_v36 = vsel %vm1621_vm0, %v1570_v2, 0 }
  0x13   : > { %567 = vst.msk [vmem:[#allocation2 + $0xa0] sm:$0x1] %vm562_vm1, %v3913_v4  ;;  %568 = vst.msk [vmem:[#allocation2 + $0xc8] sm:$0x1] %vm562_vm1, %v3913_v4  ;;  %s3407_s21 = sshll.u32 %s435_s15, 1  ;;  %v580_v11 = vunpack.c.0.s8 %v579_v6  ;;  %s3411_s15 = sadd.s32 4294967295, %s3997_s14 }
  0x14   : > { %569 = vst.msk [vmem:[#allocation2 + $0x21] sm:$0x1] %vm562_vm1, %v3913_v4  ;;  %570 = vst.msk [vmem:[#allocation2 + $0x49] sm:$0x1] %vm562_vm1, %v3913_v4  ;;  %s438_s22 = sadd.s32 %s4010_s18, %s3407_s21  ;;  %v3915_v13 = vmov 1983009808  }
  0x15   : > { %571 = vst.msk [vmem:[#allocation2 + $0x71] sm:$0x1] %vm562_vm1, %v3913_v4  ;;  %572 = vst.msk [vmem:[#allocation2 + $0x99] sm:$0x1] %vm562_vm1, %v3913_v4  ;;  %s3409_s23 = sshll.u32 %s438_s22, 2  ;;  %v742_v14 = vunpack.c.l.s4 %v3915_v13  ;;  %v4051_v24 = vsub.s32 %v580_v11, %v582_v12  ;;  %p444_p7 = scmp.gt.s32.totalorder %s3411_s15, 0 }
  0x16   : > { %573 = vst.msk [vmem:[#allocation2 + $0xc1] sm:$0x1] %vm562_vm1, %v3913_v4  ;;  %574 = vst.msk [vmem:[#allocation2 + $0xe9] sm:$0x1] %vm562_vm1, %v3913_v4  ;;  %s440_s26 = scalar_lea.vmem %s4868_s0, %s3409_s23  ;;  %v4045_v19 = vld [vmem:[%s4874_s6] ss:$0 sm:$0xff] }
  0x17   : > { %v3559_v8 = vld [vmem:[%s440_s26] sm:$0xff]   ;;  %v3574_v9 = vld [vmem:[%s440_s26 + $0x8] sm:$0xff]   ;;  %v743_v25 = vunpack.c.0.s8 %v742_v14  ;;  %p3412_p8 = scmp.lt.s32.totalorder %s3411_s15, 15  ;;  %v4059_v34 = vsub.s32 0, %v582_v12  ;;  %s4929_s15 = smov (!%p444_p7, %s3411_s15), 0  ;;  %vm811_vm2 = vcmask 64512  }
  0x18   : > { %v3560_v15 = vunpack.c.l.bf16 %v3559_v8  ;;  %v3561_v16 = vunpack.c.h.bf16 %v3559_v8  ;;  %v3564_v17 = vunpack.c.l.bf16 %v3574_v9  ;;  %v3565_v18 = vunpack.c.h.bf16 %v3574_v9  ;;  %p550_p9 = scmp.gt.s32.totalorder %s3895_s27, 0  ;;  %s3541_s12 = sadd.s32 2, %s3997_s14 }
  0x19   : > { %v4061_v35 = vsub.s32 %v743_v25, %v582_v12  ;;  %s4931_s15 = smov (!%p3412_p8, %s4929_s15), 15  ;;  %p4168_p10 = scmp.lt.s32.totalorder %s3541_s12, 15  ;;  %vm3190_vm3 = vcmask 27648   ;;  %vm3032_vm4 = vcmask 31744   ;;  %vm3070_vm5 = vcmask 24576  }
  0x1a   : > { %v511_v20 = vmul.f32 %v3560_v15, %v4039_v10  ;;  %v512_v21 = vmul.f32 %v3561_v16, %v4039_v10  ;;  %v513_v22 = vmul.f32 %v3564_v17, %v4039_v10  ;;  %v514_v23 = vmul.f32 %v3565_v18, %v4039_v10  ;;  %s3417_s19 = sshll.u32 %s4931_s15, 1  ;;  %p489_p11 = scmp.lt.s32.totalorder %s3895_s27, 7 }
  0x1b   : > { %s452_s20 = sadd.s32 %s3417_s19, %s4010_s18  ;;  %s4933_s12 = smov (!%p4168_p10, %s3541_s12), 15 }
  0x1c   : > { %v522_v26 = vadd.f32 %v4045_v19, %v511_v20  ;;  %v523_v27 = vadd.f32 %v4045_v19, %v512_v21  ;;  %v524_v28 = vadd.f32 %v4045_v19, %v513_v22  ;;  %v525_v29 = vadd.f32 %v4045_v19, %v514_v23  ;;  %s3419_s21 = sshll.u32 %s452_s20, 2  ;;  %s4935_s12 = smov (!%p4168_p10, %s4933_s12), 15 }
  0x1d   : > { %s4100_s22 = scalar_select %p550_p9, 1, 0 }
  0x1e   : > { %v526_v30 = vmax.f32 %v522_v26, 0.0  ;;  %v527_v31 = vmax.f32 %v523_v27, 0.0  ;;  %v528_v32 = vmax.f32 %v524_v28, 0.0  ;;  %v4057_v33 = vmax.f32 %v525_v29, 0.0  ;;  %s454_s25 = scalar_lea.vmem %s4869_s1, %s3419_s21  ;;  %s3424_s16 = sshll.u32 %s4935_s12, 1 }
  0x1f   : > { %v3567_v25 = vld [vmem:[%s454_s25] sm:$0xff]   ;;  %s552_s26 = scvt.s32.f32 %s4100_s22  ;;  %s469_s17 = sadd.s32 %s3424_s16, %s4010_s18 }
  0x20   : > { %v820_v37 = vcombine.high %v526_v30, %v526_v30  ;;  %v827_v38 = vrot.slane %v526_v30, %v4051_v24  ;;  %v869_v39 = vcombine.high %v527_v31, %v527_v31  ;;  %v876_v40 = vrot.slane %v527_v31, %v4051_v24  ;;  %s4262_s18 = sshll.u32 %s469_s17, 2  ;;  %s3427_s19 = sshll.u32 %s3895_s27, 2 }
  0x21   : > { %v918_v41 = vcombine.high %v528_v32, %v528_v32  ;;  %v4069_v42 = vrot.slane %v528_v32, %v4051_v24  ;;  %v967_v43 = vcombine.high %v4057_v33, %v4057_v33  ;;  %v4075_v44 = vrot.slane %v4057_v33, %v4051_v24  ;;  %s471_s21 = scalar_lea.vmem %s4870_s2, %s4262_s18  ;;  %p479_p12 = scmp.lt.s32.totalorder %s3427_s19, 31 }
  0x22   : > { %v834_v45 = vrot.slane %v820_v37, %v4051_v24  ;;  %v835_v46 = vcombine.high %v827_v38, %v827_v38  ;;  %v843_v47 = vrot.slane %v827_v38, %v4051_v24  ;;  %v883_v48 = vrot.slane %v869_v39, %v4051_v24  ;;  %s4293_s22 = scalar_select %p489_p11, 1, 0 }
  0x23   : > { %v884_v49 = vcombine.high %v876_v40, %v876_v40  ;;  %v892_v50 = vrot.slane %v876_v40, %v4051_v24  ;;  %v4083_v51 = vrot.slane %v918_v41, %v4051_v24  ;;  %v933_v52 = vcombine.high %v4069_v42, %v4069_v42  ;;  %s4937_s19 = smov (!%p479_p12, %s3427_s19), 31  ;;  %s4939_s27 = smov (!%p489_p11, %s3895_s27), 7 }
  0x24   : > { %v836_v53 = vcombine.high %v834_v45, %v834_v45  ;;  %v850_v54 = vrot.slane %v834_v45, %v4051_v24  ;;  %v857_v55 = vrot.slane %v835_v46, %v4051_v24  ;;  %v865_v56 = vcombine.high %v843_v47, %v843_v47  ;;  %s558_s23 = scvt.s32.f32 %s4293_s22  ;;  %s3428_s20 = sshll.u32 %s4937_s19, 2 }
  0x25   : > { %v1019_v57 = vrot.slane %v843_v47, %v4059_v34  ;;  %v885_v58 = vcombine.high %v883_v48, %v883_v48  ;;  %v899_v59 = vrot.slane %v883_v48, %v4051_v24  ;;  %v906_v60 = vrot.slane %v884_v49, %v4051_v24  ;;  %s3431_s14 = sshll.u32 %s4927_s28, 3 }
  0x26   : > { %v864_v61 = vrot.slane %v836_v53, %v4051_v24  ;;  %v866_v62 = vcombine.high %v850_v54, %v850_v54  ;;  %v867_v63 = vcombine.high %v857_v55, %v857_v55  ;;  %v1023_v0 = vrot.slane %v857_v55, %v4059_v34  ;;  %s492_s15 = sadd.s32 %s3431_s14, %s4939_s27 }
  0x27   : > { %v1027_v1 = vrot.slane %v865_v56, %v4059_v34  ;;  %v1035_v2 = vrot.slane %v850_v54, %v4059_v34  ;;  %v913_v4 = vrot.slane %v885_v58, %v4051_v24  ;;  %v914_v5 = vcombine.high %v892_v50, %v892_v50  ;;  %s3432_s16 = sshll.u32 %s492_s15, 1 }
  0x28   : > { %v868_v6 = vcombine.high %v864_v61, %v864_v61  ;;  %v1031_v7 = vrot.slane %v867_v63, %v4059_v34  ;;  %v1039_v8 = vrot.slane %v864_v61, %v4059_v34  ;;  %v1043_v9 = vrot.slane %v866_v62, %v4059_v34  ;;  %s494_s19 = scalar_lea.vmem %s4876_s8, %s3432_s16 }
  0x29   : > { %v1144_v11 = vcombine.low %v1019_v57, %v1023_v0  ;;  %v915_v12 = vcombine.high %v899_v59, %v899_v59  ;;  %v916_v13 = vcombine.high %v906_v60, %v906_v60  ;;  %v917_v14 = vcombine.high %v913_v4, %v913_v4 }
  0x2a   : > { %v1047_v15 = vrot.slane %v868_v6, %v4059_v34  ;;  %v1145_v16 = vcombine.low %v1027_v1, %v1031_v7  ;;  %v1161_v17 = vcombine.low %v1035_v2, %v1039_v8  ;;  %v1051_v18 = vrot.slane %v892_v50, %v4059_v34 }
  0x2b   : > { %v1152_v20 = vrot.slane %v1144_v11, %v4061_v35  ;;  %v1055_v21 = vrot.slane %v906_v60, %v4059_v34  ;;  %v1059_v22 = vrot.slane %v914_v5, %v4059_v34  ;;  %v1063_v23 = vrot.slane %v916_v13, %v4059_v34 }
  0x2c   : > { %v1159_v26 = vrot.slane %v1145_v16, %v4061_v35  ;;  %v1162_v27 = vcombine.low %v1043_v9, %v1047_v15  ;;  %v1169_v28 = vrot.slane %v1161_v17, %v4061_v35  ;;  %v1067_v29 = vrot.slane %v899_v59, %v4059_v34 }
  0x2d   : > { %v1071_v30 = vrot.slane %v913_v4, %v4059_v34  ;;  %v1075_v31 = vrot.slane %v915_v12, %v4059_v34  ;;  %v1079_v32 = vrot.slane %v917_v14, %v4059_v34  ;;  %v1178_v37 = vcombine.low %v1051_v18, %v1055_v21 }
  0x2e   : > { %v1160_v38 = vcombine.low %v1152_v20, %v1159_v26  ;;  %v1176_v39 = vrot.slane %v1162_v27, %v4061_v35  ;;  %v1179_v40 = vcombine.low %v1059_v22, %v1063_v23  ;;  %v3568_v41 = vunpack.c.l.bf16 %v3567_v25 }
  0x2f   : > { %v1186_v45 = vrot.slane %v1178_v37, %v4061_v35  ;;  %v1195_v46 = vcombine.low %v1067_v29, %v1071_v30  ;;  %v1196_v47 = vcombine.low %v1075_v31, %v1079_v32  ;;  %v3569_v48 = vunpack.c.h.bf16 %v3567_v25 }
  0x30   : > { %v1177_v49 = vcombine.low %v1169_v28, %v1176_v39  ;;  %1289 = vst.msk [vmem:[#allocation2 + $0x29] sm:$0xff] %vm811_vm2, %v1160_v38  ;;  %1293 = vst.msk [vmem:[#allocation2 + $0x51] sm:$0xff] %vm811_vm2, %v1160_v38  ;;  %v1193_v50 = vrot.slane %v1179_v40, %v4061_v35  ;;  %v534_v53 = vmul.f32 %v3568_v41, %v4039_v10  ;;  %v553_v54 = vstv %s552_s26 }
  0x31   : > { %v1203_v55 = vrot.slane %v1195_v46, %v4061_v35  ;;  %v1210_v56 = vrot.slane %v1196_v47, %v4061_v35  ;;  %v535_v57 = vmul.f32 %v3569_v48, %v4039_v10  ;;  %v934_v58 = vcombine.high %v4083_v51, %v4083_v51 }
  0x32   : > { %1290 = vst.msk [vmem:[#allocation2 + $0x31] sm:$0xff] %vm811_vm2, %v1177_v49  ;;  %1294 = vst.msk [vmem:[#allocation2 + $0x59] sm:$0xff] %vm811_vm2, %v1177_v49  ;;  %v1194_v59 = vcombine.low %v1186_v45, %v1193_v50  ;;  %v536_v60 = vadd.f32 %v4045_v19, %v534_v53  ;;  %v941_v61 = vrot.slane %v4069_v42, %v4051_v24 }
  0x33   : > { %v948_v62 = vrot.slane %v4083_v51, %v4051_v24  ;;  %v1211_v63 = vcombine.low %v1203_v55, %v1210_v56  ;;  %v537_v0 = vadd.f32 %v4045_v19, %v535_v57  ;;  %v955_v1 = vrot.slane %v933_v52, %v4051_v24 }
  0x34   : > { %v962_v2 = vrot.slane %v934_v58, %v4051_v24  ;;  %1295 = vst.msk [vmem:[#allocation2 + $0x61] sm:$0xff] %vm811_vm2, %v1194_v59  ;;  %1291 = vst.msk [vmem:[#allocation2 + $0x39] sm:$0xff] %vm811_vm2, %v1194_v59  ;;  %v538_v4 = vmax.f32 %v536_v60, 0.0  ;;  %v963_v5 = vcombine.high %v941_v61, %v941_v61  ;;  %v1083_v7 = vrot.slane %v941_v61, %v4059_v34  ;;  %v4209_v61 = vld [vmem:[%s4871_s3 + $0xc] sm:$0xf] }
  0x35   : > { %v964_v6 = vcombine.high %v948_v62, %v948_v62  ;;  %1296 = vst.msk [vmem:[#allocation2 + $0x69] sm:$0xff] %vm811_vm2, %v1211_v63  ;;  %1292 = vst.msk [vmem:[#allocation2 + $0x41] sm:$0xff] %vm811_vm2, %v1211_v63  ;;  %v539_v51 = vmax.f32 %v537_v0, 0.0  ;;  %v965_v42 = vcombine.high %v955_v1, %v955_v1  ;;  %v1087_v8 = vrot.slane %v955_v1, %v4059_v34 }
  0x36   : > { %v966_v52 = vcombine.high %v962_v2, %v962_v2  ;;  %v554_v9 = vmul.f32 %v553_v54, %v538_v4  ;;  %v4153_v11 = vrot.slane %v963_v5, %v4059_v34  ;;  %v1099_v12 = vrot.slane %v948_v62, %v4059_v34 }
  0x37   : > { %v1103_v13 = vrot.slane %v962_v2, %v4059_v34  ;;  %v1579_v14 = vld [vmem:[#allocation2 + $0x51] sm:$0xff]  ;;  %v555_v15 = vmul.f32 %v553_v54, %v539_v51  ;;  %v4158_v16 = vrot.slane %v965_v42, %v4059_v34  ;;  %v4161_v17 = vrot.slane %v964_v6, %v4059_v34 }
  0x38   : > { %v4164_v18 = vrot.slane %v966_v52, %v4059_v34  ;;  %v577_v20 = vcombine.high %v554_v9, %v554_v9  ;;  %v584_v21 = vrot.slane %v554_v9, %v4051_v24  ;;  %v4173_v22 = vcombine.low %v1083_v7, %v1087_v8 }
  0x39   : > { %v4175_v23 = vcombine.low %v1099_v12, %v1103_v13  ;;  %v1580_v25 = vld [vmem:[#allocation2 + $0x59] sm:$0xff]  ;;  %v626_v26 = vcombine.high %v555_v15, %v555_v15  ;;  %v633_v27 = vrot.slane %v555_v15, %v4051_v24  ;;  %v1213_v28 = vcombine.low %v4153_v11, %v4158_v16 }
  0x3a   : > { %v1230_v29 = vcombine.low %v4161_v17, %v4164_v18  ;;  %v4182_v30 = vpack.c.bf16 %v1580_v25, %v1579_v14  ;;  %v591_v31 = vrot.slane %v577_v20, %v4051_v24  ;;  %v592_v32 = vcombine.high %v584_v21, %v584_v21 }
  0x3b   : > { %v600_v37 = vrot.slane %v584_v21, %v4051_v24  ;;  %v1581_v38 = vld [vmem:[#allocation2 + $0x61] sm:$0xff]  ;;  %v640_v39 = vrot.slane %v626_v26, %v4051_v24  ;;  %v641_v40 = vcombine.high %v633_v27, %v633_v27  ;;  %v649_v41 = vrot.slane %v633_v27, %v4051_v24 }
  0x3c   : > { %v1220_v45 = vrot.slane %v4173_v22, %v4061_v35  ;;  %3666 = vmatprep.mubr.msk.bf16.mxu1 %vm811_vm2, %v4182_v30  ;;  %v1582_v46 = vld [vmem:[#allocation2 + $0x69] sm:$0xff]  ;;  %v593_v47 = vcombine.high %v591_v31, %v591_v31  ;;  %v607_v48 = vrot.slane %v591_v31, %v4051_v24  ;;  %v614_v49 = vrot.slane %v592_v32, %v4051_v24 }
  0x3d   : > { %v622_v50 = vcombine.high %v600_v37, %v600_v37  ;;  %v4200_v53 = vpack.c.bf16 %v1582_v46, %v1581_v38  ;;  %v678_v54 = vrot.slane %v600_v37, %v4059_v34  ;;  %v642_v55 = vcombine.high %v640_v39, %v640_v39 }
  0x3e   : > { %v656_v56 = vrot.slane %v640_v39, %v4051_v24  ;;  %v621_v57 = vrot.slane %v593_v47, %v4051_v24  ;;  %v623_v58 = vcombine.high %v607_v48, %v607_v48  ;;  %v624_v59 = vcombine.high %v614_v49, %v614_v49 }
  0x3f   : > { %v682_v60 = vrot.slane %v614_v49, %v4059_v34  ;;  %3667 = vmatmul.mubr.msk.bf16.vlgmr.msra.gmra.mxu1 %vm811_vm2, %v4200_v53  ;;  %v686_v62 = vrot.slane %v622_v50, %v4059_v34  ;;  %v694_v63 = vrot.slane %v607_v48, %v4059_v34  ;;  %v663_v0 = vrot.slane %v641_v40, %v4051_v24 }
  0x40   : > { %v670_v1 = vrot.slane %v642_v55, %v4051_v24  ;;  %3675 = vmatpush3.bf16.msra.mxu1 %v4064_v36  ;;  %v625_v2 = vcombine.high %v621_v57, %v621_v57  ;;  %v690_v4 = vrot.slane %v624_v59, %v4059_v34  ;;  %v698_v5 = vrot.slane %v621_v57, %v4059_v34 }
  0x41   : > { %v702_v6 = vrot.slane %v623_v58, %v4059_v34  ;;  %v739_v7 = vcombine.low %v678_v54, %v682_v60  ;;  %v671_v51 = vcombine.high %v649_v41, %v649_v41  ;;  %v672_v42 = vcombine.high %v656_v56, %v656_v56  ;;  %3824 = vmatprep.subr.msk.bf16.mxu1 %vm1621_vm0, %v4209_v61 }
  0x42   : > { %v673_v52 = vcombine.high %v663_v0, %v663_v0  ;;  %v706_v8 = vrot.slane %v625_v2, %v4059_v34  ;;  %v740_v9 = vcombine.low %v686_v62, %v690_v4  ;;  %v756_v12 = vcombine.low %v694_v63, %v698_v5 }
  0x43   : > { %v674_v13 = vcombine.high %v670_v1, %v670_v1  ;;  %v747_v36 = vrot.slane %v739_v7, %v4061_v35  ;;  %v710_v14 = vrot.slane %v649_v41, %v4059_v34  ;;  %v714_v15 = vrot.slane %v663_v0, %v4059_v34 }
  0x44   : > { %v718_v20 = vrot.slane %v671_v51, %v4059_v34  ;;  %v754_v21 = vrot.slane %v740_v9, %v4061_v35  ;;  %v757_v25 = vcombine.low %v702_v6, %v706_v8  ;;  %v764_v26 = vrot.slane %v756_v12, %v4061_v35  ;;  %v3571_v51 = vld [vmem:[%s471_s21] sm:$0xff]   ;;  %s3429_s21 = sshll.u32 %s4927_s28, 7 }
  0x45   : > { %v722_v27 = vrot.slane %v673_v52, %v4059_v34  ;;  %v726_v31 = vrot.slane %v656_v56, %v4059_v34  ;;  %v730_v32 = vrot.slane %v670_v1, %v4059_v34  ;;  %v734_v37 = vrot.slane %v672_v42, %v4059_v34  ;;  %s4696_s22 = sadd.s32 %s3429_s21, %s3428_s20 }
  0x46   : > { %v738_v38 = vrot.slane %v674_v13, %v4059_v34  ;;  %v755_v39 = vcombine.low %v747_v36, %v754_v21  ;;  %v771_v40 = vrot.slane %v757_v25, %v4061_v35  ;;  %v773_v41 = vcombine.low %v710_v14, %v714_v15  ;;  %v1575_v13 = vld [vmem:[#allocation2 + $0x29] sm:$0xff]  ;;  %v1576_v36 = vld [vmem:[#allocation2 + $0x31] sm:$0xff]  ;;  %s3430_s25 = sshll.u32 %s4696_s22, 2 }
  0x47   : > { %v774_v46 = vcombine.low %v718_v20, %v722_v27  ;;  %v790_v47 = vcombine.low %v726_v31, %v730_v32  ;;  %v1227_v49 = vrot.slane %v1213_v28, %v4061_v35  ;;  %v1237_v50 = vrot.slane %v4175_v23, %v4061_v35  ;;  %s4727_s13 = scalar_lea.vmem %s4875_s7, %s3430_s25 }
  0x48   : > { %v791_v48 = vcombine.low %v734_v37, %v738_v38  ;;  %v772_v54 = vcombine.low %v764_v26, %v771_v40  ;;  %812 = vst.msk [vmem:[#allocation2 + $0x1] sm:$0xff] %vm811_vm2, %v755_v39  ;;  %v781_v55 = vrot.slane %v773_v41, %v4061_v35  ;;  %v1244_v57 = vrot.slane %v1230_v29, %v4061_v35 }
  0x49   : > { %v788_v56 = vrot.slane %v774_v46, %v4061_v35  ;;  %v798_v58 = vrot.slane %v790_v47, %v4061_v35  ;;  %v1228_v16 = vcombine.low %v1220_v45, %v1227_v49  ;;  %v981_v23 = vrot.slane %v967_v43, %v4051_v24  ;;  %v3470_v49 = vld [vmem:[%s4871_s3 + $0x10] sm:$0xf] }
  0x4a   : > { %v805_v11 = vrot.slane %v791_v48, %v4061_v35  ;;  %813 = vst.msk [vmem:[#allocation2 + $0x9] sm:$0xff] %vm811_vm2, %v772_v54  ;;  %v1245_v18 = vcombine.low %v1237_v50, %v1244_v57  ;;  %v982_v28 = vcombine.high %v4075_v44, %v4075_v44  ;;  %v990_v29 = vrot.slane %v4075_v44, %v4051_v24 }
  0x4b   : > { %v789_v17 = vcombine.low %v781_v55, %v788_v56  ;;  %1297 = vst.msk [vmem:[#allocation2 + $0x79] sm:$0xff] %vm811_vm2, %v1228_v16  ;;  %1301 = vst.msk [vmem:[#allocation2 + $0xa1] sm:$0xff] %vm811_vm2, %v1228_v16  ;;  %v983_v33 = vcombine.high %v981_v23, %v981_v23  ;;  %v997_v43 = vrot.slane %v981_v23, %v4051_v24  ;;  %v3572_v40 = vunpack.c.l.bf16 %v3571_v51  ;;  %v1578_v56 = vld [vmem:[#allocation2 + $0x41] sm:$0xff] }
  0x4c   : > { %v806_v22 = vcombine.low %v798_v58, %v805_v11  ;;  %1298 = vst.msk [vmem:[#allocation2 + $0x81] sm:$0xff] %vm811_vm2, %v1245_v18  ;;  %1302 = vst.msk [vmem:[#allocation2 + $0xa9] sm:$0xff] %vm811_vm2, %v1245_v18  ;;  %v1004_v45 = vrot.slane %v982_v28, %v4051_v24  ;;  %v1012_v59 = vcombine.high %v990_v29, %v990_v29  ;;  %v1897_v46 = vsel %vm1621_vm0, %v4016_v3, 0  ;;  %v1577_v3 = vld [vmem:[#allocation2 + $0x39] sm:$0xff] }
  0x4d   : > { %814 = vst.msk [vmem:[#allocation2 + $0x11] sm:$0xff] %vm811_vm2, %v789_v17  ;;  %v1115_v44 = vrot.slane %v990_v29, %v4059_v34  ;;  %v1011_v60 = vrot.slane %v983_v33, %v4051_v24  ;;  %v1013_v62 = vcombine.high %v997_v43, %v997_v43  ;;  %v1131_v63 = vrot.slane %v997_v43, %v4059_v34  ;;  %v1551_v33 = vld [vmem:[#allocation2 + $0x30] sm:$0xff] }
  0x4e   : > { %815 = vst.msk [vmem:[#allocation2 + $0x19] sm:$0xff] %vm811_vm2, %v806_v22  ;;  %v1014_v0 = vcombine.high %v1004_v45, %v1004_v45  ;;  %v1119_v1 = vrot.slane %v1004_v45, %v4059_v34  ;;  %v1123_v2 = vrot.slane %v1012_v59, %v4059_v34  ;;  %v4301_v39 = vpack.c.bf16 %v1576_v36, %v1575_v13  ;;  %v1550_v22 = vld [vmem:[#allocation2 + $0x28] sm:$0xff] }
  0x4f   : > { %v1571_v4 = vld [vmem:[#allocation2 + $0x1] sm:$0xff]  ;;  %v1015_v5 = vcombine.high %v1011_v60, %v1011_v60  ;;  %v1135_v6 = vrot.slane %v1011_v60, %v4059_v34  ;;  %v1139_v7 = vrot.slane %v1013_v62, %v4059_v34  ;;  %v544_v50 = vmul.f32 %v3572_v40, %v4039_v10  ;;  %v1851_v62 = vld [vmem:[#allocation2 + $0x32] sm:$0xff] }
  0x50   : > { %v1127_v42 = vrot.slane %v1014_v0, %v4059_v34  ;;  %v1246_v52 = vcombine.low %v1115_v44, %v1119_v1  ;;  %v3573_v55 = vunpack.c.h.bf16 %v3571_v51  ;;  %v559_v16 = vstv %s558_s23  ;;  %v1546_v45 = vld [vmem:[#allocation2] sm:$0xff]  ;;  %v1850_v44 = vld [vmem:[#allocation2 + $0x2a] sm:$0xff] }
  0x51   : > { %v1572_v8 = vld [vmem:[#allocation2 + $0x9] sm:$0xff]  ;;  %v1143_v9 = vrot.slane %v1015_v5, %v4059_v34  ;;  %v1263_v12 = vcombine.low %v1131_v63, %v1135_v6  ;;  %v546_v57 = vadd.f32 %v4045_v19, %v544_v50  ;;  %v4323_v18 = vpack.c.bf16 %v1578_v56, %v1577_v3  ;;  %v1852_v63 = vld [vmem:[#allocation2 + $0x3a] sm:$0xff] }
  0x52   : > { %v1587_v14 = vpack.c.bf16 %v1572_v8, %v1571_v4  ;;  %v1583_v15 = vld [vmem:[#allocation2 + $0x79] sm:$0xff]  ;;  %v1247_v20 = vcombine.low %v1123_v2, %v1127_v42  ;;  %v1254_v21 = vrot.slane %v1246_v52, %v4061_v35  ;;  %v1846_v58 = vld [vmem:[#allocation2 + $0x2] sm:$0xff]  ;;  %v545_v23 = vmul.f32 %v3573_v55, %v4039_v10 }
  0x53   : > { %v1584_v26 = vld [vmem:[#allocation2 + $0x81] sm:$0xff]  ;;  %v1264_v27 = vcombine.low %v1139_v7, %v1143_v9  ;;  %v1271_v31 = vrot.slane %v1263_v12, %v4061_v35  ;;  %v548_v17 = vmax.f32 %v546_v57, 0.0  ;;  %v1854_v4 = vld [vmem:[#allocation2 + $0x52] sm:$0xff] }
  0x54   : > { %v1573_v25 = vld [vmem:[#allocation2 + $0x11] sm:$0xff]  ;;  %3658 = vmatprep.mubr.msk.bf16.mxu0 %vm811_vm2, %v1587_v14  ;;  %v4298_v37 = vpack.c.bf16 %v1584_v26, %v1583_v15  ;;  %v1261_v38 = vrot.slane %v1247_v20, %v4061_v35  ;;  %v547_v28 = vadd.f32 %v4045_v19, %v545_v23  ;;  %v1547_v59 = vld [vmem:[#allocation2 + $0x8] sm:$0xff]  ;;  %v2229_v19 = vsel %vm1621_vm0, %v3470_v49, 0  ;;  %v1855_v5 = vld [vmem:[#allocation2 + $0x5a] sm:$0xff] }
  0x55   : > { %v1574_v32 = vld [vmem:[#allocation2 + $0x19] sm:$0xff]  ;;  %v1278_v47 = vrot.slane %v1264_v27, %v4061_v35  ;;  %v1847_v11 = vld [vmem:[#allocation2 + $0xa] sm:$0xff]  ;;  %v560_v43 = vmul.f32 %v559_v16, %v548_v17  ;;  %v1853_v0 = vld [vmem:[#allocation2 + $0x42] sm:$0xff]  ;;  %v1562_v51 = vpack.c.bf16 %v1547_v59, %v1546_v45  ;;  %v4335_v15 = vpack.c.bf16 %v1551_v33, %v1550_v22 }
  0x56   : > { %v1588_v41 = vpack.c.bf16 %v1574_v32, %v1573_v25  ;;  %3670 = vmatprep.mubr.msk.bf16.mxu1 %vm811_vm2, %v4298_v37  ;;  %v1262_v48 = vcombine.low %v1254_v21, %v1261_v38  ;;  %v1862_v29 = vpack.c.bf16 %v1847_v11, %v1846_v58  ;;  %v549_v60 = vmax.f32 %v547_v28, 0.0  ;;  %v1848_v42 = vld [vmem:[#allocation2 + $0x12] sm:$0xff]  ;;  %v1849_v52 = vld [vmem:[#allocation2 + $0x1a] sm:$0xff] }
  0x57   : > { %v1279_v54 = vcombine.low %v1271_v31, %v1278_v47  ;;  %v1307_v1 = vcombine.high %v560_v43, %v560_v43  ;;  %v1314_v2 = vrot.slane %v560_v43, %v4051_v24  ;;  %v1548_v36 = vld [vmem:[#allocation2 + $0x10] sm:$0xff]  ;;  %v1549_v14 = vld [vmem:[#allocation2 + $0x18] sm:$0xff]  ;;  %v4337_v20 = vpack.c.bf16 %v1851_v62, %v1850_v44 }
  0x58   : > { %3659 = vmatmul.mubr.msk.bf16.vlgmr.msra.gmra.mxu0 %vm811_vm2, %v1588_v41  ;;  %1299 = vst.msk [vmem:[#allocation2 + $0x89] sm:$0xff] %vm811_vm2, %v1262_v48  ;;  %1303 = vst.msk [vmem:[#allocation2 + $0xb1] sm:$0xff] %vm811_vm2, %v1262_v48  ;;  %v561_v6 = vmul.f32 %v559_v16, %v549_v60  ;;  %v4339_v21 = vpack.c.bf16 %v1853_v0, %v1852_v63  ;;  %v4341_v25 = vpack.c.bf16 %v1855_v5, %v1854_v4  ;;  %v4357_v56 = vld [vmem:[%s4871_s3 + $0x18] sm:$0xf] }
  0x59   : > { %3693 = vmatpush3.bf16.msra.mxu0 %v1897_v46  ;;  %3662 = vmatprep.mubr.msk.bf16.mxu0 %vm811_vm2, %v4301_v39  ;;  %1300 = vst.msk [vmem:[#allocation2 + $0x91] sm:$0xff] %vm811_vm2, %v1279_v54  ;;  %1304 = vst.msk [vmem:[#allocation2 + $0xb9] sm:$0xff] %vm811_vm2, %v1279_v54  ;;  %v1321_v8 = vrot.slane %v1307_v1, %v4051_v24  ;;  %v1322_v9 = vcombine.high %v1314_v2, %v1314_v2  ;;  %v2063_v22 = vsel %vm1621_vm0, %v4209_v61, 0  ;;  %v4378_v61 = vld [vmem:[%s4871_s3 + $0x14] sm:$0xf] }
  0x5a   : > { %3825 = vmatprep.subr.msk.bf16.mxu0 %vm1621_vm0, %v3470_v49  ;;  %v1330_v12 = vrot.slane %v1314_v2, %v4051_v24  ;;  %v1356_v31 = vcombine.high %v561_v6, %v561_v6  ;;  %v1863_v32 = vpack.c.bf16 %v1849_v52, %v1848_v42  ;;  %v1363_v41 = vrot.slane %v561_v6, %v4051_v24  ;;  %v1552_v6 = vld [vmem:[#allocation2 + $0x38] sm:$0xff]  ;;  %v1554_v52 = vld [vmem:[#allocation2 + $0x50] sm:$0xff] }
  0x5b   : > { %v1323_v26 = vcombine.high %v1321_v8, %v1321_v8  ;;  %v1337_v27 = vrot.slane %v1321_v8, %v4051_v24  ;;  %v1344_v38 = vrot.slane %v1322_v9, %v4051_v24  ;;  %v1563_v46 = vpack.c.bf16 %v1549_v14, %v1548_v36  ;;  %v1555_v8 = vld [vmem:[#allocation2 + $0x58] sm:$0xff] }
  0x5c   : > { %v1352_v40 = vcombine.high %v1330_v12, %v1330_v12  ;;  %v1408_v49 = vrot.slane %v1330_v12, %v4059_v34  ;;  %v1370_v16 = vrot.slane %v1356_v31, %v4051_v24  ;;  %v1371_v28 = vcombine.high %v1363_v41, %v1363_v41 }
  0x5d   : > { %v1351_v47 = vrot.slane %v1323_v26, %v4051_v24  ;;  %v1353_v48 = vcombine.high %v1337_v27, %v1337_v27  ;;  %v1354_v50 = vcombine.high %v1344_v38, %v1344_v38  ;;  %v1412_v54 = vrot.slane %v1344_v38, %v4059_v34 }
  0x5e   : > { %v1416_v55 = vrot.slane %v1352_v40, %v4059_v34  ;;  %v1424_v3 = vrot.slane %v1337_v27, %v4059_v34  ;;  %v1372_v45 = vcombine.high %v1370_v16, %v1370_v16  ;;  %v1386_v60 = vrot.slane %v1370_v16, %v4051_v24 }
  0x5f   : > { %v1585_v10 = vld [vmem:[#allocation2 + $0x89] sm:$0xff]  ;;  %v1355_v57 = vcombine.high %v1351_v47, %v1351_v47  ;;  %v1428_v58 = vrot.slane %v1351_v47, %v4059_v34  ;;  %v1432_v11 = vrot.slane %v1353_v48, %v4059_v34  ;;  %v1420_v23 = vrot.slane %v1354_v50, %v4059_v34 }
  0x60   : > { %3663 = vmatmul.mubr.msk.bf16.gmra.mxu0 %vm811_vm2, %v4323_v18  ;;  %v1586_v7 = vld [vmem:[#allocation2 + $0x91] sm:$0xff]  ;;  %v1469_v17 = vcombine.low %v1408_v49, %v1412_v54  ;;  %v1393_v62 = vrot.slane %v1371_v28, %v4051_v24  ;;  %v1400_v1 = vrot.slane %v1372_v45, %v4051_v24  ;;  %v1456_v14 = vrot.slane %v1386_v60, %v4059_v34  ;;  %v1856_v47 = vld [vmem:[#allocation2 + $0x62] sm:$0xff] }
  0x61   : > { %3694 = vmatprep.mubr.msk.bf16.mxu0 %vm811_vm2, %v1862_v29  ;;  %v4333_v13 = vpack.c.bf16 %v1586_v7, %v1585_v10  ;;  %v1379_v29 = vrot.slane %v1363_v41, %v4051_v24  ;;  %v1436_v33 = vrot.slane %v1355_v57, %v4059_v34  ;;  %v1486_v43 = vcombine.low %v1424_v3, %v1428_v58  ;;  %v1553_v7 = vld [vmem:[#allocation2 + $0x40] sm:$0xff]  ;;  %v1857_v48 = vld [vmem:[#allocation2 + $0x6a] sm:$0xff] }
  0x62   : > { %v1470_v59 = vcombine.low %v1416_v55, %v1420_v23  ;;  %v1477_v44 = vrot.slane %v1469_v17, %v4061_v35  ;;  %v1403_v4 = vcombine.high %v1393_v62, %v1393_v62  ;;  %v1404_v42 = vcombine.high %v1400_v1, %v1400_v1  ;;  %v1859_v54 = vld [vmem:[#allocation2 + $0x82] sm:$0xff]  ;;  %v1860_v45 = vld [vmem:[#allocation2 + $0x8a] sm:$0xff] }
  0x63   : > { %3671 = vmatmul.mubr.msk.bf16.gmra.mxu1 %vm811_vm2, %v4333_v13  ;;  %v1487_v63 = vcombine.low %v1432_v11, %v1436_v33  ;;  %v1494_v0 = vrot.slane %v1486_v43, %v4061_v35  ;;  %v1401_v2 = vcombine.high %v1379_v29, %v1379_v29  ;;  %v1440_v5 = vrot.slane %v1379_v29, %v4059_v34  ;;  %v1556_v23 = vld [vmem:[#allocation2 + $0x60] sm:$0xff]  ;;  %v1557_v17 = vld [vmem:[#allocation2 + $0x68] sm:$0xff] }
  0x64   : > { %3676 = vmatprep.mubr.msk.bf16.mxu1 %vm811_vm2, %v1562_v51  ;;  %v1484_v10 = vrot.slane %v1470_v59, %v4061_v35  ;;  %v1444_v24 = vrot.slane %v1393_v62, %v4059_v34  ;;  %v1452_v36 = vrot.slane %v1403_v4, %v4059_v34  ;;  %v1460_v27 = vrot.slane %v1400_v1, %v4059_v34  ;;  %v1559_v33 = vld [vmem:[#allocation2 + $0x80] sm:$0xff]  ;;  %v1861_v59 = vld [vmem:[#allocation2 + $0x92] sm:$0xff] }
  0x65   : > { %v1501_v51 = vrot.slane %v1487_v63, %v4061_v35  ;;  %v1448_v12 = vrot.slane %v1401_v2, %v4059_v34  ;;  %v1565_v38 = vpack.c.bf16 %v1553_v7, %v1552_v6  ;;  %v4410_v11 = vpack.c.bf16 %v1857_v48, %v1856_v47  ;;  %v1561_v62 = vld [vmem:[#allocation2 + $0x90] sm:$0xff]  ;;  %v3506_v1 = vld [vmem:[%s4871_s3 + $0x20] sm:$0xf]  ;;  %v2025_v2 = vld [vmem:[#allocation2 + $0xa8] sm:$0xff] }
  0x66   : > { %v1485_v9 = vcombine.low %v1477_v44, %v1484_v10  ;;  %v1503_v40 = vcombine.low %v1440_v5, %v1444_v24  ;;  %v1520_v49 = vcombine.low %v1456_v14, %v1460_v27  ;;  %v4423_v44 = vpack.c.bf16 %v1861_v59, %v1860_v45  ;;  %v2026_v5 = vld [vmem:[#allocation2 + $0xb0] sm:$0xff]  ;;  %v2027_v6 = vld [vmem:[#allocation2 + $0xb8] sm:$0xff] }
  0x67   : > { %v1502_v26 = vcombine.low %v1494_v0, %v1501_v51  ;;  %v1504_v41 = vcombine.low %v1448_v12, %v1452_v36  ;;  %v2562_v0 = vsel %vm1621_vm0, %v4357_v56, 0  ;;  %v2035_v7 = vpack.c.bf16 %v2027_v6, %v2026_v5  ;;  %v2359_v27 = vld [vmem:[#allocation2 + $0xba] sm:$0xff] }
  0x68   : > { %3695 = vmatmul.mubr.msk.bf16.vlgmr.msra.gmra.mxu0 %vm811_vm2, %v1863_v32  ;;  %v1468_v32 = vrot.slane %v1404_v42, %v4059_v34  ;;  %1542 = vst.msk [vmem:[#allocation2 + $0xc9] sm:$0xff] %vm811_vm2, %v1485_v9  ;;  %v1511_v55 = vrot.slane %v1503_v40, %v4061_v35  ;;  %v1528_v57 = vrot.slane %v1520_v49, %v4061_v35  ;;  %v2894_v51 = vsel %vm1621_vm0, %v3506_v1, 0  ;;  %v2357_v9 = vld [vmem:[#allocation2 + $0xaa] sm:$0xff] }
  0x69   : > { %3729 = vmatpush3.bf16.msra.mxu0 %v2229_v19  ;;  %3698 = vmatprep.mubr.msk.bf16.mxu0 %vm811_vm2, %v4337_v20  ;;  %v1402_v19 = vcombine.high %v1386_v60, %v1386_v60  ;;  %1543 = vst.msk [vmem:[#allocation2 + $0xd1] sm:$0xff] %vm811_vm2, %v1502_v26  ;;  %v1518_v3 = vrot.slane %v1504_v41, %v4061_v35  ;;  %v1560_v60 = vld [vmem:[#allocation2 + $0x88] sm:$0xff]  ;;  %v2358_v26 = vld [vmem:[#allocation2 + $0xb2] sm:$0xff] }
  0x6a   : > { %3827 = vmatprep.subr.msk.bf16.mxu0 %vm1621_vm0, %v4357_v56  ;;  %v1569_v63 = vpack.c.bf16 %v1561_v62, %v1560_v60  ;;  %v2679_v41 = vld [vmem:[#allocation2 + $0x61] sm:$0xff] }
  0x6b   : > { %3677 = vmatmul.mubr.msk.bf16.vlgmr.msra.gmra.mxu1 %vm811_vm2, %v1563_v46  ;;  %v1464_v31 = vrot.slane %v1402_v19, %v4059_v34  ;;  %v4400_v46 = vpack.c.bf16 %v1555_v8, %v1554_v52  ;;  %v1858_v34 = vld [vmem:[#allocation2 + $0x7a] sm:$0xff]  ;;  %v1519_v16 = vcombine.low %v1511_v55, %v1518_v3  ;;  %v2356_v8 = vld [vmem:[#allocation2 + $0xa2] sm:$0xff] }
  0x6c   : > { %3711 = vmatpush3.bf16.msra.mxu1 %v2063_v22  ;;  %3680 = vmatprep.mubr.msk.bf16.mxu1 %vm811_vm2, %v4335_v15  ;;  %v4414_v28 = vpack.c.bf16 %v1859_v54, %v1858_v34  ;;  %v1558_v22 = vld [vmem:[#allocation2 + $0x78] sm:$0xff] }
  0x6d   : > { %3826 = vmatprep.subr.msk.bf16.mxu1 %vm1621_vm0, %v4378_v61  ;;  %v1521_v50 = vcombine.low %v1464_v31, %v1468_v32  ;;  %1544 = vst.msk [vmem:[#allocation2 + $0xd9] sm:$0xff] %vm811_vm2, %v1519_v16  ;;  %v1568_v43 = vpack.c.bf16 %v1559_v33, %v1558_v22  ;;  %v2193_v19 = vld [vmem:[#allocation2 + $0xb9] sm:$0xff]  ;;  %v2677_v31 = vld [vmem:[#allocation2 + $0x51] sm:$0xff] }
  0x6e   : > { %v2678_v32 = vld [vmem:[#allocation2 + $0x59] sm:$0xff] }
  0x6f   : > { %v1535_v58 = vrot.slane %v1521_v50, %v4061_v35  ;;  %v1567_v35 = vpack.c.bf16 %v1557_v17, %v1556_v23  ;;  %v2693_v40 = vpack.c.bf16 %v2678_v32, %v2677_v31  ;;  %v2689_v50 = vld [vmem:[#allocation2 + $0xc9] sm:$0xff] }
  0x70   : > { %3699 = vmatmul.mubr.msk.bf16.gmra.mxu0 %vm811_vm2, %v4339_v21  ;;  %v2524_v24 = vld [vmem:[#allocation2 + $0xd0] sm:$0xff] }
  0x71   : > { %3702 = vmatprep.mubr.msk.bf16.mxu0 %vm811_vm2, %v4341_v25  ;;  %v1536_v29 = vcombine.low %v1528_v57, %v1535_v58  ;;  %v2690_v34 = vld [vmem:[#allocation2 + $0xd1] sm:$0xff] }
  0x72   : > { %v2699_v54 = vpack.c.bf16 %v2690_v34, %v2689_v50 }
  0x73   : > { %3681 = vmatmul.mubr.msk.bf16.gmra.mxu1 %vm811_vm2, %v1565_v38  ;;  %1545 = vst.msk [vmem:[#allocation2 + $0xe1] sm:$0xff] %vm811_vm2, %v1536_v29 }
  0x74   : > { %3684 = vmatprep.mubr.msk.bf16.mxu1 %vm811_vm2, %v4400_v46  ;;  %v2525_v12 = vld [vmem:[#allocation2 + $0xd8] sm:$0xff] }
  0x75   : > { %v2856_v48 = vld [vmem:[#allocation2 + $0xd2] sm:$0xff] }
  0x78   : > { %3703 = vmatmul.mubr.msk.bf16.gmra.mxu0 %vm811_vm2, %v4410_v11 }
  0x79   : > { %3706 = vmatprep.mubr.msk.bf16.mxu0 %vm811_vm2, %v4414_v28 }
  0x7a   : > { %v2526_v36 = vld [vmem:[#allocation2 + $0xe0] sm:$0xff] }
  0x7b   : > { %3685 = vmatmul.mubr.msk.bf16.gmra.mxu1 %vm811_vm2, %v1567_v35  ;;  %v2534_v14 = vpack.c.bf16 %v2526_v36, %v2525_v12  ;;  %v2858_v55 = vld [vmem:[#allocation2 + $0xe2] sm:$0xff] }
  0x7c   : > { %3688 = vmatprep.mubr.msk.bf16.mxu1 %vm811_vm2, %v1568_v43  ;;  %v2692_v57 = vld [vmem:[#allocation2 + $0xe1] sm:$0xff] }
  0x80   : > { %3707 = vmatmul.mubr.msk.bf16.gmra.mxu0 %vm811_vm2, %v4423_v44 }
  0x81   : > { %3730 = vmatprep.mubr.msk.bf16.mxu0 %vm811_vm2, %v4301_v39  ;;  %v2395_v39 = vsel %vm1621_vm0, %v4378_v61, 0  ;;  %v2024_v61 = vld [vmem:[#allocation2 + $0xa0] sm:$0xff] }
  0x82   : > { %v2034_v10 = vpack.c.bf16 %v2025_v2, %v2024_v61 }
  0x83   : > { %3689 = vmatmul.mubr.msk.bf16.gmra.mxu1 %vm811_vm2, %v1569_v63 }
  0x84   : > { %3712 = vmatprep.mubr.msk.bf16.mxu1 %vm811_vm2, %v4335_v15  ;;  %v3497_v15 = vld [vmem:[%s4871_s3 + $0x1c] sm:$0xf] }
  0x85   : > { %v2728_v42 = vsel %vm1621_vm0, %v3497_v15, 0 }
  0x88   : > { %3731 = vmatmul.mubr.msk.bf16.vlgmr.msra.gmra.mxu0 %vm811_vm2, %v4323_v18  ;;  %v2191_v18 = vld [vmem:[#allocation2 + $0xa9] sm:$0xff] }
  0x89   : > { %3765 = vmatpush3.bf16.msra.mxu0 %v2562_v0  ;;  %3734 = vmatprep.mubr.msk.bf16.mxu0 %vm811_vm2, %v4182_v30  ;;  %v2190_v30 = vld [vmem:[#allocation2 + $0xa1] sm:$0xff] }
  0x8a   : > { %3829 = vmatprep.subr.msk.bf16.mxu0 %vm1621_vm0, %v3506_v1  ;;  %v4458_v56 = vpack.c.bf16 %v2191_v18, %v2190_v30 }
  0x8b   : > { %3713 = vmatmul.mubr.msk.bf16.vlgmr.msra.gmra.mxu1 %vm811_vm2, %v1565_v38  ;;  %v2367_v38 = vpack.c.bf16 %v2359_v27, %v2358_v26 }
  0x8c   : > { %3747 = vmatpush3.bf16.msra.mxu1 %v2395_v39  ;;  %3716 = vmatprep.mubr.msk.bf16.mxu1 %vm811_vm2, %v4400_v46 }
  0x8d   : > { %3828 = vmatprep.subr.msk.bf16.mxu1 %vm1621_vm0, %v3497_v15 }
  0x90   : > { %3735 = vmatmul.mubr.msk.bf16.gmra.mxu0 %vm811_vm2, %v4200_v53  ;;  %v2192_v53 = vld [vmem:[#allocation2 + $0xb1] sm:$0xff] }
  0x91   : > { %3738 = vmatprep.mubr.msk.bf16.mxu0 %vm811_vm2, %v4298_v37  ;;  %v4465_v4 = vpack.c.bf16 %v2193_v19, %v2192_v53 }
  0x93   : > { %3717 = vmatmul.mubr.msk.bf16.gmra.mxu1 %vm811_vm2, %v1567_v35 }
  0x94   : > { %3720 = vmatprep.mubr.msk.bf16.mxu1 %vm811_vm2, %v1568_v43 }
  0x98   : > { %3739 = vmatmul.mubr.msk.bf16.gmra.mxu0 %vm811_vm2, %v4333_v13 }
  0x99   : > { %3742 = vmatprep.mubr.msk.bf16.mxu0 %vm811_vm2, %v4458_v56 }
  0x9b   : > { %3721 = vmatmul.mubr.msk.bf16.gmra.mxu1 %vm811_vm2, %v1569_v63 }
  0x9c   : > { %3724 = vmatprep.mubr.msk.bf16.mxu1 %vm811_vm2, %v2034_v10 }
  0xa0   : > { %3743 = vmatmul.mubr.msk.bf16.gmra.mxu0 %vm811_vm2, %v4465_v4 }
  0xa1   : > { %3766 = vmatprep.mubr.msk.bf16.mxu0 %vm811_vm2, %v4400_v46  ;;  %v2680_v46 = vld [vmem:[#allocation2 + $0x69] sm:$0xff] }
  0xa2   : > { %v2694_v47 = vpack.c.bf16 %v2680_v46, %v2679_v41 }
  0xa3   : > { %3725 = vmatmul.mubr.msk.bf16.gmra.mxu1 %vm811_vm2, %v2035_v7 }
  0xa4   : > { %3748 = vmatprep.mubr.msk.bf16.mxu1 %vm811_vm2, %v4337_v20  ;;  %v2523_v20 = vld [vmem:[#allocation2 + $0xc8] sm:$0xff] }
  0xa5   : > { %v2533_v52 = vpack.c.bf16 %v2524_v24, %v2523_v20 }
  0xa8   : > { %3767 = vmatmul.mubr.msk.bf16.vlgmr.msra.gmra.mxu0 %vm811_vm2, %v1567_v35 }
  0xa9   : > { %3801 = vmatpush3.bf16.msra.mxu0 %v2894_v51  ;;  %3770 = vmatprep.mubr.msk.bf16.mxu0 %vm811_vm2, %v1568_v43 }
  0xab   : > { %3749 = vmatmul.mubr.msk.bf16.vlgmr.msra.gmra.mxu1 %vm811_vm2, %v4339_v21  ;;  %v2366_v21 = vpack.c.bf16 %v2357_v9, %v2356_v8 }
  0xac   : > { %3783 = vmatpush3.bf16.msra.mxu1 %v2728_v42  ;;  %3752 = vmatprep.mubr.msk.bf16.mxu1 %vm811_vm2, %v4341_v25 }
  0xb0   : > { %3771 = vmatmul.mubr.msk.bf16.gmra.mxu0 %vm811_vm2, %v1569_v63 }
  0xb1   : > { %3774 = vmatprep.mubr.msk.bf16.mxu0 %vm811_vm2, %v2034_v10 }
  0xb3   : > { %3753 = vmatmul.mubr.msk.bf16.gmra.mxu1 %vm811_vm2, %v4410_v11 }
  0xb4   : > { %3756 = vmatprep.mubr.msk.bf16.mxu1 %vm811_vm2, %v4414_v28 }
  0xb8   : > { %3775 = vmatmul.mubr.msk.bf16.gmra.mxu0 %vm811_vm2, %v2035_v7 }
  0xb9   : > { %3778 = vmatprep.mubr.msk.bf16.mxu0 %vm811_vm2, %v2533_v52 }
  0xbb   : > { %3757 = vmatmul.mubr.msk.bf16.gmra.mxu1 %vm811_vm2, %v4423_v44 }
  0xbc   : > { %3760 = vmatprep.mubr.msk.bf16.mxu1 %vm811_vm2, %v2366_v21 }
  0xc0   : > { %3779 = vmatmul.mubr.msk.bf16.gmra.mxu0 %vm811_vm2, %v2534_v14 }
  0xc1   : > { %3802 = vmatprep.mubr.msk.bf16.mxu0 %vm811_vm2, %v4341_v25  ;;  %v2855_v25 = vld [vmem:[#allocation2 + $0xca] sm:$0xff] }
  0xc2   : > { %v2865_v49 = vpack.c.bf16 %v2856_v48, %v2855_v25 }
  0xc3   : > { %3761 = vmatmul.mubr.msk.bf16.gmra.mxu1 %vm811_vm2, %v2367_v38 }
  0xc4   : > { %3784 = vmatprep.mubr.msk.bf16.mxu1 %vm811_vm2, %v2693_v40 }
  0xc8   : > { %3803 = vmatmul.mubr.msk.bf16.vlgmr.msra.gmra.mxu0 %vm811_vm2, %v4410_v11 }
  0xc9   : > { %3806 = vmatprep.mubr.msk.bf16.mxu0 %vm811_vm2, %v4414_v28 }
  0xcb   : > { %3785 = vmatmul.mubr.msk.bf16.vlgmr.msra.gmra.mxu1 %vm811_vm2, %v2694_v47 }
  0xcc   : > { %3788 = vmatprep.mubr.msk.bf16.mxu1 %vm811_vm2, %v4298_v37  ;;  %v2857_v37 = vld [vmem:[#allocation2 + $0xda] sm:$0xff] }
  0xcd   : > { %v2866_v3 = vpack.c.bf16 %v2858_v55, %v2857_v37 }
  0xd0   : > { %3807 = vmatmul.mubr.msk.bf16.gmra.mxu0 %vm811_vm2, %v4423_v44 }
  0xd1   : > { %3810 = vmatprep.mubr.msk.bf16.mxu0 %vm811_vm2, %v2366_v21 }
  0xd3   : > { %3789 = vmatmul.mubr.msk.bf16.gmra.mxu1 %vm811_vm2, %v4333_v13  ;;  %v2691_v13 = vld [vmem:[#allocation2 + $0xd9] sm:$0xff] }
  0xd4   : > { %3792 = vmatprep.mubr.msk.bf16.mxu1 %vm811_vm2, %v4458_v56  ;;  %v2700_v58 = vpack.c.bf16 %v2692_v57, %v2691_v13 }
  0xd8   : > { %3811 = vmatmul.mubr.msk.bf16.gmra.mxu0 %vm811_vm2, %v2367_v38 }
  0xd9   : > { %3814 = vmatprep.mubr.msk.bf16.mxu0 %vm811_vm2, %v2865_v49 }
  0xdb   : > { %3793 = vmatmul.mubr.msk.bf16.gmra.mxu1 %vm811_vm2, %v4465_v4 }
  0xdc   : > { %3796 = vmatprep.mubr.msk.bf16.mxu1 %vm811_vm2, %v2699_v54 }
  0xe0   : > { %3815 = vmatmul.mubr.msk.bf16.gmra.mxu0 %vm811_vm2, %v2866_v3 }
  0xe3   : > { %3797 = vmatmul.mubr.msk.bf16.gmra.mxu1 %vm811_vm2, %v2700_v58 }
  0xff   : > { %v3668_v11 = vpop.f32.mrf.mxu1 }
 0x101   : > { %v1691_v16 = vpop.f32.mrf.mxu1 }
 0x103   : > { %v3669_v28 = vpop.f32.mrf.mxu1 }
 0x105   : > { %v1694_v33 = vpop.f32.mrf.mxu1 }
 0x118   : > { %v3660_v23 = vpop.f32.mrf.mxu0 }
 0x11a   : > { %v1659_v17 = vpop.f32.mrf.mxu0 }
 0x11c   : > { %v3661_v29 = vpop.f32.mrf.mxu0 }
 0x11e   : > { %v1662_v22 = vpop.f32.mrf.mxu0 }
 0x120   : > { %v3664_v35 = vpop.f32.mrf.mxu0 }
 0x122   : > { %v1675_v43 = vpop.f32.mrf.mxu0 }
 0x123   : > { %v3672_v45 = vpop.f32.mrf.mxu1 }
 0x124   : > { %v3665_v59 = vpop.f32.mrf.mxu0 }
 0x125   : > { %v1707_v44 = vpop.f32.mrf.mxu1 }
 0x126   : > { %v1678_v60 = vpop.f32.mrf.mxu0 }
 0x127   : > { %v3673_v62 = vpop.f32.mrf.mxu1 }
 0x128   : > { %v3696_v63 = vpop.f32.mrf.mxu0 }
 0x129   : > { %v4520_v0 = vpop.f32.mrf.mxu1 }
 0x12a   : > { %v1933_v1 = vpop.f32.mrf.mxu0 }
 0x12b   : > { %v3678_v39 = vpop.f32.mrf.mxu1 }
 0x12c   : > { %v3697_v15 = vpop.f32.mrf.mxu0  ;;  %v1792_v30 = vadd.f32 %v3678_v39, %v3660_v23 }
 0x12d   : > { %v1783_v18 = vpop.f32.mrf.mxu1 }
 0x12e   : > { %v1936_v56 = vpop.f32.mrf.mxu0  ;;  %v1784_v61 = vadd.f32 %v1783_v18, %v1659_v17  ;;  %v4522_v2 = vadd.f32 %v3696_v63, %v1792_v30 }
 0x12f   : > { %v3679_v10 = vpop.f32.mrf.mxu1 }
 0x130   : > { %v3700_v53 = vpop.f32.mrf.mxu0  ;;  %v1795_v19 = vadd.f32 %v3679_v10, %v3661_v29  ;;  %v4524_v4 = vadd.f32 %v1933_v1, %v1784_v61 }
 0x131   : > { %v1786_v5 = vpop.f32.mrf.mxu1 }
 0x132   : > { %v1949_v6 = vpop.f32.mrf.mxu0  ;;  %v1787_v7 = vadd.f32 %v1786_v5, %v1662_v22  ;;  %v4526_v51 = vadd.f32 %v3697_v15, %v1795_v19 }
 0x133   : > { %v3682_v42 = vpop.f32.mrf.mxu1 }
 0x134   : > { %v3701_v20 = vpop.f32.mrf.mxu0  ;;  %v1808_v24 = vadd.f32 %v3682_v42, %v3664_v35  ;;  %v4528_v52 = vadd.f32 %v1936_v56, %v1787_v7 }
 0x135   : > { %v1799_v8 = vpop.f32.mrf.mxu1 }
 0x136   : > { %v1952_v9 = vpop.f32.mrf.mxu0  ;;  %v1800_v21 = vadd.f32 %v1799_v8, %v1675_v43  ;;  %v4530_v12 = vadd.f32 %v3700_v53, %v1808_v24 }
 0x137   : > { %v3683_v36 = vpop.f32.mrf.mxu1 }
 0x138   : > { %v3704_v14 = vpop.f32.mrf.mxu0  ;;  %v1811_v26 = vadd.f32 %v3683_v36, %v3665_v59  ;;  %v4532_v27 = vadd.f32 %v1949_v6, %v1800_v21 }
 0x139   : > { %v1802_v31 = vpop.f32.mrf.mxu1 }
 0x13a   : > { %v1965_v32 = vpop.f32.mrf.mxu0  ;;  %v1803_v38 = vadd.f32 %v1802_v31, %v1678_v60  ;;  %v4534_v40 = vadd.f32 %v3701_v20, %v1811_v26 }
 0x13b   : > { %v3686_v41 = vpop.f32.mrf.mxu1 }
 0x13c   : > { %v3705_v46 = vpop.f32.mrf.mxu0  ;;  %v1824_v47 = vadd.f32 %v3686_v41, %v3668_v11  ;;  %v4536_v25 = vadd.f32 %v1952_v9, %v1803_v38 }
 0x13d   : > { %v1815_v48 = vpop.f32.mrf.mxu1 }
 0x13e   : > { %v1968_v49 = vpop.f32.mrf.mxu0  ;;  %v1816_v50 = vadd.f32 %v1815_v48, %v1691_v16  ;;  %v4538_v34 = vadd.f32 %v3704_v14, %v1824_v47 }
 0x13f   : > { %v3687_v54 = vpop.f32.mrf.mxu1 }
 0x140   : > { %v3708_v37 = vpop.f32.mrf.mxu0  ;;  %v1827_v55 = vadd.f32 %v3687_v54, %v3669_v28  ;;  %v4540_v3 = vadd.f32 %v1965_v32, %v1816_v50 }
 0x141   : > { %v1818_v13 = vpop.f32.mrf.mxu1 }
 0x142   : > { %v1981_v57 = vpop.f32.mrf.mxu0  ;;  %v1819_v58 = vadd.f32 %v1818_v13, %v1694_v33  ;;  %v4542_v23 = vadd.f32 %v3705_v46, %v1827_v55 }
 0x143   : > { %v3690_v17 = vpop.f32.mrf.mxu1 }
 0x144   : > { %v3709_v29 = vpop.f32.mrf.mxu0  ;;  %v1840_v11 = vadd.f32 %v3690_v17, %v3672_v45  ;;  %v4544_v22 = vadd.f32 %v1968_v49, %v1819_v58 }
 0x145   : > { %v1831_v35 = vpop.f32.mrf.mxu1 }
 0x146   : > { %v1984_v43 = vpop.f32.mrf.mxu0  ;;  %v1832_v16 = vadd.f32 %v1831_v35, %v1707_v44  ;;  %v4546_v59 = vadd.f32 %v3708_v37, %v1840_v11 }
 0x147   : > { %v3691_v60 = vpop.f32.mrf.mxu1 }
 0x148   : > { %v4548_v63 = vpop.f32.mrf.mxu0  ;;  %v1843_v28 = vadd.f32 %v3691_v60, %v3673_v62  ;;  %v4550_v1 = vadd.f32 %v1981_v57, %v1832_v16 }
 0x149   : > { %v1834_v39 = vpop.f32.mrf.mxu1 }
 0x14a   : > { %v4552_v33 = vpop.f32.mrf.mxu0  ;;  %v1835_v15 = vadd.f32 %v1834_v39, %v4520_v0  ;;  %v4555_v30 = vadd.f32 %v3709_v29, %v1843_v28 }
 0x14b   : > { %v3714_v45 = vpop.f32.mrf.mxu1 }
 0x14c   : > { %v4557_v18 = vpop.f32.mrf.mxu0  ;;  %v4559_v56 = vadd.f32 %v1984_v43, %v1835_v15 }
 0x14d   : > { %v2099_v44 = vpop.f32.mrf.mxu1 }
 0x14e   : > { %v4561_v61 = vpop.f32.mrf.mxu0 }
 0x14f   : > { %v3715_v10 = vpop.f32.mrf.mxu1 }
 0x150   : > { %v4563_v53 = vpop.f32.mrf.mxu0 }
 0x151   : > { %v2102_v62 = vpop.f32.mrf.mxu1 }
 0x152   : > { %v4565_v19 = vpop.f32.mrf.mxu0 }
 0x153   : > { %v3718_v5 = vpop.f32.mrf.mxu1 }
 0x154   : > { %v4567_v6 = vpop.f32.mrf.mxu0 }
 0x155   : > { %v2115_v0 = vpop.f32.mrf.mxu1 }
 0x156   : > { %v4569_v7 = vpop.f32.mrf.mxu0 }
 0x157   : > { %v3719_v42 = vpop.f32.mrf.mxu1 }
 0x158   : > { %v4571_v20 = vpop.f32.mrf.mxu0 }
 0x159   : > { %v2118_v24 = vpop.f32.mrf.mxu1 }
 0x15a   : > { %v4573_v8 = vpop.f32.mrf.mxu0 }
 0x15b   : > { %v3722_v9 = vpop.f32.mrf.mxu1 }
 0x15c   : > { %v4575_v21 = vpop.f32.mrf.mxu0 }
 0x15d   : > { %v2131_v36 = vpop.f32.mrf.mxu1 }
 0x15e   : > { %v4577_v14 = vpop.f32.mrf.mxu0 }
 0x15f   : > { %v3723_v26 = vpop.f32.mrf.mxu1 }
 0x160   : > { %v4579_v31 = vpop.f32.mrf.mxu0 }
 0x161   : > { %v2134_v32 = vpop.f32.mrf.mxu1 }
 0x162   : > { %v4581_v38 = vpop.f32.mrf.mxu0 }
 0x163   : > { %v4583_v41 = vpop.f32.mrf.mxu1 }
 0x164   : > { %v4585_v46 = vpop.f32.mrf.mxu0 }
 0x165   : > { %v4587_v47 = vpop.f32.mrf.mxu1 }
 0x166   : > { %v4589_v48 = vpop.f32.mrf.mxu0 }
 0x167   : > { %v4591_v49 = vpop.f32.mrf.mxu1 }
 0x168   : > { %v4593_v50 = vpop.f32.mrf.mxu0 }
 0x169   : > { %v4595_v54 = vpop.f32.mrf.mxu1 }
 0x16a   : > { %v4597_v37 = vpop.f32.mrf.mxu0 }
 0x16b   : > { %4878 = vst [vmem:[#allocation3_spill] sm:$0xff] %v4597_v37  ;;  %v3750_v55 = vpop.f32.mrf.mxu1 }
 0x16c   : > { %v4599_v13 = vpop.f32.mrf.mxu0 }
 0x16d   : > { %4879 = vst [vmem:[#allocation4_spill] sm:$0xff] %v4599_v13  ;;  %v4601_v57 = vpop.f32.mrf.mxu1 }
 0x16e   : > { %v4603_v58 = vpop.f32.mrf.mxu0 }
 0x16f   : > { %4880 = vst [vmem:[#allocation5_spill] sm:$0xff] %v4603_v58  ;;  %v4605_v17 = vpop.f32.mrf.mxu1 }
 0x170   : > { %v4607_v29 = vpop.f32.mrf.mxu0 }
 0x171   : > { %4881 = vst [vmem:[#allocation6_spill] sm:$0xff] %v4607_v29  ;;  %v4609_v11 = vpop.f32.mrf.mxu1 }
 0x172   : > { %v4611_v35 = vpop.f32.mrf.mxu0 }
 0x173   : > { %4882 = vst [vmem:[#allocation7_spill] sm:$0xff] %v4611_v35  ;;  %v4613_v43 = vpop.f32.mrf.mxu1 }
 0x174   : > { %v4615_v16 = vpop.f32.mrf.mxu0 }
 0x175   : > { %4883 = vst [vmem:[#allocation8_spill] sm:$0xff] %v4615_v16  ;;  %v4617_v60 = vpop.f32.mrf.mxu1 }
 0x176   : > { %4884 = vst [vmem:[#allocation9_spill] sm:$0xff] %v4617_v60  ;;  %v4619_v28 = vpop.f32.mrf.mxu0 }
 0x177   : > { %4885 = vst [vmem:[#allocation10_spill] sm:$0xff] %v4619_v28  ;;  %v4621_v39 = vpop.f32.mrf.mxu1 }
 0x178   : > { %4886 = vst [vmem:[#allocation11_spill] sm:$0xff] %v4621_v39  ;;  %v4623_v15 = vpop.f32.mrf.mxu0 }
 0x179   : > { %4887 = vst [vmem:[#allocation12_spill] sm:$0xff] %v4623_v15  ;;  %v4625_v58 = vpop.f32.mrf.mxu1 }
 0x17a   : > { %4888 = vst [vmem:[#allocation13_spill] sm:$0xff] %v4625_v58  ;;  %v4627_v13 = vpop.f32.mrf.mxu0  ;;  %v2163_v58 = vadd.f32 %v2102_v62, %v4528_v52  ;;  %v2169_v52 = vadd.f32 %v3719_v42, %v4534_v40  ;;  %v2171_v40 = vadd.f32 %v2134_v32, %v4544_v22 }
 0x17b   : > { %4889 = vst [vmem:[#allocation14_spill] sm:$0xff] %v4627_v13  ;;  %v4629_v29 = vpop.f32.mrf.mxu1  ;;  %v2164_v13 = vadd.f32 %v3714_v45, %v4522_v2 }
 0x17c   : > { %4890 = vst [vmem:[#allocation15_spill] sm:$0xff] %v4629_v29  ;;  %v4631_v37 = vpop.f32.mrf.mxu0  ;;  %v2162_v29 = vadd.f32 %v2099_v44, %v4524_v4  ;;  %v2166_v4 = vadd.f32 %v2115_v0, %v4532_v27  ;;  %v2335_v27 = vadd.f32 %v4567_v6, %v2169_v52  ;;  %v2337_v22 = vadd.f32 %v4577_v14, %v2171_v40 }
 0x17d   : > { %4891 = vst [vmem:[#allocation16_spill] sm:$0xff] %v4631_v37  ;;  %v4634_v35 = vpop.f32.mrf.mxu1  ;;  %v2165_v37 = vadd.f32 %v3715_v10, %v4526_v51  ;;  %v2329_v51 = vadd.f32 %v4561_v61, %v2163_v58  ;;  %v2173_v61 = vadd.f32 %v3723_v26, %v4542_v23  ;;  %v2174_v23 = vadd.f32 %v4587_v47, %v4550_v1  ;;  %v4897_v26 = vld [vmem:[#allocation3_spill] sm:$0xff] }
 0x17e   : > { %4892 = vst [vmem:[#allocation17_spill] sm:$0xff] %v4634_v35  ;;  %v4636_v16 = vpop.f32.mrf.mxu0  ;;  %v2332_v10 = vadd.f32 %v4565_v19, %v2166_v4  ;;  %v2176_v19 = vadd.f32 %v4583_v41, %v4546_v59 }
 0x17f   : > { %4893 = vst [vmem:[#allocation18_spill] sm:$0xff] %v4636_v16  ;;  %v4638_v60 = vpop.f32.mrf.mxu1  ;;  %v2331_v2 = vadd.f32 %v4557_v18, %v2165_v37  ;;  %v2170_v18 = vadd.f32 %v2131_v36, %v4540_v3  ;;  %v2339_v6 = vadd.f32 %v4575_v21, %v2173_v61  ;;  %v2495_v21 = vadd.f32 %v4609_v11, %v2329_v51 }
 0x180   : > { %v4640_v28 = vpop.f32.mrf.mxu0  ;;  %v2342_v1 = vadd.f32 %v4579_v31, %v2176_v19 }
 0x181   : > { %4894 = vst [vmem:[#allocation19_spill] sm:$0xff] %v4640_v28  ;;  %v4642_v39 = vpop.f32.mrf.mxu1  ;;  %v2330_v28 = vadd.f32 %v4548_v63, %v2164_v13  ;;  %v4712_v13 = vld [vmem:[%s4872_s4] ss:$0 sm:$0xff] }
 0x182   : > { %4895 = vst [vmem:[#allocation20_spill] sm:$0xff] %v4642_v39  ;;  %v4644_v15 = vpop.f32.mrf.mxu0  ;;  %v2328_v39 = vadd.f32 %v4552_v33, %v2162_v29  ;;  %v2167_v33 = vadd.f32 %v2118_v24, %v4536_v25  ;;  %v4902_v58 = vld [vmem:[#allocation13_spill] sm:$0xff] }
 0x183   : > { %4896 = vst [vmem:[#allocation21_spill] sm:$0xff] %v4644_v15  ;;  %v4650_v35 = vpop.f32.mrf.mxu1  ;;  %v2168_v15 = vadd.f32 %v3718_v5, %v4530_v12  ;;  %v2172_v12 = vadd.f32 %v3722_v9, %v4538_v34  ;;  %v2336_v34 = vadd.f32 %v4573_v8, %v2170_v18  ;;  %v2496_v3 = vadd.f32 %v3750_v55, %v2330_v28 }
 0x184   : > { %v4652_v16 = vpop.f32.mrf.mxu0  ;;  %v2494_v24 = vadd.f32 %v4601_v57, %v2328_v39  ;;  %v2340_v8 = vadd.f32 %v4581_v38, %v2174_v23  ;;  %v2497_v9 = vadd.f32 %v4605_v17, %v2331_v2  ;;  %v4904_v39 = vld [vmem:[#allocation7_spill] sm:$0xff] }
 0x185   : > { %v4663_v45 = vpop.f32.mrf.mxu1  ;;  %v2334_v63 = vadd.f32 %v4563_v53, %v2168_v15  ;;  %v2333_v53 = vadd.f32 %v4569_v7, %v2167_v33  ;;  %v2338_v25 = vadd.f32 %v4571_v20, %v2172_v12  ;;  %v2177_v7 = vadd.f32 %v4591_v49, %v4555_v30  ;;  %v4898_v49 = vld [vmem:[#allocation4_spill] sm:$0xff]  ;;  %v4905_v2 = vld [vmem:[#allocation15_spill] sm:$0xff]  ;;  %v4906_v51 = vld [vmem:[#allocation17_spill] sm:$0xff] }
 0x186   : > { %v4665_v44 = vpop.f32.mrf.mxu0  ;;  %v2175_v20 = vadd.f32 %v4595_v54, %v4559_v56  ;;  %v2663_v59 = vadd.f32 %v4593_v50, %v2496_v3  ;;  %v2661_v32 = vadd.f32 %v4897_v26, %v2494_v24  ;;  %v2664_v31 = vadd.f32 %v4898_v49, %v2497_v9  ;;  %v4899_v50 = vld [vmem:[#allocation9_spill] sm:$0xff]  ;;  %v4907_v12 = vld [vmem:[#allocation8_spill] sm:$0xff] }
 0x187   : > { %v4675_v62 = vpop.f32.mrf.mxu1  ;;  %v2343_v14 = vadd.f32 %v4585_v46, %v2177_v7  ;;  %v2500_v47 = vadd.f32 %v4613_v43, %v2334_v63  ;;  %v2498_v38 = vadd.f32 %v4899_v50, %v2332_v10  ;;  %v4900_v54 = vld [vmem:[#allocation5_spill] sm:$0xff]  ;;  %v2499_v17 = vadd.f32 %v4902_v58, %v2333_v53  ;;  %v4903_v43 = vld [vmem:[#allocation6_spill] sm:$0xff]  ;;  %v4909_v53 = vld [vmem:[#allocation12_spill] sm:$0xff] }
 0x188   : > { %v3804_v5 = vpop.f32.mrf.mxu0  ;;  %v2341_v56 = vadd.f32 %v4589_v48, %v2175_v20  ;;  %v2662_v37 = vadd.f32 %v4900_v54, %v2495_v21  ;;  %v4901_v48 = vld [vmem:[#allocation11_spill] sm:$0xff]  ;;  %v2504_v4 = vadd.f32 %v4905_v2, %v2338_v25  ;;  %v2502_v52 = vadd.f32 %v4906_v51, %v2336_v34  ;;  %v4908_v10 = vld [vmem:[#allocation10_spill] sm:$0xff]  ;;  %v4912_v21 = vld [vmem:[#allocation16_spill] sm:$0xff] }
 0x189   : > { %v4688_v0 = vpop.f32.mrf.mxu1  ;;  %v2501_v57 = vadd.f32 %v4901_v48, %v2335_v27  ;;  %v2667_v28 = vadd.f32 %v4903_v43, %v2500_v47  ;;  %v2665_v15 = vadd.f32 %v4904_v39, %v2498_v38  ;;  %v2666_v61 = vadd.f32 %v4908_v10, %v2499_v17  ;;  %v4910_v34 = vld [vmem:[#allocation14_spill] sm:$0xff]  ;;  %v4911_v20 = vld [vmem:[#allocation20_spill] sm:$0xff] }
 0x18a   : > { %v2930_v42 = vpop.f32.mrf.mxu0  ;;  %v4731_v25 = vadd.f32 %v4909_v53, %v2504_v4  ;;  %v4734_v3 = vadd.f32 %v4910_v34, %v2502_v52  ;;  %v2503_v24 = vadd.f32 %v4911_v20, %v2337_v22  ;;  %v4913_v47 = vld [vmem:[#allocation18_spill] sm:$0xff]  ;;  %v4915_v38 = vld [vmem:[#allocation21_spill] sm:$0xff] }
 0x18b   : > { %v3786_v36 = vpop.f32.mrf.mxu1  ;;  %v2668_v18 = vadd.f32 %v4907_v12, %v2501_v57 }
 0x18c   : > { %v3805_v30 = vpop.f32.mrf.mxu0  ;;  %v2829_v41 = vadd.f32 %v3786_v36, %v2663_v59  ;;  %v4744_v49 = vadd.f32 %v4913_v47, %v2503_v24 }
 0x18d   : > { %v2764_v55 = vpop.f32.mrf.mxu1 }
 0x18e   : > { %v2933_v46 = vpop.f32.mrf.mxu0  ;;  %v2827_v29 = vadd.f32 %v2764_v55, %v2661_v32  ;;  %v2995_v11 = vadd.f32 %v3804_v5, %v2829_v41  ;;  %v2505_v5 = vadd.f32 %v4638_v60, %v2339_v6  ;;  %v2506_v60 = vadd.f32 %v4663_v45, %v2340_v8 }
 0x18f   : > { %v3787_v63 = vpop.f32.mrf.mxu1  ;;  %v4757_v55 = vadd.f32 %v4688_v0, %v2341_v56 }
 0x190   : > { %v3808_v33 = vpop.f32.mrf.mxu0  ;;  %v3018_v27 = vadd.f32 %v4712_v13, %v2995_v11  ;;  %v2993_v40 = vadd.f32 %v2930_v42, %v2827_v29  ;;  %v2830_v19 = vadd.f32 %v3787_v63, %v2664_v31  ;;  %v2508_v42 = vadd.f32 %v4650_v35, %v2342_v1  ;;  %v4914_v31 = vld [vmem:[#allocation19_spill] sm:$0xff] }
 0x191   : > { %v2767_v23 = vpop.f32.mrf.mxu1  ;;  %v4739_v36 = vadd.f32 %v4912_v21, %v2505_v5  ;;  %v2509_v1 = vadd.f32 %v4675_v62, %v2343_v14  ;;  %v4753_v45 = vadd.f32 %v4915_v38, %v2506_v60 }
 0x192   : > { %v2946_v7 = vpop.f32.mrf.mxu0  ;;  %v3544_v59 = vpack.c.bf16 %v3018_v27, %v3018_v27  ;;  %v2828_v9 = vadd.f32 %v2767_v23, %v2662_v37  ;;  %v3016_v6 = vadd.f32 %v4712_v13, %v2993_v40  ;;  %v2996_v32 = vadd.f32 %v3805_v30, %v2830_v19 }
 0x193   : > { %v3790_v26 = vpop.f32.mrf.mxu1  ;;  %v4747_v50 = vadd.f32 %v4914_v31, %v2508_v42  ;;  %v3074_v17 = vmul.f32 %v3018_v27, %v3018_v27  ;;  %v3036_v39 = vsel %vm3032_vm4, %v3018_v27, 0.0  ;;  %v4777_v24 = vadd.f32 %v4652_v16, %v2509_v1 }
 0x194   : > { %v3809_v41 = vpop.f32.mrf.mxu0  ;;  %3193 = vst.msk [vmem:[%s4727_s13 + $0x8] sm:$0xf] %vm3190_vm3, %v3544_v59  ;;  %v2833_v35 = vadd.f32 %v3790_v26, %v2667_v28  ;;  %v2994_v22 = vadd.f32 %v2933_v46, %v2828_v9  ;;  %v3542_v8 = vpack.c.bf16 %v3016_v6, %v3016_v6  ;;  %v3019_v30 = vadd.f32 %v4712_v13, %v2996_v32 }
 0x195   : > { %v2780_v54 = vpop.f32.mrf.mxu1  ;;  %v3072_v48 = vmul.f32 %v3016_v6, %v3016_v6  ;;  %v3033_v46 = vsel %vm3032_vm4, %v3016_v6, 0.0 }
 0x196   : > { %v2949_v37 = vpop.f32.mrf.mxu0  ;;  %v3017_v57 = vadd.f32 %v4712_v13, %v2994_v22  ;;  %v2999_v58 = vadd.f32 %v3808_v33, %v2833_v35  ;;  %3191 = vst.msk [vmem:[%s4727_s13] sm:$0xf] %vm3190_vm3, %v3542_v8  ;;  %v3545_v62 = vpack.c.bf16 %v3019_v30, %v3019_v30  ;;  %v2831_v14 = vadd.f32 %v2780_v54, %v2665_v15 }
 0x197   : > { %v3791_v29 = vpop.f32.mrf.mxu1  ;;  %v3088_v15 = vsel %vm3032_vm4, %v3072_v48, 0.0  ;;  %v3075_v33 = vmul.f32 %v3019_v30, %v3019_v30  ;;  %v3038_v19 = vsel %vm3032_vm4, %v3019_v30, 0.0 }
 0x198   : > { %v3812_v11 = vpop.f32.mrf.mxu0  ;;  %v3034_v43 = vsel %vm3032_vm4, %v3017_v57, 0.0  ;;  %v3073_v28 = vmul.f32 %v3017_v57, %v3017_v57  ;;  %v3543_v0 = vpack.c.bf16 %v3017_v57, %v3017_v57  ;;  %v2834_v56 = vadd.f32 %v3791_v29, %v2668_v18  ;;  %3194 = vst.msk [vmem:[%s4727_s13 + $0xc] sm:$0xf] %vm3190_vm3, %v3545_v62 }
 0x199   : > { %v3035_v2 = vadd.f32 %v3034_v43, %v3033_v46  ;;  %v3022_v4 = vadd.f32 %v4712_v13, %v2999_v58  ;;  %v2783_v51 = vpop.f32.mrf.mxu1  ;;  %v2997_v52 = vadd.f32 %v2946_v7, %v2831_v14  ;;  %v3091_v18 = vsel %vm3032_vm4, %v3074_v17, 0.0 }
 0x19a   : > { %v2962_v63 = vpop.f32.mrf.mxu0  ;;  %v3089_v12 = vsel %vm3032_vm4, %v3073_v28, 0.0  ;;  %3192 = vst.msk [vmem:[%s4727_s13 + $0x4] sm:$0xf] %vm3190_vm3, %v3543_v0  ;;  %v3000_v10 = vadd.f32 %v3809_v41, %v2834_v56  ;;  %v2832_v5 = vadd.f32 %v2783_v51, %v2666_v61  ;;  %v3093_v61 = vsel %vm3032_vm4, %v3075_v33, 0.0 }
 0x19b   : > { %v3037_v40 = vadd.f32 %v3036_v39, %v3035_v2  ;;  %v3090_v27 = vadd.f32 %v3089_v12, %v3088_v15  ;;  %v3794_v53 = vpop.f32.mrf.mxu1  ;;  %v3548_v23 = vpack.c.bf16 %v3022_v4, %v3022_v4  ;;  %v3020_v7 = vadd.f32 %v4712_v13, %v2997_v52 }
 0x19c   : > { %v3813_v34 = vpop.f32.mrf.mxu0  ;;  %v3023_v20 = vadd.f32 %v4712_v13, %v3000_v10  ;;  %v2998_v21 = vadd.f32 %v2949_v37, %v2832_v5  ;;  %v2837_v16 = vadd.f32 %v3794_v53, %v4731_v25  ;;  %v3078_v22 = vmul.f32 %v3022_v4, %v3022_v4 }
 0x19d   : > { %v3092_v42 = vadd.f32 %v3091_v18, %v3090_v27  ;;  %v3039_v59 = vadd.f32 %v3038_v19, %v3037_v40  ;;  %v2796_v9 = vpop.f32.mrf.mxu1  ;;  %3197 = vst.msk [vmem:[%s4727_s13 + $0x18] sm:$0xf] %vm3190_vm3, %v3548_v23  ;;  %v3040_v6 = vsel %vm3032_vm4, %v3020_v7, 0.0  ;;  %v3076_v26 = vmul.f32 %v3020_v7, %v3020_v7 }
 0x19e   : > { %v2965_v60 = vpop.f32.mrf.mxu0  ;;  %v3546_v32 = vpack.c.bf16 %v3020_v7, %v3020_v7  ;;  %v3549_v31 = vpack.c.bf16 %v3023_v20, %v3023_v20  ;;  %v3079_v38 = vmul.f32 %v3023_v20, %v3023_v20  ;;  %v3021_v8 = vadd.f32 %v4712_v13, %v2998_v21 }
 0x19f   : > { %v3041_v41 = vadd.f32 %v3040_v6, %v3039_v59  ;;  %v3094_v47 = vadd.f32 %v3093_v61, %v3092_v42  ;;  %v3795_v35 = vpop.f32.mrf.mxu1  ;;  %v3095_v1 = vsel %vm3032_vm4, %v3076_v26, 0.0  ;;  %v2835_v37 = vadd.f32 %v2796_v9, %v4734_v3 }
 0x1a0   : > { %3195 = vst.msk [vmem:[%s4727_s13 + $0x10] sm:$0xf] %vm3190_vm3, %v3546_v32  ;;  %v3816_v30 = vpop.f32.mrf.mxu0  ;;  %3198 = vst.msk [vmem:[%s4727_s13 + $0x1c] sm:$0xf] %vm3190_vm3, %v3549_v31  ;;  %v2838_v48 = vadd.f32 %v3795_v35, %v4739_v36  ;;  %v3003_v25 = vadd.f32 %v3812_v11, %v2837_v16  ;;  %v3042_v58 = vsel %vm3032_vm4, %v3021_v8, 0.0  ;;  %v3077_v17 = vmul.f32 %v3021_v8, %v3021_v8 }
 0x1a1   : > { %v3096_v54 = vadd.f32 %v3095_v1, %v3094_v47  ;;  %v2799_v57 = vpop.f32.mrf.mxu1  ;;  %v3547_v46 = vpack.c.bf16 %v3021_v8, %v3021_v8  ;;  %v3043_v14 = vadd.f32 %v3042_v58, %v3041_v41  ;;  %v3001_v43 = vadd.f32 %v2962_v63, %v2835_v37 }
 0x1a2   : > { %v2836_v62 = vadd.f32 %v2799_v57, %v4744_v49  ;;  %v3026_v29 = vadd.f32 %v4712_v13, %v3003_v25  ;;  %v3004_v0 = vadd.f32 %v3813_v34, %v2838_v48  ;;  %v2674_v3 = vadd.f32 %v4665_v44, %v4757_v55  ;;  %v2978_v39 = vpop.f32.mrf.mxu0 }
 0x1a3   : > { %v3798_v28 = vpop.f32.mrf.mxu1  ;;  %v3044_v56 = vsel %vm3032_vm4, %v3022_v4, 0.0  ;;  %v3097_v36 = vsel %vm3032_vm4, %v3077_v17, 0.0  ;;  %3196 = vst.msk [vmem:[%s4727_s13 + $0x14] sm:$0xf] %vm3190_vm3, %v3547_v46  ;;  %v3099_v49 = vsel %vm3032_vm4, %v3078_v22, 0.0  ;;  %v3046_v2 = vsel %vm3032_vm4, %v3023_v20, 0.0 }
 0x1a4   : > { %v3002_v11 = vadd.f32 %v2965_v60, %v2836_v62  ;;  %v3045_v51 = vadd.f32 %v3044_v56, %v3043_v14  ;;  %v3098_v52 = vadd.f32 %v3097_v36, %v3096_v54  ;;  %v3101_v15 = vsel %vm3032_vm4, %v3079_v38, 0.0  ;;  %v3817_v19 = vpop.f32.mrf.mxu0 }
 0x1a5   : > { %v2812_v63 = vpop.f32.mrf.mxu1  ;;  %v3552_v33 = vpack.c.bf16 %v3026_v29, %v3026_v29  ;;  %v3024_v44 = vadd.f32 %v4712_v13, %v3001_v43  ;;  %v3027_v55 = vadd.f32 %v4712_v13, %v3004_v0  ;;  %v2841_v10 = vadd.f32 %v3798_v28, %v4747_v50 }
 0x1a6   : > { %v3100_v4 = vadd.f32 %v3099_v49, %v3098_v52  ;;  %v3047_v12 = vadd.f32 %v3046_v2, %v3045_v51  ;;  %v3025_v18 = vadd.f32 %v4712_v13, %v3002_v11  ;;  %v3082_v27 = vmul.f32 %v3026_v29, %v3026_v29  ;;  %v2981_v31 = vpop.f32.mrf.mxu0 }
 0x1a7   : > { %v3799_v40 = vpop.f32.mrf.mxu1  ;;  %3201 = vst.msk [vmem:[%s4727_s13 + $0x28] sm:$0xf] %vm3190_vm3, %v3552_v33  ;;  %v3048_v5 = vsel %vm3032_vm4, %v3024_v44, 0.0  ;;  %v3080_v53 = vmul.f32 %v3024_v44, %v3024_v44  ;;  %v3550_v34 = vpack.c.bf16 %v3024_v44, %v3024_v44  ;;  %v3553_v20 = vpack.c.bf16 %v3027_v55, %v3027_v55 }
 0x1a8   : > { %v3049_v23 = vadd.f32 %v3048_v5, %v3047_v12  ;;  %v3102_v7 = vadd.f32 %v3101_v15, %v3100_v4  ;;  %v2839_v42 = vadd.f32 %v2812_v63, %v4753_v45  ;;  %v3050_v59 = vsel %vm3032_vm4, %v3025_v18, 0.0 }
 0x1a9   : > { %v3103_v50 = vsel %vm3032_vm4, %v3080_v53, 0.0  ;;  %3199 = vst.msk [vmem:[%s4727_s13 + $0x20] sm:$0xf] %vm3190_vm3, %v3550_v34  ;;  %v3081_v9 = vmul.f32 %v3025_v18, %v3025_v18  ;;  %v3551_v21 = vpack.c.bf16 %v3025_v18, %v3025_v18  ;;  %v2815_v60 = vpop.f32.mrf.mxu1  ;;  %v3052_v61 = vsel %vm3032_vm4, %v3026_v29, 0.0  ;;  %3202 = vst.msk [vmem:[%s4727_s13 + $0x2c] sm:$0xf] %vm3190_vm3, %v3553_v20 }
 0x1aa   : > { %v3104_v6 = vadd.f32 %v3103_v50, %v3102_v7  ;;  %v3051_v26 = vadd.f32 %v3050_v59, %v3049_v23  ;;  %v2842_v32 = vadd.f32 %v3799_v40, %v4777_v24  ;;  %v3083_v41 = vmul.f32 %v3027_v55, %v3027_v55 }
 0x1ab   : > { %v3105_v45 = vsel %vm3032_vm4, %v3081_v9, 0.0  ;;  %3200 = vst.msk [vmem:[%s4727_s13 + $0x24] sm:$0xf] %vm3190_vm3, %v3551_v21  ;;  %v3007_v47 = vadd.f32 %v3816_v30, %v2841_v10  ;;  %v3005_v16 = vadd.f32 %v2978_v39, %v2839_v42  ;;  %v2840_v1 = vadd.f32 %v2815_v60, %v2674_v3 }
 0x1ac   : > { %v3053_v35 = vadd.f32 %v3052_v61, %v3051_v26  ;;  %v3106_v22 = vadd.f32 %v3105_v45, %v3104_v6  ;;  %v3008_v38 = vadd.f32 %v3817_v19, %v2842_v32  ;;  %v3107_v8 = vsel %vm3032_vm4, %v3082_v27, 0.0 }
 0x1ad   : > { %v3054_v54 = vsel %vm3032_vm4, %v3027_v55, 0.0  ;;  %v3030_v37 = vadd.f32 %v4712_v13, %v3007_v47  ;;  %v3028_v24 = vadd.f32 %v4712_v13, %v3005_v16  ;;  %v3006_v57 = vadd.f32 %v2981_v31, %v2840_v1 }
 0x1ae   : > { %v3108_v48 = vadd.f32 %v3107_v8, %v3106_v22  ;;  %v3055_v25 = vadd.f32 %v3054_v54, %v3053_v35  ;;  %v3031_v30 = vadd.f32 %v4712_v13, %v3008_v38  ;;  %v3109_v58 = vsel %vm3032_vm4, %v3083_v41, 0.0 }
 0x1af   : > { %v3556_v17 = vpack.c.bf16 %v3030_v37, %v3030_v37  ;;  %v3056_v46 = vsel %vm3032_vm4, %v3028_v24, 0.0  ;;  %v3084_v14 = vmul.f32 %v3028_v24, %v3028_v24  ;;  %v3554_v43 = vpack.c.bf16 %v3028_v24, %v3028_v24 }
 0x1b0   : > { %v3057_v62 = vadd.f32 %v3056_v46, %v3055_v25  ;;  %v3110_v29 = vadd.f32 %v3109_v58, %v3108_v48  ;;  %v3557_v28 = vpack.c.bf16 %v3031_v30, %v3031_v30  ;;  %v3029_v3 = vadd.f32 %v4712_v13, %v3006_v57 }
 0x1b1   : > { %3205 = vst.msk [vmem:[%s4727_s13 + $0x38] sm:$0xf] %vm3190_vm3, %v3556_v17  ;;  %v3111_v0 = vsel %vm3032_vm4, %v3084_v14, 0.0  ;;  %3203 = vst.msk [vmem:[%s4727_s13 + $0x30] sm:$0xf] %vm3190_vm3, %v3554_v43  ;;  %v3086_v36 = vmul.f32 %v3030_v37, %v3030_v37  ;;  %v3060_v51 = vsel %vm3032_vm4, %v3030_v37, 0.0  ;;  %v3087_v52 = vmul.f32 %v3031_v30, %v3031_v30 }
 0x1b2   : > { %v3112_v56 = vadd.f32 %v3111_v0, %v3110_v29  ;;  %3206 = vst.msk [vmem:[%s4727_s13 + $0x3c] sm:$0xf] %vm3190_vm3, %v3557_v28  ;;  %v3058_v11 = vsel %vm3032_vm4, %v3029_v3, 0.0  ;;  %v3085_v39 = vmul.f32 %v3029_v3, %v3029_v3  ;;  %v3555_v49 = vpack.c.bf16 %v3029_v3, %v3029_v3 }
 0x1b3   : > { %v3059_v2 = vadd.f32 %v3058_v11, %v3057_v62  ;;  %v3115_v33 = vsel %vm3032_vm4, %v3086_v36, 0.0  ;;  %v3062_v44 = vsel %vm3032_vm4, %v3031_v30, 0.0  ;;  %v3117_v12 = vsel %vm3032_vm4, %v3087_v52, 0.0 }
 0x1b4   : > { %v3113_v63 = vsel %vm3032_vm4, %v3085_v39, 0.0  ;;  %3204 = vst.msk [vmem:[%s4727_s13 + $0x34] sm:$0xf] %vm3190_vm3, %v3555_v49 }
 0x1b5   : > { %v3061_v13 = vadd.f32 %v3060_v51, %v3059_v2  ;;  %v3114_v15 = vadd.f32 %v3113_v63, %v3112_v56 }
 0x1b7   : > { %v3063_v55 = vadd.f32 %v3062_v44, %v3061_v13  ;;  %v3116_v4 = vadd.f32 %v3115_v33, %v3114_v15 }
 0x1b9   : > { %v3064_v10 = vrot.slane %v3063_v55, 4  ;;  %v3118_v18 = vadd.f32 %v3117_v12, %v3116_v4 }
 0x1bb   : > { %v3065_v40 = vadd.f32 %v3064_v10, %v3063_v55  ;;  %v3119_v27 = vrot.slane %v3118_v18, 4 }
 0x1bd   : > { %v3066_v5 = vrot.slane %v3065_v40, 2  ;;  %v3120_v53 = vadd.f32 %v3119_v27, %v3118_v18 }
 0x1bf   : > { %v3067_v34 = vadd.f32 %v3066_v5, %v3065_v40  ;;  %v3121_v19 = vrot.slane %v3120_v53, 2 }
 0x1c1   : > { %v3068_v23 = vrot.slane %v3067_v34, 1  ;;  %v3122_v7 = vadd.f32 %v3121_v19, %v3120_v53 }
 0x1c3   : > { %v3069_v20 = vadd.f32 %v3068_v23, %v3067_v34  ;;  %v3123_v42 = vrot.slane %v3122_v7, 1 }
 0x1c5   : > { %3071 = vst.msk [vmem:[%s494_s19] sm:$0x1] %vm3070_vm5, %v3069_v20  ;;  %v3124_v50 = vadd.f32 %v3123_v42, %v3122_v7 }
 0x1c7   : > { %3125 = vst.msk [vmem:[%s494_s19 + $0x1] sm:$0x1] %vm3070_vm5, %v3124_v50 }
 0x1c8 PF: > { %s19_s9 = sadd.s32 1, %s3911_s9   ;;  %s4916_s27 = smov %s3903_s29 }
 0x1c9   : > { %p16_p13 = scmp.ge.s32.totalorder %s19_s9, 18   ;;  %s4917_s28 = smov %s3907_s30 }
 0x1ca   : > { %s4918_s29 = smov %s4921_s10  ;;  %s4919_s30 = smov %s4925_s11 }
 0x1cb   :  { %18 = sbr.rel (!%p16_p13) target bundleno = 3 (0x3), region = 107 }

// kernel: basic_block_dec.6
= control target key start
LH: loop header
LB: loop body
LE: loop exit
PB: predicated region body
PF: predicated region fallthrough
CT: control target
= control target key end

     0   :  { %s3836_s21 = smov 0   ;;  %s3838_s22 = smov 0   ;;  %s4712_s0 = inlined_call_operand.vmem [shape: f32[2,16,16,8], index: 0, kind: input, shape index: {}, may-alias: {0,1,2}]   ;;  %s4713_s1 = inlined_call_operand.vmem [shape: f32[2,16,16,8], index: 1, kind: input, shape index: {}, may-alias: {0,1,2}]   ;;  %s4714_s2 = inlined_call_operand.vmem [shape: f32[2,16,16,8], index: 2, kind: input, shape index: {}, may-alias: {0,1,2}]   ;;  %s4715_s3 = inlined_call_operand.vmem [shape: bf16[3,3,8,4], index: 3, kind: input, shape index: {}]   ;;  %s4716_s4 = inlined_call_operand.vmem [shape: f32[1,4], index: 4, kind: input, shape index: {}]   ;;  %s4717_s5 = inlined_call_operand.vmem [shape: bf16[2,32,32,4], index: 5, kind: output, shape index: {0}]   ;;  %s4718_s6 = inlined_call_operand.vmem [shape: f32[2,8,2,4], index: 6, kind: output, shape index: {1}]  }
   0x1   :  { %s3840_s23 = smov 0   ;;  %s3842_s24 = smov 0  }
   0x2   :  { %s3844_s25 = smov 0  }
   0x3 LB: > { %s26_s26 = sadd.s32 1, %s3788_s23  ;;  %s29_s27 = sadd.s32 1, %s3792_s24  ;;  %s3796_s25 = sphi %s3844_s25, %s17_s25   ;;  %s3792_s24 = sphi %s3842_s24, %s4763_s24   ;;  %s3788_s23 = sphi %s3840_s23, %s4762_s23   ;;  %s3784_s22 = sphi %s3838_s22, %s4761_s22   ;;  %s3780_s21 = sphi %s3836_s21, %s4760_s21  }
   0x4   : > { %p27_p0 = scmp.ge.s32.totalorder %s26_s26, 8  ;;  %p3305_p1 = scmp.ge.s32.totalorder %s3796_s25, 1 }
   0x5   : > { %p303_p2 = scmp.lt.s32.totalorder %s3796_s25, 17 }
   0x6   : > { %s4765_s26 = smov (%p27_p0, %s26_s26), 0  ;;  %s4767_s27 = smov (!%p27_p0, %s29_s27), %s3792_s24 }
   0x7   : > { %p304_p3 = pnand %p3305_p1, %p303_p2  ;;  %p31_p4 = scmp.ge.s32.totalorder %s4767_s27, 2 }
   0x9   : > { %s4769_s27 = smov (%p31_p4, %s4767_s27), 0  ;;  %307 = sbr.rel (%p304_p3) target bundleno = 446 (0x1be), region = 40 }
   0xe   : > { %v3333_v0 = vld [vmem:[%s4715_s3 + $0x4] sm:$0xf]  ;;  %vm1521_vm0 = vcmask 1043456   ;;  %s3872_s30 = sshll.u32 %s3780_s21, 1  ;;  %p378_p5 = scmp.lt.s32.totalorder %s3784_s22, 1  ;;  %v481_v1 = vlaneseq  ;;  %vm462_vm1 = vcmask 57344  }
   0xf   : > { %3702 = vmatprep.subr.msk.bf16.mxu1 %vm1521_vm0, %v3333_v0  ;;  %v1523_v2 = vsel %vm1521_vm0, %v3333_v0, 0  ;;  %p380_p6 = scmp.lt.s32.totalorder %s3872_s30, 15  ;;  %3701 = vmatprep.subr.msk.bf16.mxu0 %vm1521_vm0, %v3333_v0  ;;  %v3798_v3 = vmov 1966171168   ;;  %v1470_v6 = vld [vmem:[%s4715_s3] sm:$0xf] }
  0x10   : > { %3700 = vmatpush3.bf16.msra.mxu1 %v1523_v2  ;;  %s4771_s22 = smov (!%p378_p5, %s3784_s22), 1  ;;  %v479_v4 = vunpack.c.l.s4 %v3798_v3  ;;  %v482_v5 = vshrl.u32 %v481_v1, 7  ;;  %3538 = vmatpush3.bf16.msra.mxu0 %v1523_v2  ;;  %v3799_v7 = vmov 1983009808   ;;  %v3888_v9 = vld [vmem:[%s4715_s3 + $0x8] sm:$0xf] }
  0x11   : > { %s381_s9 = scalar_select %p380_p6, %s3872_s30, 15  ;;  %v642_v8 = vunpack.c.l.s4 %v3799_v7  ;;  %3703 = vmatprep.subr.msk.bf16.mxu1 %vm1521_vm0, %v1470_v6  ;;  %3704 = vmatprep.subr.msk.bf16.mxu0 %vm1521_vm0, %v3888_v9  ;;  %v3800_v11 = vmov 0.0   ;;  %v3918_v18 = vsel %vm1521_vm0, %v1470_v6, 0  ;;  %vm711_vm2 = vcmask 64512  }
  0x12   : > { %s3891_s12 = sshll.u32 %s4771_s22, 5  ;;  %v480_v10 = vunpack.c.0.s8 %v479_v4  ;;  %463 = vst.msk [vmem:[#allocation2] sm:$0x1] %vm462_vm1, %v3800_v11  ;;  %464 = vst.msk [vmem:[#allocation2 + $0x28] sm:$0x1] %vm462_vm1, %v3800_v11  ;;  %v3913_v15 = vsub.s32 0, %v482_v5 }
  0x13   : > { %465 = vst.msk [vmem:[#allocation2 + $0x50] sm:$0x1] %vm462_vm1, %v3800_v11  ;;  %466 = vst.msk [vmem:[#allocation2 + $0x78] sm:$0x1] %vm462_vm1, %v3800_v11  ;;  %s3307_s13 = sshll.u32 %s381_s9, 1  ;;  %v643_v12 = vunpack.c.0.s8 %v642_v8  ;;  %s3921_s19 = sadd.s32 4294967295, %s3872_s30 }
  0x14   : > { %467 = vst.msk [vmem:[#allocation2 + $0xa0] sm:$0x1] %vm462_vm1, %v3800_v11  ;;  %468 = vst.msk [vmem:[#allocation2 + $0xc8] sm:$0x1] %vm462_vm1, %v3800_v11  ;;  %s384_s14 = sadd.s32 %s3891_s12, %s3307_s13  ;;  %v3908_v13 = vsub.s32 %v480_v10, %v482_v5  ;;  %p390_p7 = scmp.gt.s32.totalorder %s3921_s19, 0  ;;  %vm3090_vm3 = vcmask 27648  }
  0x15   : > { %469 = vst.msk [vmem:[#allocation2 + $0x21] sm:$0x1] %vm462_vm1, %v3800_v11  ;;  %470 = vst.msk [vmem:[#allocation2 + $0x49] sm:$0x1] %vm462_vm1, %v3800_v11  ;;  %s3309_s15 = sshll.u32 %s384_s14, 3  ;;  %v3915_v16 = vsub.s32 %v643_v12, %v482_v5  ;;  %p3312_p8 = scmp.lt.s32.totalorder %s3921_s19, 15 }
  0x16   : > { %471 = vst.msk [vmem:[#allocation2 + $0x71] sm:$0x1] %vm462_vm1, %v3800_v11  ;;  %472 = vst.msk [vmem:[#allocation2 + $0x99] sm:$0x1] %vm462_vm1, %v3800_v11  ;;  %s386_s18 = scalar_lea.vmem %s4712_s0, %s3309_s15  ;;  %p450_p9 = scmp.gt.s32.totalorder %s3780_s21, 0  ;;  %vm2932_vm4 = vcmask 31744  }
  0x17   : > { %473 = vst.msk [vmem:[#allocation2 + $0xc1] sm:$0x1] %vm462_vm1, %v3800_v11  ;;  %474 = vst.msk [vmem:[#allocation2 + $0xe9] sm:$0x1] %vm462_vm1, %v3800_v11  ;;  %v442_v14 = vld [vmem:[%s386_s18] sm:$0xff]  ;;  %v443_v17 = vld [vmem:[%s386_s18 + $0x8] sm:$0xff] }
  0x18   : > { %v444_v19 = vld [vmem:[%s386_s18 + $0x10] sm:$0xff]  ;;  %v720_v20 = vcombine.high %v442_v14, %v442_v14  ;;  %v727_v21 = vrot.slane %v442_v14, %v3908_v13  ;;  %v769_v22 = vcombine.high %v443_v17, %v443_v17  ;;  %v776_v23 = vrot.slane %v443_v17, %v3908_v13  ;;  %v3925_v24 = vld [vmem:[%s386_s18 + $0x18] sm:$0xff]  ;;  %s391_s20 = scalar_select %p390_p7, %s3921_s19, 0 }
  0x19   : > { %v818_v25 = vcombine.high %v444_v19, %v444_v19  ;;  %v3928_v26 = vrot.slane %v444_v19, %v3908_v13  ;;  %v867_v27 = vcombine.high %v3925_v24, %v3925_v24  ;;  %v3934_v28 = vrot.slane %v3925_v24, %v3908_v13  ;;  %s451_s28 = scalar_select %p450_p9, 1, 0 }
  0x1a   : > { %v734_v29 = vrot.slane %v720_v20, %v3908_v13  ;;  %v735_v30 = vcombine.high %v727_v21, %v727_v21  ;;  %v743_v31 = vrot.slane %v727_v21, %v3908_v13  ;;  %v783_v32 = vrot.slane %v769_v22, %v3908_v13  ;;  %s4773_s20 = smov (!%p3312_p8, %s391_s20), 15  ;;  %s3439_s14 = sadd.s32 2, %s3872_s30 }
  0x1b   : > { %v784_v33 = vcombine.high %v776_v23, %v776_v23  ;;  %v792_v34 = vrot.slane %v776_v23, %v3908_v13  ;;  %v3942_v35 = vrot.slane %v818_v25, %v3908_v13  ;;  %v833_v36 = vcombine.high %v3928_v26, %v3928_v26  ;;  %s3317_s29 = sshll.u32 %s4773_s20, 1  ;;  %s452_s8 = scvt.s32.f32 %s451_s28 }
  0x1c   : > { %v736_v37 = vcombine.high %v734_v29, %v734_v29  ;;  %v750_v38 = vrot.slane %v734_v29, %v3908_v13  ;;  %v757_v39 = vrot.slane %v735_v30, %v3908_v13  ;;  %v765_v40 = vcombine.high %v743_v31, %v743_v31  ;;  %s398_s7 = sadd.s32 %s3317_s29, %s3891_s12  ;;  %p4024_p10 = scmp.lt.s32.totalorder %s3439_s14, 15 }
  0x1d   : > { %v919_v41 = vrot.slane %v743_v31, %v3913_v15  ;;  %v785_v42 = vcombine.high %v783_v32, %v783_v32  ;;  %v799_v43 = vrot.slane %v783_v32, %v3908_v13  ;;  %v806_v44 = vrot.slane %v784_v33, %v3908_v13  ;;  %s3319_s9 = sshll.u32 %s398_s7, 3  ;;  %p435_p11 = scmp.lt.s32.totalorder %s3780_s21, 7 }
  0x1e   : > { %v764_v45 = vrot.slane %v736_v37, %v3908_v13  ;;  %v766_v46 = vcombine.high %v750_v38, %v750_v38  ;;  %v767_v47 = vcombine.high %v757_v39, %v757_v39  ;;  %v923_v48 = vrot.slane %v757_v39, %v3913_v15  ;;  %s400_s13 = scalar_lea.vmem %s4713_s1, %s3319_s9  ;;  %s4775_s14 = smov (!%p4024_p10, %s3439_s14), 15 }
  0x1f   : > { %v927_v49 = vrot.slane %v765_v40, %v3913_v15  ;;  %v935_v50 = vrot.slane %v750_v38, %v3913_v15  ;;  %v813_v51 = vrot.slane %v785_v42, %v3908_v13  ;;  %v814_v52 = vcombine.high %v792_v34, %v792_v34  ;;  %v446_v21 = vld [vmem:[%s400_s13] sm:$0xff]  ;;  %v447_v22 = vld [vmem:[%s400_s13 + $0x8] sm:$0xff]  ;;  %s4777_s14 = smov (!%p4024_p10, %s4775_s14), 15  ;;  %s3331_s11 = sshll.u32 %s4771_s22, 3 }
  0x20   : > { %v768_v53 = vcombine.high %v764_v45, %v764_v45  ;;  %v931_v54 = vrot.slane %v767_v47, %v3913_v15  ;;  %v939_v55 = vrot.slane %v764_v45, %v3913_v15  ;;  %v943_v56 = vrot.slane %v766_v46, %v3913_v15  ;;  %s4094_s17 = sshll.u32 %s4777_s14, 1 }
  0x21   : > { %v1044_v57 = vcombine.low %v919_v41, %v923_v48  ;;  %v815_v58 = vcombine.high %v799_v43, %v799_v43  ;;  %v816_v59 = vcombine.high %v806_v44, %v806_v44  ;;  %v817_v60 = vcombine.high %v813_v51, %v813_v51  ;;  %s415_s18 = sadd.s32 %s4094_s17, %s3891_s12 }
  0x22   : > { %v947_v61 = vrot.slane %v768_v53, %v3913_v15  ;;  %v1045_v62 = vcombine.low %v927_v49, %v931_v54  ;;  %v1061_v63 = vcombine.low %v935_v50, %v939_v55  ;;  %v951_v0 = vrot.slane %v792_v34, %v3913_v15  ;;  %s3326_s12 = sshll.u32 %s415_s18, 3  ;;  %s3327_s18 = sshll.u32 %s3780_s21, 2 }
  0x23   : > { %v1052_v1 = vrot.slane %v1044_v57, %v3915_v16  ;;  %v955_v2 = vrot.slane %v806_v44, %v3913_v15  ;;  %v959_v3 = vrot.slane %v814_v52, %v3913_v15  ;;  %v963_v4 = vrot.slane %v816_v59, %v3913_v15  ;;  %s4128_s19 = scalar_select %p435_p11, 1, 0 }
  0x24   : > { %v1059_v5 = vrot.slane %v1045_v62, %v3915_v16  ;;  %v1062_v6 = vcombine.low %v943_v56, %v947_v61  ;;  %v1069_v7 = vrot.slane %v1061_v63, %v3915_v16  ;;  %v967_v8 = vrot.slane %v799_v43, %v3913_v15  ;;  %s417_s29 = scalar_lea.vmem %s4714_s2, %s3326_s12  ;;  %p425_p12 = scmp.lt.s32.totalorder %s3327_s18, 31 }
  0x25   : > { %v971_v10 = vrot.slane %v813_v51, %v3913_v15  ;;  %v975_v11 = vrot.slane %v815_v58, %v3913_v15  ;;  %v979_v12 = vrot.slane %v817_v60, %v3913_v15  ;;  %v1078_v14 = vcombine.low %v951_v0, %v955_v2  ;;  %s458_s9 = scvt.s32.f32 %s4128_s19  ;;  %s3329_s19 = sshll.u32 %s4771_s22, 7 }
  0x26   : > { %v1060_v17 = vcombine.low %v1052_v1, %v1059_v5  ;;  %v1076_v19 = vrot.slane %v1062_v6, %v3915_v16  ;;  %v1079_v20 = vcombine.low %v959_v3, %v963_v4  ;;  %v453_v23 = vstv %s452_s8  ;;  %s4779_s18 = smov (!%p425_p12, %s3327_s18), 31  ;;  %s4781_s21 = smov (!%p435_p11, %s3780_s21), 7 }
  0x27   : > { %v1086_v25 = vrot.slane %v1078_v14, %v3915_v16  ;;  %v1095_v29 = vcombine.low %v967_v8, %v971_v10  ;;  %v1096_v30 = vcombine.low %v975_v11, %v979_v12  ;;  %v454_v31 = vmul.f32 %v453_v23, %v446_v21  ;;  %s3328_s12 = sshll.u32 %s4779_s18, 2  ;;  %s438_s13 = sadd.s32 %s3331_s11, %s4781_s21 }
  0x28   : > { %v1077_v32 = vcombine.low %v1069_v7, %v1076_v19  ;;  %1189 = vst.msk [vmem:[#allocation2 + $0x29] sm:$0xff] %vm711_vm2, %v1060_v17  ;;  %1193 = vst.msk [vmem:[#allocation2 + $0x51] sm:$0xff] %vm711_vm2, %v1060_v17  ;;  %v1093_v33 = vrot.slane %v1079_v20, %v3915_v16  ;;  %v455_v34 = vmul.f32 %v453_v23, %v447_v22  ;;  %s4537_s20 = sadd.s32 %s3329_s19, %s3328_s12  ;;  %s3332_s14 = sshll.u32 %s438_s13, 1  ;;  %vm2970_vm5 = vcmask 24576  }
  0x29   : > { %v834_v37 = vcombine.high %v3942_v35, %v3942_v35  ;;  %v1103_v38 = vrot.slane %v1095_v29, %v3915_v16  ;;  %v1110_v39 = vrot.slane %v1096_v30, %v3915_v16  ;;  %v477_v40 = vcombine.high %v454_v31, %v454_v31  ;;  %s3330_s7 = sshll.u32 %s4537_s20, 2  ;;  %s440_s16 = scalar_lea.vmem %s4718_s6, %s3332_s14 }
  0x2a   : > { %v484_v41 = vrot.slane %v454_v31, %v3908_v13  ;;  %1190 = vst.msk [vmem:[#allocation2 + $0x31] sm:$0xff] %vm711_vm2, %v1077_v32  ;;  %1194 = vst.msk [vmem:[#allocation2 + $0x59] sm:$0xff] %vm711_vm2, %v1077_v32  ;;  %v1094_v42 = vcombine.low %v1086_v25, %v1093_v33  ;;  %v526_v43 = vcombine.high %v455_v34, %v455_v34  ;;  %s4568_s10 = scalar_lea.vmem %s4717_s5, %s3330_s7 }
  0x2b   : > { %v533_v44 = vrot.slane %v455_v34, %v3908_v13  ;;  %v3997_v45 = vrot.slane %v3928_v26, %v3908_v13  ;;  %v1111_v46 = vcombine.low %v1103_v38, %v1110_v39  ;;  %v491_v47 = vrot.slane %v477_v40, %v3908_v13 }
  0x2c   : > { %v492_v48 = vcombine.high %v484_v41, %v484_v41  ;;  %v500_v49 = vrot.slane %v484_v41, %v3908_v13  ;;  %1195 = vst.msk [vmem:[#allocation2 + $0x61] sm:$0xff] %vm711_vm2, %v1094_v42  ;;  %1191 = vst.msk [vmem:[#allocation2 + $0x39] sm:$0xff] %vm711_vm2, %v1094_v42  ;;  %v540_v50 = vrot.slane %v526_v43, %v3908_v13 }
  0x2d   : > { %v541_v51 = vcombine.high %v533_v44, %v533_v44  ;;  %v549_v52 = vrot.slane %v533_v44, %v3908_v13  ;;  %v4007_v53 = vrot.slane %v3942_v35, %v3908_v13  ;;  %1196 = vst.msk [vmem:[#allocation2 + $0x69] sm:$0xff] %vm711_vm2, %v1111_v46  ;;  %1192 = vst.msk [vmem:[#allocation2 + $0x41] sm:$0xff] %vm711_vm2, %v1111_v46 }
  0x2e   : > { %v493_v54 = vcombine.high %v491_v47, %v491_v47  ;;  %v507_v55 = vrot.slane %v491_v47, %v3908_v13  ;;  %v514_v56 = vrot.slane %v492_v48, %v3908_v13  ;;  %v522_v57 = vcombine.high %v500_v49, %v500_v49  ;;  %v4057_v47 = vld [vmem:[%s4715_s3 + $0xc] sm:$0xf] }
  0x2f   : > { %v578_v58 = vrot.slane %v500_v49, %v3913_v15  ;;  %v542_v59 = vcombine.high %v540_v50, %v540_v50  ;;  %v556_v60 = vrot.slane %v540_v50, %v3908_v13  ;;  %v563_v61 = vrot.slane %v541_v51, %v3908_v13  ;;  %v1479_v62 = vld [vmem:[#allocation2 + $0x51] sm:$0xff] }
  0x30   : > { %v521_v63 = vrot.slane %v493_v54, %v3908_v13  ;;  %v523_v0 = vcombine.high %v507_v55, %v507_v55  ;;  %v524_v1 = vcombine.high %v514_v56, %v514_v56  ;;  %v582_v2 = vrot.slane %v514_v56, %v3913_v15 }
  0x31   : > { %v586_v3 = vrot.slane %v522_v57, %v3913_v15  ;;  %v594_v4 = vrot.slane %v507_v55, %v3913_v15  ;;  %v570_v5 = vrot.slane %v542_v59, %v3908_v13  ;;  %v571_v6 = vcombine.high %v549_v52, %v549_v52  ;;  %v1480_v7 = vld [vmem:[#allocation2 + $0x59] sm:$0xff] }
  0x32   : > { %v525_v8 = vcombine.high %v521_v63, %v521_v63  ;;  %v590_v10 = vrot.slane %v524_v1, %v3913_v15  ;;  %v598_v11 = vrot.slane %v521_v63, %v3913_v15  ;;  %v602_v12 = vrot.slane %v523_v0, %v3913_v15 }
  0x33   : > { %v4031_v14 = vpack.c.bf16 %v1480_v7, %v1479_v62  ;;  %v639_v17 = vcombine.low %v578_v58, %v582_v2  ;;  %v572_v19 = vcombine.high %v556_v60, %v556_v60  ;;  %v573_v20 = vcombine.high %v563_v61, %v563_v61  ;;  %v1481_v21 = vld [vmem:[#allocation2 + $0x61] sm:$0xff] }
  0x34   : > { %v606_v22 = vrot.slane %v525_v8, %v3913_v15  ;;  %v640_v23 = vcombine.low %v586_v3, %v590_v10  ;;  %v656_v25 = vcombine.low %v594_v4, %v598_v11  ;;  %v574_v29 = vcombine.high %v570_v5, %v570_v5  ;;  %v1482_v30 = vld [vmem:[#allocation2 + $0x69] sm:$0xff] }
  0x35   : > { %3547 = vmatprep.mubr.msk.bf16.mxu1 %vm711_vm2, %v4031_v14  ;;  %v647_v31 = vrot.slane %v639_v17, %v3915_v16  ;;  %v610_v32 = vrot.slane %v549_v52, %v3913_v15  ;;  %v614_v33 = vrot.slane %v563_v61, %v3913_v15  ;;  %v618_v34 = vrot.slane %v571_v6, %v3913_v15 }
  0x36   : > { %v4046_v38 = vpack.c.bf16 %v1482_v30, %v1481_v21  ;;  %v654_v39 = vrot.slane %v640_v23, %v3915_v16  ;;  %v657_v40 = vcombine.low %v602_v12, %v606_v22  ;;  %v664_v41 = vrot.slane %v656_v25, %v3915_v16 }
  0x37   : > { %v622_v42 = vrot.slane %v573_v20, %v3913_v15  ;;  %v626_v43 = vrot.slane %v556_v60, %v3913_v15  ;;  %v630_v44 = vrot.slane %v570_v5, %v3913_v15  ;;  %v634_v46 = vrot.slane %v572_v19, %v3913_v15 }
  0x38   : > { %3548 = vmatmul.mubr.msk.bf16.vlgmr.msra.gmra.mxu1 %vm711_vm2, %v4046_v38  ;;  %v655_v48 = vcombine.low %v647_v31, %v654_v39  ;;  %v671_v49 = vrot.slane %v657_v40, %v3915_v16  ;;  %v638_v50 = vrot.slane %v574_v29, %v3913_v15  ;;  %v673_v51 = vcombine.low %v610_v32, %v614_v33 }
  0x39   : > { %3556 = vmatpush3.bf16.msra.mxu1 %v3918_v18  ;;  %v674_v52 = vcombine.low %v618_v34, %v622_v42  ;;  %v690_v54 = vcombine.low %v626_v43, %v630_v44  ;;  %v855_v55 = vrot.slane %v833_v36, %v3908_v13  ;;  %v862_v56 = vrot.slane %v834_v37, %v3908_v13  ;;  %v1475_v42 = vld [vmem:[#allocation2 + $0x29] sm:$0xff]  ;;  %v1476_v43 = vld [vmem:[#allocation2 + $0x31] sm:$0xff] }
  0x3a   : > { %v672_v57 = vcombine.low %v664_v41, %v671_v49  ;;  %712 = vst.msk [vmem:[#allocation2 + $0x1] sm:$0xff] %vm711_vm2, %v655_v48  ;;  %v681_v58 = vrot.slane %v673_v51, %v3915_v16  ;;  %v691_v18 = vcombine.low %v634_v46, %v638_v50  ;;  %v863_v59 = vcombine.high %v3997_v45, %v3997_v45 }
  0x3b   : > { %3705 = vmatprep.subr.msk.bf16.mxu1 %vm1521_vm0, %v4057_v47  ;;  %v688_v26 = vrot.slane %v674_v52, %v3915_v16  ;;  %v698_v36 = vrot.slane %v690_v54, %v3915_v16  ;;  %v864_v35 = vcombine.high %v4007_v53, %v4007_v53  ;;  %v865_v37 = vcombine.high %v855_v55, %v855_v55 }
  0x3c   : > { %713 = vst.msk [vmem:[#allocation2 + $0x9] sm:$0xff] %vm711_vm2, %v672_v57  ;;  %v705_v60 = vrot.slane %v691_v18, %v3915_v16  ;;  %v866_v61 = vcombine.high %v862_v56, %v862_v56  ;;  %v983_v62 = vrot.slane %v3997_v45, %v3913_v15  ;;  %v987_v63 = vrot.slane %v855_v55, %v3913_v15 }
  0x3d   : > { %v689_v0 = vcombine.low %v681_v58, %v688_v26  ;;  %v991_v1 = vrot.slane %v863_v59, %v3913_v15  ;;  %v995_v2 = vrot.slane %v865_v37, %v3913_v15  ;;  %v999_v3 = vrot.slane %v4007_v53, %v3913_v15 }
  0x3e   : > { %v706_v4 = vcombine.low %v698_v36, %v705_v60  ;;  %v1003_v5 = vrot.slane %v862_v56, %v3913_v15  ;;  %v1007_v6 = vrot.slane %v864_v35, %v3913_v15  ;;  %v1011_v45 = vrot.slane %v866_v61, %v3913_v15  ;;  %v3368_v60 = vld [vmem:[%s4715_s3 + $0x10] sm:$0xf] }
  0x3f   : > { %714 = vst.msk [vmem:[#allocation2 + $0x11] sm:$0xff] %vm711_vm2, %v689_v0  ;;  %v1112_v7 = vcombine.low %v983_v62, %v987_v63  ;;  %v1113_v8 = vcombine.low %v991_v1, %v995_v2  ;;  %v881_v53 = vrot.slane %v867_v27, %v3908_v13  ;;  %v882_v10 = vcombine.high %v3934_v28, %v3934_v28  ;;  %v448_v62 = vld [vmem:[%s417_s29] sm:$0xff]  ;;  %v449_v1 = vld [vmem:[%s417_s29 + $0x8] sm:$0xff] }
  0x40   : > { %715 = vst.msk [vmem:[#allocation2 + $0x19] sm:$0xff] %vm711_vm2, %v706_v4  ;;  %v1129_v11 = vcombine.low %v999_v3, %v1003_v5  ;;  %v1130_v12 = vcombine.low %v1007_v6, %v1011_v45  ;;  %v890_v17 = vrot.slane %v3934_v28, %v3908_v13  ;;  %v4136_v58 = vpack.c.bf16 %v1476_v43, %v1475_v42  ;;  %v1478_v0 = vld [vmem:[#allocation2 + $0x41] sm:$0xff] }
  0x41   : > { %v1471_v19 = vld [vmem:[#allocation2 + $0x1] sm:$0xff]  ;;  %v1120_v20 = vrot.slane %v1112_v7, %v3915_v16  ;;  %v1127_v21 = vrot.slane %v1113_v8, %v3915_v16  ;;  %v883_v22 = vcombine.high %v881_v53, %v881_v53  ;;  %v897_v24 = vrot.slane %v881_v53, %v3908_v13 }
  0x42   : > { %v1137_v27 = vrot.slane %v1129_v11, %v3915_v16  ;;  %v1144_v23 = vrot.slane %v1130_v12, %v3915_v16  ;;  %v904_v25 = vrot.slane %v882_v10, %v3908_v13  ;;  %v912_v29 = vcombine.high %v890_v17, %v890_v17  ;;  %v1446_v12 = vld [vmem:[#allocation2] sm:$0xff] }
  0x43   : > { %v1472_v30 = vld [vmem:[#allocation2 + $0x9] sm:$0xff]  ;;  %v1128_v31 = vcombine.low %v1120_v20, %v1127_v21  ;;  %v911_v28 = vrot.slane %v883_v22, %v3908_v13  ;;  %v913_v32 = vcombine.high %v897_v24, %v897_v24  ;;  %v1015_v33 = vrot.slane %v890_v17, %v3913_v15 }
  0x44   : > { %v1487_v34 = vpack.c.bf16 %v1472_v30, %v1471_v19  ;;  %v1145_v39 = vcombine.low %v1137_v27, %v1144_v23  ;;  %v914_v40 = vcombine.high %v904_v25, %v904_v25  ;;  %v1019_v41 = vrot.slane %v904_v25, %v3913_v15  ;;  %v1746_v4 = vld [vmem:[#allocation2 + $0x2] sm:$0xff]  ;;  %v1451_v25 = vld [vmem:[#allocation2 + $0x30] sm:$0xff] }
  0x45   : > { %1197 = vst.msk [vmem:[#allocation2 + $0x79] sm:$0xff] %vm711_vm2, %v1128_v31  ;;  %1201 = vst.msk [vmem:[#allocation2 + $0xa1] sm:$0xff] %vm711_vm2, %v1128_v31  ;;  %v915_v44 = vcombine.high %v911_v28, %v911_v28  ;;  %v1023_v46 = vrot.slane %v912_v29, %v3913_v15  ;;  %v1031_v48 = vrot.slane %v897_v24, %v3913_v15  ;;  %v1797_v59 = vsel %vm1521_vm0, %v3888_v9, 0  ;;  %v1477_v9 = vld [vmem:[#allocation2 + $0x39] sm:$0xff]  ;;  %v1447_v19 = vld [vmem:[#allocation2 + $0x8] sm:$0xff] }
  0x46   : > { %v1035_v49 = vrot.slane %v911_v28, %v3913_v15  ;;  %3539 = vmatprep.mubr.msk.bf16.mxu0 %vm711_vm2, %v1487_v34  ;;  %v1473_v50 = vld [vmem:[#allocation2 + $0x11] sm:$0xff]  ;;  %1198 = vst.msk [vmem:[#allocation2 + $0x81] sm:$0xff] %vm711_vm2, %v1145_v39  ;;  %1202 = vst.msk [vmem:[#allocation2 + $0xa9] sm:$0xff] %vm711_vm2, %v1145_v39  ;;  %v1027_v51 = vrot.slane %v914_v40, %v3913_v15  ;;  %v1039_v52 = vrot.slane %v913_v32, %v3913_v15  ;;  %v1450_v23 = vld [vmem:[#allocation2 + $0x28] sm:$0xff] }
  0x47   : > { %v1146_v54 = vcombine.low %v1015_v33, %v1019_v41  ;;  %v1474_v55 = vld [vmem:[#allocation2 + $0x19] sm:$0xff]  ;;  %v1043_v56 = vrot.slane %v915_v44, %v3913_v15  ;;  %v1747_v5 = vld [vmem:[#allocation2 + $0xa] sm:$0xff]  ;;  %v459_v7 = vstv %s458_s9  ;;  %v4159_v53 = vpack.c.bf16 %v1478_v0, %v1477_v9 }
  0x48   : > { %v1163_v57 = vcombine.low %v1031_v48, %v1035_v49  ;;  %v1488_v18 = vpack.c.bf16 %v1474_v55, %v1473_v50  ;;  %v1147_v26 = vcombine.low %v1023_v46, %v1027_v51  ;;  %v460_v10 = vmul.f32 %v459_v7, %v448_v62  ;;  %v4165_v20 = vld [vmem:[#allocation2 + $0x10] sm:$0xff]  ;;  %v4167_v21 = vld [vmem:[#allocation2 + $0x18] sm:$0xff] }
  0x49   : > { %v1154_v36 = vrot.slane %v1146_v54, %v3915_v16  ;;  %v1164_v35 = vcombine.low %v1039_v52, %v1043_v56  ;;  %v461_v11 = vmul.f32 %v459_v7, %v449_v1  ;;  %v1762_v17 = vpack.c.bf16 %v1747_v5, %v1746_v4  ;;  %v1750_v29 = vld [vmem:[#allocation2 + $0x2a] sm:$0xff]  ;;  %v1748_v31 = vld [vmem:[#allocation2 + $0x12] sm:$0xff]  ;;  %v1749_v28 = vld [vmem:[#allocation2 + $0x1a] sm:$0xff] }
  0x4a   : > { %v1171_v37 = vrot.slane %v1163_v57, %v3915_v16  ;;  %3540 = vmatmul.mubr.msk.bf16.vlgmr.msra.gmra.mxu0 %vm711_vm2, %v1488_v18  ;;  %v1161_v61 = vrot.slane %v1147_v26, %v3915_v16  ;;  %v1207_v22 = vcombine.high %v460_v10, %v460_v10  ;;  %v1214_v24 = vrot.slane %v460_v10, %v3908_v13  ;;  %v1751_v32 = vld [vmem:[#allocation2 + $0x32] sm:$0xff]  ;;  %v1752_v57 = vld [vmem:[#allocation2 + $0x3a] sm:$0xff]  ;;  %v1753_v18 = vld [vmem:[#allocation2 + $0x42] sm:$0xff] }
  0x4b   : > { %3574 = vmatpush3.bf16.msra.mxu0 %v1797_v59  ;;  %v1178_v63 = vrot.slane %v1164_v35, %v3915_v16  ;;  %3543 = vmatprep.mubr.msk.bf16.mxu0 %vm711_vm2, %v4136_v58  ;;  %v1256_v27 = vcombine.high %v461_v11, %v461_v11  ;;  %v1263_v30 = vrot.slane %v461_v11, %v3908_v13  ;;  %v2129_v42 = vsel %vm1521_vm0, %v3368_v60, 0  ;;  %v4202_v5 = vld [vmem:[%s4715_s3 + $0x18] sm:$0xf] }
  0x4c   : > { %v1483_v2 = vld [vmem:[#allocation2 + $0x79] sm:$0xff]  ;;  %v1162_v3 = vcombine.low %v1154_v36, %v1161_v61  ;;  %3706 = vmatprep.subr.msk.bf16.mxu0 %vm1521_vm0, %v3368_v60  ;;  %v1221_v33 = vrot.slane %v1207_v22, %v3908_v13  ;;  %v1222_v34 = vcombine.high %v1214_v24, %v1214_v24  ;;  %v1230_v39 = vrot.slane %v1214_v24, %v3908_v13 }
  0x4d   : > { %v1484_v6 = vld [vmem:[#allocation2 + $0x81] sm:$0xff]  ;;  %v1179_v45 = vcombine.low %v1171_v37, %v1178_v63  ;;  %v1462_v40 = vpack.c.bf16 %v1447_v19, %v1446_v12  ;;  %v1463_v41 = vpack.c.bf16 %v4167_v21, %v4165_v20  ;;  %v1270_v43 = vrot.slane %v1256_v27, %v3908_v13  ;;  %v1754_v60 = vld [vmem:[#allocation2 + $0x52] sm:$0xff] }
  0x4e   : > { %v4155_v8 = vpack.c.bf16 %v1484_v6, %v1483_v2  ;;  %1199 = vst.msk [vmem:[#allocation2 + $0x89] sm:$0xff] %vm711_vm2, %v1162_v3  ;;  %1203 = vst.msk [vmem:[#allocation2 + $0xb1] sm:$0xff] %vm711_vm2, %v1162_v3  ;;  %v1223_v44 = vcombine.high %v1221_v33, %v1221_v33  ;;  %v1237_v46 = vrot.slane %v1221_v33, %v3908_v13  ;;  %v1755_v61 = vld [vmem:[#allocation2 + $0x5a] sm:$0xff] }
  0x4f   : > { %1200 = vst.msk [vmem:[#allocation2 + $0x91] sm:$0xff] %vm711_vm2, %v1179_v45  ;;  %1204 = vst.msk [vmem:[#allocation2 + $0xb9] sm:$0xff] %vm711_vm2, %v1179_v45  ;;  %v1244_v48 = vrot.slane %v1222_v34, %v3908_v13  ;;  %v1252_v49 = vcombine.high %v1230_v39, %v1230_v39  ;;  %v1763_v51 = vpack.c.bf16 %v1749_v28, %v1748_v31  ;;  %v1455_v20 = vld [vmem:[#allocation2 + $0x58] sm:$0xff] }
  0x50   : > { %3551 = vmatprep.mubr.msk.bf16.mxu1 %vm711_vm2, %v4155_v8  ;;  %v4182_v52 = vpack.c.bf16 %v1451_v25, %v1450_v23  ;;  %v4184_v54 = vpack.c.bf16 %v1751_v32, %v1750_v29  ;;  %v1271_v55 = vcombine.high %v1263_v30, %v1263_v30  ;;  %v1251_v59 = vrot.slane %v1223_v44, %v3908_v13  ;;  %v4232_v44 = vld [vmem:[%s4715_s3 + $0x14] sm:$0xf] }
  0x51   : > { %v1253_v26 = vcombine.high %v1237_v46, %v1237_v46  ;;  %v1254_v36 = vcombine.high %v1244_v48, %v1244_v48  ;;  %v1279_v35 = vrot.slane %v1263_v30, %v3908_v13  ;;  %v1308_v62 = vrot.slane %v1230_v39, %v3913_v15 }
  0x52   : > { %3544 = vmatmul.mubr.msk.bf16.gmra.mxu0 %vm711_vm2, %v4159_v53  ;;  %v1312_v63 = vrot.slane %v1244_v48, %v3913_v15  ;;  %v1316_v9 = vrot.slane %v1252_v49, %v3913_v15  ;;  %v1255_v0 = vcombine.high %v1251_v59, %v1251_v59  ;;  %v1272_v2 = vcombine.high %v1270_v43, %v1270_v43 }
  0x53   : > { %3575 = vmatprep.mubr.msk.bf16.mxu0 %vm711_vm2, %v1762_v17  ;;  %v1320_v1 = vrot.slane %v1254_v36, %v3913_v15  ;;  %v1286_v3 = vrot.slane %v1270_v43, %v3908_v13  ;;  %v4197_v4 = vpack.c.bf16 %v1753_v18, %v1752_v57  ;;  %v1324_v6 = vrot.slane %v1237_v46, %v3913_v15  ;;  %v1453_v57 = vld [vmem:[#allocation2 + $0x40] sm:$0xff]  ;;  %v1757_v36 = vld [vmem:[#allocation2 + $0x6a] sm:$0xff] }
  0x54   : > { %v1328_v45 = vrot.slane %v1251_v59, %v3913_v15  ;;  %v1293_v7 = vrot.slane %v1271_v55, %v3908_v13  ;;  %v4209_v10 = vpack.c.bf16 %v1755_v61, %v1754_v60  ;;  %v1332_v11 = vrot.slane %v1253_v26, %v3913_v15  ;;  %v1756_v26 = vld [vmem:[#allocation2 + $0x62] sm:$0xff] }
  0x55   : > { %v1485_v50 = vld [vmem:[#allocation2 + $0x89] sm:$0xff]  ;;  %v1336_v12 = vrot.slane %v1255_v0, %v3913_v15  ;;  %v1963_v17 = vsel %vm1521_vm0, %v4057_v47, 0  ;;  %v1369_v19 = vcombine.low %v1308_v62, %v1312_v63  ;;  %v1370_v22 = vcombine.low %v1316_v9, %v1320_v1  ;;  %v1758_v62 = vld [vmem:[#allocation2 + $0x7a] sm:$0xff] }
  0x56   : > { %v1486_v56 = vld [vmem:[#allocation2 + $0x91] sm:$0xff]  ;;  %v1386_v24 = vcombine.low %v1324_v6, %v1328_v45  ;;  %v1300_v23 = vrot.slane %v1272_v2, %v3908_v13  ;;  %v1301_v25 = vcombine.high %v1279_v35, %v1279_v35  ;;  %v1302_v29 = vcombine.high %v1286_v3, %v1286_v3  ;;  %v1759_v63 = vld [vmem:[#allocation2 + $0x82] sm:$0xff] }
  0x57   : > { %v4188_v37 = vpack.c.bf16 %v1486_v56, %v1485_v50  ;;  %v1387_v27 = vcombine.low %v1332_v11, %v1336_v12  ;;  %v1377_v30 = vrot.slane %v1369_v19, %v3915_v16  ;;  %v1384_v31 = vrot.slane %v1370_v22, %v3915_v16  ;;  %v1452_v56 = vld [vmem:[#allocation2 + $0x38] sm:$0xff]  ;;  %v1456_v6 = vld [vmem:[#allocation2 + $0x60] sm:$0xff]  ;;  %v1760_v11 = vld [vmem:[#allocation2 + $0x8a] sm:$0xff] }
  0x58   : > { %v1394_v47 = vrot.slane %v1386_v24, %v3915_v16  ;;  %v1303_v28 = vcombine.high %v1293_v7, %v1293_v7  ;;  %v1304_v33 = vcombine.high %v1300_v23, %v1300_v23  ;;  %v1340_v34 = vrot.slane %v1279_v35, %v3913_v15  ;;  %v1458_v45 = vld [vmem:[#allocation2 + $0x78] sm:$0xff]  ;;  %v1460_v24 = vld [vmem:[#allocation2 + $0x88] sm:$0xff] }
  0x59   : > { %3552 = vmatmul.mubr.msk.bf16.gmra.mxu1 %vm711_vm2, %v4188_v37  ;;  %v1401_v32 = vrot.slane %v1387_v27, %v3915_v16  ;;  %v1344_v39 = vrot.slane %v1293_v7, %v3913_v15  ;;  %v1356_v43 = vrot.slane %v1286_v3, %v3913_v15  ;;  %v1360_v48 = vrot.slane %v1300_v23, %v3913_v15  ;;  %v1459_v7 = vld [vmem:[#allocation2 + $0x80] sm:$0xff]  ;;  %v1761_v12 = vld [vmem:[#allocation2 + $0x92] sm:$0xff] }
  0x5a   : > { %3557 = vmatprep.mubr.msk.bf16.mxu1 %vm711_vm2, %v1462_v40  ;;  %3576 = vmatmul.mubr.msk.bf16.vlgmr.msra.gmra.mxu0 %vm711_vm2, %v1763_v51  ;;  %v1385_v40 = vcombine.low %v1377_v30, %v1384_v31  ;;  %v1352_v13 = vrot.slane %v1303_v28, %v3913_v15  ;;  %v1364_v49 = vrot.slane %v1302_v29, %v3913_v15  ;;  %v1461_v27 = vld [vmem:[#allocation2 + $0x90] sm:$0xff]  ;;  %v3404_v29 = vld [vmem:[%s4715_s3 + $0x20] sm:$0xf]  ;;  %v1925_v31 = vld [vmem:[#allocation2 + $0xa8] sm:$0xff] }
  0x5b   : > { %3610 = vmatpush3.bf16.msra.mxu0 %v2129_v42  ;;  %3579 = vmatprep.mubr.msk.bf16.mxu0 %vm711_vm2, %v4184_v54  ;;  %v1348_v42 = vrot.slane %v1301_v25, %v3913_v15  ;;  %v1402_v46 = vcombine.low %v1394_v47, %v1401_v32  ;;  %v1368_v50 = vrot.slane %v1304_v33, %v3913_v15  ;;  %v1454_v15 = vld [vmem:[#allocation2 + $0x50] sm:$0xff]  ;;  %v2462_v25 = vsel %vm1521_vm0, %v4202_v5, 0  ;;  %v1924_v30 = vld [vmem:[#allocation2 + $0xa0] sm:$0xff] }
  0x5c   : > { %3708 = vmatprep.subr.msk.bf16.mxu0 %vm1521_vm0, %v4202_v5  ;;  %1442 = vst.msk [vmem:[#allocation2 + $0xc9] sm:$0xff] %vm711_vm2, %v1385_v40  ;;  %v1403_v51 = vcombine.low %v1340_v34, %v1344_v39  ;;  %v1420_v18 = vcombine.low %v1356_v43, %v1360_v48  ;;  %v1465_v61 = vpack.c.bf16 %v1453_v57, %v1452_v56  ;;  %v2092_v47 = vld [vmem:[#allocation2 + $0xb1] sm:$0xff]  ;;  %v2093_v28 = vld [vmem:[#allocation2 + $0xb9] sm:$0xff] }
  0x5d   : > { %v1404_v55 = vcombine.low %v1348_v42, %v1352_v13  ;;  %1443 = vst.msk [vmem:[#allocation2 + $0xd1] sm:$0xff] %vm711_vm2, %v1402_v46  ;;  %v1421_v59 = vcombine.low %v1364_v49, %v1368_v50  ;;  %v1466_v0 = vpack.c.bf16 %v1455_v20, %v1454_v15  ;;  %v4255_v2 = vpack.c.bf16 %v1757_v36, %v1756_v26  ;;  %v1926_v34 = vld [vmem:[#allocation2 + $0xb0] sm:$0xff]  ;;  %v1927_v39 = vld [vmem:[#allocation2 + $0xb8] sm:$0xff] }
  0x5e   : > { %v1411_v21 = vrot.slane %v1403_v51, %v3915_v16  ;;  %v1428_v35 = vrot.slane %v1420_v18, %v3915_v16  ;;  %v4258_v3 = vpack.c.bf16 %v1759_v63, %v1758_v62  ;;  %v1468_v19 = vpack.c.bf16 %v1459_v7, %v1458_v45  ;;  %v2257_v46 = vld [vmem:[#allocation2 + $0xaa] sm:$0xff]  ;;  %v2259_v56 = vld [vmem:[#allocation2 + $0xba] sm:$0xff] }
  0x5f   : > { %v1435_v60 = vrot.slane %v1421_v59, %v3915_v16  ;;  %v4267_v22 = vpack.c.bf16 %v1761_v12, %v1760_v11  ;;  %v1469_v23 = vpack.c.bf16 %v1461_v27, %v1460_v24  ;;  %v1934_v32 = vpack.c.bf16 %v1925_v31, %v1924_v30  ;;  %v2577_v57 = vld [vmem:[#allocation2 + $0x51] sm:$0xff]  ;;  %v2578_v18 = vld [vmem:[#allocation2 + $0x59] sm:$0xff] }
  0x60   : > { %v4308_v33 = vpack.c.bf16 %v2093_v28, %v2092_v47  ;;  %v1935_v40 = vpack.c.bf16 %v1927_v39, %v1926_v34  ;;  %v2794_v42 = vsel %vm1521_vm0, %v3404_v29, 0  ;;  %v2593_v15 = vpack.c.bf16 %v2578_v18, %v2577_v57 }
  0x61   : > { %3558 = vmatmul.mubr.msk.bf16.vlgmr.msra.gmra.mxu1 %vm711_vm2, %v1463_v41  ;;  %v1418_v41 = vrot.slane %v1404_v55, %v3915_v16  ;;  %v1436_v1 = vcombine.low %v1428_v35, %v1435_v60  ;;  %v1457_v16 = vld [vmem:[#allocation2 + $0x68] sm:$0xff]  ;;  %v2258_v55 = vld [vmem:[#allocation2 + $0xb2] sm:$0xff] }
  0x62   : > { %3592 = vmatpush3.bf16.msra.mxu1 %v1963_v17  ;;  %3561 = vmatprep.mubr.msk.bf16.mxu1 %vm711_vm2, %v4182_v52  ;;  %v1467_v17 = vpack.c.bf16 %v1457_v16, %v1456_v6  ;;  %v2267_v59 = vpack.c.bf16 %v2259_v56, %v2258_v55 }
  0x63   : > { %3580 = vmatmul.mubr.msk.bf16.gmra.mxu0 %vm711_vm2, %v4197_v4  ;;  %3707 = vmatprep.subr.msk.bf16.mxu1 %vm1521_vm0, %v4232_v44  ;;  %v1419_v9 = vcombine.low %v1411_v21, %v1418_v41  ;;  %1445 = vst.msk [vmem:[#allocation2 + $0xe1] sm:$0xff] %vm711_vm2, %v1436_v1  ;;  %v2423_v43 = vld [vmem:[#allocation2 + $0xc8] sm:$0xff] }
  0x64   : > { %3583 = vmatprep.mubr.msk.bf16.mxu0 %vm711_vm2, %v4209_v10  ;;  %v2590_v41 = vld [vmem:[#allocation2 + $0xd1] sm:$0xff] }
  0x65   : > { %1444 = vst.msk [vmem:[#allocation2 + $0xd9] sm:$0xff] %vm711_vm2, %v1419_v9 }
  0x69   : > { %3562 = vmatmul.mubr.msk.bf16.gmra.mxu1 %vm711_vm2, %v1465_v61 }
  0x6a   : > { %3565 = vmatprep.mubr.msk.bf16.mxu1 %vm711_vm2, %v1466_v0  ;;  %v2758_v26 = vld [vmem:[#allocation2 + $0xe2] sm:$0xff] }
  0x6b   : > { %3584 = vmatmul.mubr.msk.bf16.gmra.mxu0 %vm711_vm2, %v4255_v2 }
  0x6c   : > { %3587 = vmatprep.mubr.msk.bf16.mxu0 %vm711_vm2, %v4258_v3  ;;  %v2425_v48 = vld [vmem:[#allocation2 + $0xd8] sm:$0xff]  ;;  %v2426_v49 = vld [vmem:[#allocation2 + $0xe0] sm:$0xff] }
  0x6d   : > { %v2434_v51 = vpack.c.bf16 %v2426_v49, %v2425_v48  ;;  %v2756_v20 = vld [vmem:[#allocation2 + $0xd2] sm:$0xff] }
  0x6e   : > { %v2591_v60 = vld [vmem:[#allocation2 + $0xd9] sm:$0xff] }
  0x71   : > { %3566 = vmatmul.mubr.msk.bf16.gmra.mxu1 %vm711_vm2, %v1467_v17 }
  0x72   : > { %3569 = vmatprep.mubr.msk.bf16.mxu1 %vm711_vm2, %v1468_v19 }
  0x73   : > { %3588 = vmatmul.mubr.msk.bf16.gmra.mxu0 %vm711_vm2, %v4267_v22 }
  0x74   : > { %3611 = vmatprep.mubr.msk.bf16.mxu0 %vm711_vm2, %v4136_v58  ;;  %v2295_v58 = vsel %vm1521_vm0, %v4232_v44, 0 }
  0x79   : > { %3570 = vmatmul.mubr.msk.bf16.gmra.mxu1 %vm711_vm2, %v1469_v23 }
  0x7a   : > { %3593 = vmatprep.mubr.msk.bf16.mxu1 %vm711_vm2, %v4182_v52  ;;  %v3395_v52 = vld [vmem:[%s4715_s3 + $0x1c] sm:$0xf] }
  0x7b   : > { %3612 = vmatmul.mubr.msk.bf16.vlgmr.msra.gmra.mxu0 %vm711_vm2, %v4159_v53  ;;  %v2091_v53 = vld [vmem:[#allocation2 + $0xa9] sm:$0xff]  ;;  %v2628_v13 = vsel %vm1521_vm0, %v3395_v52, 0 }
  0x7c   : > { %3646 = vmatpush3.bf16.msra.mxu0 %v2462_v25  ;;  %3615 = vmatprep.mubr.msk.bf16.mxu0 %vm711_vm2, %v4031_v14  ;;  %v2090_v14 = vld [vmem:[#allocation2 + $0xa1] sm:$0xff] }
  0x7d   : > { %3710 = vmatprep.subr.msk.bf16.mxu0 %vm1521_vm0, %v3404_v29  ;;  %v4300_v5 = vpack.c.bf16 %v2091_v53, %v2090_v14 }
  0x81   : > { %3594 = vmatmul.mubr.msk.bf16.vlgmr.msra.gmra.mxu1 %vm711_vm2, %v1465_v61 }
  0x82   : > { %3628 = vmatpush3.bf16.msra.mxu1 %v2295_v58  ;;  %3597 = vmatprep.mubr.msk.bf16.mxu1 %vm711_vm2, %v1466_v0 }
  0x83   : > { %3616 = vmatmul.mubr.msk.bf16.gmra.mxu0 %vm711_vm2, %v4046_v38  ;;  %3709 = vmatprep.subr.msk.bf16.mxu1 %vm1521_vm0, %v3395_v52 }
  0x84   : > { %3619 = vmatprep.mubr.msk.bf16.mxu0 %vm711_vm2, %v4155_v8 }
  0x89   : > { %3598 = vmatmul.mubr.msk.bf16.gmra.mxu1 %vm711_vm2, %v1467_v17 }
  0x8a   : > { %3601 = vmatprep.mubr.msk.bf16.mxu1 %vm711_vm2, %v1468_v19 }
  0x8b   : > { %3620 = vmatmul.mubr.msk.bf16.gmra.mxu0 %vm711_vm2, %v4188_v37 }
  0x8c   : > { %3623 = vmatprep.mubr.msk.bf16.mxu0 %vm711_vm2, %v4300_v5 }
  0x91   : > { %3602 = vmatmul.mubr.msk.bf16.gmra.mxu1 %vm711_vm2, %v1469_v23 }
  0x92   : > { %3605 = vmatprep.mubr.msk.bf16.mxu1 %vm711_vm2, %v1934_v32 }
  0x93   : > { %3624 = vmatmul.mubr.msk.bf16.gmra.mxu0 %vm711_vm2, %v4308_v33 }
  0x94   : > { %3647 = vmatprep.mubr.msk.bf16.mxu0 %vm711_vm2, %v1466_v0 }
  0x99   : > { %3606 = vmatmul.mubr.msk.bf16.gmra.mxu1 %vm711_vm2, %v1935_v40 }
  0x9a   : > { %3629 = vmatprep.mubr.msk.bf16.mxu1 %vm711_vm2, %v4184_v54  ;;  %v2424_v54 = vld [vmem:[#allocation2 + $0xd0] sm:$0xff] }
  0x9b   : > { %3648 = vmatmul.mubr.msk.bf16.vlgmr.msra.gmra.mxu0 %vm711_vm2, %v1467_v17  ;;  %v2433_v44 = vpack.c.bf16 %v2424_v54, %v2423_v43 }
  0x9c   : > { %3682 = vmatpush3.bf16.msra.mxu0 %v2794_v42  ;;  %3651 = vmatprep.mubr.msk.bf16.mxu0 %vm711_vm2, %v1468_v19 }
  0xa1   : > { %3630 = vmatmul.mubr.msk.bf16.vlgmr.msra.gmra.mxu1 %vm711_vm2, %v4197_v4  ;;  %v2256_v4 = vld [vmem:[#allocation2 + $0xa2] sm:$0xff] }
  0xa2   : > { %3664 = vmatpush3.bf16.msra.mxu1 %v2628_v13  ;;  %3633 = vmatprep.mubr.msk.bf16.mxu1 %vm711_vm2, %v4209_v10  ;;  %v2266_v50 = vpack.c.bf16 %v2257_v46, %v2256_v4 }
  0xa3   : > { %3652 = vmatmul.mubr.msk.bf16.gmra.mxu0 %vm711_vm2, %v1469_v23 }
  0xa4   : > { %3655 = vmatprep.mubr.msk.bf16.mxu0 %vm711_vm2, %v1934_v32 }
  0xa9   : > { %3634 = vmatmul.mubr.msk.bf16.gmra.mxu1 %vm711_vm2, %v4255_v2 }
  0xaa   : > { %3637 = vmatprep.mubr.msk.bf16.mxu1 %vm711_vm2, %v4258_v3 }
  0xab   : > { %3656 = vmatmul.mubr.msk.bf16.gmra.mxu0 %vm711_vm2, %v1935_v40 }
  0xac   : > { %3659 = vmatprep.mubr.msk.bf16.mxu0 %vm711_vm2, %v2433_v44 }
  0xb1   : > { %3638 = vmatmul.mubr.msk.bf16.gmra.mxu1 %vm711_vm2, %v4267_v22 }
  0xb2   : > { %3641 = vmatprep.mubr.msk.bf16.mxu1 %vm711_vm2, %v2266_v50 }
  0xb3   : > { %3660 = vmatmul.mubr.msk.bf16.gmra.mxu0 %vm711_vm2, %v2434_v51 }
  0xb4   : > { %3683 = vmatprep.mubr.msk.bf16.mxu0 %vm711_vm2, %v4209_v10  ;;  %v2755_v10 = vld [vmem:[#allocation2 + $0xca] sm:$0xff] }
  0xb5   : > { %v2765_v21 = vpack.c.bf16 %v2756_v20, %v2755_v10 }
  0xb9   : > { %3642 = vmatmul.mubr.msk.bf16.gmra.mxu1 %vm711_vm2, %v2267_v59 }
  0xba   : > { %3665 = vmatprep.mubr.msk.bf16.mxu1 %vm711_vm2, %v2593_v15 }
  0xbb   : > { %3684 = vmatmul.mubr.msk.bf16.vlgmr.msra.gmra.mxu0 %vm711_vm2, %v4255_v2 }
  0xbc   : > { %3687 = vmatprep.mubr.msk.bf16.mxu0 %vm711_vm2, %v4258_v3 }
  0xc1   : > { %3666 = vmatmul.mubr.msk.bf16.vlgmr.msra.gmra.mxu1 %vm711_vm2, %v4046_v38  ;;  %v2589_v38 = vld [vmem:[#allocation2 + $0xc9] sm:$0xff] }
  0xc2   : > { %3669 = vmatprep.mubr.msk.bf16.mxu1 %vm711_vm2, %v4155_v8  ;;  %v2757_v8 = vld [vmem:[#allocation2 + $0xda] sm:$0xff]  ;;  %v2599_v36 = vpack.c.bf16 %v2590_v41, %v2589_v38 }
  0xc3   : > { %3688 = vmatmul.mubr.msk.bf16.gmra.mxu0 %vm711_vm2, %v4267_v22  ;;  %v2766_v35 = vpack.c.bf16 %v2758_v26, %v2757_v8 }
  0xc4   : > { %3691 = vmatprep.mubr.msk.bf16.mxu0 %vm711_vm2, %v2266_v50 }
  0xc9   : > { %3670 = vmatmul.mubr.msk.bf16.gmra.mxu1 %vm711_vm2, %v4188_v37  ;;  %v2592_v37 = vld [vmem:[#allocation2 + $0xe1] sm:$0xff] }
  0xca   : > { %3673 = vmatprep.mubr.msk.bf16.mxu1 %vm711_vm2, %v4300_v5  ;;  %v2600_v61 = vpack.c.bf16 %v2592_v37, %v2591_v60 }
  0xcb   : > { %3692 = vmatmul.mubr.msk.bf16.gmra.mxu0 %vm711_vm2, %v2267_v59 }
  0xcc   : > { %3695 = vmatprep.mubr.msk.bf16.mxu0 %vm711_vm2, %v2765_v21 }
  0xd1   : > { %3674 = vmatmul.mubr.msk.bf16.gmra.mxu1 %vm711_vm2, %v4308_v33 }
  0xd2   : > { %3677 = vmatprep.mubr.msk.bf16.mxu1 %vm711_vm2, %v2599_v36 }
  0xd3   : > { %3696 = vmatmul.mubr.msk.bf16.gmra.mxu0 %vm711_vm2, %v2766_v35 }
  0xd9   : > { %3678 = vmatmul.mubr.msk.bf16.gmra.mxu1 %vm711_vm2, %v2600_v61 }
  0xf8   : > { %v3549_v62 = vpop.f32.mrf.mxu1 }
  0xfa   : > { %v1591_v0 = vpop.f32.mrf.mxu1 }
  0xfc   : > { %v3550_v3 = vpop.f32.mrf.mxu1 }
  0xfe   : > { %v1594_v45 = vpop.f32.mrf.mxu1 }
 0x10a   : > { %v3541_v63 = vpop.f32.mrf.mxu0 }
 0x10c   : > { %v1559_v9 = vpop.f32.mrf.mxu0 }
 0x10e   : > { %v3542_v1 = vpop.f32.mrf.mxu0 }
 0x110   : > { %v1562_v2 = vpop.f32.mrf.mxu0 }
 0x112   : > { %v3545_v6 = vpop.f32.mrf.mxu0 }
 0x114   : > { %v1575_v16 = vpop.f32.mrf.mxu0 }
 0x116   : > { %v3546_v7 = vpop.f32.mrf.mxu0 }
 0x118   : > { %v1578_v11 = vpop.f32.mrf.mxu0 }
 0x119   : > { %v3553_v12 = vpop.f32.mrf.mxu1 }
 0x11a   : > { %v3577_v17 = vpop.f32.mrf.mxu0 }
 0x11b   : > { %v1607_v19 = vpop.f32.mrf.mxu1 }
 0x11c   : > { %v1833_v22 = vpop.f32.mrf.mxu0 }
 0x11d   : > { %v3554_v24 = vpop.f32.mrf.mxu1 }
 0x11e   : > { %v3578_v27 = vpop.f32.mrf.mxu0 }
 0x11f   : > { %v1610_v23 = vpop.f32.mrf.mxu1 }
 0x120   : > { %v1836_v25 = vpop.f32.mrf.mxu0 }
 0x121   : > { %v3559_v29 = vpop.f32.mrf.mxu1 }
 0x122   : > { %v1692_v58 = vadd.f32 %v3559_v29, %v3541_v63 }
 0x123   : > { %v1683_v52 = vpop.f32.mrf.mxu1  ;;  %v3581_v14 = vpop.f32.mrf.mxu0 }
 0x124   : > { %v1684_v53 = vadd.f32 %v1683_v52, %v1559_v9  ;;  %v4364_v5 = vadd.f32 %v3577_v17, %v1692_v58 }
 0x125   : > { %v3560_v30 = vpop.f32.mrf.mxu1  ;;  %v1849_v31 = vpop.f32.mrf.mxu0 }
 0x126   : > { %v1695_v47 = vadd.f32 %v3560_v30, %v3542_v1  ;;  %v4366_v28 = vadd.f32 %v1833_v22, %v1684_v53 }
 0x127   : > { %v1686_v32 = vpop.f32.mrf.mxu1  ;;  %v3582_v33 = vpop.f32.mrf.mxu0 }
 0x128   : > { %v1687_v34 = vadd.f32 %v1686_v32, %v1562_v2  ;;  %v4368_v39 = vadd.f32 %v3578_v27, %v1695_v47 }
 0x129   : > { %v3563_v40 = vpop.f32.mrf.mxu1  ;;  %v1852_v42 = vpop.f32.mrf.mxu0 }
 0x12a   : > { %v1708_v13 = vadd.f32 %v3563_v40, %v3545_v6  ;;  %v4370_v43 = vadd.f32 %v1836_v25, %v1687_v34 }
 0x12b   : > { %v1699_v54 = vpop.f32.mrf.mxu1  ;;  %v3585_v44 = vpop.f32.mrf.mxu0 }
 0x12c   : > { %v1700_v4 = vadd.f32 %v1699_v54, %v1575_v16  ;;  %v4372_v46 = vadd.f32 %v3581_v14, %v1708_v13 }
 0x12d   : > { %v3564_v48 = vpop.f32.mrf.mxu1  ;;  %v1865_v49 = vpop.f32.mrf.mxu0 }
 0x12e   : > { %v1711_v50 = vadd.f32 %v3564_v48, %v3546_v7  ;;  %v4374_v51 = vadd.f32 %v1849_v31, %v1700_v4 }
 0x12f   : > { %v1702_v55 = vpop.f32.mrf.mxu1  ;;  %v3586_v56 = vpop.f32.mrf.mxu0 }
 0x130   : > { %v1703_v57 = vadd.f32 %v1702_v55, %v1578_v11  ;;  %v4376_v18 = vadd.f32 %v3582_v33, %v1711_v50 }
 0x131   : > { %v3567_v59 = vpop.f32.mrf.mxu1  ;;  %v1868_v15 = vpop.f32.mrf.mxu0 }
 0x132   : > { %v1724_v10 = vadd.f32 %v3567_v59, %v3549_v62  ;;  %v4378_v20 = vadd.f32 %v1852_v42, %v1703_v57 }
 0x133   : > { %v1715_v21 = vpop.f32.mrf.mxu1  ;;  %v3589_v38 = vpop.f32.mrf.mxu0 }
 0x134   : > { %v1716_v41 = vadd.f32 %v1715_v21, %v1591_v0  ;;  %v4380_v8 = vadd.f32 %v3585_v44, %v1724_v10 }
 0x135   : > { %v3568_v26 = vpop.f32.mrf.mxu1  ;;  %v1881_v36 = vpop.f32.mrf.mxu0 }
 0x136   : > { %v1727_v35 = vadd.f32 %v3568_v26, %v3550_v3  ;;  %v4382_v60 = vadd.f32 %v1865_v49, %v1716_v41 }
 0x137   : > { %v1718_v37 = vpop.f32.mrf.mxu1  ;;  %v3590_v61 = vpop.f32.mrf.mxu0 }
 0x138   : > { %v1719_v63 = vadd.f32 %v1718_v37, %v1594_v45  ;;  %v4384_v9 = vadd.f32 %v3586_v56, %v1727_v35 }
 0x139   : > { %v3571_v1 = vpop.f32.mrf.mxu1  ;;  %v1884_v2 = vpop.f32.mrf.mxu0 }
 0x13a   : > { %v1740_v62 = vadd.f32 %v3571_v1, %v3553_v12  ;;  %v4386_v6 = vadd.f32 %v1868_v15, %v1719_v63 }
 0x13b   : > { %v1731_v16 = vpop.f32.mrf.mxu1  ;;  %v4388_v7 = vpop.f32.mrf.mxu0 }
 0x13c   : > { %v1732_v0 = vadd.f32 %v1731_v16, %v1607_v19  ;;  %v4390_v11 = vadd.f32 %v3589_v38, %v1740_v62 }
 0x13d   : > { %v3572_v17 = vpop.f32.mrf.mxu1  ;;  %v4392_v3 = vpop.f32.mrf.mxu0 }
 0x13e   : > { %v1743_v22 = vadd.f32 %v3572_v17, %v3554_v24  ;;  %v4394_v27 = vadd.f32 %v1881_v36, %v1732_v0 }
 0x13f   : > { %v1734_v45 = vpop.f32.mrf.mxu1  ;;  %v4396_v25 = vpop.f32.mrf.mxu0 }
 0x140   : > { %v1735_v29 = vadd.f32 %v1734_v45, %v1610_v23  ;;  %v4398_v58 = vadd.f32 %v3590_v61, %v1743_v22 }
 0x141   : > { %v3595_v12 = vpop.f32.mrf.mxu1  ;;  %v4400_v52 = vpop.f32.mrf.mxu0 }
 0x142   : > { %v4402_v14 = vadd.f32 %v1884_v2, %v1735_v29 }
 0x143   : > { %v1999_v19 = vpop.f32.mrf.mxu1  ;;  %v4404_v53 = vpop.f32.mrf.mxu0 }
 0x145   : > { %v3596_v30 = vpop.f32.mrf.mxu1  ;;  %v4406_v31 = vpop.f32.mrf.mxu0 }
 0x147   : > { %v2002_v24 = vpop.f32.mrf.mxu1  ;;  %v4408_v47 = vpop.f32.mrf.mxu0 }
 0x149   : > { %v3599_v32 = vpop.f32.mrf.mxu1  ;;  %v4410_v33 = vpop.f32.mrf.mxu0 }
 0x14b   : > { %v2015_v23 = vpop.f32.mrf.mxu1  ;;  %v4412_v34 = vpop.f32.mrf.mxu0 }
 0x14d   : > { %v3600_v40 = vpop.f32.mrf.mxu1  ;;  %v4414_v42 = vpop.f32.mrf.mxu0 }
 0x14f   : > { %v2018_v13 = vpop.f32.mrf.mxu1  ;;  %v4416_v54 = vpop.f32.mrf.mxu0 }
 0x151   : > { %v3603_v44 = vpop.f32.mrf.mxu1  ;;  %v4418_v4 = vpop.f32.mrf.mxu0 }
 0x153   : > { %v2031_v48 = vpop.f32.mrf.mxu1  ;;  %v4420_v49 = vpop.f32.mrf.mxu0 }
 0x155   : > { %v3604_v50 = vpop.f32.mrf.mxu1  ;;  %v4422_v55 = vpop.f32.mrf.mxu0 }
 0x157   : > { %v2034_v56 = vpop.f32.mrf.mxu1  ;;  %v4424_v57 = vpop.f32.mrf.mxu0 }
 0x159   : > { %v4426_v59 = vpop.f32.mrf.mxu1  ;;  %v4428_v15 = vpop.f32.mrf.mxu0 }
 0x15b   : > { %v4430_v10 = vpop.f32.mrf.mxu1  ;;  %v4432_v21 = vpop.f32.mrf.mxu0 }
 0x15d   : > { %v4434_v38 = vpop.f32.mrf.mxu1  ;;  %v4436_v41 = vpop.f32.mrf.mxu0 }
 0x15e   : > { %4720 = vst [vmem:[#allocation3_spill] sm:$0xff] %v4436_v41 }
 0x15f   : > { %v4438_v26 = vpop.f32.mrf.mxu1  ;;  %v4440_v36 = vpop.f32.mrf.mxu0 }
 0x160   : > { %4721 = vst [vmem:[#allocation4_spill] sm:$0xff] %v4440_v36 }
 0x161   : > { %v3631_v35 = vpop.f32.mrf.mxu1  ;;  %v4442_v37 = vpop.f32.mrf.mxu0 }
 0x162   : > { %4722 = vst [vmem:[#allocation5_spill] sm:$0xff] %v4442_v37 }
 0x163   : > { %v4444_v61 = vpop.f32.mrf.mxu1  ;;  %v4446_v63 = vpop.f32.mrf.mxu0 }
 0x164   : > { %4723 = vst [vmem:[#allocation6_spill] sm:$0xff] %v4446_v63 }
 0x165   : > { %v4448_v1 = vpop.f32.mrf.mxu1  ;;  %v4450_v2 = vpop.f32.mrf.mxu0 }
 0x166   : > { %4724 = vst [vmem:[#allocation7_spill] sm:$0xff] %v4450_v2 }
 0x167   : > { %v4452_v62 = vpop.f32.mrf.mxu1  ;;  %v4454_v16 = vpop.f32.mrf.mxu0 }
 0x168   : > { %4725 = vst [vmem:[#allocation8_spill] sm:$0xff] %v4454_v16 }
 0x169   : > { %v4456_v0 = vpop.f32.mrf.mxu1  ;;  %v4458_v17 = vpop.f32.mrf.mxu0 }
 0x16a   : > { %4726 = vst [vmem:[#allocation9_spill] sm:$0xff] %v4458_v17 }
 0x16b   : > { %v4460_v22 = vpop.f32.mrf.mxu1  ;;  %v4462_v45 = vpop.f32.mrf.mxu0 }
 0x16c   : > { %4727 = vst [vmem:[#allocation10_spill] sm:$0xff] %v4460_v22  ;;  %4728 = vst [vmem:[#allocation11_spill] sm:$0xff] %v4462_v45 }
 0x16d   : > { %v4464_v29 = vpop.f32.mrf.mxu1  ;;  %v4466_v37 = vpop.f32.mrf.mxu0 }
 0x16e   : > { %4729 = vst [vmem:[#allocation12_spill] sm:$0xff] %v4464_v29  ;;  %4730 = vst [vmem:[#allocation13_spill] sm:$0xff] %v4466_v37 }
 0x16f   : > { %v4468_v63 = vpop.f32.mrf.mxu1  ;;  %v4470_v36 = vpop.f32.mrf.mxu0 }
 0x170   : > { %4731 = vst [vmem:[#allocation14_spill] sm:$0xff] %v4468_v63  ;;  %4732 = vst [vmem:[#allocation15_spill] sm:$0xff] %v4470_v36  ;;  %v2064_v36 = vadd.f32 %v3595_v12, %v4364_v5  ;;  %v2063_v63 = vadd.f32 %v2002_v24, %v4370_v43  ;;  %v2069_v43 = vadd.f32 %v3600_v40, %v4376_v18 }
 0x171   : > { %v4472_v2 = vpop.f32.mrf.mxu1  ;;  %v4474_v41 = vpop.f32.mrf.mxu0  ;;  %v2073_v24 = vadd.f32 %v3604_v50, %v4384_v9  ;;  %v2074_v9 = vadd.f32 %v4430_v10, %v4394_v27  ;;  %v4740_v50 = vld [vmem:[#allocation3_spill] sm:$0xff] }
 0x172   : > { %4733 = vst [vmem:[#allocation16_spill] sm:$0xff] %v4472_v2  ;;  %4734 = vst [vmem:[#allocation17_spill] sm:$0xff] %v4474_v41  ;;  %v2062_v2 = vadd.f32 %v1999_v19, %v4366_v28  ;;  %v2065_v41 = vadd.f32 %v3596_v30, %v4368_v39  ;;  %v2066_v28 = vadd.f32 %v2015_v23, %v4374_v51 }
 0x173   : > { %v4477_v16 = vpop.f32.mrf.mxu1  ;;  %v4479_v17 = vpop.f32.mrf.mxu0  ;;  %v2229_v39 = vadd.f32 %v4400_v52, %v2063_v63  ;;  %v2235_v51 = vadd.f32 %v4408_v47, %v2069_v43  ;;  %v2071_v52 = vadd.f32 %v2034_v56, %v4386_v6  ;;  %v2239_v47 = vadd.f32 %v4416_v54, %v2073_v24 }
 0x174   : > { %4735 = vst [vmem:[#allocation18_spill] sm:$0xff] %v4477_v16  ;;  %4736 = vst [vmem:[#allocation19_spill] sm:$0xff] %v4479_v17  ;;  %v2231_v5 = vadd.f32 %v4396_v25, %v2065_v41  ;;  %v2232_v25 = vadd.f32 %v4406_v31, %v2066_v28  ;;  %v2076_v31 = vadd.f32 %v4426_v59, %v4390_v11  ;;  %v4743_v41 = vld [vmem:[#allocation5_spill] sm:$0xff] }
 0x175   : > { %v4481_v22 = vpop.f32.mrf.mxu1  ;;  %v4483_v45 = vpop.f32.mrf.mxu0  ;;  %v2237_v6 = vadd.f32 %v4418_v4, %v2071_v52 }
 0x176   : > { %4737 = vst [vmem:[#allocation20_spill] sm:$0xff] %v4483_v45  ;;  %v2230_v45 = vadd.f32 %v4388_v7, %v2064_v36  ;;  %v2067_v7 = vadd.f32 %v2018_v13, %v4378_v20  ;;  %v2242_v27 = vadd.f32 %v4420_v49, %v2076_v31  ;;  %v2240_v13 = vadd.f32 %v4422_v55, %v2074_v9 }
 0x177   : > { %v4485_v29 = vpop.f32.mrf.mxu1  ;;  %v4487_v37 = vpop.f32.mrf.mxu0  ;;  %v2397_v54 = vadd.f32 %v4448_v1, %v2231_v5 }
 0x178   : > { %4738 = vst [vmem:[#allocation21_spill] sm:$0xff] %v4485_v29  ;;  %4739 = vst [vmem:[#allocation22_spill] sm:$0xff] %v4487_v37  ;;  %v2228_v29 = vadd.f32 %v4392_v3, %v2062_v2  ;;  %v2068_v37 = vadd.f32 %v3599_v32, %v4372_v46  ;;  %v2072_v3 = vadd.f32 %v3603_v44, %v4380_v8 }
 0x179   : > { %v4493_v16 = vpop.f32.mrf.mxu1  ;;  %v4495_v17 = vpop.f32.mrf.mxu0  ;;  %v2070_v46 = vadd.f32 %v2031_v48, %v4382_v60  ;;  %v2396_v60 = vadd.f32 %v3631_v35, %v2230_v45  ;;  %v2395_v44 = vadd.f32 %v4452_v62, %v2229_v39  ;;  %v4553_v35 = vld [vmem:[%s4716_s4] ss:$0 sm:$0xff]  ;;  %v4746_v62 = vld [vmem:[#allocation6_spill] sm:$0xff]  ;;  %v4747_v45 = vld [vmem:[#allocation7_spill] sm:$0xff] }
 0x17a   : > { %v2234_v30 = vadd.f32 %v4404_v53, %v2068_v37  ;;  %v2233_v53 = vadd.f32 %v4410_v33, %v2067_v7  ;;  %v2238_v20 = vadd.f32 %v4412_v34, %v2072_v3  ;;  %v2077_v33 = vadd.f32 %v4434_v38, %v4398_v58  ;;  %v4742_v38 = vld [vmem:[#allocation10_spill] sm:$0xff]  ;;  %v4748_v5 = vld [vmem:[#allocation16_spill] sm:$0xff] }
 0x17b   : > { %v4506_v12 = vpop.f32.mrf.mxu1  ;;  %v3685_v19 = vpop.f32.mrf.mxu0  ;;  %v2236_v8 = vadd.f32 %v4414_v42, %v2070_v46  ;;  %v2075_v34 = vadd.f32 %v4438_v26, %v4402_v14  ;;  %v2394_v42 = vadd.f32 %v4444_v61, %v2228_v29  ;;  %v2563_v11 = vadd.f32 %v4432_v21, %v2396_v60  ;;  %v4741_v21 = vld [vmem:[#allocation4_spill] sm:$0xff]  ;;  %v4745_v61 = vld [vmem:[#allocation14_spill] sm:$0xff] }
 0x17c   : > { %v2243_v48 = vadd.f32 %v4424_v57, %v2077_v33  ;;  %v2400_v10 = vadd.f32 %v4456_v0, %v2234_v30  ;;  %v2564_v49 = vadd.f32 %v4741_v21, %v2397_v54  ;;  %v2398_v55 = vadd.f32 %v4742_v38, %v2232_v25  ;;  %v4749_v39 = vld [vmem:[#allocation18_spill] sm:$0xff]  ;;  %v4750_v3 = vld [vmem:[#allocation8_spill] sm:$0xff]  ;;  %v4751_v25 = vld [vmem:[#allocation9_spill] sm:$0xff] }
 0x17d   : > { %v4516_v18 = vpop.f32.mrf.mxu1  ;;  %v2830_v32 = vpop.f32.mrf.mxu0  ;;  %v2241_v14 = vadd.f32 %v4428_v15, %v2075_v34  ;;  %v2561_v56 = vadd.f32 %v4740_v50, %v2394_v42  ;;  %v2562_v26 = vadd.f32 %v4743_v41, %v2395_v44  ;;  %v4744_v15 = vld [vmem:[#allocation12_spill] sm:$0xff]  ;;  %v2399_v63 = vadd.f32 %v4745_v61, %v2233_v53  ;;  %v4752_v53 = vld [vmem:[#allocation11_spill] sm:$0xff] }
 0x17e   : > { %v2401_v37 = vadd.f32 %v4744_v15, %v2235_v51  ;;  %v2567_v0 = vadd.f32 %v4746_v62, %v2400_v10  ;;  %v2565_v29 = vadd.f32 %v4747_v45, %v2398_v55  ;;  %v2404_v28 = vadd.f32 %v4748_v5, %v2238_v20  ;;  %v4755_v44 = vld [vmem:[#allocation15_spill] sm:$0xff]  ;;  %v4756_v10 = vld [vmem:[#allocation17_spill] sm:$0xff]  ;;  %v4758_v55 = vld [vmem:[#allocation20_spill] sm:$0xff] }
 0x17f   : > { %v4529_v23 = vpop.f32.mrf.mxu1  ;;  %v3686_v40 = vpop.f32.mrf.mxu0  ;;  %v2402_v43 = vadd.f32 %v4749_v39, %v2236_v8  ;;  %v2566_v24 = vadd.f32 %v4751_v25, %v2399_v63  ;;  %v4753_v8 = vld [vmem:[#allocation13_spill] sm:$0xff] }
 0x180   : > { %v2568_v46 = vadd.f32 %v4750_v3, %v2401_v37  ;;  %v4572_v20 = vadd.f32 %v4752_v53, %v2404_v28  ;;  %v4754_v34 = vld [vmem:[#allocation21_spill] sm:$0xff] }
 0x181   : > { %v3667_v4 = vpop.f32.mrf.mxu1  ;;  %v2833_v58 = vpop.f32.mrf.mxu0  ;;  %v4575_v60 = vadd.f32 %v4753_v8, %v2402_v43  ;;  %v2403_v42 = vadd.f32 %v4754_v34, %v2237_v6 }
 0x182   : > { %v2729_v59 = vadd.f32 %v3667_v4, %v2563_v11 }
 0x183   : > { %v2664_v36 = vpop.f32.mrf.mxu1  ;;  %v3689_v57 = vpop.f32.mrf.mxu0  ;;  %v4585_v21 = vadd.f32 %v4756_v10, %v2403_v42  ;;  %v4759_v42 = vld [vmem:[#allocation22_spill] sm:$0xff] }
 0x184   : > { %v2727_v1 = vadd.f32 %v2664_v36, %v2561_v56  ;;  %v2895_v2 = vadd.f32 %v3685_v19, %v2729_v59  ;;  %v2405_v19 = vadd.f32 %v4481_v22, %v2239_v47  ;;  %v2406_v22 = vadd.f32 %v4506_v12, %v2240_v13 }
 0x185   : > { %v3668_v30 = vpop.f32.mrf.mxu1  ;;  %v2846_v7 = vpop.f32.mrf.mxu0  ;;  %v4600_v36 = vadd.f32 %v4529_v23, %v2241_v14 }
 0x186   : > { %v2918_v51 = vadd.f32 %v4553_v35, %v2895_v2  ;;  %v2893_v52 = vadd.f32 %v2830_v32, %v2727_v1  ;;  %v2730_v31 = vadd.f32 %v3668_v30, %v2564_v49  ;;  %v2408_v32 = vadd.f32 %v4493_v16, %v2242_v27  ;;  %v4757_v49 = vld [vmem:[#allocation19_spill] sm:$0xff] }
 0x187   : > { %v2667_v9 = vpop.f32.mrf.mxu1  ;;  %v3690_v33 = vpop.f32.mrf.mxu0  ;;  %v4580_v4 = vadd.f32 %v4755_v44, %v2405_v19  ;;  %v2409_v27 = vadd.f32 %v4516_v18, %v2243_v48  ;;  %v4594_v12 = vadd.f32 %v4758_v55, %v2406_v22 }
 0x188   : > { %v3442_v11 = vpack.c.bf16 %v2918_v51, %v2918_v51  ;;  %v2728_v54 = vadd.f32 %v2667_v9, %v2562_v26  ;;  %v2916_v47 = vadd.f32 %v4553_v35, %v2893_v52  ;;  %v2896_v56 = vadd.f32 %v3686_v40, %v2730_v31 }
 0x189   : > { %v3671_v50 = vpop.f32.mrf.mxu1  ;;  %v2849_v59 = vpop.f32.mrf.mxu0  ;;  %v4588_v38 = vadd.f32 %v4757_v49, %v2408_v32  ;;  %v2936_v45 = vsel %vm2932_vm4, %v2918_v51, 0.0  ;;  %v4620_v32 = vadd.f32 %v4759_v42, %v2409_v27 }
 0x18a   : > { %3093 = vst.msk [vmem:[%s4568_s10 + $0x8] sm:$0xf] %vm3090_vm3, %v3442_v11  ;;  %v2733_v16 = vadd.f32 %v3671_v50, %v2567_v0  ;;  %v2894_v6 = vadd.f32 %v2833_v58, %v2728_v54  ;;  %v3440_v13 = vpack.c.bf16 %v2916_v47, %v2916_v47  ;;  %v2919_v40 = vadd.f32 %v4553_v35, %v2896_v56 }
 0x18b   : > { %v2680_v41 = vpop.f32.mrf.mxu1  ;;  %v4597_v26 = vpop.f32.mrf.mxu0  ;;  %v2972_v15 = vmul.f32 %v2916_v47, %v2916_v47  ;;  %v2974_v58 = vmul.f32 %v2918_v51, %v2918_v51  ;;  %v2933_v18 = vsel %vm2932_vm4, %v2916_v47, 0.0 }
 0x18c   : > { %v2917_v37 = vadd.f32 %v4553_v35, %v2894_v6  ;;  %v2899_v61 = vadd.f32 %v3689_v57, %v2733_v16  ;;  %3091 = vst.msk [vmem:[%s4568_s10] sm:$0xf] %vm3090_vm3, %v3440_v13  ;;  %v3443_v48 = vpack.c.bf16 %v2919_v40, %v2919_v40  ;;  %v2731_v63 = vadd.f32 %v2680_v41, %v2565_v29 }
 0x18d   : > { %v3672_v1 = vpop.f32.mrf.mxu1  ;;  %v2862_v2 = vpop.f32.mrf.mxu0  ;;  %v2988_v29 = vsel %vm2932_vm4, %v2972_v15, 0.0  ;;  %v2975_v30 = vmul.f32 %v2919_v40, %v2919_v40  ;;  %v2938_v8 = vsel %vm2932_vm4, %v2919_v40, 0.0 }
 0x18e   : > { %v2934_v62 = vsel %vm2932_vm4, %v2917_v37, 0.0  ;;  %v2973_v0 = vmul.f32 %v2917_v37, %v2917_v37  ;;  %v3441_v23 = vpack.c.bf16 %v2917_v37, %v2917_v37  ;;  %v2734_v14 = vadd.f32 %v3672_v1, %v2568_v46  ;;  %3094 = vst.msk [vmem:[%s4568_s10 + $0xc] sm:$0xf] %vm3090_vm3, %v3443_v48 }
 0x18f   : > { %v2935_v57 = vadd.f32 %v2934_v62, %v2933_v18  ;;  %v2922_v5 = vadd.f32 %v4553_v35, %v2899_v61  ;;  %v2683_v28 = vpop.f32.mrf.mxu1  ;;  %v2897_v39 = vadd.f32 %v2846_v7, %v2731_v63  ;;  %v3694_v43 = vpop.f32.mrf.mxu0  ;;  %v2991_v46 = vsel %vm2932_vm4, %v2974_v58, 0.0 }
 0x190   : > { %v2989_v3 = vsel %vm2932_vm4, %v2973_v0, 0.0  ;;  %3092 = vst.msk [vmem:[%s4568_s10 + $0x4] sm:$0xf] %vm3090_vm3, %v3441_v23  ;;  %v2900_v25 = vadd.f32 %v3690_v33, %v2734_v14  ;;  %v2732_v19 = vadd.f32 %v2683_v28, %v2566_v24  ;;  %v2993_v22 = vsel %vm2932_vm4, %v2975_v30, 0.0 }
 0x191   : > { %v2937_v51 = vadd.f32 %v2936_v45, %v2935_v57  ;;  %v2990_v52 = vadd.f32 %v2989_v3, %v2988_v29  ;;  %v3675_v53 = vpop.f32.mrf.mxu1  ;;  %v3446_v31 = vpack.c.bf16 %v2922_v5, %v2922_v5  ;;  %v2920_v7 = vadd.f32 %v4553_v35, %v2897_v39  ;;  %v2865_v34 = vpop.f32.mrf.mxu0 }
 0x192   : > { %v2923_v9 = vadd.f32 %v4553_v35, %v2900_v25  ;;  %v2898_v44 = vadd.f32 %v2849_v59, %v2732_v19  ;;  %v2737_v49 = vadd.f32 %v3675_v53, %v4572_v20  ;;  %v2978_v27 = vmul.f32 %v2922_v5, %v2922_v5 }
 0x193   : > { %v2992_v11 = vadd.f32 %v2991_v46, %v2990_v52  ;;  %v2939_v33 = vadd.f32 %v2938_v8, %v2937_v51  ;;  %v2696_v54 = vpop.f32.mrf.mxu1  ;;  %3097 = vst.msk [vmem:[%s4568_s10 + $0x18] sm:$0xf] %vm3090_vm3, %v3446_v31  ;;  %v2940_v24 = vsel %vm2932_vm4, %v2920_v7, 0.0  ;;  %v2976_v47 = vmul.f32 %v2920_v7, %v2920_v7  ;;  %v3697_v40 = vpop.f32.mrf.mxu0 }
 0x194   : > { %v3444_v50 = vpack.c.bf16 %v2920_v7, %v2920_v7  ;;  %v3447_v16 = vpack.c.bf16 %v2923_v9, %v2923_v9  ;;  %v2979_v59 = vmul.f32 %v2923_v9, %v2923_v9  ;;  %v2921_v13 = vadd.f32 %v4553_v35, %v2898_v44 }
 0x195   : > { %v2941_v56 = vadd.f32 %v2940_v24, %v2939_v33  ;;  %v2994_v10 = vadd.f32 %v2993_v22, %v2992_v11  ;;  %v3676_v6 = vpop.f32.mrf.mxu1  ;;  %v2995_v55 = vsel %vm2932_vm4, %v2976_v47, 0.0  ;;  %v2735_v15 = vadd.f32 %v2696_v54, %v4575_v60  ;;  %v2878_v57 = vpop.f32.mrf.mxu0 }
 0x196   : > { %3095 = vst.msk [vmem:[%s4568_s10 + $0x10] sm:$0xf] %vm3090_vm3, %v3444_v50  ;;  %3098 = vst.msk [vmem:[%s4568_s10 + $0x1c] sm:$0xf] %vm3090_vm3, %v3447_v16  ;;  %v2738_v37 = vadd.f32 %v3676_v6, %v4580_v4  ;;  %v2903_v20 = vadd.f32 %v4597_v26, %v2737_v49  ;;  %v2942_v58 = vsel %vm2932_vm4, %v2921_v13, 0.0  ;;  %v2977_v18 = vmul.f32 %v2921_v13, %v2921_v13 }
 0x197   : > { %v2996_v41 = vadd.f32 %v2995_v55, %v2994_v10  ;;  %v2699_v61 = vpop.f32.mrf.mxu1  ;;  %v3445_v48 = vpack.c.bf16 %v2921_v13, %v2921_v13  ;;  %v2943_v1 = vadd.f32 %v2942_v58, %v2941_v56  ;;  %v2901_v0 = vadd.f32 %v2862_v2, %v2735_v15  ;;  %v3698_v31 = vpop.f32.mrf.mxu0 }
 0x198   : > { %v2736_v63 = vadd.f32 %v2699_v61, %v4585_v21  ;;  %v2926_v62 = vadd.f32 %v4553_v35, %v2903_v20  ;;  %v2904_v14 = vadd.f32 %v3694_v43, %v2738_v37  ;;  %v2574_v60 = vadd.f32 %v4495_v17, %v4600_v36 }
 0x199   : > { %v3679_v23 = vpop.f32.mrf.mxu1  ;;  %v2944_v4 = vsel %vm2932_vm4, %v2922_v5, 0.0  ;;  %v2997_v26 = vsel %vm2932_vm4, %v2977_v18, 0.0  ;;  %3096 = vst.msk [vmem:[%s4568_s10 + $0x14] sm:$0xf] %vm3090_vm3, %v3445_v48  ;;  %v2999_v21 = vsel %vm2932_vm4, %v2978_v27, 0.0  ;;  %v2946_v28 = vsel %vm2932_vm4, %v2923_v9, 0.0  ;;  %v2881_v16 = vpop.f32.mrf.mxu0 }
 0x19a   : > { %v2902_v45 = vadd.f32 %v2865_v34, %v2736_v63  ;;  %v2945_v39 = vadd.f32 %v2944_v4, %v2943_v1  ;;  %v2998_v2 = vadd.f32 %v2997_v26, %v2996_v41  ;;  %v3001_v43 = vsel %vm2932_vm4, %v2979_v59, 0.0 }
 0x19b   : > { %v2712_v29 = vpop.f32.mrf.mxu1  ;;  %v3450_v30 = vpack.c.bf16 %v2926_v62, %v2926_v62  ;;  %v2924_v17 = vadd.f32 %v4553_v35, %v2901_v0  ;;  %v2927_v36 = vadd.f32 %v4553_v35, %v2904_v14  ;;  %v2741_v25 = vadd.f32 %v3679_v23, %v4588_v38 }
 0x19c   : > { %v3000_v5 = vadd.f32 %v2999_v21, %v2998_v2  ;;  %v2947_v3 = vadd.f32 %v2946_v28, %v2945_v39  ;;  %v2925_v46 = vadd.f32 %v4553_v35, %v2902_v45  ;;  %v2982_v52 = vmul.f32 %v2926_v62, %v2926_v62 }
 0x19d   : > { %v3680_v51 = vpop.f32.mrf.mxu1  ;;  %3101 = vst.msk [vmem:[%s4568_s10 + $0x28] sm:$0xf] %vm3090_vm3, %v3450_v30  ;;  %v2948_v19 = vsel %vm2932_vm4, %v2924_v17, 0.0  ;;  %v2980_v53 = vmul.f32 %v2924_v17, %v2924_v17  ;;  %v3448_v8 = vpack.c.bf16 %v2924_v17, %v2924_v17  ;;  %v3451_v34 = vpack.c.bf16 %v2927_v36, %v2927_v36 }
 0x19e   : > { %v2949_v7 = vadd.f32 %v2948_v19, %v2947_v3  ;;  %v3002_v9 = vadd.f32 %v3001_v43, %v3000_v5  ;;  %v2739_v42 = vadd.f32 %v2712_v29, %v4594_v12  ;;  %v2950_v11 = vsel %vm2932_vm4, %v2925_v46, 0.0 }
 0x19f   : > { %v3003_v38 = vsel %vm2932_vm4, %v2980_v53, 0.0  ;;  %3099 = vst.msk [vmem:[%s4568_s10 + $0x20] sm:$0xf] %vm3090_vm3, %v3448_v8  ;;  %v2981_v33 = vmul.f32 %v2925_v46, %v2925_v46  ;;  %v3449_v54 = vpack.c.bf16 %v2925_v46, %v2925_v46  ;;  %v2715_v44 = vpop.f32.mrf.mxu1  ;;  %v2952_v22 = vsel %vm2932_vm4, %v2926_v62, 0.0  ;;  %3102 = vst.msk [vmem:[%s4568_s10 + $0x2c] sm:$0xf] %vm3090_vm3, %v3451_v34 }
 0x1a0   : > { %v3004_v24 = vadd.f32 %v3003_v38, %v3002_v9  ;;  %v2951_v47 = vadd.f32 %v2950_v11, %v2949_v7  ;;  %v2742_v50 = vadd.f32 %v3680_v51, %v4620_v32  ;;  %v2983_v56 = vmul.f32 %v2927_v36, %v2927_v36 }
 0x1a1   : > { %v3005_v12 = vsel %vm2932_vm4, %v2981_v33, 0.0  ;;  %3100 = vst.msk [vmem:[%s4568_s10 + $0x24] sm:$0xf] %vm3090_vm3, %v3449_v54  ;;  %v2907_v10 = vadd.f32 %v3697_v40, %v2741_v25  ;;  %v2905_v49 = vadd.f32 %v2878_v57, %v2739_v42  ;;  %v2740_v55 = vadd.f32 %v2715_v44, %v2574_v60 }
 0x1a2   : > { %v2953_v6 = vadd.f32 %v2952_v22, %v2951_v47  ;;  %v3006_v27 = vadd.f32 %v3005_v12, %v3004_v24  ;;  %v2908_v59 = vadd.f32 %v3698_v31, %v2742_v50  ;;  %v3007_v13 = vsel %vm2932_vm4, %v2982_v52, 0.0 }
 0x1a3   : > { %v2954_v41 = vsel %vm2932_vm4, %v2927_v36, 0.0  ;;  %v2930_v15 = vadd.f32 %v4553_v35, %v2907_v10  ;;  %v2928_v32 = vadd.f32 %v4553_v35, %v2905_v49  ;;  %v2906_v61 = vadd.f32 %v2881_v16, %v2740_v55 }
 0x1a4   : > { %v3008_v37 = vadd.f32 %v3007_v13, %v3006_v27  ;;  %v2955_v20 = vadd.f32 %v2954_v41, %v2953_v6  ;;  %v2931_v40 = vadd.f32 %v4553_v35, %v2908_v59  ;;  %v3009_v58 = vsel %vm2932_vm4, %v2983_v56, 0.0 }
 0x1a5   : > { %v3454_v18 = vpack.c.bf16 %v2930_v15, %v2930_v15  ;;  %v2956_v48 = vsel %vm2932_vm4, %v2928_v32, 0.0  ;;  %v2984_v1 = vmul.f32 %v2928_v32, %v2928_v32  ;;  %v3452_v0 = vpack.c.bf16 %v2928_v32, %v2928_v32 }
 0x1a6   : > { %v2957_v63 = vadd.f32 %v2956_v48, %v2955_v20  ;;  %v3010_v62 = vadd.f32 %v3009_v58, %v3008_v37  ;;  %v3455_v23 = vpack.c.bf16 %v2931_v40, %v2931_v40  ;;  %v2929_v60 = vadd.f32 %v4553_v35, %v2906_v61 }
 0x1a7   : > { %3105 = vst.msk [vmem:[%s4568_s10 + $0x38] sm:$0xf] %vm3090_vm3, %v3454_v18  ;;  %v3011_v14 = vsel %vm2932_vm4, %v2984_v1, 0.0  ;;  %3103 = vst.msk [vmem:[%s4568_s10 + $0x30] sm:$0xf] %vm3090_vm3, %v3452_v0  ;;  %v2986_v26 = vmul.f32 %v2930_v15, %v2930_v15  ;;  %v2960_v39 = vsel %vm2932_vm4, %v2930_v15, 0.0  ;;  %v2987_v2 = vmul.f32 %v2931_v40, %v2931_v40 }
 0x1a8   : > { %v3012_v4 = vadd.f32 %v3011_v14, %v3010_v62  ;;  %3106 = vst.msk [vmem:[%s4568_s10 + $0x3c] sm:$0xf] %vm3090_vm3, %v3455_v23  ;;  %v2958_v45 = vsel %vm2932_vm4, %v2929_v60, 0.0  ;;  %v2985_v57 = vmul.f32 %v2929_v60, %v2929_v60  ;;  %v3453_v21 = vpack.c.bf16 %v2929_v60, %v2929_v60 }
 0x1a9   : > { %v2959_v28 = vadd.f32 %v2958_v45, %v2957_v63  ;;  %v3015_v30 = vsel %vm2932_vm4, %v2986_v26, 0.0  ;;  %v2962_v17 = vsel %vm2932_vm4, %v2931_v40, 0.0  ;;  %v3017_v3 = vsel %vm2932_vm4, %v2987_v2, 0.0 }
 0x1aa   : > { %v3013_v29 = vsel %vm2932_vm4, %v2985_v57, 0.0  ;;  %3104 = vst.msk [vmem:[%s4568_s10 + $0x34] sm:$0xf] %vm3090_vm3, %v3453_v21 }
 0x1ab   : > { %v2961_v35 = vadd.f32 %v2960_v39, %v2959_v28  ;;  %v3014_v43 = vadd.f32 %v3013_v29, %v3012_v4 }
 0x1ad   : > { %v2963_v36 = vadd.f32 %v2962_v17, %v2961_v35  ;;  %v3016_v5 = vadd.f32 %v3015_v30, %v3014_v43 }
 0x1af   : > { %v2964_v25 = vrot.slane %v2963_v36, 4  ;;  %v3018_v46 = vadd.f32 %v3017_v3, %v3016_v5 }
 0x1b1   : > { %v2965_v51 = vadd.f32 %v2964_v25, %v2963_v36  ;;  %v3019_v52 = vrot.slane %v3018_v46, 4 }
 0x1b3   : > { %v2966_v19 = vrot.slane %v2965_v51, 2  ;;  %v3020_v53 = vadd.f32 %v3019_v52, %v3018_v46 }
 0x1b5   : > { %v2967_v8 = vadd.f32 %v2966_v19, %v2965_v51  ;;  %v3021_v31 = vrot.slane %v3020_v53, 2 }
 0x1b7   : > { %v2968_v7 = vrot.slane %v2967_v8, 1  ;;  %v3022_v9 = vadd.f32 %v3021_v31, %v3020_v53 }
 0x1b9   : > { %v2969_v34 = vadd.f32 %v2968_v7, %v2967_v8  ;;  %v3023_v42 = vrot.slane %v3022_v9, 1 }
 0x1bb   : > { %2971 = vst.msk [vmem:[%s440_s16] sm:$0x1] %vm2970_vm5, %v2969_v34  ;;  %v3024_v38 = vadd.f32 %v3023_v42, %v3022_v9 }
 0x1bd   : > { %3025 = vst.msk [vmem:[%s440_s16 + $0x1] sm:$0x1] %vm2970_vm5, %v3024_v38 }
 0x1be PF: > { %s17_s25 = sadd.s32 1, %s3796_s25   ;;  %s4760_s21 = smov %s3788_s23 }
 0x1bf   : > { %p14_p13 = scmp.ge.s32.totalorder %s17_s25, 18   ;;  %s4761_s22 = smov %s3792_s24 }
 0x1c0   : > { %s4762_s23 = smov %s4765_s26  ;;  %s4763_s24 = smov %s4769_s27 }
 0x1c1   :  { %16 = sbr.rel (!%p14_p13) target bundleno = 3 (0x3), region = 99 }

// kernel: basic_block_dec.7
= control target key start
LH: loop header
LB: loop body
LE: loop exit
PB: predicated region body
PF: predicated region fallthrough
CT: control target
= control target key end

     0   :  { %s625_s21 = smov 0   ;;  %s627_s22 = smov 0   ;;  %s677_s0 = inlined_call_operand.vmem [shape: bf16[2,32,128], index: 0, kind: input, shape index: {}]   ;;  %s678_s1 = inlined_call_operand.vmem [shape: f32[1,128], index: 1, kind: input, shape index: {}]   ;;  %s679_s2 = inlined_call_operand.vmem [shape: f32[1,128], index: 2, kind: input, shape index: {}]   ;;  %s680_s3 = inlined_call_operand.vmem [shape: bf16[2,32,128], index: 3, kind: input, shape index: {}]   ;;  %s681_s4 = inlined_call_operand.vmem [shape: f32[1,128], index: 4, kind: input, shape index: {}]   ;;  %s682_s5 = inlined_call_operand.vmem [shape: f32[1,128], index: 5, kind: input, shape index: {}]   ;;  %s683_s6 = inlined_call_operand.vmem [shape: f32[2,32,128], index: 6, kind: output, shape index: {}]  }
   0x1   :  { %s629_s23 = smov 0  }
   0x2 LB: > { %s28_s24 = sadd.s32 1, %s584_s22  ;;  %p508_p0 = scmp.ge.s32.totalorder %s588_s23, 1  ;;  %s588_s23 = sphi %s629_s23, %s16_s23   ;;  %s584_s22 = sphi %s627_s22, %s685_s22   ;;  %s580_s21 = sphi %s625_s21, %s684_s21  }
   0x3   : > { %p30_p1 = scmp.ge.s32.totalorder %s28_s24, 2  ;;  %p250_p2 = scmp.lt.s32.totalorder %s588_s23, 3 }
   0x5   : > { %s687_s24 = smov (%p30_p1, %s28_s24), 0  ;;  %p251_p3 = pnand %p508_p0, %p250_p2 }
   0x6   : > { %p298_p4 = scmp.lt.s32.totalorder (!%p251_p3), %s580_s21, 1 }
   0x7   : > { %254 = sbr.rel (%p251_p3) target bundleno = 29 (0x1d), region = 44 }
   0xc   : > { %s689_s21 = smov (!%p298_p4, %s580_s21), 1  ;;  %v515_v0 = vld [vmem:[%s678_s1] ss:$0 sm:$0xff] }
   0xd   : > { %s521_s25 = sshll.u32 %s689_s21, 4  ;;  %v517_v1 = vld [vmem:[%s681_s4] ss:$0 sm:$0xff]  ;;  %s523_s16 = sshll.u32 %s689_s21, 5 }
   0xe   : > { %s305_s28 = scalar_lea.vmem %s677_s0, %s521_s25  ;;  %s315_s7 = scalar_lea.vmem %s680_s3, %s521_s25  ;;  %v516_v10 = vld [vmem:[%s679_s2] ss:$0 sm:$0xff] }
   0xf   : > { %v525_v2 = vld [vmem:[%s305_s28] sm:$0xff]   ;;  %v540_v4 = vld [vmem:[%s305_s28 + $0x8] sm:$0xff]   ;;  %s325_s19 = scalar_lea.vmem %s683_s6, %s523_s16 }
  0x10   : > { %v533_v3 = vld [vmem:[%s315_s7] sm:$0xff]   ;;  %v526_v5 = vunpack.c.l.bf16 %v525_v2  ;;  %v527_v7 = vunpack.c.h.bf16 %v525_v2  ;;  %v541_v9 = vld [vmem:[%s315_s7 + $0x8] sm:$0xff]   ;;  %v530_v12 = vunpack.c.l.bf16 %v540_v4  ;;  %v531_v14 = vunpack.c.h.bf16 %v540_v4 }
  0x11   : > { %v534_v6 = vunpack.c.l.bf16 %v533_v3  ;;  %v535_v8 = vunpack.c.h.bf16 %v533_v3  ;;  %v518_v11 = vld [vmem:[%s682_s5] ss:$0 sm:$0xff]  ;;  %v538_v13 = vunpack.c.l.bf16 %v541_v9  ;;  %v539_v15 = vunpack.c.h.bf16 %v541_v9 }
  0x12   : > { %v350_v16 = vmul.f32 %v526_v5, %v515_v0  ;;  %v351_v18 = vmul.f32 %v527_v7, %v515_v0  ;;  %v352_v20 = vmul.f32 %v530_v12, %v515_v0  ;;  %v353_v22 = vmul.f32 %v531_v14, %v515_v0 }
  0x13   : > { %v372_v17 = vmul.f32 %v534_v6, %v517_v1  ;;  %v373_v19 = vmul.f32 %v535_v8, %v517_v1  ;;  %v374_v21 = vmul.f32 %v538_v13, %v517_v1  ;;  %v375_v23 = vmul.f32 %v539_v15, %v517_v1 }
  0x14   : > { %v361_v24 = vadd.f32 %v516_v10, %v350_v16  ;;  %v362_v26 = vadd.f32 %v516_v10, %v351_v18  ;;  %v363_v28 = vadd.f32 %v516_v10, %v352_v20  ;;  %v364_v30 = vadd.f32 %v516_v10, %v353_v22 }
  0x15   : > { %v383_v25 = vadd.f32 %v518_v11, %v372_v17  ;;  %v384_v27 = vadd.f32 %v518_v11, %v373_v19  ;;  %v385_v29 = vadd.f32 %v518_v11, %v374_v21  ;;  %v386_v31 = vadd.f32 %v518_v11, %v375_v23 }
  0x17   : > { %v387_v32 = vadd.f32 %v383_v25, %v361_v24  ;;  %v388_v33 = vadd.f32 %v384_v27, %v362_v26  ;;  %v389_v34 = vadd.f32 %v385_v29, %v363_v28  ;;  %v390_v35 = vadd.f32 %v386_v31, %v364_v30 }
  0x19   : > { %v391_v36 = vmax.f32 %v387_v32, 0.0  ;;  %v392_v37 = vmax.f32 %v388_v33, 0.0  ;;  %v393_v38 = vmax.f32 %v389_v34, 0.0  ;;  %v394_v39 = vmax.f32 %v390_v35, 0.0 }
  0x1b   : > { %395 = vst [vmem:[%s325_s19] sm:$0xff] %v391_v36  ;;  %396 = vst [vmem:[%s325_s19 + $0x8] sm:$0xff] %v392_v37 }
  0x1c   : > { %397 = vst [vmem:[%s325_s19 + $0x10] sm:$0xff] %v393_v38  ;;  %398 = vst [vmem:[%s325_s19 + $0x18] sm:$0xff] %v394_v39 }
  0x1d PF: > { %s16_s23 = sadd.s32 1, %s588_s23   ;;  %s684_s21 = smov %s584_s22 }
  0x1e   : > { %p13_p5 = scmp.ge.s32.totalorder %s16_s23, 4   ;;  %s685_s22 = smov %s687_s24 }
  0x20   :  { %15 = sbr.rel (!%p13_p5) target bundleno = 2 (0x2), region = 77 }

</bundles_post_ra>
